<compile_context>
chip_gen: v6e
topology: v6e:2x2x1
jax: 0.10.0
libtpu: 0.0.40
codegen_flags: <defaults>
</compile_context>

<pallas_src>
import math
import functools

import jax
import jax.numpy as jnp
import numpy as np
from jax import lax
from jax.experimental import pallas as pl
from jax.experimental.pallas import tpu as pltpu


# ----------------------------------------------------------------------------
# Pallas kernel: one full encoder layer for `block_b` batch elements.
# ----------------------------------------------------------------------------
def _encoder_layer_kernel(
    x_ref,
    wqkv_ref, wh_ref, bh_ref,
    ln1w_ref, ln1b_ref,
    ff1w_ref, ff1b_ref, ff2w_ref, ff2b_ref,
    ln2w_ref, ln2b_ref,
    o_ref,
    *, num_heads: int, d_k: int, eps: float, matmul_dtype, approx_softmax: bool,
):
    Bb, S, D = x_ref.shape
    R = Bb * S
    H = num_heads

    x = x_ref[...].astype(jnp.float32).reshape(R, D)          # (R, D) f32

    def layernorm(v, w_ref, b_ref):
        mu = jnp.mean(v, axis=-1, keepdims=True)
        var = jnp.mean((v - mu) ** 2, axis=-1, keepdims=True)  # biased, like torch
        return (v - mu) * lax.rsqrt(var + eps) * w_ref[0] + b_ref[0]

    def gelu_erf(v):
        # PyTorch nn.GELU() default (erf form)
        return 0.5 * v * (1.0 + lax.erf(v * (1.0 / math.sqrt(2.0))))

    mm = lambda a: a.astype(matmul_dtype)   # cast MXU operands; no-op for the f32 path

    # ---- fused QKV projection: one (R, D) x (D, 3D) matmul ----------------
    # Output stays in matmul_dtype (bf16 on the perf path): halves the bytes
    # the head-split relayouts move; MXU still accumulates in f32 internally.
    x_mm = mm(x)
    qkv = jnp.dot(x_mm, wqkv_ref[...], preferred_element_type=matmul_dtype)  # (R, 3D)
    q = qkv[:, 0 * D:1 * D]          # lane slices at multiples of D (aligned)
    k = qkv[:, 1 * D:2 * D]
    v = qkv[:, 2 * D:3 * D]

    # ---- batched multi-head attention (single contraction over all heads) --
    def split_heads(t):   # (R, D) -> (Bb*H, S, d_k)
        return (t.reshape(Bb, S, H, d_k)
                 .transpose(0, 2, 1, 3)
                 .reshape(Bb * H, S, d_k))

    qh, kh, vh = split_heads(q), split_heads(k), split_heads(v)

    # 1/sqrt(d_k) is pre-folded into W_q (prepare_params); scores stay f32.
    scores = jnp.einsum("bqd,bkd->bqk", qh, kh,
                        preferred_element_type=jnp.float32)    # (Bb*H, S, S)
    m = jnp.max(scores, axis=-1, keepdims=True)
    e = jnp.exp(scores - m)
    denom = jnp.sum(e, axis=-1, keepdims=True)
    if approx_softmax:
        a = e * pl.reciprocal(denom, approx=True)              # EUP, perf path
    else:
        a = e / denom                                          # exact, f32 check path

    ctx = jnp.einsum("bqk,bkd->bqd", mm(a), vh,
                     preferred_element_type=matmul_dtype)      # (Bb*H, S, d_k)

    h_cat = (ctx.reshape(Bb, H, S, d_k)
                .transpose(0, 2, 1, 3)
                .reshape(R, D))                                # merge heads (matmul dtype)
    attn = jnp.dot(h_cat, wh_ref[...],
                   preferred_element_type=jnp.float32) + bh_ref[0]

    # ---- residual + layernorm1 (f32) ----
    x1 = layernorm(x + attn, ln1w_ref, ln1b_ref)

    # ---- feedforward ----
    hid = jnp.dot(mm(x1), ff1w_ref[...],
                  preferred_element_type=jnp.float32) + ff1b_ref[0]
    hid = gelu_erf(hid)
    ff = jnp.dot(mm(hid), ff2w_ref[...],
                 preferred_element_type=jnp.float32) + ff2b_ref[0]

    # ---- residual + layernorm2 ----
    out = layernorm(ff + x1, ln2w_ref, ln2b_ref)
    o_ref[...] = out.reshape(Bb, S, D).astype(o_ref.dtype)


# ----------------------------------------------------------------------------
# One-time parameter preparation (hoisted out of the call path).
# ----------------------------------------------------------------------------
def prepare_params(params, *, num_heads: int, matmul_dtype=jnp.bfloat16):
    """Fold 1/sqrt(d_k) into Wq, fuse Wq|Wk|Wv into (D, 3D), cast matmul
    weights, and reshape 1-D params to (1, N) rows. Run ONCE at load time."""
    D = params["wq"].shape[0]
    d_k = D // num_heads
    scale = 1.0 / math.sqrt(d_k)
    wqkv = jnp.concatenate(
        [params["wq"] * scale, params["wk"], params["wv"]], axis=1
    ).astype(matmul_dtype)                                     # (D, 3D)
    row = lambda a: a.reshape(1, -1).astype(jnp.float32)
    return {
        "wqkv": wqkv,
        "wh": params["wh"].astype(matmul_dtype),
        "wh_b": row(params["wh_b"]),
        "ln1_w": row(params["ln1_w"]), "ln1_b": row(params["ln1_b"]),
        "ff1_w": params["ff1_w"].astype(matmul_dtype), "ff1_b": row(params["ff1_b"]),
        "ff2_w": params["ff2_w"].astype(matmul_dtype), "ff2_b": row(params["ff2_b"]),
        "ln2_w": row(params["ln2_w"]), "ln2_b": row(params["ln2_b"]),
    }


# ----------------------------------------------------------------------------
# VMEM budgeting / block_b selection (per-generation).
# ----------------------------------------------------------------------------
def _vmem_budget_bytes():
    """~75% of physical VMEM: 96 MiB on v5e/v6e (128 MiB), 48 MiB on v7x (64 MiB)."""
    try:
        cap = pltpu.get_tpu_info().vmem_capacity_bytes
    except Exception:
        cap = 64 * 1024 * 1024          # conservative (v7x-sized) fallback
    return int(cap * 0.75)


def _per_step_vmem_bytes(bb, S, D, Hd, H, mm_bytes):
    """Rough per-grid-step VMEM footprint estimate (bytes)."""
    R = bb * S
    io = 2 * 2 * bb * S * D * 4                          # x + out slabs, double-buffered
    w = 2 * (3 * D * D + D * D + D * Hd + Hd * D) * mm_bytes   # dense weights (2 buffers)
    w += 2 * (6 * D + Hd) * 4                            # biases / LN params
    acts = R * 3 * D * mm_bytes                          # fused qkv output
    acts += 3 * R * D * mm_bytes                         # head-split q/k/v
    acts += 3 * bb * H * S * S * 4                       # scores / exp / probs (f32)
    acts += 2 * R * D * mm_bytes                         # ctx + merged heads
    acts += 4 * R * D * 4                                # x, attn, x1, ff (f32)
    acts += R * Hd * 4                                   # FF hidden (f32)
    return io + w + acts


def _choose_block_b(B, S, D, Hd, H, mm_bytes, budget_bytes):
    divisors = [d for d in range(1, B + 1) if B % d == 0]
    fitting = [d for d in divisors
               if _per_step_vmem_bytes(d, S, D, Hd, H, mm_bytes) <= budget_bytes]
    if not fitting:
        fitting = [1]
    # Prefer an even grid with >= 2 steps so both v7x TensorCores get work;
    # among those, take the largest slab (amortizes per-step + weight-push cost).
    multi = [d for d in fitting if (B // d) >= 2 and (B // d) % 2 == 0]
    return max(multi) if multi else max(fitting)


# ----------------------------------------------------------------------------
# Wrapper
# ----------------------------------------------------------------------------
def encoder_layer(x, prep, *, num_heads: int, block_b: int = None):
    """x: (B, S, D) float32. `prep` is the output of prepare_params()."""
    B, S, D = x.shape
    assert D % num_heads == 0
    d_k = D // num_heads
    Hd = prep["ff1_w"].shape[1]
    matmul_dtype = prep["wqkv"].dtype
    mm_bytes = jnp.dtype(matmul_dtype).itemsize

    budget = _vmem_budget_bytes()
    if block_b is None:
        block_b = _choose_block_b(B, S, D, Hd, num_heads, mm_bytes, budget)
    assert B % block_b == 0

    approx_softmax = jnp.dtype(matmul_dtype) != jnp.dtype(jnp.float32)

    kernel = functools.partial(
        _encoder_layer_kernel, num_heads=num_heads, d_k=d_k, eps=1e-6,
        matmul_dtype=matmul_dtype, approx_softmax=approx_softmax,
    )

    # Weight/bias blocks: constant index_map -> DMA'd once, kept resident.
    # (At real model sizes these should additionally be single-buffered, e.g.
    #  pipeline_mode=pl.Buffered(1); negligible at D=128/Hd=256.)
    const = lambda shp: pl.BlockSpec(shp, lambda b: (0,) * len(shp))

    return pl.pallas_call(
        kernel,
        out_shape=jax.ShapeDtypeStruct((B, S, D), x.dtype),
        grid_spec=pltpu.PrefetchScalarGridSpec(
            num_scalar_prefetch=0,
            grid=(B // block_b,),
            in_specs=[
                pl.BlockSpec((block_b, S, D), lambda b: (b, 0, 0)),   # x
                const((D, 3 * D)),                                    # fused Wqkv
                const((D, D)), const((1, D)),                         # Wh, b_h
                const((1, D)), const((1, D)),                         # ln1 w, b
                const((D, Hd)), const((1, Hd)),                       # ff1 w, b
                const((Hd, D)), const((1, D)),                        # ff2 w, b
                const((1, D)), const((1, D)),                         # ln2 w, b
            ],
            out_specs=pl.BlockSpec((block_b, S, D), lambda b: (b, 0, 0)),
        ),
        compiler_params=pltpu.CompilerParams(
            dimension_semantics=("parallel",),       # batch blocks are independent
            vmem_limit_bytes=budget,                 # per-generation scoped limit
        ),
    )(
        x,
        prep["wqkv"],
        prep["wh"], prep["wh_b"],
        prep["ln1_w"], prep["ln1_b"],
        prep["ff1_w"], prep["ff1_b"],
        prep["ff2_w"], prep["ff2_b"],
        prep["ln2_w"], prep["ln2_b"],
    )


# ----------------------------------------------------------------------------
# Pure-JAX reference (mirrors the PyTorch EncoderLayer.forward exactly)
# ----------------------------------------------------------------------------
def encoder_layer_ref(x, params, *, num_heads: int):
    B, S, D = x.shape
    d_k = D // num_heads
    eps = 1e-6

    def ln(v, w, b):
        mu = jnp.mean(v, axis=-1, keepdims=True)
        var = jnp.mean((v - mu) ** 2, axis=-1, keepdims=True)
        return (v - mu) / jnp.sqrt(var + eps) * w + b

    q = x @ params["wq"]
    k = x @ params["wk"]
    v = x @ params["wv"]
    split = lambda t: t.reshape(B, S, num_heads, d_k).transpose(0, 2, 1, 3)
    qh, kh, vh = split(q), split(k), split(v)
    scores = (qh / math.sqrt(d_k)) @ kh.transpose(0, 1, 3, 2)
    a = jax.nn.softmax(scores, axis=-1)
    h = a @ vh
    h_cat = h.transpose(0, 2, 1, 3).reshape(B, S, D)
    attn = h_cat @ params["wh"] + params["wh_b"]
    x1 = ln(x + attn, params["ln1_w"], params["ln1_b"])
    hid = jax.nn.gelu(x1 @ params["ff1_w"] + params["ff1_b"], approximate=False)
    ff = hid @ params["ff2_w"] + params["ff2_b"]
    return ln(ff + x1, params["ln2_w"], params["ln2_b"])


# ----------------------------------------------------------------------------
if __name__ == "__main__":
    B, S, D = 8, 32, 128          # lane-dense: D, HID are multiples of 128
    NUM_HEADS = 4
    HID = 256

    key = jax.random.PRNGKey(0)
    ks = jax.random.split(key, 14)

    def init_w(k, shape, fan_in):
        return jax.random.normal(k, shape, jnp.float32) / math.sqrt(fan_in)

    params = {
        "wq": init_w(ks[0], (D, D), D),
        "wk": init_w(ks[1], (D, D), D),
        "wv": init_w(ks[2], (D, D), D),
        "wh": init_w(ks[3], (D, D), D),
        "wh_b": 0.1 * jax.random.normal(ks[4], (D,), jnp.float32),
        "ln1_w": 1.0 + 0.1 * jax.random.normal(ks[5], (D,), jnp.float32),
        "ln1_b": 0.1 * jax.random.normal(ks[6], (D,), jnp.float32),
        "ff1_w": init_w(ks[7], (D, HID), D),
        "ff1_b": 0.1 * jax.random.normal(ks[8], (HID,), jnp.float32),
        "ff2_w": init_w(ks[9], (HID, D), HID),
        "ff2_b": 0.1 * jax.random.normal(ks[10], (D,), jnp.float32),
        "ln2_w": 1.0 + 0.1 * jax.random.normal(ks[11], (D,), jnp.float32),
        "ln2_b": 0.1 * jax.random.normal(ks[12], (D,), jnp.float32),
    }

    x = jax.random.normal(ks[13], (B, S, D), jnp.float32)

    ref = encoder_layer_ref(x, params, num_heads=NUM_HEADS)

    # One-time parameter preparation (outside the call path).
    prep_f32 = prepare_params(params, num_heads=NUM_HEADS, matmul_dtype=jnp.float32)
    prep_bf16 = prepare_params(params, num_heads=NUM_HEADS, matmul_dtype=jnp.bfloat16)

    # f32-matmul path (exact softmax reciprocal): tight check of kernel semantics.
    out_f32 = encoder_layer(x, prep_f32, num_heads=NUM_HEADS)
    out_f32 = jax.block_until_ready(out_f32)
    np.testing.assert_allclose(np.asarray(out_f32), np.asarray(ref),
                               rtol=2e-3, atol=2e-3)

    # bf16-matmul path (performance configuration): loose check.
    out_bf16 = encoder_layer(x, prep_bf16, num_heads=NUM_HEADS)
    out_bf16 = jax.block_until_ready(out_bf16)
    np.testing.assert_allclose(np.asarray(out_bf16), np.asarray(ref),
                               rtol=1e-1, atol=1e-1)

    print("KERNEL_OK")
</pallas_src>

<mosaic_0001>
module attributes {stable_mosaic.version = 11 : i64} {
  func.func @_encoder_layer_kernel(%arg0: i32, %arg1: memref<4x32x128xf32, #tpu.memory_space<vmem>>, %arg2: memref<128x384xf32, #tpu.memory_space<vmem>>, %arg3: memref<128x128xf32, #tpu.memory_space<vmem>>, %arg4: memref<1x128xf32, #tpu.memory_space<vmem>>, %arg5: memref<1x128xf32, #tpu.memory_space<vmem>>, %arg6: memref<1x128xf32, #tpu.memory_space<vmem>>, %arg7: memref<128x256xf32, #tpu.memory_space<vmem>>, %arg8: memref<1x256xf32, #tpu.memory_space<vmem>>, %arg9: memref<256x128xf32, #tpu.memory_space<vmem>>, %arg10: memref<1x128xf32, #tpu.memory_space<vmem>>, %arg11: memref<1x128xf32, #tpu.memory_space<vmem>>, %arg12: memref<1x128xf32, #tpu.memory_space<vmem>>, %arg13: memref<4x32x128xf32, #tpu.memory_space<vmem>>) attributes {dimension_semantics = [#tpu.dimension_semantics<parallel>], iteration_bounds = array<i64: 2>, scalar_prefetch = 0 : i64, scratch_operands = 0 : i64, tpu.core_type = #tpu.core_type<tc>, window_params = [{transform_indices = @transform_0, window_bounds = array<i64: 4, 32, 128>}, {pipeline_mode = #tpu.pipeline_mode<synchronous>, transform_indices = @transform_1, window_bounds = array<i64: 128, 384>}, {pipeline_mode = #tpu.pipeline_mode<synchronous>, transform_indices = @transform_2, window_bounds = array<i64: 128, 128>}, {pipeline_mode = #tpu.pipeline_mode<synchronous>, transform_indices = @transform_3, window_bounds = array<i64: 1, 128>}, {pipeline_mode = #tpu.pipeline_mode<synchronous>, transform_indices = @transform_4, window_bounds = array<i64: 1, 128>}, {pipeline_mode = #tpu.pipeline_mode<synchronous>, transform_indices = @transform_5, window_bounds = array<i64: 1, 128>}, {pipeline_mode = #tpu.pipeline_mode<synchronous>, transform_indices = @transform_6, window_bounds = array<i64: 128, 256>}, {pipeline_mode = #tpu.pipeline_mode<synchronous>, transform_indices = @transform_7, window_bounds = array<i64: 1, 256>}, {pipeline_mode = #tpu.pipeline_mode<synchronous>, transform_indices = @transform_8, window_bounds = array<i64: 256, 128>}, {pipeline_mode = #tpu.pipeline_mode<synchronous>, transform_indices = @transform_9, window_bounds = array<i64: 1, 128>}, {pipeline_mode = #tpu.pipeline_mode<synchronous>, transform_indices = @transform_10, window_bounds = array<i64: 1, 128>}, {pipeline_mode = #tpu.pipeline_mode<synchronous>, transform_indices = @transform_11, window_bounds = array<i64: 1, 128>}, {transform_indices = @transform_12, window_bounds = array<i64: 4, 32, 128>}]} {
    %c0 = arith.constant 0 : index
    %c0_0 = arith.constant 0 : index
    %c0_1 = arith.constant 0 : index
    %0 = vector.load %arg1[%c0, %c0_0, %c0_1] : memref<4x32x128xf32, #tpu.memory_space<vmem>>, vector<4x32x128xf32>
    %1 = vector.shape_cast %0 : vector<4x32x128xf32> to vector<128x128xf32>
    %c0_2 = arith.constant 0 : index
    %c0_3 = arith.constant 0 : index
    %2 = vector.load %arg2[%c0_2, %c0_3] : memref<128x384xf32, #tpu.memory_space<vmem>>, vector<128x384xf32>
    %cst = arith.constant dense<0.000000e+00> : vector<128x384xf32>
    %3 = tpu.matmul %1, %2, %cst {dimension_numbers = #tpu.dot_dimension_numbers<[1], [0], [0], [1], [0, 0, 1, 1], [], []>} : vector<128x128xf32>, vector<128x384xf32>, vector<128x384xf32> -> vector<128x384xf32>
    %4 = vector.extract_strided_slice %3 {offsets = [0, 0], sizes = [128, 128], strides = [1, 1]} : vector<128x384xf32> to vector<128x128xf32>
    %5 = vector.extract_strided_slice %3 {offsets = [0, 128], sizes = [128, 128], strides = [1, 1]} : vector<128x384xf32> to vector<128x128xf32>
    %6 = vector.extract_strided_slice %3 {offsets = [0, 256], sizes = [128, 128], strides = [1, 1]} : vector<128x384xf32> to vector<128x128xf32>
    %7 = vector.shape_cast %4 : vector<128x128xf32> to vector<4x32x4x32xf32>
    %8 = tpu.transpose %7, [0, 2, 1, 3] : vector<4x32x4x32xf32> -> vector<4x4x32x32xf32>
    %9 = vector.shape_cast %8 : vector<4x4x32x32xf32> to vector<16x32x32xf32>
    %10 = vector.shape_cast %5 : vector<128x128xf32> to vector<4x32x4x32xf32>
    %11 = tpu.transpose %10, [0, 2, 1, 3] : vector<4x32x4x32xf32> -> vector<4x4x32x32xf32>
    %12 = vector.shape_cast %11 : vector<4x4x32x32xf32> to vector<16x32x32xf32>
    %13 = vector.shape_cast %6 : vector<128x128xf32> to vector<4x32x4x32xf32>
    %14 = tpu.transpose %13, [0, 2, 1, 3] : vector<4x32x4x32xf32> -> vector<4x4x32x32xf32>
    %15 = vector.shape_cast %14 : vector<4x4x32x32xf32> to vector<16x32x32xf32>
    "tpu.trace_start"() <{level = 10 : i32, message = "bqd,bkd->bqk"}> : () -> ()
    %cst_4 = arith.constant dense<0.000000e+00> : vector<16x32x32xf32>
    %16 = tpu.matmul %9, %12, %cst_4 {dimension_numbers = #tpu.dot_dimension_numbers<[2], [2], [1], [1], [0, 0, 0, 1, 1, 1], [0], [0]>} : vector<16x32x32xf32>, vector<16x32x32xf32>, vector<16x32x32xf32> -> vector<16x32x32xf32>
    "tpu.trace_stop"() : () -> ()
    %cst_5 = arith.constant dense<0xFF800000> : vector<16x32xf32>
    %17 = vector.multi_reduction <maximumf>, %16, %cst_5 [2] : vector<16x32x32xf32> to vector<16x32xf32>
    %18 = vector.shape_cast %17 : vector<16x32xf32> to vector<16x32x1xf32>
    %19 = vector.broadcast %18 : vector<16x32x1xf32> to vector<16x32x32xf32>
    %20 = arith.subf %16, %19 : vector<16x32x32xf32>
    %21 = math.exp %20 : vector<16x32x32xf32>
    %cst_6 = arith.constant dense<0.000000e+00> : vector<16x32xf32>
    %22 = vector.multi_reduction <add>, %21, %cst_6 [2] : vector<16x32x32xf32> to vector<16x32xf32>
    %23 = vector.shape_cast %22 : vector<16x32xf32> to vector<16x32x1xf32>
    %24 = vector.broadcast %23 : vector<16x32x1xf32> to vector<16x32x32xf32>
    %25 = arith.divf %21, %24 : vector<16x32x32xf32>
    "tpu.trace_start"() <{level = 10 : i32, message = "bqk,bkd->bqd"}> : () -> ()
    %cst_7 = arith.constant dense<0.000000e+00> : vector<16x32x32xf32>
    %26 = tpu.matmul %25, %15, %cst_7 {dimension_numbers = #tpu.dot_dimension_numbers<[2], [1], [1], [2], [0, 0, 0, 1, 1, 2], [0], [0]>} : vector<16x32x32xf32>, vector<16x32x32xf32>, vector<16x32x32xf32> -> vector<16x32x32xf32>
    "tpu.trace_stop"() : () -> ()
    %27 = vector.shape_cast %26 : vector<16x32x32xf32> to vector<4x4x32x32xf32>
    %28 = tpu.transpose %27, [0, 2, 1, 3] : vector<4x4x32x32xf32> -> vector<4x32x4x32xf32>
    %29 = vector.shape_cast %28 : vector<4x32x4x32xf32> to vector<128x128xf32>
    %c0_8 = arith.constant 0 : index
    %c0_9 = arith.constant 0 : index
    %30 = vector.load %arg3[%c0_8, %c0_9] : memref<128x128xf32, #tpu.memory_space<vmem>>, vector<128x128xf32>
    %cst_10 = arith.constant dense<0.000000e+00> : vector<128x128xf32>
    %31 = tpu.matmul %29, %30, %cst_10 {dimension_numbers = #tpu.dot_dimension_numbers<[1], [0], [0], [1], [0, 0, 1, 1], [], []>} : vector<128x128xf32>, vector<128x128xf32>, vector<128x128xf32> -> vector<128x128xf32>
    %c0_11 = arith.constant 0 : index
    %c0_12 = arith.constant 0 : index
    %32 = vector.load %arg4[%c0_11, %c0_12] : memref<1x128xf32, #tpu.memory_space<vmem>>, vector<1x128xf32>
    %33 = vector.shape_cast %32 : vector<1x128xf32> to vector<128xf32>
    %34 = vector.shape_cast %33 : vector<128xf32> to vector<1x128xf32>
    %35 = vector.broadcast %34 : vector<1x128xf32> to vector<128x128xf32>
    %36 = arith.addf %31, %35 : vector<128x128xf32>
    %37 = arith.addf %1, %36 : vector<128x128xf32>
    %cst_13 = arith.constant dense<0.000000e+00> : vector<128xf32>
    %38 = vector.multi_reduction <add>, %37, %cst_13 [1] : vector<128x128xf32> to vector<128xf32>
    %39 = vector.shape_cast %38 : vector<128xf32> to vector<128x1xf32>
    %cst_14 = arith.constant 1.280000e+02 : f32
    %40 = vector.broadcast %cst_14 : f32 to vector<128x1xf32>
    %41 = arith.divf %39, %40 : vector<128x1xf32>
    %42 = vector.broadcast %41 : vector<128x1xf32> to vector<128x128xf32>
    %43 = arith.subf %37, %42 : vector<128x128xf32>
    %44 = arith.mulf %43, %43 : vector<128x128xf32>
    %cst_15 = arith.constant dense<0.000000e+00> : vector<128xf32>
    %45 = vector.multi_reduction <add>, %44, %cst_15 [1] : vector<128x128xf32> to vector<128xf32>
    %46 = vector.shape_cast %45 : vector<128xf32> to vector<128x1xf32>
    %cst_16 = arith.constant 1.280000e+02 : f32
    %47 = vector.broadcast %cst_16 : f32 to vector<128x1xf32>
    %48 = arith.divf %46, %47 : vector<128x1xf32>
    %49 = vector.broadcast %41 : vector<128x1xf32> to vector<128x128xf32>
    %50 = arith.subf %37, %49 : vector<128x128xf32>
    %cst_17 = arith.constant 9.99999997E-7 : f32
    %51 = vector.broadcast %cst_17 : f32 to vector<128x1xf32>
    %52 = arith.addf %48, %51 : vector<128x1xf32>
    %53 = math.rsqrt %52 : vector<128x1xf32>
    %54 = vector.broadcast %53 : vector<128x1xf32> to vector<128x128xf32>
    %55 = arith.mulf %50, %54 : vector<128x128xf32>
    %c0_18 = arith.constant 0 : index
    %c0_19 = arith.constant 0 : index
    %56 = vector.load %arg5[%c0_18, %c0_19] : memref<1x128xf32, #tpu.memory_space<vmem>>, vector<1x128xf32>
    %57 = vector.shape_cast %56 : vector<1x128xf32> to vector<128xf32>
    %58 = vector.shape_cast %57 : vector<128xf32> to vector<1x128xf32>
    %59 = vector.broadcast %58 : vector<1x128xf32> to vector<128x128xf32>
    %60 = arith.mulf %55, %59 : vector<128x128xf32>
    %c0_20 = arith.constant 0 : index
    %c0_21 = arith.constant 0 : index
    %61 = vector.load %arg6[%c0_20, %c0_21] : memref<1x128xf32, #tpu.memory_space<vmem>>, vector<1x128xf32>
    %62 = vector.shape_cast %61 : vector<1x128xf32> to vector<128xf32>
    %63 = vector.shape_cast %62 : vector<128xf32> to vector<1x128xf32>
    %64 = vector.broadcast %63 : vector<1x128xf32> to vector<128x128xf32>
    %65 = arith.addf %60, %64 : vector<128x128xf32>
    %c0_22 = arith.constant 0 : index
    %c0_23 = arith.constant 0 : index
    %66 = vector.load %arg7[%c0_22, %c0_23] : memref<128x256xf32, #tpu.memory_space<vmem>>, vector<128x256xf32>
    %cst_24 = arith.constant dense<0.000000e+00> : vector<128x256xf32>
    %67 = tpu.matmul %65, %66, %cst_24 {dimension_numbers = #tpu.dot_dimension_numbers<[1], [0], [0], [1], [0, 0, 1, 1], [], []>} : vector<128x128xf32>, vector<128x256xf32>, vector<128x256xf32> -> vector<128x256xf32>
    %c0_25 = arith.constant 0 : index
    %c0_26 = arith.constant 0 : index
    %68 = vector.load %arg8[%c0_25, %c0_26] : memref<1x256xf32, #tpu.memory_space<vmem>>, vector<1x256xf32>
    %69 = vector.shape_cast %68 : vector<1x256xf32> to vector<256xf32>
    %70 = vector.shape_cast %69 : vector<256xf32> to vector<1x256xf32>
    %71 = vector.broadcast %70 : vector<1x256xf32> to vector<128x256xf32>
    %72 = arith.addf %67, %71 : vector<128x256xf32>
    %cst_27 = arith.constant 5.000000e-01 : f32
    %73 = vector.broadcast %cst_27 : f32 to vector<128x256xf32>
    %74 = arith.mulf %73, %72 : vector<128x256xf32>
    %cst_28 = arith.constant 0.707106769 : f32
    %75 = vector.broadcast %cst_28 : f32 to vector<128x256xf32>
    %76 = arith.mulf %72, %75 : vector<128x256xf32>
    %77 = math.erf %76 : vector<128x256xf32>
    %cst_29 = arith.constant 1.000000e+00 : f32
    %78 = vector.broadcast %cst_29 : f32 to vector<128x256xf32>
    %79 = arith.addf %78, %77 : vector<128x256xf32>
    %80 = arith.mulf %74, %79 : vector<128x256xf32>
    %c0_30 = arith.constant 0 : index
    %c0_31 = arith.constant 0 : index
    %81 = vector.load %arg9[%c0_30, %c0_31] : memref<256x128xf32, #tpu.memory_space<vmem>>, vector<256x128xf32>
    %cst_32 = arith.constant dense<0.000000e+00> : vector<128x128xf32>
    %82 = tpu.matmul %80, %81, %cst_32 {dimension_numbers = #tpu.dot_dimension_numbers<[1], [0], [0], [1], [0, 0, 1, 1], [], []>} : vector<128x256xf32>, vector<256x128xf32>, vector<128x128xf32> -> vector<128x128xf32>
    %c0_33 = arith.constant 0 : index
    %c0_34 = arith.constant 0 : index
    %83 = vector.load %arg10[%c0_33, %c0_34] : memref<1x128xf32, #tpu.memory_space<vmem>>, vector<1x128xf32>
    %84 = vector.shape_cast %83 : vector<1x128xf32> to vector<128xf32>
    %85 = vector.shape_cast %84 : vector<128xf32> to vector<1x128xf32>
    %86 = vector.broadcast %85 : vector<1x128xf32> to vector<128x128xf32>
    %87 = arith.addf %82, %86 : vector<128x128xf32>
    %88 = arith.addf %87, %65 : vector<128x128xf32>
    %cst_35 = arith.constant dense<0.000000e+00> : vector<128xf32>
    %89 = vector.multi_reduction <add>, %88, %cst_35 [1] : vector<128x128xf32> to vector<128xf32>
    %90 = vector.shape_cast %89 : vector<128xf32> to vector<128x1xf32>
    %cst_36 = arith.constant 1.280000e+02 : f32
    %91 = vector.broadcast %cst_36 : f32 to vector<128x1xf32>
    %92 = arith.divf %90, %91 : vector<128x1xf32>
    %93 = vector.broadcast %92 : vector<128x1xf32> to vector<128x128xf32>
    %94 = arith.subf %88, %93 : vector<128x128xf32>
    %95 = arith.mulf %94, %94 : vector<128x128xf32>
    %cst_37 = arith.constant dense<0.000000e+00> : vector<128xf32>
    %96 = vector.multi_reduction <add>, %95, %cst_37 [1] : vector<128x128xf32> to vector<128xf32>
    %97 = vector.shape_cast %96 : vector<128xf32> to vector<128x1xf32>
    %cst_38 = arith.constant 1.280000e+02 : f32
    %98 = vector.broadcast %cst_38 : f32 to vector<128x1xf32>
    %99 = arith.divf %97, %98 : vector<128x1xf32>
    %100 = vector.broadcast %92 : vector<128x1xf32> to vector<128x128xf32>
    %101 = arith.subf %88, %100 : vector<128x128xf32>
    %cst_39 = arith.constant 9.99999997E-7 : f32
    %102 = vector.broadcast %cst_39 : f32 to vector<128x1xf32>
    %103 = arith.addf %99, %102 : vector<128x1xf32>
    %104 = math.rsqrt %103 : vector<128x1xf32>
    %105 = vector.broadcast %104 : vector<128x1xf32> to vector<128x128xf32>
    %106 = arith.mulf %101, %105 : vector<128x128xf32>
    %c0_40 = arith.constant 0 : index
    %c0_41 = arith.constant 0 : index
    %107 = vector.load %arg11[%c0_40, %c0_41] : memref<1x128xf32, #tpu.memory_space<vmem>>, vector<1x128xf32>
    %108 = vector.shape_cast %107 : vector<1x128xf32> to vector<128xf32>
    %109 = vector.shape_cast %108 : vector<128xf32> to vector<1x128xf32>
    %110 = vector.broadcast %109 : vector<1x128xf32> to vector<128x128xf32>
    %111 = arith.mulf %106, %110 : vector<128x128xf32>
    %c0_42 = arith.constant 0 : index
    %c0_43 = arith.constant 0 : index
    %112 = vector.load %arg12[%c0_42, %c0_43] : memref<1x128xf32, #tpu.memory_space<vmem>>, vector<1x128xf32>
    %113 = vector.shape_cast %112 : vector<1x128xf32> to vector<128xf32>
    %114 = vector.shape_cast %113 : vector<128xf32> to vector<1x128xf32>
    %115 = vector.broadcast %114 : vector<1x128xf32> to vector<128x128xf32>
    %116 = arith.addf %111, %115 : vector<128x128xf32>
    %117 = vector.shape_cast %116 : vector<128x128xf32> to vector<4x32x128xf32>
    %c0_44 = arith.constant 0 : index
    %c0_45 = arith.constant 0 : index
    %c0_46 = arith.constant 0 : index
    %118 = vector.load %arg13[%c0_44, %c0_45, %c0_46] : memref<4x32x128xf32, #tpu.memory_space<vmem>>, vector<4x32x128xf32>
    tpu.vector_store %arg13[%c0_44, %c0_45, %c0_46], %117 {strides = array<i32>} : memref<4x32x128xf32, #tpu.memory_space<vmem>>, vector<4x32x128xf32>,
    return
  }
  func.func @transform_0(%arg0: i32) -> (i32, i32, i32) {
    %c0_i32 = arith.constant 0 : i32
    %c0_i32_0 = arith.constant 0 : i32
    %c0_i32_1 = arith.constant 0 : i32
    return %arg0, %c0_i32, %c0_i32_0 : i32, i32, i32
  }
  func.func @transform_1(%arg0: i32) -> (i32, i32) {
    %c0_i32 = arith.constant 0 : i32
    %c0_i32_0 = arith.constant 0 : i32
    %c0_i32_1 = arith.constant 0 : i32
    return %c0_i32, %c0_i32_0 : i32, i32
  }
  func.func @transform_2(%arg0: i32) -> (i32, i32) {
    %c0_i32 = arith.constant 0 : i32
    %c0_i32_0 = arith.constant 0 : i32
    %c0_i32_1 = arith.constant 0 : i32
    return %c0_i32, %c0_i32_0 : i32, i32
  }
  func.func @transform_3(%arg0: i32) -> (i32, i32) {
    %c0_i32 = arith.constant 0 : i32
    %c0_i32_0 = arith.constant 0 : i32
    %c0_i32_1 = arith.constant 0 : i32
    return %c0_i32, %c0_i32_0 : i32, i32
  }
  func.func @transform_4(%arg0: i32) -> (i32, i32) {
    %c0_i32 = arith.constant 0 : i32
    %c0_i32_0 = arith.constant 0 : i32
    %c0_i32_1 = arith.constant 0 : i32
    return %c0_i32, %c0_i32_0 : i32, i32
  }
  func.func @transform_5(%arg0: i32) -> (i32, i32) {
    %c0_i32 = arith.constant 0 : i32
    %c0_i32_0 = arith.constant 0 : i32
    %c0_i32_1 = arith.constant 0 : i32
    return %c0_i32, %c0_i32_0 : i32, i32
  }
  func.func @transform_6(%arg0: i32) -> (i32, i32) {
    %c0_i32 = arith.constant 0 : i32
    %c0_i32_0 = arith.constant 0 : i32
    %c0_i32_1 = arith.constant 0 : i32
    return %c0_i32, %c0_i32_0 : i32, i32
  }
  func.func @transform_7(%arg0: i32) -> (i32, i32) {
    %c0_i32 = arith.constant 0 : i32
    %c0_i32_0 = arith.constant 0 : i32
    %c0_i32_1 = arith.constant 0 : i32
    return %c0_i32, %c0_i32_0 : i32, i32
  }
  func.func @transform_8(%arg0: i32) -> (i32, i32) {
    %c0_i32 = arith.constant 0 : i32
    %c0_i32_0 = arith.constant 0 : i32
    %c0_i32_1 = arith.constant 0 : i32
    return %c0_i32, %c0_i32_0 : i32, i32
  }
  func.func @transform_9(%arg0: i32) -> (i32, i32) {
    %c0_i32 = arith.constant 0 : i32
    %c0_i32_0 = arith.constant 0 : i32
    %c0_i32_1 = arith.constant 0 : i32
    return %c0_i32, %c0_i32_0 : i32, i32
  }
  func.func @transform_10(%arg0: i32) -> (i32, i32) {
    %c0_i32 = arith.constant 0 : i32
    %c0_i32_0 = arith.constant 0 : i32
    %c0_i32_1 = arith.constant 0 : i32
    return %c0_i32, %c0_i32_0 : i32, i32
  }
  func.func @transform_11(%arg0: i32) -> (i32, i32) {
    %c0_i32 = arith.constant 0 : i32
    %c0_i32_0 = arith.constant 0 : i32
    %c0_i32_1 = arith.constant 0 : i32
    return %c0_i32, %c0_i32_0 : i32, i32
  }
  func.func @transform_12(%arg0: i32) -> (i32, i32, i32) {
    %c0_i32 = arith.constant 0 : i32
    %c0_i32_0 = arith.constant 0 : i32
    %c0_i32_1 = arith.constant 0 : i32
    return %arg0, %c0_i32, %c0_i32_0 : i32, i32, i32
  }
}

</mosaic_0001>

<bundles_post_ra>
// kernel: tpu_custom_call.1
= control target key start
LH: loop header
LB: loop body
LE: loop exit
PB: predicated region body
PF: predicated region fallthrough
CT: control target
= control target key end

     0   :  { %s24151_s0 = inlined_call_operand.hbm [shape: f32[8,32,128], index: 0, kind: input, shape index: {}]   ;;  %s24152_s1 = inlined_call_operand.hbm [shape: f32[128,384], index: 1, kind: input, shape index: {}]   ;;  %s24153_s2 = inlined_call_operand.hbm [shape: f32[128,128], index: 2, kind: input, shape index: {}]   ;;  %s24154_s3 = inlined_call_operand.vmem [shape: f32[1,128], index: 3, kind: input, shape index: {}]   ;;  %s24155_s4 = inlined_call_operand.vmem [shape: f32[1,128], index: 4, kind: input, shape index: {}]   ;;  %s24156_s5 = inlined_call_operand.vmem [shape: f32[1,128], index: 5, kind: input, shape index: {}]   ;;  %s24157_s6 = inlined_call_operand.hbm [shape: f32[128,256], index: 6, kind: input, shape index: {}]   ;;  %s24158_s7 = inlined_call_operand.vmem [shape: f32[1,256], index: 7, kind: input, shape index: {}]   ;;  %s24159_s8 = inlined_call_operand.hbm [shape: f32[256,128], index: 8, kind: input, shape index: {}]   ;;  %s24160_s9 = inlined_call_operand.vmem [shape: f32[1,128], index: 9, kind: input, shape index: {}]   ;;  %s24161_s10 = inlined_call_operand.vmem [shape: f32[1,128], index: 10, kind: input, shape index: {}]   ;;  %s24162_s11 = inlined_call_operand.vmem [shape: f32[1,128], index: 11, kind: input, shape index: {}]   ;;  %s24163_s12 = inlined_call_operand.hbm [shape: f32[8,32,128], index: 12, kind: output, shape index: {}]  }
   0x1   :  { %24375 = sst [smem:[#allocation117_spill]] %s24152_s1 }
   0x2   :  { %24376 = sst [smem:[#allocation118_spill]] %s24153_s2 }
   0x3   :  { %24377 = sst [smem:[#allocation119_spill]] %s24157_s6 }
   0x4   :  { %24378 = sst [smem:[#allocation120_spill]] %s24159_s8 }
   0x5   :  { %17 = vsyncpa [#allocation3], 0 }
   0x6   :  { %19 = vsyncpa [#allocation3 + $0x1], 0 }
   0x7   :  { %20 = vsyncpa [#allocation6], 0 }
   0x8   :  { %21 = vsyncpa [#allocation9], 0 }
   0x9   :  { %22 = vsyncpa [#allocation4], 0 }
   0xa   :  { %24 = vsyncpa [#allocation4 + $0x1], 0  ;;  %s17852_s21 = smov 0   ;;  %s17854_s22 = smov 0  }
   0xb   :  { %s17856_s23 = smov 0   ;;  %s17858_s24 = smov 0  }
   0xc LB: > { %24379 = sst [smem:[#allocation16_spill]] %s17753_s21  ;;  %s17873_s25 = sadd.s32 4294967295, %s17765_s24   ;;  %s17765_s24 = sphi %s17858_s24, %s24835_s24   ;;  %s17761_s23 = sphi %s17856_s23, %s24834_s23   ;;  %s17757_s22 = sphi %s17854_s22, %s24833_s22   ;;  %s17753_s21 = sphi %s17852_s21, %s24832_s21  }
   0xd   : > { %s15626_s26 = sadd.s32 4294967294, %s17765_s24   ;;  %p50_p0 = scmp.ne.s32.totalorder %s17757_s22, %s17753_s21 }
   0xe   : > { %p24164_p1 = scmp.eq.s32.totalorder %s17873_s25, 0  ;;  %p311_p3 = scmp.eq.s32.totalorder %s15626_s26, 1 }
   0xf   : > { %p15627_p5 = scmp.ge.s32.totalorder %s17765_s24, 1  ;;  %p318_p7 = scmp.lt.s32.totalorder %s17765_s24, 3 }
  0x10   : > { %p17882_p4 = por %p24164_p1, %p50_p0  ;;  %p17887_p6 = por %p311_p3, %p50_p0 }
  0x11   : > { %p17892_p8 = pnand %p15627_p5, %p318_p7  ;;  %s17767_s30 = smov [#allocation5]  }
  0x12   : > { %s24380_s27 = scalar_select %p17882_p4, 1, 0 }
  0x13   : > { %s24381_s28 = scalar_select %p17887_p6, 1, 0 }
  0x14   : > { %s24383_s29 = scalar_select %p17892_p8, 1, 0 }
  0x15   : > { %24382 = sst [smem:[#allocation17_spill]] %s24381_s28  ;;  %s330_s13 = sshll.u32 %s17767_s30, 4  ;;  %s331_s13 = int_to_ptr.vmem [resolvable:$true] %s330_s13 }
  0x16   : > { %p16960_p9 = pneg %p17892_p8  ;;  %s17768_s15 = smov [#allocation8]  }
  0x17   : > { %s365_s16 = sshll.u32 %s17768_s15, 4  ;;  %s17572_s17 = scalar_lea.vmem %s331_s13, 6144  ;;  %s366_s16 = int_to_ptr.vmem [resolvable:$true] %s365_s16 }
  0x18   : > { %p17901_p11 = pnand %p16960_p9, %p24164_p1  ;;  %p17573_p13 = scmp.ne.s32.totalorder %s331_s13, %s17572_s17 }
  0x19   : > { %p17580_p5 = scmp.lt.s32.totalorder %s331_s13, %s331_s13  ;;  %p17581_p7 = scmp.lt.s32.totalorder %s17572_s17, %s17572_s17 }
  0x1a   : > { %p17563_p12 = pneg %p17901_p11 }
  0x1b   : > { %p17582_p10 = por %p17581_p7, %p17580_p5 }
  0x1c   : > { %p17575_p0 = pnand %p17573_p13, %p17563_p12 }
  0x1e   : > { %p17576_p3 = pneg %p17575_p0 }
  0x20   : > { %p17583_p9 = pnand %p17582_p10, %p17576_p3 }
  0x22   : > { %17586 = shalt.err (!%p17583_p9)
}
  0x23   : > { %s17769_s18 = smov 384   ;;  %s17770_s19 = smov 24  }
  0x24   : > { %s24385_s1 = sld [smem:[#allocation117_spill]]  ;;  %s17598_s30 = scalar_lea.vmem %s366_s16, 4096 }
  0x25   : > { %p17599_p1 = scmp.ne.s32.totalorder %s366_s16, %s17598_s30  ;;  %p17606_p2 = scmp.lt.s32.totalorder %s366_s16, %s366_s16 }
  0x26   : > { %p17607_p6 = scmp.lt.s32.totalorder %s17598_s30, %s17598_s30 }
  0x27   : > { %p17601_p13 = pnand %p17599_p1, %p17563_p12 }
  0x28   : > { %p17608_p5 = por %p17607_p6, %p17606_p2 }
  0x29   : > { %p17602_p0 = pneg %p17601_p13 }
  0x2a   : > { %16963 = dma.hbm_to_vmem [thread:$0]  (!%p17901_p11), %s24385_s1, 6144, %s331_s13, [#allocation6], %s17769_s18, %s17769_s18, %s17770_s19  }
  0x2b   : > { %p17609_p10 = pnand %p17608_p5, %p17602_p0 }
  0x2d   : > { %17612 = shalt.err (!%p17609_p10)
}
  0x2e   : > { %s17771_s15 = smov 256   ;;  %s17772_s17 = smov 16  }
  0x2f   : > { %s24386_s6 = sld [smem:[#allocation119_spill]]  ;;  %s17773_s13 = smov [#allocation7]  }
  0x30   : > { %s343_s18 = sshll.u32 %s17773_s13, 4  ;;  %s344_s18 = int_to_ptr.vmem [resolvable:$true] %s343_s18 }
  0x31   : > { %s17624_s19 = scalar_lea.vmem %s344_s18, 2048  ;;  %p17632_p6 = scmp.lt.s32.totalorder %s344_s18, %s344_s18 }
  0x32   : > { %p17625_p1 = scmp.ne.s32.totalorder %s344_s18, %s17624_s19  ;;  %p17633_p7 = scmp.lt.s32.totalorder %s17624_s19, %s17624_s19 }
  0x34   : > { %p17627_p3 = pnand %p17625_p1, %p17563_p12  ;;  %p17634_p9 = por %p17633_p7, %p17632_p6 }
  0x35   : > { %16969 = dma.hbm_to_vmem [thread:$0]  (!%p17901_p11), %s24386_s6, 4096, %s366_s16, [#allocation9], %s17771_s15, %s17771_s15, %s17772_s17  }
  0x36   : > { %p17628_p2 = pneg %p17627_p3 }
  0x38   : > { %p17635_p13 = pnand %p17634_p9, %p17628_p2 }
  0x3a   : > { %17638 = shalt.err (!%p17635_p13)
}
  0x3b   : > { %s24167_s20 = smov 128   ;;  %s24168_s26 = smov 8  }
  0x3c   : > { %s24387_s2 = sld [smem:[#allocation118_spill]]  ;;  %s17776_s16 = smov [#allocation10]  }
  0x3d   : > { %s381_s30 = sshll.u32 %s17776_s16, 4  ;;  %s382_s30 = int_to_ptr.vmem [resolvable:$true] %s381_s30 }
  0x3e   : > { %s17650_s15 = scalar_lea.vmem %s382_s30, 4096  ;;  %p17658_p1 = scmp.lt.s32.totalorder %s382_s30, %s382_s30 }
  0x3f   : > { %p17651_p0 = scmp.ne.s32.totalorder %s382_s30, %s17650_s15  ;;  %p17659_p3 = scmp.lt.s32.totalorder %s17650_s15, %s17650_s15 }
  0x41   : > { %p17653_p5 = pnand %p17651_p0, %p17563_p12  ;;  %p17660_p2 = por %p17659_p3, %p17658_p1 }
  0x42   : > { %16966 = dma.hbm_to_vmem [thread:$0]  (!%p17901_p11), %s24387_s2, 2048, %s344_s18, [#allocation6], %s24167_s20, %s24167_s20, %s24168_s26  }
  0x43   : > { %p17654_p10 = pneg %p17653_p5 }
  0x45   : > { %p17661_p6 = pnand %p17660_p2, %p17654_p10 }
  0x47   : > { %17664 = shalt.err (!%p17661_p6)
}
  0x48   : > { %s24388_s8 = sld [smem:[#allocation120_spill]]  ;;  %s17946_s18 = sadd.s32 1, %s17765_s24  }
  0x49   : > { %s37_s14 = sadd.s32 1, %s17761_s23  ;;  %s34_s19 = ssub.s32 %s17765_s24, %s17946_s18 }
  0x4a   : > { %p44_p12 = scmp.ne.s32.totalorder %s17761_s23, %s17757_s22  ;;  %p35_p7 = scmp.eq.s32.totalorder %s34_s19, 0 }
  0x4b   : > { %p45_p9 = scmp.eq.s32.totalorder %s17765_s24, 0  ;;  %p24389_p13 = scmp.eq.s32.totalorder %s17873_s25, 1 }
  0x4c   : > { %p16985_p5 = scmp.lt.s32.totalorder %s17765_s24, 2  ;;  %s404_s16 = sand.u32 1, %s17761_s23  }
  0x4d   : > { %p17956_p0 = por %p24389_p13, %p44_p12  ;;  %p46_p10 = por %p45_p9, %p44_p12 }
  0x4e   : > { %16972 = dma.hbm_to_vmem [thread:$0]  (!%p17901_p11), %s24388_s8, 4096, %s382_s30, [#allocation9], %s24167_s20, %s24167_s20, %s24168_s26  }
  0x4f   : > { %s24390_s21 = scalar_select %p17956_p0, 1, 0 }
  0x50   : > { %s17962_s28 = scalar_select %p35_p7, %s17761_s23, %s37_s14  }
  0x51   : > { %s15633_s15 = sshll.u32 %s404_s16, 7  ;;  %s15977_s30 = sshll.u32 %s17765_s24, 11 }
  0x52   : > { %s17969_s20 = scalar_lea.hbm %s24151_s0, %s15977_s30  ;;  %s408_s19 = scalar_lea.vmem [#allocation2], %s15633_s15 }
  0x53   : > { %s416_s26 = sshll.u32 %s408_s19, 4  ;;  %p17973_p11 = pnand %p16985_p5, %p46_p10  ;;  %s17971_s26 = int_to_ptr.vmem [resolvable:$true] %s416_s26 }
  0x54   : > { %s17977_s14 = scalar_lea.sflag [#allocation3], %s404_s16  ;;  %s17665_s2 = scalar_lea.hbm %s17969_s20, 2048 }
  0x55   : > { %p17666_p1 = scmp.ne.s32.totalorder %s17969_s20, %s17665_s2  ;;  %p17667_p3 = pneg %p17973_p11 }
  0x56   : > { %s17670_s15 = scalar_lea.hbm %s24151_s0, 4096  ;;  %p17671_p12 = scmp.lt.s32.totalorder %s17969_s20, %s24151_s0 }
  0x57   : > { %p17668_p2 = pnand %p17667_p3, %p17666_p1  ;;  %p17672_p7 = scmp.lt.s32.totalorder %s17670_s15, %s17665_s2 }
  0x59   : > { %p17669_p6 = pneg %p17668_p2  ;;  %p17673_p9 = por %p17672_p7, %p17671_p12 }
  0x5b   : > { %p17674_p13 = pnand %p17673_p9, %p17669_p6 }
  0x5d   : > { %17677 = shalt.err (!%p17674_p13)
}
  0x5e   : > { %s17678_s16 = scalar_lea.vmem %s17971_s26, 2048  ;;  %s17777_s6 = smov [#allocation2]  }
  0x5f   : > { %p17679_p5 = scmp.ne.s32.totalorder %s17971_s26, %s17678_s16  ;;  %s17683_s8 = sshll.u32 %s17777_s6, 4  ;;  %s17684_s8 = int_to_ptr.vmem [resolvable:$false] %s17683_s8 }
  0x60   : > { %s17685_s30 = scalar_lea.vmem %s17684_s8, 4096  ;;  %p17686_p2 = scmp.lt.s32.totalorder %s17971_s26, %s17684_s8 }
  0x61   : > { %p17681_p10 = pnand %p17679_p5, %p17667_p3  ;;  %p17687_p0 = scmp.lt.s32.totalorder %s17685_s30, %s17678_s16 }
  0x63   : > { %p17682_p1 = pneg %p17681_p10  ;;  %p17688_p4 = por %p17687_p0, %p17686_p2 }
  0x65   : > { %p17689_p8 = pnand %p17688_p4, %p17682_p1 }
  0x67   : > { %17692 = shalt.err (!%p17689_p8)
}
  0x68   : > { %s24392_s2 = smov 8   ;;  %s24393_s17 = smov 128  }
  0x69   : > { %16976 = dma.hbm_to_vmem [thread:$0]  (!%p17973_p11), %s17969_s20, 2048, %s17971_s26, %s17977_s14, %s24393_s17, %s24393_s17, %s24392_s2  }
  0x6a   : > { %p24394_p3 = scmp.ne.s32.totalorder %s24383_s29, 0 }
  0x6c   : > { %428 = sbr.rel (%p24394_p3) target bundleno = 3327 (0xcff), region = 68 }
  0x71   : > { %s18004_s6 = sand.u32 1, %s17757_s22   ;;  %p24395_p4 = scmp.ne.s32.totalorder %s24380_s27, 0 }
  0x72   : > { %s15638_s8 = sshll.u32 %s18004_s6, 7  ;;  %s431_s15 = scalar_lea.sflag [#allocation3], %s18004_s6 }
  0x73   : > { %s18010_s1 = scalar_lea.vmem [#allocation2], %s15638_s8 }
  0x74   : > { %17736 = dma.done.wait (%p24395_p4), %s431_s15, 2048  }
  0x75   : > { %17738 = vsyncadd (%p24395_p4), %s431_s15, 4294965248  ;;  %p24396_p8 = scmp.eq.s32.totalorder %s17873_s25, 0 }
  0x77   : > { %17740 = dma.done.wait (%p24396_p8), [#allocation6], 8192   ;;  %p24397_p0 = pmov %p24396_p8 }
  0x79   : > { %17742 = vsyncadd (%p24397_p0), [#allocation6], 4294959104  ;;  %p24398_p11 = pmov %p24397_p0 }
  0x7a   : > { %p24399_p6 = pmov %p24397_p0 }
  0x7b   : > { %17744 = dma.done.wait (%p24398_p11), [#allocation9], 8192  }
  0x7c   : > { %17746 = vsyncadd (%p24399_p6), [#allocation9], 4294959104  ;;  %v24172_v0 = vmov 0.0   ;;  %v555_v1 = vld [vmem:[#allocation5 + $0x170] sm:$0xff]  ;;  %v554_v2 = vld [vmem:[#allocation5 + $0x168] sm:$0xff]  ;;  %s17779_s27 = smov 64  }
  0x7d   : > { %621 = vmatprep.mubr.f32.mxu0 %v24172_v0  ;;  %v552_v3 = vld [vmem:[#allocation5 + $0x158] sm:$0xff]  ;;  %557 = vmatprep.subr.mxu0 %v555_v1  ;;  %v551_v5 = vld [vmem:[#allocation5 + $0x150] sm:$0xff]  ;;  %v549_v6 = vld [vmem:[#allocation5 + $0x140] sm:$0xff]  ;;  %s17780_s29 = smov 96   ;;  %s17781_s20 = smov 32   ;;  %vm7871_vm0 = vcmask 261120  }
  0x7e   : > { %v556_v4 = vld [vmem:[#allocation5 + $0x178] sm:$0xff]  ;;  %558 = vmatpush1.msra.mxu0 %v554_v2  ;;  %v553_v7 = vld [vmem:[#allocation5 + $0x160] sm:$0xff]  ;;  %v550_v9 = vld [vmem:[#allocation5 + $0x148] sm:$0xff]  ;;  %vm14256_vm1 = vcmask 523264   ;;  %vm14273_vm2 = vcmask 785408   ;;  %s24039_s14 = scalar_lea.vmem [#allocation11], %s15638_s8 }
  0x7f   : > { %16380 = vmatprep.subr.mxu1 %v556_v4  ;;  %559 = vmatprep.subr.mxu0 %v552_v3  ;;  %v548_v8 = vld [vmem:[#allocation5 + $0x138] sm:$0xff]  ;;  %v546_v10 = vld [vmem:[#allocation5 + $0x128] sm:$0xff]  ;;  %v545_v11 = vld [vmem:[#allocation5 + $0x120] sm:$0xff]  ;;  %s15979_s8 = sshll.u32 %s17873_s25, 11  ;;  %s15515_s13 = sshll.u32 %s24039_s14, 4  ;;  %s24106_s13 = int_to_ptr.vmem [resolvable:$true] %s15515_s13 }
  0x80   : > { %16381 = vmatpush3.msra.mxu1 %v556_v4  ;;  %560 = vmatpush1.msra.mxu0 %v551_v5  ;;  %v547_v12 = vld [vmem:[#allocation5 + $0x130] sm:$0xff]  ;;  %v542_v14 = vld [vmem:[#allocation5 + $0x108] sm:$0xff]  ;;  %v544_v15 = vld [vmem:[#allocation5 + $0x118] sm:$0xff]  ;;  %s24104_s30 = scalar_lea.hbm %s24163_s12, %s15979_s8  ;;  %s15501_s2 = scalar_lea.sflag [#allocation4], %s18004_s6 }
  0x81   : > { %16382 = vmatprep.subr.mxu1 %v553_v7  ;;  %561 = vmatprep.subr.mxu0 %v549_v6  ;;  %v543_v13 = vld [vmem:[#allocation5 + $0x110] sm:$0xff]  ;;  %v540_v16 = vld [vmem:[#allocation5 + $0xf8] sm:$0xff]  ;;  %v541_v18 = vld [vmem:[#allocation5 + $0x100] sm:$0xff]  ;;  %s17693_s17 = scalar_lea.vmem %s24106_s13, 2048  ;;  %p24827_p7 = scmp.ne.s32.totalorder %s24390_s21, 0 }
  0x82   : > { %16383 = vmatpush3.msra.mxu1 %v553_v7  ;;  %562 = vmatpush1.msra.mxu0 %v548_v8  ;;  %v539_v17 = vld [vmem:[#allocation5 + $0xf0] sm:$0xff]  ;;  %v537_v19 = vld [vmem:[#allocation5 + $0xe0] sm:$0xff]  ;;  %v536_v20 = vld [vmem:[#allocation5 + $0xd8] sm:$0xff]  ;;  %p17694_p12 = scmp.ne.s32.totalorder %s24106_s13, %s17693_s17  ;;  %s17784_s25 = smov [#allocation11]  }
  0x83   : > { %16384 = vmatprep.subr.mxu1 %v550_v9  ;;  %563 = vmatprep.subr.mxu0 %v546_v10  ;;  %v538_v21 = vld [vmem:[#allocation5 + $0xe8] sm:$0xff]  ;;  %v533_v23 = vld [vmem:[#allocation5 + $0xc0] sm:$0xff]  ;;  %v535_v24 = vld [vmem:[#allocation5 + $0xd0] sm:$0xff]  ;;  %s17697_s15 = sshll.u32 %s17784_s25, 4  ;;  %s17698_s15 = int_to_ptr.vmem [resolvable:$false] %s17697_s15 }
  0x84   : > { %16385 = vmatpush3.msra.mxu1 %v550_v9  ;;  %564 = vmatpush1.msra.mxu0 %v545_v11  ;;  %v534_v22 = vld [vmem:[#allocation5 + $0xc8] sm:$0xff]  ;;  %v531_v25 = vld [vmem:[#allocation5 + $0xb0] sm:$0xff]  ;;  %v532_v27 = vld [vmem:[#allocation5 + $0xb8] sm:$0xff]  ;;  %p17695_p9 = pnand %p17694_p12, %p24827_p7  ;;  %p17700_p5 = scmp.lt.s32.totalorder %s24106_s13, %s17698_s15 }
  0x85   : > { %16386 = vmatprep.subr.mxu1 %v547_v12  ;;  %565 = vmatprep.subr.mxu0 %v543_v13  ;;  %v530_v26 = vld [vmem:[#allocation5 + $0xa8] sm:$0xff]  ;;  %v528_v28 = vld [vmem:[#allocation5 + $0x98] sm:$0xff]  ;;  %v527_v29 = vld [vmem:[#allocation5 + $0x90] sm:$0xff] }
  0x86   : > { %16387 = vmatpush3.msra.mxu1 %v547_v12  ;;  %566 = vmatpush1.msra.mxu0 %v542_v14  ;;  %v529_v30 = vld [vmem:[#allocation5 + $0xa0] sm:$0xff]  ;;  %v524_v32 = vld [vmem:[#allocation5 + $0x78] sm:$0xff]  ;;  %v526_v33 = vld [vmem:[#allocation5 + $0x88] sm:$0xff]  ;;  %p17696_p13 = pneg %p17695_p9 }
  0x87   : > { %16388 = vmatprep.subr.mxu1 %v544_v15  ;;  %567 = vmatprep.subr.mxu0 %v540_v16  ;;  %v525_v31 = vld [vmem:[#allocation5 + $0x80] sm:$0xff]  ;;  %v522_v34 = vld [vmem:[#allocation5 + $0x68] sm:$0xff]  ;;  %v523_v36 = vld [vmem:[#allocation5 + $0x70] sm:$0xff] }
  0x88   : > { %16389 = vmatpush3.msra.mxu1 %v544_v15  ;;  %568 = vmatpush1.msra.mxu0 %v539_v17  ;;  %v521_v35 = vld [vmem:[#allocation5 + $0x60] sm:$0xff]  ;;  %v519_v37 = vld [vmem:[#allocation5 + $0x50] sm:$0xff]  ;;  %v518_v38 = vld [vmem:[#allocation5 + $0x48] sm:$0xff] }
  0x89   : > { %16390 = vmatprep.subr.mxu1 %v541_v18  ;;  %569 = vmatprep.subr.mxu0 %v537_v19  ;;  %v520_v39 = vld [vmem:[#allocation5 + $0x58] sm:$0xff]  ;;  %v515_v41 = vld [vmem:[#allocation5 + $0x30] sm:$0xff]  ;;  %v517_v42 = vld [vmem:[#allocation5 + $0x40] sm:$0xff] }
  0x8a   : > { %16391 = vmatpush3.msra.mxu1 %v541_v18  ;;  %570 = vmatpush1.msra.mxu0 %v536_v20  ;;  %v516_v40 = vld [vmem:[#allocation5 + $0x38] sm:$0xff]  ;;  %v513_v43 = vld [vmem:[#allocation5 + $0x20] sm:$0xff]  ;;  %v514_v45 = vld [vmem:[#allocation5 + $0x28] sm:$0xff] }
  0x8b   : > { %16392 = vmatprep.subr.mxu1 %v538_v21  ;;  %571 = vmatprep.subr.mxu0 %v534_v22  ;;  %v512_v44 = vld [vmem:[#allocation5 + $0x18] sm:$0xff]  ;;  %v510_v46 = vld [vmem:[#allocation5 + $0x8] sm:$0xff]  ;;  %v509_v47 = vld [vmem:[#allocation5] sm:$0xff] }
  0x8c   : > { %16393 = vmatpush3.msra.mxu1 %v538_v21  ;;  %572 = vmatpush1.msra.mxu0 %v533_v23  ;;  %v511_v48 = vld [vmem:[#allocation5 + $0x10] sm:$0xff]  ;;  %v493_v49 = vld [vmem:[%s18010_s1] sm:$0xff]  ;;  %v494_v50 = vld [vmem:[%s18010_s1 + $0x8] sm:$0xff] }
  0x8d   : > { %16394 = vmatprep.subr.mxu1 %v535_v24  ;;  %573 = vmatprep.subr.mxu0 %v531_v25  ;;  %v495_v51 = vld [vmem:[%s18010_s1 + $0x10] sm:$0xff]  ;;  %v496_v52 = vld [vmem:[%s18010_s1 + $0x18] sm:$0xff]  ;;  %v497_v53 = vld [vmem:[%s18010_s1 + $0x20] sm:$0xff]  ;;  %v17782_v25 = vmov 1983009808  }
  0x8e   : > { %16395 = vmatpush3.msra.mxu1 %v535_v24  ;;  %574 = vmatpush1.msra.mxu0 %v530_v26  ;;  %v498_v54 = vld [vmem:[%s18010_s1 + $0x28] sm:$0xff]  ;;  %v499_v55 = vld [vmem:[%s18010_s1 + $0x30] sm:$0xff]  ;;  %v500_v56 = vld [vmem:[%s18010_s1 + $0x38] sm:$0xff]  ;;  %v1026_v26 = vunpack.c.l.s4 %v17782_v25 }
  0x8f   : > { %16396 = vmatprep.subr.mxu1 %v532_v27  ;;  %575 = vmatprep.subr.mxu0 %v528_v28  ;;  %v501_v57 = vld [vmem:[%s18010_s1 + $0x40] sm:$0xff]  ;;  %v502_v58 = vld [vmem:[%s18010_s1 + $0x48] sm:$0xff]  ;;  %v503_v59 = vld [vmem:[%s18010_s1 + $0x50] sm:$0xff] }
  0x90   : > { %16397 = vmatpush3.msra.mxu1 %v532_v27  ;;  %576 = vmatpush1.msra.mxu0 %v527_v29  ;;  %v504_v60 = vld [vmem:[%s18010_s1 + $0x58] sm:$0xff]  ;;  %v505_v61 = vld [vmem:[%s18010_s1 + $0x60] sm:$0xff]  ;;  %v506_v62 = vld [vmem:[%s18010_s1 + $0x68] sm:$0xff]  ;;  %v1028_v27 = vlaneseq  ;;  %v1027_v28 = vunpack.c.0.s8 %v1026_v26 }
  0x91   : > { %16398 = vmatprep.subr.mxu1 %v529_v30  ;;  %577 = vmatprep.subr.mxu0 %v525_v31  ;;  %v507_v63 = vld [vmem:[%s18010_s1 + $0x70] sm:$0xff]  ;;  %v508_v1 = vld [vmem:[%s18010_s1 + $0x78] sm:$0xff] }
  0x92   : > { %16399 = vmatpush3.msra.mxu1 %v529_v30  ;;  %578 = vmatpush1.msra.mxu0 %v524_v32  ;;  %v18218_v29 = vshrl.u32 %v1028_v27, 7 }
  0x93   : > { %16400 = vmatprep.subr.mxu1 %v526_v33  ;;  %579 = vmatprep.subr.mxu0 %v522_v34 }
  0x94   : > { %16401 = vmatpush3.msra.mxu1 %v526_v33  ;;  %580 = vmatpush1.msra.mxu0 %v521_v35  ;;  %24406 = vst [vmem:[#allocation24_spill] sm:$0xff] %v18218_v29  ;;  %v17783_v33 = vmov 1934713408   ;;  %v18227_v35 = vsub.s32 %v1027_v28, %v18218_v29 }
  0x95   : > { %16402 = vmatprep.subr.mxu1 %v523_v36  ;;  %581 = vmatprep.subr.mxu0 %v519_v37  ;;  %v1058_v34 = vunpack.c.l.s4 %v17783_v33 }
  0x96   : > { %16403 = vmatpush3.msra.mxu1 %v523_v36  ;;  %582 = vmatpush1.msra.mxu0 %v518_v38  ;;  %24408 = vst [vmem:[#allocation26_spill] sm:$0xff] %v18227_v35 }
  0x97   : > { %16404 = vmatprep.subr.mxu1 %v520_v39  ;;  %583 = vmatprep.subr.mxu0 %v516_v40 }
  0x98   : > { %16405 = vmatpush3.msra.mxu1 %v520_v39  ;;  %584 = vmatpush1.msra.mxu0 %v515_v41  ;;  %v1059_v39 = vunpack.c.0.s8 %v1058_v34 }
  0x99   : > { %16406 = vmatprep.subr.mxu1 %v517_v42  ;;  %585 = vmatprep.subr.mxu0 %v513_v43 }
  0x9a   : > { %16407 = vmatpush3.msra.mxu1 %v517_v42  ;;  %586 = vmatpush1.msra.mxu0 %v512_v44 }
  0x9b   : > { %16408 = vmatprep.subr.mxu1 %v514_v45  ;;  %587 = vmatprep.subr.mxu0 %v510_v46 }
  0x9c   : > { %16409 = vmatpush3.msra.mxu1 %v514_v45  ;;  %588 = vmatpush1.msra.mxu0 %v509_v47 }
  0x9d   : > { %16410 = vmatprep.subr.mxu1 %v511_v48  ;;  %622 = vmatmul.mubr.f32.vlgmr.msra.gmra.mxu0 %v493_v49 }
  0x9e   : > { %16411 = vmatpush3.msra.mxu1 %v511_v48  ;;  %16412 = vmatprep.mubr.f32.mxu1 %v493_v49  ;;  %v18244_v48 = vsub.s32 %v1059_v39, %v18218_v29 }
  0x9f   : > { %627 = vmatprep.mubr.f32.mxu0 %v24172_v0  ;;  %16413 = vmatmul.mubr.f32.vlgmr.msra.gmra.mxu1 %v494_v50 }
  0xa0   : > { %16415 = vmatprep.mubr.f32.mxu1 %v495_v51  ;;  %24410 = vst [vmem:[#allocation28_spill] sm:$0xff] %v18244_v48 }
  0xa1   : > { %628 = vmatmul.mubr.f32.gmra.mxu0 %v494_v50 }
  0xa2   : > { %633 = vmatprep.mubr.f32.mxu0 %v24172_v0 }
  0xa3   : > { %16416 = vmatmul.mubr.f32.gmra.mxu1 %v496_v52 }
  0xa4   : > { %16418 = vmatprep.mubr.f32.mxu1 %v497_v53 }
  0xa5   : > { %634 = vmatmul.mubr.f32.gmra.mxu0 %v495_v51 }
  0xa6   : > { %639 = vmatprep.mubr.f32.mxu0 %v24172_v0 }
  0xa7   : > { %16419 = vmatmul.mubr.f32.gmra.mxu1 %v498_v54 }
  0xa8   : > { %16421 = vmatprep.mubr.f32.mxu1 %v499_v55 }
  0xa9   : > { %640 = vmatmul.mubr.f32.gmra.mxu0 %v496_v52 }
  0xaa   : > { %645 = vmatprep.mubr.f32.mxu0 %v24172_v0 }
  0xab   : > { %16422 = vmatmul.mubr.f32.gmra.mxu1 %v500_v56 }
  0xac   : > { %16424 = vmatprep.mubr.f32.mxu1 %v501_v57 }
  0xad   : > { %646 = vmatmul.mubr.f32.gmra.mxu0 %v497_v53 }
  0xae   : > { %651 = vmatprep.mubr.f32.mxu0 %v24172_v0 }
  0xaf   : > { %16425 = vmatmul.mubr.f32.gmra.mxu1 %v502_v58 }
  0xb0   : > { %16427 = vmatprep.mubr.f32.mxu1 %v503_v59 }
  0xb1   : > { %652 = vmatmul.mubr.f32.gmra.mxu0 %v498_v54 }
  0xb2   : > { %657 = vmatprep.mubr.f32.mxu0 %v24172_v0 }
  0xb3   : > { %16428 = vmatmul.mubr.f32.gmra.mxu1 %v504_v60 }
  0xb4   : > { %16430 = vmatprep.mubr.f32.mxu1 %v505_v61 }
  0xb5   : > { %658 = vmatmul.mubr.f32.gmra.mxu0 %v499_v55 }
  0xb6   : > { %663 = vmatprep.mubr.f32.mxu0 %v24172_v0 }
  0xb7   : > { %16431 = vmatmul.mubr.f32.gmra.mxu1 %v506_v62 }
  0xb8   : > { %16433 = vmatprep.mubr.f32.mxu1 %v507_v63 }
  0xb9   : > { %664 = vmatmul.mubr.f32.gmra.mxu0 %v500_v56 }
  0xba   : > { %669 = vmatprep.mubr.f32.mxu0 %v24172_v0 }
  0xbb   : > { %16434 = vmatmul.mubr.f32.gmra.mxu1 %v508_v1 }
  0xbd   : > { %670 = vmatmul.mubr.f32.gmra.mxu0 %v501_v57 }
  0xbe   : > { %675 = vmatprep.mubr.f32.mxu0 %v24172_v0 }
  0xc1   : > { %676 = vmatmul.mubr.f32.gmra.mxu0 %v502_v58 }
  0xc2   : > { %681 = vmatprep.mubr.f32.mxu0 %v24172_v0 }
  0xc5   : > { %682 = vmatmul.mubr.f32.gmra.mxu0 %v503_v59 }
  0xc6   : > { %687 = vmatprep.mubr.f32.mxu0 %v24172_v0 }
  0xc9   : > { %688 = vmatmul.mubr.f32.gmra.mxu0 %v504_v60 }
  0xca   : > { %693 = vmatprep.mubr.f32.mxu0 %v24172_v0 }
  0xcd   : > { %694 = vmatmul.mubr.f32.gmra.mxu0 %v505_v61 }
  0xce   : > { %699 = vmatprep.mubr.f32.mxu0 %v24172_v0 }
  0xd1   : > { %700 = vmatmul.mubr.f32.gmra.mxu0 %v506_v62 }
  0xd2   : > { %705 = vmatprep.mubr.f32.mxu0 %v24172_v0 }
  0xd5   : > { %706 = vmatmul.mubr.f32.gmra.mxu0 %v507_v63 }
  0xd6   : > { %711 = vmatprep.mubr.f32.mxu0 %v24172_v0 }
  0xd9   : > { %712 = vmatmul.mubr.f32.gmra.mxu0 %v508_v1 }
 0x15d   : > { %v18056_v2 = vpop.f32.mrf.mxu0 }
 0x15e   : > { %927 = vrot.lane.b32.xlu1 %v18056_v2, %s17779_s27  ;;  %879 = vrot.lane.b32.xlu0 %v18056_v2, %s17780_s29 }
 0x15f   : > { %v18062_v3 = vpop.f32.mrf.mxu1  ;;  %v18068_v4 = vpop.f32.mrf.mxu0 }
 0x161   : > { %v18078_v5 = vpop.f32.mrf.mxu1  ;;  %v18088_v6 = vpop.f32.mrf.mxu0 }
 0x162   : > { %5601 = vrot.lane.b32.xlu1 %v18062_v3, %s17779_s27  ;;  %975 = vrot.lane.b32.xlu0 %v18056_v2, %s17781_s20 }
 0x163   : > { %v18094_v7 = vpop.f32.mrf.mxu1  ;;  %v18100_v8 = vpop.f32.mrf.mxu0 }
 0x165   : > { %v18110_v9 = vpop.f32.mrf.mxu1  ;;  %v18116_v10 = vpop.f32.mrf.mxu0 }
 0x166   : > { %5553 = vrot.lane.b32.xlu0 %v18062_v3, %s17780_s29  ;;  %3215 = vrot.lane.b32.xlu1 %v18068_v4, %s17780_s29 }
 0x167   : > { %v18126_v11 = vpop.f32.mrf.mxu0  ;;  %v18144_v14 = vpop.f32.mrf.mxu1 }
 0x168   : > { %24400 = vst [vmem:[#allocation18_spill] sm:$0xff] %v18144_v14 }
 0x169   : > { %v18132_v12 = vpop.f32.mrf.mxu0  ;;  %v18152_v16 = vpop.f32.mrf.mxu1 }
 0x16a   : > { %5649 = vrot.lane.b32.xlu0 %v18062_v3, %s17781_s20  ;;  %3311 = vrot.lane.b32.xlu1 %v18068_v4, %s17781_s20  ;;  %24401 = vst [vmem:[#allocation19_spill] sm:$0xff] %v18152_v16 }
 0x16b   : > { %v18138_v13 = vpop.f32.mrf.mxu0  ;;  %v18158_v17 = vpop.f32.mrf.mxu1 }
 0x16c   : > { %24402 = vst [vmem:[#allocation20_spill] sm:$0xff] %v18158_v17 }
 0x16d   : > { %v18150_v15 = vpop.f32.mrf.mxu0 }
 0x16e   : > { %3263 = vrot.lane.b32.xlu0 %v18068_v4, %s17779_s27  ;;  %5599 = vrot.lane.b32.xlu1 %v18078_v5, %s17779_s27 }
 0x16f   : > { %v18164_v18 = vpop.f32.mrf.mxu0 }
 0x171   : > { %v18170_v19 = vpop.f32.mrf.mxu0 }
 0x172   : > { %5551 = vrot.lane.b32.xlu0 %v18078_v5, %s17780_s29  ;;  %5647 = vrot.lane.b32.xlu1 %v18078_v5, %s17781_s20 }
 0x173   : > { %v18176_v20 = vpop.f32.mrf.mxu0 }
 0x175   : > { %v18186_v21 = vpop.f32.mrf.mxu0 }
 0x176   : > { %929 = vrot.lane.b32.xlu0 %v18088_v6, %s17779_s27  ;;  %881 = vrot.lane.b32.xlu1 %v18088_v6, %s17780_s29  ;;  %24403 = vst [vmem:[#allocation21_spill] sm:$0xff] %v18186_v21 }
 0x177   : > { %v18196_v22 = vpop.f32.mrf.mxu0 }
 0x179   : > { %v18202_v23 = vpop.f32.mrf.mxu0 }
 0x17a   : > { %5605 = vrot.lane.b32.xlu0 %v18094_v7, %s17779_s27  ;;  %977 = vrot.lane.b32.xlu1 %v18088_v6, %s17781_s20  ;;  %24404 = vst [vmem:[#allocation22_spill] sm:$0xff] %v18202_v23 }
 0x17b   : > { %v18208_v24 = vpop.f32.mrf.mxu0 }
 0x17c   : > { %24405 = vst [vmem:[#allocation23_spill] sm:$0xff] %v18208_v24 }
 0x17d   : > { %v18220_v30 = vpop.f32.mrf.mxu0 }
 0x17e   : > { %5557 = vrot.lane.b32.xlu1 %v18094_v7, %s17780_s29  ;;  %3217 = vrot.lane.b32.xlu0 %v18100_v8, %s17780_s29  ;;  %24407 = vst [vmem:[#allocation25_spill] sm:$0xff] %v18220_v30 }
 0x17f   : > { %v18241_v47 = vpop.f32.mrf.mxu0 }
 0x180   : > { %24409 = vst [vmem:[#allocation27_spill] sm:$0xff] %v18241_v47 }
 0x181   : > { %v18254_v55 = vpop.f32.mrf.mxu0 }
 0x182   : > { %5653 = vrot.lane.b32.xlu1 %v18094_v7, %s17781_s20  ;;  %3313 = vrot.lane.b32.xlu0 %v18100_v8, %s17781_s20  ;;  %24411 = vst [vmem:[#allocation29_spill] sm:$0xff] %v18254_v55 }
 0x183   : > { %v18266_v62 = vpop.f32.mrf.mxu0 }
 0x184   : > { %24412 = vst [vmem:[#allocation30_spill] sm:$0xff] %v18266_v62 }
 0x186   : > { %3265 = vrot.lane.b32.xlu1 %v18100_v8, %s17779_s27  ;;  %5555 = vrot.lane.b32.xlu0 %v18110_v9, %s17780_s29 }
 0x18a   : > { %5603 = vrot.lane.b32.xlu1 %v18110_v9, %s17779_s27  ;;  %883 = vrot.lane.b32.xlu0 %v18116_v10, %s17780_s29 }
 0x18e   : > { %5651 = vrot.lane.b32.xlu1 %v18110_v9, %s17781_s20  ;;  %979 = vrot.lane.b32.xlu0 %v18116_v10, %s17781_s20 }
 0x192   : > { %931 = vrot.lane.b32.xlu1 %v18116_v10, %s17779_s27  ;;  %3267 = vrot.lane.b32.xlu0 %v18126_v11, %s17779_s27 }
 0x196   : > { %3219 = vrot.lane.b32.xlu1 %v18126_v11, %s17780_s29  ;;  %933 = vrot.lane.b32.xlu0 %v18132_v12, %s17779_s27 }
 0x19a   : > { %3315 = vrot.lane.b32.xlu1 %v18126_v11, %s17781_s20  ;;  %3221 = vrot.lane.b32.xlu0 %v18138_v13, %s17780_s29 }
 0x19e   : > { %885 = vrot.lane.b32.xlu1 %v18132_v12, %s17780_s29  ;;  %3269 = vrot.lane.b32.xlu0 %v18138_v13, %s17779_s27 }
 0x1a2   : > { %981 = vrot.lane.b32.xlu1 %v18132_v12, %s17781_s20  ;;  %887 = vrot.lane.b32.xlu0 %v18150_v15, %s17780_s29 }
 0x1a6   : > { %5565 = vrot.lane.b32.xlu1 %v18158_v17, %s17780_s29  ;;  %983 = vrot.lane.b32.xlu0 %v18150_v15, %s17781_s20 }
 0x1aa   : > { %3317 = vrot.lane.b32.xlu1 %v18138_v13, %s17781_s20  ;;  %3271 = vrot.lane.b32.xlu0 %v18164_v18, %s17779_s27 }
 0x1ae   : > { %935 = vrot.lane.b32.xlu1 %v18150_v15, %s17779_s27  ;;  %937 = vrot.lane.b32.xlu0 %v18170_v19, %s17779_s27 }
 0x1b2   : > { %3223 = vrot.lane.b32.xlu1 %v18164_v18, %s17780_s29  ;;  %3225 = vrot.lane.b32.xlu0 %v18176_v20, %s17780_s29 }
 0x1b6   : > { %3319 = vrot.lane.b32.xlu1 %v18164_v18, %s17781_s20  ;;  %3321 = vrot.lane.b32.xlu0 %v18176_v20, %s17781_s20 }
 0x1ba   : > { %889 = vrot.lane.b32.xlu1 %v18170_v19, %s17780_s29  ;;  %891 = vrot.lane.b32.xlu0 %v18186_v21, %s17780_s29 }
 0x1be   : > { %985 = vrot.lane.b32.xlu1 %v18170_v19, %s17781_s20  ;;  %987 = vrot.lane.b32.xlu0 %v18186_v21, %s17781_s20 }
 0x1c2   : > { %3273 = vrot.lane.b32.xlu1 %v18176_v20, %s17779_s27  ;;  %3275 = vrot.lane.b32.xlu0 %v18196_v22, %s17779_s27 }
 0x1c6   : > { %939 = vrot.lane.b32.xlu1 %v18186_v21, %s17779_s27  ;;  %941 = vrot.lane.b32.xlu0 %v18202_v23, %s17779_s27 }
 0x1ca   : > { %3227 = vrot.lane.b32.xlu1 %v18196_v22, %s17780_s29  ;;  %3229 = vrot.lane.b32.xlu0 %v18208_v24, %s17780_s29 }
 0x1ce   : > { %3323 = vrot.lane.b32.xlu1 %v18196_v22, %s17781_s20  ;;  %3325 = vrot.lane.b32.xlu0 %v18208_v24, %s17781_s20 }
 0x1d0   : > { %v928_v31 = vpop.permute.xlu1 %927  ;;  %v880_v32 = vpop.permute.xlu0 %879 }
 0x1d1   : > { %v1023_v36 = vcombine.low %v18056_v2, %v928_v31  ;;  %v1024_v37 = vcombine.high %v18056_v2, %v928_v31 }
 0x1d2   : > { %893 = vrot.lane.b32.xlu1 %v18202_v23, %s17780_s29  ;;  %895 = vrot.lane.b32.xlu0 %v18220_v30, %s17780_s29 }
 0x1d3   : > { %v1031_v43 = vrot.slane %v1023_v36, %v18227_v35  ;;  %v1038_v44 = vrot.slane %v1024_v37, %v18227_v35  ;;  %v18294_v37 = vpop.f32.mrf.mxu0 }
 0x1d4   : > { %v18231_v38 = vpop.permute.xlu1 %5601  ;;  %v976_v40 = vpop.permute.xlu0 %975  ;;  %24413 = vst [vmem:[#allocation31_spill] sm:$0xff] %v18294_v37 }
 0x1d5   : > { %v1039_v41 = vcombine.low %v880_v32, %v976_v40  ;;  %v1040_v42 = vcombine.high %v880_v32, %v976_v40 }
 0x1d6   : > { %989 = vrot.lane.b32.xlu1 %v18202_v23, %s17781_s20  ;;  %991 = vrot.lane.b32.xlu0 %v18220_v30, %s17781_s20 }
 0x1d7   : > { %v1047_v45 = vrot.slane %v1039_v41, %v18227_v35  ;;  %v1054_v46 = vrot.slane %v1040_v42, %v18227_v35 }
 0x1d8   : > { %v18246_v49 = vpop.permute.xlu0 %5553  ;;  %v18248_v50 = vpop.permute.xlu1 %3215 }
 0x1d9   : > { %v1055_v51 = vcombine.low %v1031_v43, %v1047_v45  ;;  %v1056_v52 = vcombine.high %v1031_v43, %v1047_v45  ;;  %v1071_v53 = vcombine.low %v1038_v44, %v1054_v46  ;;  %v1072_v54 = vcombine.high %v1038_v44, %v1054_v46 }
 0x1da   : > { %3277 = vrot.lane.b32.xlu1 %v18208_v24, %s17779_s27  ;;  %3279 = vrot.lane.b32.xlu0 %v18241_v47, %s17779_s27 }
 0x1db   : > { %v1063_v56 = vrot.slane %v1055_v51, %v18244_v48  ;;  %v1070_v57 = vrot.slane %v1056_v52, %v18244_v48  ;;  %v1079_v58 = vrot.slane %v1071_v53, %v18244_v48  ;;  %v1086_v59 = vrot.slane %v1072_v54, %v18244_v48 }
 0x1dc   : > { %v5650_v60 = vpop.permute.xlu0 %5649  ;;  %v18260_v61 = vpop.permute.xlu1 %3311 }
 0x1dd   : > { %v2111_v63 = vcombine.low %v1063_v56, %v1070_v57  ;;  %v15644_v1 = vcombine.high %v1063_v56, %v1070_v57  ;;  %v2127_v2 = vcombine.low %v1079_v58, %v1086_v59  ;;  %v15645_v25 = vcombine.high %v1079_v58, %v1086_v59  ;;  %v18334_v59 = vpop.f32.mrf.mxu0 }
 0x1de   : > { %943 = vrot.lane.b32.xlu1 %v18220_v30, %s17779_s27  ;;  %945 = vrot.lane.b32.xlu0 %v18254_v55, %s17779_s27  ;;  %v5779_v53 = vcombine.low %v18246_v49, %v5650_v60  ;;  %v5780_v57 = vcombine.high %v18246_v49, %v5650_v60  ;;  %v3375_v58 = vcombine.low %v18248_v50, %v18260_v61 }
 0x1df   : > { %v18279_v32 = vrot.slane %v2111_v63, %v18227_v35  ;;  %v18282_v33 = vrot.slane %v15644_v1, %v18227_v35  ;;  %v18285_v34 = vrot.slane %v2127_v2, %v18227_v35  ;;  %v18288_v36 = vrot.slane %v15645_v25, %v18227_v35  ;;  %24416 = vst [vmem:[#allocation34_spill] sm:$0xff] %v18334_v59 }
 0x1e0   : > { %v3264_v26 = vpop.permute.xlu0 %3263  ;;  %v18268_v27 = vpop.permute.xlu1 %5599  ;;  %v5763_v63 = vcombine.low %v18062_v3, %v18231_v38  ;;  %v5764_v49 = vcombine.high %v18062_v3, %v18231_v38  ;;  %v3376_v60 = vcombine.high %v18248_v50, %v18260_v61  ;;  %v5794_v0 = vrot.slane %v5780_v57, %v18227_v35 }
 0x1e1   : > { %v2143_v39 = vcombine.low %v18279_v32, %v18282_v33  ;;  %v2159_v40 = vcombine.low %v18285_v34, %v18288_v36  ;;  %v3359_v52 = vcombine.low %v18068_v4, %v3264_v26  ;;  %v3360_v1 = vcombine.high %v18068_v4, %v3264_v26  ;;  %v18361_v38 = vpop.f32.mrf.mxu0 }
 0x1e2   : > { %3231 = vrot.lane.b32.xlu1 %v18241_v47, %s17780_s29  ;;  %3233 = vrot.lane.b32.xlu0 %v18266_v62, %s17780_s29  ;;  %v3383_v3 = vrot.slane %v3375_v58, %v18227_v35  ;;  %24417 = vst [vmem:[#allocation35_spill] sm:$0xff] %v18361_v38  ;;  %v5771_v50 = vrot.slane %v5763_v63, %v18227_v35 }
 0x1e3   : > { %v18305_v43 = vrot.slane %v2143_v39, %v18244_v48  ;;  %v18308_v44 = vrot.slane %v2159_v40, %v18244_v48  ;;  %v3367_v39 = vrot.slane %v3359_v52, %v18227_v35  ;;  %v5787_v40 = vrot.slane %v5779_v53, %v18227_v35 }
 0x1e4   : > { %v18274_v28 = vpop.permute.xlu0 %5551  ;;  %v18276_v31 = vpop.permute.xlu1 %5647  ;;  %v3374_v61 = vrot.slane %v3360_v1, %v18227_v35  ;;  %v5778_v53 = vrot.slane %v5764_v49, %v18227_v35  ;;  %v3390_v2 = vrot.slane %v3376_v60, %v18227_v35  ;;  %v5695_v29 = vcombine.low %v18078_v5, %v18268_v27 }
 0x1e5   : > { %24414 = vst [vmem:[#allocation32_spill] sm:$0xff] %v18305_v43  ;;  %24415 = vst [vmem:[#allocation33_spill] sm:$0xff] %v18308_v44  ;;  %v2175_v51 = vcombine.low %v18305_v43, %v18308_v44  ;;  %v5711_v52 = vcombine.low %v18274_v28, %v18276_v31  ;;  %v3392_v57 = vcombine.high %v3367_v39, %v3383_v3 }
 0x1e6   : > { %3327 = vrot.lane.b32.xlu1 %v18241_v47, %s17781_s20  ;;  %3329 = vrot.lane.b32.xlu0 %v18266_v62, %s17781_s20  ;;  %v5795_v25 = vcombine.low %v5771_v50, %v5787_v40  ;;  %v5796_v58 = vcombine.high %v5771_v50, %v5787_v40  ;;  %v5712_v63 = vcombine.high %v18274_v28, %v18276_v31  ;;  %v18385_v40 = vpop.f32.mrf.mxu0 }
 0x1e7   : > { %16444 = vmatprep.mubr.msk.f32.mxu1 %vm7871_vm0, %v2175_v51  ;;  %v3391_v51 = vcombine.low %v3367_v39, %v3383_v3  ;;  %v5811_v49 = vcombine.low %v5778_v53, %v5794_v0  ;;  %v5696_v60 = vcombine.high %v18078_v5, %v18268_v27  ;;  %24418 = vst [vmem:[#allocation36_spill] sm:$0xff] %v18385_v40 }
 0x1e8   : > { %v18300_v41 = vpop.permute.xlu0 %929  ;;  %v18302_v42 = vpop.permute.xlu1 %881  ;;  %v5812_v3 = vcombine.high %v5778_v53, %v5794_v0  ;;  %v3407_v50 = vcombine.low %v3374_v61, %v3390_v2  ;;  %v5719_v28 = vrot.slane %v5711_v52, %v18227_v35  ;;  %v18397_v47 = vrot.slane %v5795_v25, %v18244_v48 }
 0x1e9   : > { %v3399_v31 = vrot.slane %v3391_v51, %v18244_v48  ;;  %v1091_v5 = vcombine.low %v18088_v6, %v18300_v41  ;;  %v18400_v0 = vrot.slane %v5796_v58, %v18244_v48  ;;  %v5710_v53 = vrot.slane %v5696_v60, %v18227_v35 }
 0x1ea   : > { %897 = vrot.lane.b32.xlu1 %v18254_v55, %s17780_s29  ;;  %899 = vrot.lane.b32.xlu0 %v18294_v37, %s17780_s29  ;;  %24419 = vst [vmem:[#allocation37_spill] sm:$0xff] %v18397_v47  ;;  %v3415_v25 = vrot.slane %v3407_v50, %v18244_v48  ;;  %v18421_v21 = vrot.slane %v5811_v49, %v18244_v48 }
 0x1eb   : > { %24420 = vst [vmem:[#allocation38_spill] sm:$0xff] %v18400_v0  ;;  %v1099_v23 = vrot.slane %v1091_v5, %v18227_v35  ;;  %v18435_v5 = vpop.f32.mrf.mxu0 }
 0x1ec   : > { %v18314_v45 = vpop.permute.xlu0 %5605  ;;  %v18316_v46 = vpop.permute.xlu1 %977  ;;  %24421 = vst [vmem:[#allocation39_spill] sm:$0xff] %v18421_v21  ;;  %24423 = vst [vmem:[#allocation41_spill] sm:$0xff] %v18435_v5 }
 0x1ed   : > { %v1107_v39 = vcombine.low %v18302_v42, %v18316_v46  ;;  %v1108_v27 = vcombine.high %v18302_v42, %v18316_v46  ;;  %v1092_v42 = vcombine.high %v18088_v6, %v18300_v41  ;;  %v18424_v6 = vrot.slane %v5812_v3, %v18244_v48 }
 0x1ee   : > { %993 = vrot.lane.b32.xlu1 %v18254_v55, %s17781_s20  ;;  %995 = vrot.lane.b32.xlu0 %v18294_v37, %s17781_s20  ;;  %v3406_v55 = vrot.slane %v3392_v57, %v18244_v48 }
 0x1ef   : > { %v1115_v46 = vrot.slane %v1107_v39, %v18227_v35  ;;  %v1122_v60 = vrot.slane %v1108_v27, %v18227_v35  ;;  %24422 = vst [vmem:[#allocation40_spill] sm:$0xff] %v18424_v6 }
 0x1f0   : > { %v18327_v54 = vpop.permute.xlu1 %5557  ;;  %v18329_v56 = vpop.permute.xlu0 %3217  ;;  %v15676_v30 = vcombine.high %v3399_v31, %v3406_v55 }
 0x1f1   : > { %v1124_v49 = vcombine.high %v1099_v23, %v1115_v46 }
 0x1f2   : > { %3281 = vrot.lane.b32.xlu1 %v18266_v62, %s17779_s27  ;;  %3283 = vrot.lane.b32.xlu0 %v18334_v59, %s17779_s27  ;;  %v3408_v62 = vcombine.high %v3374_v61, %v3390_v2  ;;  %v5703_v2 = vrot.slane %v5695_v29, %v18227_v35  ;;  %v5726_v61 = vrot.slane %v5712_v63, %v18227_v35 }
 0x1f3   : > { %v4447_v63 = vcombine.low %v3399_v31, %v3406_v55  ;;  %v1123_v31 = vcombine.low %v1099_v23, %v1115_v46  ;;  %v18451_v23 = vrot.slane %v15676_v30, %v18227_v35 }
 0x1f4   : > { %v18353_v4 = vpop.permute.xlu1 %5653  ;;  %v18355_v26 = vpop.permute.xlu0 %3313  ;;  %v3422_v29 = vrot.slane %v3408_v62, %v18244_v48  ;;  %v5727_v57 = vcombine.low %v5703_v2, %v5719_v28  ;;  %v5728_v58 = vcombine.high %v5703_v2, %v5719_v28  ;;  %v5743_v41 = vcombine.low %v5710_v53, %v5726_v61 }
 0x1f5   : > { %v5744_v50 = vcombine.high %v5710_v53, %v5726_v61  ;;  %v1106_v28 = vrot.slane %v1092_v42, %v18227_v35  ;;  %v5899_v62 = vcombine.low %v18094_v7, %v18314_v45  ;;  %v18448_v42 = vrot.slane %v4447_v63, %v18227_v35  ;;  %24427 = vst [vmem:[#allocation45_spill] sm:$0xff] %v18451_v23 }
 0x1f6   : > { %947 = vrot.lane.b32.xlu1 %v18294_v37, %s17779_s27  ;;  %949 = vrot.lane.b32.xlu0 %v18361_v38, %s17779_s27  ;;  %v4463_v3 = vcombine.low %v3415_v25, %v3422_v29  ;;  %v18438_v27 = vrot.slane %v5727_v57, %v18244_v48  ;;  %v18441_v2 = vrot.slane %v5728_v58, %v18244_v48 }
 0x1f7   : > { %v1139_v61 = vcombine.low %v1106_v28, %v1122_v60  ;;  %v1140_v53 = vcombine.high %v1106_v28, %v1122_v60  ;;  %24426 = vst [vmem:[#allocation44_spill] sm:$0xff] %v18448_v42  ;;  %v18466_v30 = vrot.slane %v5743_v41, %v18244_v48  ;;  %v18469_v28 = vrot.slane %v5744_v50, %v18244_v48 }
 0x1f8   : > { %v18377_v1 = vpop.permute.xlu1 %3265  ;;  %v18379_v37 = vpop.permute.xlu0 %5555  ;;  %24424 = vst [vmem:[#allocation42_spill] sm:$0xff] %v18438_v27  ;;  %24425 = vst [vmem:[#allocation43_spill] sm:$0xff] %v18441_v2  ;;  %v1131_v46 = vrot.slane %v1123_v31, %v18244_v48  ;;  %v1138_v57 = vrot.slane %v1124_v49, %v18244_v48  ;;  %v18478_v58 = vrot.slane %v5899_v62, %v18227_v35 }
 0x1f9   : > { %24428 = vst [vmem:[#allocation46_spill] sm:$0xff] %v18466_v30  ;;  %24429 = vst [vmem:[#allocation47_spill] sm:$0xff] %v18469_v28  ;;  %v18483_v41 = vrot.slane %v4463_v3, %v18227_v35  ;;  %v1147_v50 = vrot.slane %v1139_v61, %v18244_v48  ;;  %v1154_v31 = vrot.slane %v1140_v53, %v18244_v48 }
 0x1fa   : > { %3235 = vrot.lane.b32.xlu1 %v18334_v59, %s17780_s29  ;;  %3237 = vrot.lane.b32.xlu0 %v18385_v40, %s17780_s29  ;;  %v5915_v49 = vcombine.low %v18327_v54, %v18353_v4  ;;  %v3444_v62 = vcombine.high %v18329_v56, %v18355_v26  ;;  %v3427_v21 = vcombine.low %v18100_v8, %v18377_v1 }
 0x1fb   : > { %v3428_v47 = vcombine.high %v18100_v8, %v18377_v1  ;;  %v15647_v6 = vcombine.high %v1147_v50, %v1154_v31 }
 0x1fc   : > { %v18406_v51 = vpop.permute.xlu1 %5603  ;;  %v18408_v52 = vpop.permute.xlu0 %883  ;;  %v5923_v2 = vrot.slane %v5915_v49, %v18227_v35 }
 0x1fe   : > { %3331 = vrot.lane.b32.xlu1 %v18334_v59, %s17781_s20  ;;  %3333 = vrot.lane.b32.xlu0 %v18385_v40, %s17781_s20  ;;  %v15677_v59 = vcombine.high %v3415_v25, %v3422_v29  ;;  %v5900_v29 = vcombine.high %v18094_v7, %v18314_v45  ;;  %v4479_v25 = vcombine.low %v18448_v42, %v18451_v23 }
 0x1ff   : > { %v5916_v7 = vcombine.high %v18327_v54, %v18353_v4  ;;  %v3443_v45 = vcombine.low %v18329_v56, %v18355_v26  ;;  %v2179_v4 = vcombine.low %v1131_v46, %v1138_v57  ;;  %v18510_v56 = vpop.f32.mrf.mxu0  ;;  %v2195_v54 = vcombine.low %v1147_v50, %v1154_v31 }
 0x200   : > { %v18430_v39 = vpop.permute.xlu1 %5651  ;;  %v18432_v55 = vpop.permute.xlu0 %979  ;;  %v18502_v53 = vrot.slane %v15677_v59, %v18227_v35  ;;  %24430 = vst [vmem:[#allocation48_spill] sm:$0xff] %v18510_v56  ;;  %v18515_v0 = vrot.slane %v5900_v29, %v18227_v35  ;;  %v15646_v59 = vcombine.high %v1131_v46, %v1138_v57  ;;  %v18523_v27 = vrot.slane %v4479_v25, %v18244_v48 }
 0x201   : > { %v3451_v26 = vrot.slane %v3443_v45, %v18227_v35  ;;  %v3458_v29 = vrot.slane %v3444_v62, %v18227_v35  ;;  %v2186_v57 = vrot.slane %v2179_v4, %v18227_v35  ;;  %v3435_v25 = vrot.slane %v3427_v21, %v18227_v35  ;;  %v18540_v49 = vpop.f32.mrf.mxu0 }
 0x202   : > { %901 = vrot.lane.b32.xlu1 %v18361_v38, %s17780_s29  ;;  %903 = vrot.lane.b32.xlu0 %v18435_v5, %s17780_s29  ;;  %24431 = vst [vmem:[#allocation49_spill] sm:$0xff] %v18540_v49  ;;  %v3442_v45 = vrot.slane %v3428_v47, %v18227_v35  ;;  %v2202_v4 = vrot.slane %v2195_v54, %v18227_v35 }
 0x203   : > { %v2210_v21 = vrot.slane %v15647_v6, %v18227_v35  ;;  %v5931_v46 = vcombine.low %v18478_v58, %v5923_v2  ;;  %v5932_v30 = vcombine.high %v18478_v58, %v5923_v2  ;;  %v3459_v6 = vcombine.low %v3435_v25, %v3451_v26  ;;  %v18562_v58 = vpop.f32.mrf.mxu0 }
 0x204   : > { %v18461_v60 = vpop.permute.xlu1 %931  ;;  %v18463_v63 = vpop.permute.xlu0 %3267  ;;  %24432 = vst [vmem:[#allocation50_spill] sm:$0xff] %v18562_v58 }
 0x205   : > { %v3495_v50 = vcombine.low %v18126_v11, %v18463_v63  ;;  %v3496_v31 = vcombine.high %v18126_v11, %v18463_v63  ;;  %v2227_v43 = vcombine.low %v2202_v4, %v2210_v21  ;;  %v2228_v24 = vcombine.high %v2202_v4, %v2210_v21 }
 0x206   : > { %997 = vrot.lane.b32.xlu1 %v18361_v38, %s17781_s20  ;;  %999 = vrot.lane.b32.xlu0 %v18435_v5, %s17781_s20  ;;  %v5930_v38 = vrot.slane %v5916_v7, %v18227_v35  ;;  %v2194_v7 = vrot.slane %v15646_v59, %v18227_v35 }
 0x207   : > { %v3510_v2 = vrot.slane %v3496_v31, %v18227_v35 }
 0x208   : > { %v3220_v3 = vpop.permute.xlu1 %3219  ;;  %v18499_v61 = vpop.permute.xlu0 %933  ;;  %v5947_v11 = vcombine.low %v18515_v0, %v5930_v38  ;;  %v5948_v63 = vcombine.high %v18515_v0, %v5930_v38  ;;  %v2211_v38 = vcombine.low %v2186_v57, %v2194_v7  ;;  %v2212_v0 = vcombine.high %v2186_v57, %v2194_v7 }
 0x20a   : > { %3285 = vrot.lane.b32.xlu1 %v18385_v40, %s17779_s27  ;;  %3287 = vrot.lane.b32.xlu0 %v18510_v56, %s17779_s27  ;;  %v3476_v40 = vcombine.high %v3442_v45, %v3458_v29  ;;  %v18590_v7 = vrot.slane %v2211_v38, %v18244_v48  ;;  %v18622_v38 = vpop.f32.mrf.mxu0 }
 0x20b   : > { %24442 = vst [vmem:[#allocation59_spill] sm:$0xff] %v18622_v38 }
 0x20c   : > { %v3316_v8 = vpop.permute.xlu1 %3315  ;;  %v18530_v1 = vpop.permute.xlu0 %3221  ;;  %v3490_v21 = vrot.slane %v3476_v40, %v18244_v48 }
 0x20d   : > { %v3511_v62 = vcombine.low %v3220_v3, %v3316_v8  ;;  %v3512_v28 = vcombine.high %v3220_v3, %v3316_v8  ;;  %v3460_v8 = vcombine.high %v3435_v25, %v3451_v26  ;;  %v18567_v26 = vrot.slane %v5931_v46, %v18244_v48 }
 0x20e   : > { %951 = vrot.lane.b32.xlu1 %v18435_v5, %s17779_s27  ;;  %953 = vrot.lane.b32.xlu0 %v18540_v49, %s17779_s27  ;;  %v3503_v5 = vrot.slane %v3495_v50, %v18227_v35  ;;  %v18570_v25 = vrot.slane %v5932_v30, %v18244_v48  ;;  %v18579_v50 = vrot.slane %v5947_v11, %v18244_v48 }
 0x20f   : > { %v3519_v59 = vrot.slane %v3511_v62, %v18227_v35  ;;  %v3526_v47 = vrot.slane %v3512_v28, %v18227_v35  ;;  %v3475_v62 = vcombine.low %v3442_v45, %v3458_v29  ;;  %24433 = vst [vmem:[#allocation51_spill] sm:$0xff] %v18567_v26  ;;  %v3474_v31 = vrot.slane %v3460_v8, %v18244_v48 }
 0x210   : > { %v18556_v3 = vpop.permute.xlu1 %885  ;;  %v18558_v54 = vpop.permute.xlu0 %3269  ;;  %24434 = vst [vmem:[#allocation52_spill] sm:$0xff] %v18570_v25  ;;  %24435 = vst [vmem:[#allocation53_spill] sm:$0xff] %v18579_v50  ;;  %v24436_v46 = vcombine.high %v18279_v32, %v18282_v33  ;;  %v18593_v45 = vrot.slane %v5948_v63, %v18244_v48  ;;  %v18607_v63 = vrot.slane %v2227_v43, %v18244_v48 }
 0x211   : > { %v3527_v28 = vcombine.low %v3503_v5, %v3519_v59  ;;  %v3528_v42 = vcombine.high %v3503_v5, %v3519_v59  ;;  %v3543_v23 = vcombine.low %v3510_v2, %v3526_v47  ;;  %v3544_v44 = vcombine.high %v3510_v2, %v3526_v47 }
 0x212   : > { %3239 = vrot.lane.b32.xlu1 %v18510_v56, %s17780_s29  ;;  %3241 = vrot.lane.b32.xlu0 %v18562_v58, %s17780_s29  ;;  %v3467_v5 = vrot.slane %v3459_v6, %v18244_v48  ;;  %v18587_v30 = vrot.slane %v24436_v46, %v18244_v48  ;;  %24438 = vst [vmem:[#allocation55_spill] sm:$0xff] %v18593_v45  ;;  %v18885_v45 = vpop.f32.mrf.mxu1 }
 0x213   : > { %v3483_v4 = vrot.slane %v3475_v62, %v18244_v48  ;;  %v3535_v11 = vrot.slane %v3527_v28, %v18244_v48  ;;  %v3542_v59 = vrot.slane %v3528_v42, %v18244_v48  ;;  %v3551_v32 = vrot.slane %v3543_v23, %v18244_v48  ;;  %24472 = vst [vmem:[#allocation82_spill] sm:$0xff] %v18885_v45 }
 0x214   : > { %v18574_v57 = vpop.permute.xlu1 %981  ;;  %v18576_v29 = vpop.permute.xlu0 %887  ;;  %24437 = vst [vmem:[#allocation54_spill] sm:$0xff] %v18587_v30  ;;  %v3558_v33 = vrot.slane %v3544_v44, %v18244_v48  ;;  %v18604_v47 = vrot.slane %v2212_v0, %v18244_v48  ;;  %v18610_v6 = vrot.slane %v2228_v24, %v18244_v48  ;;  %v4515_v8 = vcombine.low %v3467_v5, %v3474_v31 }
 0x215   : > { %v15678_v44 = vcombine.high %v3467_v5, %v3474_v31  ;;  %v4531_v24 = vcombine.low %v3483_v4, %v3490_v21  ;;  %v15679_v0 = vcombine.high %v3483_v4, %v3490_v21  ;;  %v4583_v5 = vcombine.low %v3535_v11, %v3542_v59 }
 0x216   : > { %3335 = vrot.lane.b32.xlu1 %v18510_v56, %s17781_s20  ;;  %24439 = vst [vmem:[#allocation56_spill] sm:$0xff] %v18604_v47  ;;  %24440 = vst [vmem:[#allocation57_spill] sm:$0xff] %v18610_v6  ;;  %3337 = vrot.lane.b32.xlu0 %v18562_v58, %s17781_s20  ;;  %v15680_v31 = vcombine.high %v3535_v11, %v3542_v59  ;;  %v4599_v46 = vcombine.low %v3551_v32, %v3558_v33 }
 0x217   : > { %v15681_v40 = vcombine.high %v3551_v32, %v3558_v33  ;;  %v3563_v4 = vcombine.low %v18138_v13, %v18558_v54  ;;  %v3564_v21 = vcombine.high %v18138_v13, %v18558_v54  ;;  %v18643_v32 = vrot.slane %v4515_v8, %v18227_v35 }
 0x218   : > { %v18616_v42 = vpop.permute.xlu1 %5565  ;;  %v984_v23 = vpop.permute.xlu0 %983  ;;  %v18646_v33 = vrot.slane %v15678_v44, %v18227_v35  ;;  %v18655_v13 = vrot.slane %v4531_v24, %v18227_v35  ;;  %v18658_v54 = vrot.slane %v15679_v0, %v18227_v35  ;;  %v18667_v8 = vrot.slane %v4599_v46, %v18227_v35 }
 0x219   : > { %24441 = vst [vmem:[#allocation58_spill] sm:$0xff] %v18616_v42  ;;  %v1311_v11 = vcombine.low %v18576_v29, %v984_v23  ;;  %v1312_v59 = vcombine.high %v18576_v29, %v984_v23  ;;  %24443 = vst [vmem:[#allocation60_spill] sm:$0xff] %v18643_v32  ;;  %v18661_v29 = vrot.slane %v4583_v5, %v18227_v35 }
 0x21a   : > { %905 = vrot.lane.b32.xlu1 %v18540_v49, %s17780_s29  ;;  %907 = vrot.lane.b32.xlu0 %v18622_v38, %s17780_s29  ;;  %24444 = vst [vmem:[#allocation61_spill] sm:$0xff] %v18646_v33  ;;  %24445 = vst [vmem:[#allocation62_spill] sm:$0xff] %v18655_v13  ;;  %v18664_v23 = vrot.slane %v15680_v31, %v18227_v35  ;;  %v3571_v44 = vrot.slane %v3563_v4, %v18227_v35 }
 0x21b   : > { %24446 = vst [vmem:[#allocation63_spill] sm:$0xff] %v18658_v54  ;;  %24447 = vst [vmem:[#allocation64_spill] sm:$0xff] %v18661_v29  ;;  %v3578_v24 = vrot.slane %v3564_v21, %v18227_v35  ;;  %v1319_v31 = vrot.slane %v1311_v11, %v18227_v35  ;;  %v1326_v46 = vrot.slane %v1312_v59, %v18227_v35 }
 0x21c   : > { %v3318_v28 = vpop.permute.xlu1 %3317  ;;  %v18650_v43 = vpop.permute.xlu0 %3271  ;;  %24448 = vst [vmem:[#allocation65_spill] sm:$0xff] %v18664_v23  ;;  %24449 = vst [vmem:[#allocation66_spill] sm:$0xff] %v18667_v8  ;;  %v4615_v11 = vcombine.low %v18661_v29, %v18664_v23 }
 0x21d   : > { %v3579_v62 = vcombine.low %v18530_v1, %v3318_v28  ;;  %v3580_v2 = vcombine.high %v18530_v1, %v3318_v28  ;;  %v18670_v1 = vrot.slane %v15681_v40, %v18227_v35 }
 0x21e   : > { %1001 = vrot.lane.b32.xlu1 %v18540_v49, %s17781_s20  ;;  %1003 = vrot.lane.b32.xlu0 %v18622_v38, %s17781_s20  ;;  %v18682_v49 = vpop.f32.mrf.mxu0 }
 0x21f   : > { %24450 = vst [vmem:[#allocation67_spill] sm:$0xff] %v18670_v1  ;;  %v3587_v28 = vrot.slane %v3579_v62, %v18227_v35  ;;  %v3594_v0 = vrot.slane %v3580_v2, %v18227_v35  ;;  %24451 = vst [vmem:[#allocation68_spill] sm:$0xff] %v18682_v49  ;;  %v4631_v59 = vcombine.low %v18667_v8, %v18670_v1 }
 0x220   : > { %v936_v5 = vpop.permute.xlu1 %935  ;;  %v18702_v30 = vpop.f32.mrf.mxu0 }
 0x221   : > { %v1295_v42 = vcombine.low %v18150_v15, %v936_v5  ;;  %v1296_v40 = vcombine.high %v18150_v15, %v936_v5  ;;  %v3595_v4 = vcombine.low %v3571_v44, %v3587_v28  ;;  %v3596_v21 = vcombine.high %v3571_v44, %v3587_v28  ;;  %v18696_v28 = vpop.permute.xlu0 %937  ;;  %24452 = vst [vmem:[#allocation69_spill] sm:$0xff] %v18702_v30 }
 0x222   : > { %v3611_v56 = vcombine.low %v3578_v24, %v3594_v0  ;;  %v3612_v62 = vcombine.high %v3578_v24, %v3594_v0  ;;  %3289 = vrot.lane.b32.xlu1 %v18562_v58, %s17779_s27  ;;  %3291 = vrot.lane.b32.xlu0 %v18682_v49, %s17779_s27 }
 0x223   : > { %v1303_v2 = vrot.slane %v1295_v42, %v18227_v35  ;;  %v1310_v47 = vrot.slane %v1296_v40, %v18227_v35  ;;  %v3603_v15 = vrot.slane %v3595_v4, %v18244_v48  ;;  %v3610_v5 = vrot.slane %v3596_v21, %v18244_v48 }
 0x224   : > { %v3619_v44 = vrot.slane %v3611_v56, %v18244_v48  ;;  %v3626_v24 = vrot.slane %v3612_v62, %v18244_v48  ;;  %v18700_v42 = vpop.permute.xlu1 %3223 }
 0x225   : > { %v1327_v0 = vcombine.low %v1303_v2, %v1319_v31  ;;  %v1328_v40 = vcombine.high %v1303_v2, %v1319_v31  ;;  %v1343_v58 = vcombine.low %v1310_v47, %v1326_v46  ;;  %v1344_v6 = vcombine.high %v1310_v47, %v1326_v46 }
 0x226   : > { %v4651_v4 = vcombine.low %v3603_v15, %v3610_v5  ;;  %v15682_v8 = vcombine.high %v3603_v15, %v3610_v5  ;;  %v4667_v21 = vcombine.low %v3619_v44, %v3626_v24  ;;  %v15683_v1 = vcombine.high %v3619_v44, %v3626_v24  ;;  %955 = vrot.lane.b32.xlu1 %v18622_v38, %s17779_s27  ;;  %v18726_v24 = vpop.f32.mrf.mxu0 }
 0x227   : > { %v1335_v56 = vrot.slane %v1327_v0, %v18244_v48  ;;  %v1342_v62 = vrot.slane %v1328_v40, %v18244_v48  ;;  %v1351_v29 = vrot.slane %v1343_v58, %v18244_v48  ;;  %v1358_v23 = vrot.slane %v1344_v6, %v18244_v48  ;;  %957 = vrot.lane.b32.xlu0 %v18702_v30, %s17779_s27 }
 0x228   : > { %v18712_v47 = vpop.permute.xlu1 %3319  ;;  %v18715_v31 = vrot.slane %v4651_v4, %v18227_v35  ;;  %v18718_v46 = vrot.slane %v15682_v8, %v18227_v35  ;;  %v18721_v2 = vrot.slane %v4667_v21, %v18227_v35  ;;  %v18724_v15 = vrot.slane %v15683_v1, %v18227_v35  ;;  %24454 = vst [vmem:[#allocation71_spill] sm:$0xff] %v18726_v24 }
 0x229   : > { %v2383_v58 = vcombine.low %v1335_v56, %v1342_v62  ;;  %v15652_v5 = vcombine.high %v1335_v56, %v1342_v62  ;;  %v2399_v6 = vcombine.low %v1351_v29, %v1358_v23  ;;  %v15653_v44 = vcombine.high %v1351_v29, %v1358_v23  ;;  %v18740_v56 = vpop.permute.xlu0 %3225 }
 0x22a   : > { %24453 = vst [vmem:[#allocation70_spill] sm:$0xff] %v18721_v2  ;;  %v1176_v0 = vcombine.high %v18408_v52, %v18432_v55  ;;  %v24455_v8 = vcombine.low %v18408_v52, %v18432_v55  ;;  %v1160_v4 = vcombine.high %v18116_v10, %v18461_v60  ;;  %v24456_v1 = vcombine.low %v18116_v10, %v18461_v60 }
 0x22b   : > { %3243 = vrot.lane.b32.xlu1 %v18682_v49, %s17780_s29  ;;  %v4683_v29 = vcombine.low %v18715_v31, %v18718_v46  ;;  %v4699_v52 = vcombine.low %v18721_v2, %v18724_v15  ;;  %v4547_v55 = vcombine.low %v18643_v32, %v18646_v33  ;;  %v4563_v23 = vcombine.low %v18655_v13, %v18658_v54 }
 0x22c   : > { %v1183_v40 = vrot.slane %v24455_v8, %v18227_v35  ;;  %v1167_v21 = vrot.slane %v24456_v1, %v18227_v35  ;;  %3245 = vrot.lane.b32.xlu0 %v18726_v24, %s17780_s29  ;;  %v18754_v10 = vpop.permute.xlu1 %889  ;;  %v18757_v60 = vrot.slane %v4615_v11, %v18244_v48  ;;  %v18760_v62 = vrot.slane %v4631_v59, %v18244_v48 }
 0x22d   : > { %v18763_v8 = vrot.slane %v2383_v58, %v18227_v35  ;;  %v18766_v1 = vrot.slane %v15652_v5, %v18227_v35  ;;  %v18769_v38 = vrot.slane %v4683_v29, %v18244_v48  ;;  %v18772_v13 = vrot.slane %v4699_v52, %v18244_v48  ;;  %v18804_v2 = vpop.permute.xlu0 %3321 }
 0x22e   : > { %v18775_v54 = vrot.slane %v2399_v6, %v18227_v35  ;;  %v18778_v11 = vrot.slane %v15653_v44, %v18227_v35  ;;  %v24461_v58 = vcombine.low %v18110_v9, %v18406_v51  ;;  %v24462_v29 = vcombine.low %v18379_v37, %v18430_v39 }
 0x22f   : > { %24457 = vst [vmem:[#allocation72_spill] sm:$0xff] %v18763_v8  ;;  %24458 = vst [vmem:[#allocation73_spill] sm:$0xff] %v18766_v1  ;;  %v24463_v6 = vcombine.high %v18379_v37, %v18430_v39  ;;  %3339 = vrot.lane.b32.xlu1 %v18682_v49, %s17781_s20  ;;  %v24464_v44 = vcombine.high %v18110_v9, %v18406_v51  ;;  %v1174_v25 = vrot.slane %v1160_v4, %v18227_v35 }
 0x230   : > { %24459 = vst [vmem:[#allocation74_spill] sm:$0xff] %v18775_v54  ;;  %24460 = vst [vmem:[#allocation75_spill] sm:$0xff] %v18778_v11  ;;  %v5839_v5 = vrot.slane %v24461_v58, %v18227_v35  ;;  %v5855_v52 = vrot.slane %v24462_v29, %v18227_v35  ;;  %v1190_v58 = vrot.slane %v1176_v0, %v18227_v35  ;;  %3341 = vrot.lane.b32.xlu0 %v18726_v24, %s17781_s20  ;;  %v18808_v37 = vpop.permute.xlu1 %985 }
 0x231   : > { %v5862_v32 = vrot.slane %v24463_v6, %v18227_v35  ;;  %v5846_v59 = vrot.slane %v24464_v44, %v18227_v35  ;;  %v4715_v29 = vcombine.low %v18769_v38, %v18772_v13  ;;  %v1191_v26 = vcombine.low %v1167_v21, %v1183_v40 }
 0x232   : > { %v1192_v33 = vcombine.high %v1167_v21, %v1183_v40  ;;  %v2415_v9 = vcombine.low %v18763_v8, %v18766_v1  ;;  %v2431_v51 = vcombine.low %v18775_v54, %v18778_v11  ;;  %v1243_v39 = vcombine.low %v18556_v3, %v18574_v57 }
 0x233   : > { %16436 = vmatprep.subr.msk.mxu1 %vm7871_vm0, %v4715_v29  ;;  %v4647_v0 = vcombine.low %v18757_v60, %v18760_v62  ;;  %v18820_v40 = vrot.slane %v4547_v55, %v18244_v48  ;;  %v18823_v4 = vrot.slane %v4563_v23, %v18244_v48  ;;  %v5863_v21 = vcombine.low %v5839_v5, %v5855_v52 }
 0x234   : > { %v5864_v6 = vcombine.high %v5839_v5, %v5855_v52  ;;  %v5879_v44 = vcombine.low %v5846_v59, %v5862_v32  ;;  %v5880_v49 = vcombine.high %v5846_v59, %v5862_v32  ;;  %16437 = vmatpush3.xpose.msk.msra.mxu1 %vm7871_vm0, %v4715_v29  ;;  %v1207_v54 = vcombine.low %v1174_v25, %v1190_v58  ;;  %v18843_v5 = vpop.permute.xlu1 %3273 }
 0x235   : > { %v1227_v11 = vcombine.low %v18132_v12, %v18499_v61  ;;  %v1228_v8 = vcombine.high %v18132_v12, %v18499_v61  ;;  %v1244_v55 = vcombine.high %v18556_v3, %v18574_v57  ;;  %16438 = vmatprep.subr.msk.mxu1 %vm7871_vm0, %v4647_v0  ;;  %v1208_v23 = vcombine.high %v1174_v25, %v1190_v58  ;;  %v18854_v58 = vpop.permute.xlu0 %891 }
 0x236   : > { %909 = vrot.lane.b32.xlu1 %v18702_v30, %s17780_s29  ;;  %5613 = vrot.lane.b32.xlu0 %v18158_v17, %s17779_s27  ;;  %v18838_v32 = vrot.slane %v2415_v9, %v18244_v48  ;;  %v18841_v59 = vrot.slane %v2431_v51, %v18244_v48  ;;  %v1199_v12 = vrot.slane %v1191_v26, %v18244_v48 }
 0x237   : > { %v1206_v61 = vrot.slane %v1192_v33, %v18244_v48  ;;  %v1251_v3 = vrot.slane %v1243_v39, %v18227_v35  ;;  %v4579_v25 = vcombine.low %v18820_v40, %v18823_v4  ;;  %v24467_v26 = vcombine.low %v18483_v41, %v18502_v53 }
 0x238   : > { %24465 = vst [vmem:[#allocation76_spill] sm:$0xff] %v18838_v32  ;;  %24466 = vst [vmem:[#allocation77_spill] sm:$0xff] %v18841_v59  ;;  %v2447_v29 = vcombine.low %v18838_v32, %v18841_v59  ;;  %16439 = vmatpush3.xpose.msk.msra.mxu1 %vm7871_vm0, %v4647_v0  ;;  %v18866_v9 = vrot.slane %v5863_v21, %v18244_v48  ;;  %v18869_v51 = vrot.slane %v5864_v6, %v18244_v48  ;;  %v18883_v6 = vpop.permute.xlu1 %939 }
 0x239   : > { %v18863_v33 = vrot.slane %v24467_v26, %v18244_v48  ;;  %v1235_v39 = vrot.slane %v1227_v11, %v18227_v35  ;;  %v1258_v52 = vrot.slane %v1244_v55, %v18227_v35  ;;  %16440 = vmatprep.subr.msk.mxu1 %vm7871_vm0, %v4579_v25  ;;  %v18875_v0 = vrot.slane %v5879_v44, %v18244_v48  ;;  %v18911_v59 = vpop.permute.xlu0 %987 }
 0x23a   : > { %24468 = vst [vmem:[#allocation78_spill] sm:$0xff] %v18866_v9  ;;  %24469 = vst [vmem:[#allocation79_spill] sm:$0xff] %v18869_v51  ;;  %v18878_v57 = vrot.slane %v5880_v49, %v18244_v48  ;;  %v1215_v26 = vrot.slane %v1207_v54, %v18244_v48  ;;  %v1222_v21 = vrot.slane %v1208_v23, %v18244_v48  ;;  %16500 = vmatprep.mubr.msk.f32.mxu0 %vm7871_vm0, %v2447_v29 }
 0x23b   : > { %24470 = vst [vmem:[#allocation80_spill] sm:$0xff] %v18875_v0  ;;  %v2247_v11 = vcombine.low %v1199_v12, %v1206_v61  ;;  %v15648_v55 = vcombine.high %v1199_v12, %v1206_v61  ;;  %v1242_v50 = vrot.slane %v1228_v8, %v18227_v35  ;;  %v1259_v1 = vcombine.low %v1235_v39, %v1251_v3  ;;  %v24476_v0 = vld [vmem:[#allocation33_spill] sm:$0xff] }
 0x23c   : > { %24471 = vst [vmem:[#allocation81_spill] sm:$0xff] %v18878_v57  ;;  %1005 = vrot.lane.b32.xlu1 %v18702_v30, %s17781_s20  ;;  %v1260_v49 = vcombine.high %v1235_v39, %v1251_v3  ;;  %5563 = vrot.lane.b32.xlu0 %v18885_v45, %s17780_s29  ;;  %v4511_v54 = vcombine.low %v18523_v27, %v18863_v33  ;;  %v18914_v12 = vpop.permute.xlu1 %3227 }
 0x23d   : > { %v2243_v44 = vcombine.low %v18590_v7, %v18607_v63  ;;  %v1275_v61 = vcombine.low %v1242_v50, %v1258_v52  ;;  %16441 = vmatpush3.xpose.msk.msra.mxu1 %vm7871_vm0, %v4579_v25  ;;  %v24473_v3 = vcombine.high %v18285_v34, %v18288_v36  ;;  %v2263_v30 = vcombine.low %v1215_v26, %v1222_v21 }
 0x23e   : > { %v15649_v23 = vcombine.high %v1215_v26, %v1222_v21  ;;  %v1276_v32 = vcombine.high %v1242_v50, %v1258_v52  ;;  %16442 = vmatprep.subr.msk.mxu1 %vm7871_vm0, %v4511_v54  ;;  %v18917_v25 = vrot.slane %v1259_v1, %v18244_v48  ;;  %v3647_v34 = vcombine.low %v18700_v42, %v18712_v47 }
 0x23f   : > { %v18907_v29 = vrot.slane %v24473_v3, %v18244_v48  ;;  %v18924_v36 = vrot.slane %v2247_v11, %v18227_v35  ;;  %v18927_v50 = vrot.slane %v15648_v55, %v18227_v35  ;;  %v18930_v52 = vrot.slane %v1260_v49, %v18244_v48 }
 0x240   : > { %3293 = vrot.lane.b32.xlu1 %v18726_v24, %s17779_s27  ;;  %v3648_v26 = vcombine.high %v18700_v42, %v18712_v47  ;;  %v1379_v1 = vcombine.low %v18754_v10, %v18808_v37  ;;  %5561 = vrot.lane.b32.xlu0 %v18144_v14, %s17780_s29  ;;  %v4716_v21 = vcombine.high %v18769_v38, %v18772_v13  ;;  %v18960_v3 = vpop.permute.xlu1 %3323 }
 0x241   : > { %v18943_v55 = vrot.slane %v1275_v61, %v18244_v48  ;;  %v3631_v49 = vcombine.low %v18164_v18, %v18650_v43  ;;  %v1380_v42 = vcombine.high %v18754_v10, %v18808_v37  ;;  %16443 = vmatpush3.xpose.msk.msra.mxu1 %vm7871_vm0, %v4511_v54  ;;  %v18951_v47 = vrot.slane %v1276_v32, %v18244_v48  ;;  %v18977_v54 = vpop.permute.xlu0 %3275 }
 0x242   : > { %v3632_v38 = vcombine.high %v18164_v18, %v18650_v43  ;;  %v1363_v13 = vcombine.low %v18170_v19, %v18696_v28  ;;  %v1364_v61 = vcombine.high %v18170_v19, %v18696_v28  ;;  %16450 = vmatprep.subr.msk.mxu1 %vm7871_vm0, %v4716_v21  ;;  %v3655_v10 = vrot.slane %v3647_v34, %v18227_v35 }
 0x243   : > { %v18966_v37 = vrot.slane %v2263_v30, %v18227_v35  ;;  %v18969_v18 = vrot.slane %v15649_v23, %v18227_v35  ;;  %v2279_v43 = vcombine.low %v18924_v36, %v18927_v50  ;;  %v2315_v19 = vcombine.low %v18917_v25, %v18930_v52 }
 0x244   : > { %5661 = vrot.lane.b32.xlu1 %v18158_v17, %s17781_s20  ;;  %v3662_v28 = vrot.slane %v3648_v26, %v18227_v35  ;;  %v1387_v32 = vrot.slane %v1379_v1, %v18227_v35  ;;  %5657 = vrot.lane.b32.xlu0 %v18144_v14, %s17781_s20  ;;  %v3639_v30 = vrot.slane %v3631_v49, %v18227_v35  ;;  %v18996_v49 = vpop.permute.xlu1 %893 }
 0x245   : > { %16445 = vmatmul.mubr.msk.f32.vlgmr.msra.gmra.mxu1 %vm7871_vm0, %v2243_v44  ;;  %v1394_v23 = vrot.slane %v1380_v42, %v18227_v35  ;;  %v18985_v34 = vrot.slane %v2279_v43, %v18244_v48  ;;  %v2295_v11 = vcombine.low %v18966_v37, %v18969_v18  ;;  %v3646_v26 = vrot.slane %v3632_v38, %v18227_v35 }
 0x246   : > { %16451 = vmatpush3.xpose.msk.msra.mxu1 %vm7871_vm0, %v4716_v21  ;;  %v1371_v1 = vrot.slane %v1363_v13, %v18227_v35  ;;  %v3715_v39 = vcombine.low %v18740_v56, %v18804_v2  ;;  %v3716_v44 = vcombine.high %v18740_v56, %v18804_v2  ;;  %v1378_v42 = vrot.slane %v1364_v61, %v18227_v35 }
 0x247   : > { %v3663_v43 = vcombine.low %v3639_v30, %v3655_v10  ;;  %v3664_v8 = vcombine.high %v3639_v30, %v3655_v10  ;;  %v19000_v17 = vrot.slane %v2295_v11, %v18244_v48  ;;  %v15650_v21 = vcombine.high %v18917_v25, %v18930_v52 }
 0x248   : > { %5611 = vrot.lane.b32.xlu1 %v18885_v45, %s17779_s27  ;;  %v3679_v38 = vcombine.low %v3646_v26, %v3662_v28  ;;  %v1395_v13 = vcombine.low %v1371_v1, %v1387_v32  ;;  %v1396_v57 = vcombine.high %v1371_v1, %v1387_v32  ;;  %5559 = vrot.lane.b32.xlu0 %v18152_v16, %s17780_s29  ;;  %v19020_v32 = vpop.permute.xlu0 %941 }
 0x249   : > { %v3680_v2 = vcombine.high %v3646_v26, %v3662_v28  ;;  %v1411_v56 = vcombine.low %v1378_v42, %v1394_v23  ;;  %v1412_v61 = vcombine.high %v1378_v42, %v1394_v23  ;;  %v2311_v10 = vcombine.low %v18985_v34, %v19000_v17 }
 0x24a   : > { %v2331_v11 = vcombine.low %v18943_v55, %v18951_v47  ;;  %v15651_v30 = vcombine.high %v18943_v55, %v18951_v47  ;;  %v19015_v25 = vrot.slane %v3715_v39, %v18227_v35  ;;  %v19018_v52 = vrot.slane %v3716_v44, %v18227_v35 }
 0x24b   : > { %v19023_v28 = vrot.slane %v3663_v43, %v18244_v48  ;;  %v19026_v23 = vrot.slane %v3664_v8, %v18244_v48  ;;  %v3699_v26 = vcombine.low %v18176_v20, %v18843_v5  ;;  %v3700_v55 = vcombine.high %v18176_v20, %v18843_v5  ;;  %16447 = vmatprep.mubr.msk.f32.mxu1 %vm7871_vm0, %v2311_v10  ;;  %v19042_v8 = vpop.permute.xlu1 %989 }
 0x24c   : > { %v1403_v39 = vrot.slane %v1395_v13, %v18244_v48  ;;  %v1410_v47 = vrot.slane %v1396_v57, %v18244_v48  ;;  %v4648_v1 = vcombine.high %v18757_v60, %v18760_v62  ;;  %v19038_v44 = vrot.slane %v2315_v19, %v18227_v35  ;;  %5659 = vrot.lane.b32.xlu1 %v18885_v45, %s17781_s20  ;;  %v3230_v10 = vpop.permute.xlu0 %3229 }
 0x24d   : > { %v19045_v42 = vrot.slane %v3679_v38, %v18244_v48  ;;  %v19048_v20 = vrot.slane %v3680_v2, %v18244_v48  ;;  %v1419_v5 = vrot.slane %v1411_v56, %v18244_v48  ;;  %v1426_v57 = vrot.slane %v1412_v61, %v18244_v48 }
 0x24e   : > { %v1447_v60 = vcombine.low %v18854_v58, %v18911_v59  ;;  %16452 = vmatprep.subr.msk.mxu1 %vm7871_vm0, %v4648_v1  ;;  %v19056_v62 = vrot.slane %v15650_v21, %v18227_v35  ;;  %v19059_v19 = vrot.slane %v2331_v11, %v18227_v35  ;;  %v19062_v43 = vrot.slane %v15651_v30, %v18227_v35 }
 0x24f   : > { %v1448_v13 = vcombine.high %v18854_v58, %v18911_v59  ;;  %v3707_v2 = vrot.slane %v3699_v26, %v18227_v35  ;;  %16453 = vmatpush3.xpose.msk.msra.mxu1 %vm7871_vm0, %v4648_v1  ;;  %v4580_v21 = vcombine.high %v18820_v40, %v18823_v4  ;;  %v2451_v56 = vcombine.low %v1403_v39, %v1410_v47 }
 0x250   : > { %v3714_v61 = vrot.slane %v3700_v55, %v18227_v35  ;;  %v2347_v11 = vcombine.low %v19038_v44, %v19056_v62  ;;  %v2363_v30 = vcombine.low %v19059_v19, %v19062_v43  ;;  %5609 = vrot.lane.b32.xlu1 %v18144_v14, %s17779_s27  ;;  %v15654_v58 = vcombine.high %v1403_v39, %v1410_v47  ;;  %v3278_v14 = vpop.permute.xlu1 %3277 }
 0x251   : > { %v2467_v26 = vcombine.low %v1419_v5, %v1426_v57  ;;  %v15655_v1 = vcombine.high %v1419_v5, %v1426_v57  ;;  %16454 = vmatprep.subr.msk.mxu1 %vm7871_vm0, %v4580_v21  ;;  %v4512_v38 = vcombine.high %v18523_v27, %v18863_v33  ;;  %v3731_v47 = vcombine.low %v3707_v2, %v19015_v25 }
 0x252   : > { %v19085_v4 = vrot.slane %v2347_v11, %v18244_v48  ;;  %v19088_v55 = vrot.slane %v2363_v30, %v18244_v48  ;;  %v3732_v5 = vcombine.high %v3707_v2, %v19015_v25  ;;  %v3767_v57 = vcombine.low %v18196_v22, %v18977_v54 }
 0x253   : > { %16455 = vmatpush3.xpose.msk.msra.mxu1 %vm7871_vm0, %v4580_v21  ;;  %v2458_v11 = vrot.slane %v2451_v56, %v18227_v35  ;;  %v3747_v30 = vcombine.low %v3714_v61, %v19018_v52  ;;  %v3748_v40 = vcombine.high %v3714_v61, %v19018_v52  ;;  %v2466_v33 = vrot.slane %v15654_v58, %v18227_v35  ;;  %v24474_v21 = vld [vmem:[#allocation23_spill] sm:$0xff]  ;;  %v3326_v58 = vpop.permute.xlu0 %3325 }
 0x254   : > { %v2379_v27 = vcombine.low %v19085_v4, %v19088_v55  ;;  %16456 = vmatprep.subr.msk.mxu1 %vm7871_vm0, %v4512_v38  ;;  %v19107_v25 = vrot.slane %v2467_v26, %v18227_v35  ;;  %v19110_v2 = vrot.slane %v15655_v1, %v18227_v35  ;;  %v3835_v39 = vcombine.low %v24474_v21, %v3278_v14 }
 0x255   : > { %5607 = vrot.lane.b32.xlu1 %v18152_v16, %s17779_s27  ;;  %v19116_v52 = vrot.slane %v1447_v60, %v18227_v35  ;;  %v19119_v56 = vrot.slane %v1448_v13, %v18227_v35  ;;  %v3768_v61 = vcombine.high %v18196_v22, %v18977_v54  ;;  %v3836_v26 = vcombine.high %v24474_v21, %v3278_v14  ;;  %v24475_v60 = vld [vmem:[#allocation32_spill] sm:$0xff] }
 0x256   : > { %16448 = vmatmul.mubr.msk.f32.gmra.mxu1 %vm7871_vm0, %v2379_v27  ;;  %v19126_v1 = vrot.slane %v3731_v47, %v18244_v48  ;;  %v19129_v59 = vrot.slane %v3732_v5, %v18244_v48  ;;  %v3851_v45 = vcombine.low %v3230_v10, %v3326_v58  ;;  %v24477_v51 = vcombine.high %v24475_v60, %v24476_v0 }
 0x257   : > { %16457 = vmatpush3.xpose.msk.msra.mxu1 %vm7871_vm0, %v4512_v38  ;;  %v19137_v22 = vrot.slane %v3747_v30, %v18244_v48  ;;  %v19140_v54 = vrot.slane %v3748_v40, %v18244_v48  ;;  %v19143_v14 = vrot.slane %v3767_v57, %v18227_v35  ;;  %v3852_v13 = vcombine.high %v3230_v10, %v3326_v58  ;;  %v24478_v10 = vld [vmem:[#allocation70_spill] sm:$0xff] }
 0x258   : > { %16458 = vmatprep.mubr.msk.f32.mxu1 %vm7871_vm0, %v24477_v51  ;;  %v2483_v47 = vcombine.low %v2458_v11, %v2466_v33  ;;  %v2484_v5 = vcombine.high %v2458_v11, %v2466_v33  ;;  %v3843_v0 = vrot.slane %v3835_v39, %v18227_v35  ;;  %v3850_v38 = vrot.slane %v3836_v26, %v18227_v35 }
 0x259   : > { %5655 = vrot.lane.b32.xlu1 %v18152_v16, %s17781_s20  ;;  %v4684_v40 = vcombine.high %v18715_v31, %v18718_v46  ;;  %v4700_v57 = vcombine.high %v24478_v10, %v18724_v15  ;;  %v24479_v11 = vcombine.high %v18590_v7, %v18607_v63  ;;  %v3859_v33 = vrot.slane %v3851_v45, %v18227_v35  ;;  %v24481_v10 = vld [vmem:[#allocation64_spill] sm:$0xff] }
 0x25a   : > { %v2312_v21 = vcombine.high %v18985_v34, %v19000_v17  ;;  %v3783_v31 = vcombine.low %v18914_v12, %v18960_v3  ;;  %v3866_v46 = vrot.slane %v3852_v13, %v18227_v35  ;;  %v19184_v13 = vpop.permute.xlu1 %943  ;;  %v19192_v15 = vrot.slane %v2484_v5, %v18244_v48 }
 0x25b   : > { %16459 = vmatmul.mubr.msk.f32.vlgmr.msra.gmra.mxu1 %vm7871_vm0, %v24479_v11  ;;  %v19172_v7 = vrot.slane %v4684_v40, %v18244_v48  ;;  %v19175_v63 = vrot.slane %v4700_v57, %v18244_v48  ;;  %v3867_v58 = vcombine.low %v3843_v0, %v3859_v33  ;;  %v3868_v26 = vcombine.high %v3843_v0, %v3859_v33  ;;  %v24480_v40 = vld [vmem:[#allocation65_spill] sm:$0xff]  ;;  %v19196_v33 = vpop.permute.xlu0 %895 }
 0x25c   : > { %16461 = vmatprep.mubr.msk.f32.mxu1 %vm7871_vm0, %v2312_v21  ;;  %v3883_v17 = vcombine.low %v3850_v38, %v3866_v46  ;;  %v3884_v34 = vcombine.high %v3850_v38, %v3866_v46  ;;  %v4616_v57 = vcombine.high %v24481_v10, %v24480_v40  ;;  %v19189_v11 = vrot.slane %v2483_v47, %v18244_v48  ;;  %v24484_v38 = vld [vmem:[#allocation67_spill] sm:$0xff]  ;;  %v24485_v21 = vld [vmem:[#allocation66_spill] sm:$0xff] }
 0x25d   : > { %v4717_v60 = vcombine.low %v19172_v7, %v19175_v63  ;;  %24483 = vst [vmem:[#allocation32_spill] sm:$0xff] %v19192_v15  ;;  %v3784_v0 = vcombine.high %v18914_v12, %v18960_v3  ;;  %v4632_v46 = vcombine.high %v24485_v21, %v24484_v38  ;;  %v3782_v45 = vrot.slane %v3768_v61, %v18227_v35  ;;  %v24486_v61 = vld [vmem:[#allocation54_spill] sm:$0xff]  ;;  %v24487_v38 = vld [vmem:[#allocation61_spill] sm:$0xff] }
 0x25e   : > { %24482 = vst [vmem:[#allocation23_spill] sm:$0xff] %v19189_v11  ;;  %v3791_v30 = vrot.slane %v3783_v31, %v18227_v35  ;;  %v19204_v47 = vrot.slane %v4616_v57, %v18244_v48  ;;  %v2380_v5 = vcombine.high %v19085_v4, %v19088_v55  ;;  %v3875_v40 = vrot.slane %v3867_v58, %v18244_v48  ;;  %v24488_v4 = vld [vmem:[#allocation60_spill] sm:$0xff]  ;;  %v24489_v58 = vld [vmem:[#allocation63_spill] sm:$0xff]  ;;  %v24490_v21 = vld [vmem:[#allocation62_spill] sm:$0xff] }
 0x25f   : > { %16464 = vmatprep.subr.msk.mxu1 %vm7871_vm0, %v4717_v60  ;;  %v3882_v12 = vrot.slane %v3868_v26, %v18244_v48  ;;  %v19212_v3 = vrot.slane %v4632_v46, %v18244_v48  ;;  %v2177_v31 = vcombine.low %v24486_v61, %v18907_v29  ;;  %v3891_v10 = vrot.slane %v3883_v17, %v18244_v48 }
 0x260   : > { %16465 = vmatpush3.xpose.msk.msra.mxu1 %vm7871_vm0, %v4717_v60  ;;  %v3898_v57 = vrot.slane %v3884_v34, %v18244_v48  ;;  %v4548_v55 = vcombine.high %v24488_v4, %v24487_v38  ;;  %v4564_v26 = vcombine.high %v24490_v21, %v24489_v58  ;;  %v24491_v60 = vld [vmem:[#allocation21_spill] sm:$0xff]  ;;  %v3798_v51 = vrot.slane %v3784_v0, %v18227_v35  ;;  %v24492_v34 = vld [vmem:[#allocation22_spill] sm:$0xff]  ;;  %v19235_v4 = vpop.permute.xlu1 %3231 }
 0x261   : > { %16462 = vmatmul.mubr.msk.f32.gmra.mxu1 %vm7871_vm0, %v2380_v5  ;;  %v1431_v39 = vcombine.low %v24491_v60, %v18883_v6  ;;  %v1432_v46 = vcombine.high %v24491_v60, %v18883_v6  ;;  %v4649_v17 = vcombine.low %v19204_v47, %v19212_v3  ;;  %v1499_v5 = vcombine.low %v24492_v34, %v19020_v32  ;;  %v19245_v60 = vpop.permute.xlu0 %991 }
 0x262   : > { %16472 = vmatprep.mubr.msk.f32.mxu1 %vm7871_vm0, %v2177_v31  ;;  %v1500_v38 = vcombine.high %v24492_v34, %v19020_v32  ;;  %v19238_v58 = vrot.slane %v4548_v55, %v18244_v48  ;;  %v19241_v6 = vrot.slane %v4564_v26, %v18244_v48  ;;  %v3799_v0 = vcombine.low %v19143_v14, %v3791_v30  ;;  %v24493_v55 = vld [vmem:[#allocation45_spill] sm:$0xff]  ;;  %v24494_v34 = vld [vmem:[#allocation44_spill] sm:$0xff] }
 0x263   : > { %v3800_v21 = vcombine.high %v19143_v14, %v3791_v30  ;;  %v4923_v31 = vcombine.low %v3875_v40, %v3882_v12  ;;  %v15690_v27 = vcombine.high %v3875_v40, %v3882_v12  ;;  %16466 = vmatprep.subr.msk.mxu1 %vm7871_vm0, %v4649_v17  ;;  %v4939_v16 = vcombine.low %v3891_v10, %v3898_v57 }
 0x264   : > { %16467 = vmatpush3.xpose.msk.msra.mxu1 %vm7871_vm0, %v4649_v17  ;;  %v4581_v32 = vcombine.low %v19238_v58, %v19241_v6  ;;  %v4480_v26 = vcombine.high %v24494_v34, %v24493_v55  ;;  %v4496_v9 = vcombine.high %v18483_v41, %v18502_v53  ;;  %v24495_v14 = vcombine.low %v19107_v25, %v19110_v2 }
 0x265   : > { %v1439_v40 = vrot.slane %v1431_v39, %v18227_v35  ;;  %v3815_v12 = vcombine.low %v3782_v45, %v3798_v51  ;;  %v3816_v24 = vcombine.high %v3782_v45, %v3798_v51  ;;  %v1446_v17 = vrot.slane %v1432_v46, %v18227_v35  ;;  %v19279_v45 = vpop.permute.xlu1 %3327 }
 0x266   : > { %v19259_v30 = vrot.slane %v24495_v14, %v18244_v48  ;;  %v15691_v15 = vcombine.high %v3891_v10, %v3898_v57  ;;  %16468 = vmatprep.subr.msk.mxu1 %vm7871_vm0, %v4581_v32  ;;  %v19265_v55 = vrot.slane %v4480_v26, %v18244_v48  ;;  %v19268_v41 = vrot.slane %v4496_v9, %v18244_v48 }
 0x267   : > { %v19271_v53 = vrot.slane %v1499_v5, %v18227_v35  ;;  %v19274_v34 = vrot.slane %v1500_v38, %v18227_v35  ;;  %v3807_v39 = vrot.slane %v3799_v0, %v18244_v48  ;;  %v3814_v51 = vrot.slane %v3800_v21, %v18244_v48 }
 0x268   : > { %24496 = vst [vmem:[#allocation33_spill] sm:$0xff] %v19259_v30  ;;  %16469 = vmatpush3.xpose.msk.msra.mxu1 %vm7871_vm0, %v4581_v32  ;;  %v4513_v10 = vcombine.low %v19265_v55, %v19268_v41  ;;  %v19284_v9 = vrot.slane %v4923_v31, %v18227_v35  ;;  %v19287_v57 = vrot.slane %v15690_v27, %v18227_v35  ;;  %v19296_v32 = vpop.permute.xlu0 %3279 }
 0x269   : > { %v19290_v46 = vrot.slane %v4939_v16, %v18227_v35  ;;  %v1463_v5 = vcombine.low %v1439_v40, %v19116_v52  ;;  %v1464_v38 = vcombine.high %v1439_v40, %v19116_v52  ;;  %v3823_v0 = vrot.slane %v3815_v12, %v18244_v48 }
 0x26a   : > { %v3830_v21 = vrot.slane %v3816_v24, %v18244_v48  ;;  %16470 = vmatprep.subr.msk.mxu1 %vm7871_vm0, %v4513_v10  ;;  %v19300_v31 = vrot.slane %v15691_v15, %v18227_v35  ;;  %v4955_v27 = vcombine.low %v19284_v9, %v19287_v57  ;;  %v2280_v16 = vcombine.high %v18924_v36, %v18927_v50 }
 0x26b   : > { %24497 = vst [vmem:[#allocation70_spill] sm:$0xff] %v19290_v46  ;;  %v2296_v52 = vcombine.high %v18966_v37, %v18969_v18  ;;  %v1479_v26 = vcombine.low %v1446_v17, %v19119_v56  ;;  %v4855_v14 = vcombine.low %v3807_v39, %v3814_v51  ;;  %v1515_v24 = vcombine.low %v18996_v49, %v19042_v8 }
 0x26c   : > { %v4718_v40 = vcombine.high %v19172_v7, %v19175_v63  ;;  %16471 = vmatpush3.xpose.msk.msra.mxu1 %vm7871_vm0, %v4513_v10  ;;  %v19315_v15 = vrot.slane %v4955_v27, %v18244_v48  ;;  %v4971_v36 = vcombine.low %v19290_v46, %v19300_v31  ;;  %v19320_v50 = vrot.slane %v2280_v16, %v18244_v48  ;;  %v24498_v63 = vld [vmem:[#allocation57_spill] sm:$0xff]  ;;  %v24499_v10 = vld [vmem:[#allocation56_spill] sm:$0xff]  ;;  %v19331_v46 = vpop.permute.xlu1 %897 }
 0x26d   : > { %v19323_v37 = vrot.slane %v2296_v52, %v18244_v48  ;;  %v1480_v18 = vcombine.high %v1446_v17, %v19119_v56  ;;  %v15688_v12 = vcombine.high %v3807_v39, %v3814_v51  ;;  %v1516_v7 = vcombine.high %v18996_v49, %v19042_v8  ;;  %v19345_v17 = vpop.permute.xlu0 %945 }
 0x26e   : > { %16478 = vmatprep.subr.msk.mxu1 %vm7871_vm0, %v4718_v40  ;;  %v2245_v27 = vcombine.low %v24499_v10, %v24498_v63  ;;  %v4871_v11 = vcombine.low %v3823_v0, %v3830_v21  ;;  %v15689_v30 = vcombine.high %v3823_v0, %v3830_v21  ;;  %v19334_v16 = vrot.slane %v4971_v36, %v18244_v48 }
 0x26f   : > { %v2313_v52 = vcombine.low %v19320_v50, %v19323_v37  ;;  %v19339_v56 = vrot.slane %v1463_v5, %v18244_v48  ;;  %v19342_v49 = vrot.slane %v1464_v38, %v18244_v48  ;;  %v1523_v8 = vrot.slane %v1515_v24, %v18227_v35 }
 0x270   : > { %16473 = vmatmul.mubr.msk.f32.vlgmr.msra.gmra.mxu1 %vm7871_vm0, %v2245_v27  ;;  %v4650_v39 = vcombine.high %v19204_v47, %v19212_v3  ;;  %v19351_v51 = vrot.slane %v1479_v26, %v18244_v48  ;;  %v4987_v0 = vcombine.low %v19315_v15, %v19334_v16  ;;  %v19358_v5 = vrot.slane %v4855_v14, %v18227_v35  ;;  %v24500_v3 = vld [vmem:[#allocation25_spill] sm:$0xff] }
 0x271   : > { %16475 = vmatprep.mubr.msk.f32.mxu1 %vm7871_vm0, %v2313_v52  ;;  %16479 = vmatpush3.xpose.msk.msra.mxu1 %vm7871_vm0, %v4718_v40  ;;  %v19361_v38 = vrot.slane %v1480_v18, %v18244_v48  ;;  %v1530_v21 = vrot.slane %v1516_v7, %v18227_v35  ;;  %v1583_v47 = vcombine.low %v19196_v33, %v19245_v60 }
 0x272   : > { %v1567_v26 = vcombine.low %v24500_v3, %v19184_v13  ;;  %16480 = vmatprep.subr.msk.mxu1 %vm7871_vm0, %v4650_v39  ;;  %16492 = vmatprep.subr.msk.mxu0 %vm7871_vm0, %v4987_v0  ;;  %v19371_v24 = vrot.slane %v15688_v12, %v18227_v35  ;;  %v19374_v14 = vrot.slane %v4871_v11, %v18227_v35  ;;  %v19388_v11 = vpop.permute.xlu1 %993 }
 0x273   : > { %v19377_v40 = vrot.slane %v15689_v30, %v18227_v35  ;;  %v2348_v36 = vcombine.high %v19038_v44, %v19056_v62  ;;  %v1531_v18 = vcombine.low %v19271_v53, %v1523_v8  ;;  %v1532_v7 = vcombine.high %v19271_v53, %v1523_v8  ;;  %16493 = vmatpush3.xpose.msk.msra.mxu0 %vm7871_vm0, %v4987_v0  ;;  %v19404_v8 = vpop.permute.xlu0 %3233 }
 0x274   : > { %v1584_v27 = vcombine.high %v19196_v33, %v19245_v60  ;;  %v1568_v12 = vcombine.high %v24500_v3, %v19184_v13  ;;  %v4887_v30 = vcombine.low %v19358_v5, %v19371_v24  ;;  %v2364_v53 = vcombine.high %v19059_v19, %v19062_v43 }
 0x275   : > { %v4903_v44 = vcombine.low %v19374_v14, %v19377_v40  ;;  %v19395_v62 = vrot.slane %v2348_v36, %v18244_v48  ;;  %16481 = vmatpush3.xpose.msk.msra.mxu1 %vm7871_vm0, %v4650_v39  ;;  %v1547_v13 = vcombine.low %v19274_v34, %v1530_v21  ;;  %v1548_v33 = vcombine.high %v19274_v34, %v1530_v21 }
 0x276   : > { %v1591_v60 = vrot.slane %v1583_v47, %v18227_v35  ;;  %v1575_v52 = vrot.slane %v1567_v26, %v18227_v35  ;;  %v19407_v0 = vrot.slane %v4887_v30, %v18244_v48  ;;  %v19413_v19 = vrot.slane %v2364_v53, %v18244_v48 }
 0x277   : > { %v19410_v3 = vrot.slane %v4903_v44, %v18244_v48  ;;  %v2178_v43 = vcombine.high %v24486_v61, %v18907_v29  ;;  %v24501_v34 = vcombine.high %v19107_v25, %v19110_v2  ;;  %v19426_v47 = vrot.slane %v1531_v18, %v18244_v48  ;;  %v19455_v2 = vpop.permute.xlu0 %3329 }
 0x278   : > { %v1598_v26 = vrot.slane %v1584_v27, %v18227_v35  ;;  %v19430_v36 = vrot.slane %v1532_v7, %v18244_v48  ;;  %v1582_v30 = vrot.slane %v1568_v12, %v18227_v35  ;;  %v2381_v25 = vcombine.low %v19395_v62, %v19413_v19  ;;  %v24502_v12 = vld [vmem:[#allocation27_spill] sm:$0xff] }
 0x279   : > { %v19421_v39 = vrot.slane %v24501_v34, %v18244_v48  ;;  %v4919_v29 = vcombine.low %v19407_v0, %v19410_v3  ;;  %v19442_v18 = vrot.slane %v1547_v13, %v18244_v48  ;;  %v19445_v7 = vrot.slane %v1548_v33, %v18244_v48  ;;  %v19453_v34 = vpop.permute.xlu1 %3281 }
 0x27a   : > { %v3903_v44 = vcombine.low %v24502_v12, %v19296_v32  ;;  %v1599_v53 = vcombine.low %v1575_v52, %v1591_v60  ;;  %16476 = vmatmul.mubr.msk.f32.gmra.mxu1 %vm7871_vm0, %v2381_v25  ;;  %v1600_v61 = vcombine.high %v1575_v52, %v1591_v60  ;;  %v4582_v13 = vcombine.high %v19238_v58, %v19241_v6 }
 0x27b   : > { %16494 = vmatprep.subr.msk.mxu0 %vm7871_vm0, %v4919_v29  ;;  %16486 = vmatprep.mubr.msk.f32.mxu1 %vm7871_vm0, %v2178_v43  ;;  %v24503_v33 = vcombine.low %v19126_v1, %v19129_v59  ;;  %v1615_v52 = vcombine.low %v1582_v30, %v1598_v26  ;;  %v1616_v21 = vcombine.high %v1582_v30, %v1598_v26 }
 0x27c   : > { %16495 = vmatpush3.xpose.msk.msra.mxu0 %vm7871_vm0, %v4919_v29  ;;  %v3904_v58 = vcombine.high %v24502_v12, %v19296_v32  ;;  %16482 = vmatprep.subr.msk.mxu1 %vm7871_vm0, %v4582_v13  ;;  %v24504_v6 = vcombine.high %v19126_v1, %v19129_v59  ;;  %v19491_v30 = vrot.slane %v1599_v53, %v18244_v48  ;;  %v24506_v32 = vld [vmem:[#allocation29_spill] sm:$0xff] }
 0x27d   : > { %v19465_v27 = vrot.slane %v24503_v33, %v18227_v35  ;;  %v24505_v33 = vcombine.low %v19137_v22, %v19140_v54  ;;  %v1635_v12 = vcombine.low %v24506_v32, %v19345_v17  ;;  %v1636_v59 = vcombine.high %v24506_v32, %v19345_v17  ;;  %16483 = vmatpush3.xpose.msk.msra.mxu1 %vm7871_vm0, %v4582_v13  ;;  %v19522_v32 = vpop.permute.xlu1 %947 }
 0x27e   : > { %v19480_v29 = vrot.slane %v24504_v6, %v18227_v35  ;;  %v19499_v1 = vrot.slane %v1600_v61, %v18244_v48  ;;  %v1651_v6 = vcombine.low %v19331_v46, %v19388_v11  ;;  %v19512_v43 = vrot.slane %v3903_v44, %v18227_v35  ;;  %24510 = vst [vmem:[#allocation67_spill] sm:$0xff] %v19522_v32 }
 0x27f   : > { %v19486_v60 = vrot.slane %v24505_v33, %v18227_v35  ;;  %v24507_v33 = vcombine.high %v19137_v22, %v19140_v54  ;;  %v19515_v17 = vrot.slane %v1615_v52, %v18244_v48  ;;  %v19518_v61 = vrot.slane %v1616_v21, %v18244_v48 }
 0x280   : > { %v4819_v26 = vcombine.low %v19465_v27, %v19480_v29  ;;  %v1652_v13 = vcombine.high %v19331_v46, %v19388_v11  ;;  %v19525_v22 = vrot.slane %v3904_v58, %v18227_v35  ;;  %v3919_v54 = vcombine.low %v19235_v4, %v19279_v45 }
 0x281   : > { %v19507_v53 = vrot.slane %v24507_v33, %v18227_v35  ;;  %24508 = vst [vmem:[#allocation65_spill] sm:$0xff] %v19515_v17  ;;  %24509 = vst [vmem:[#allocation64_spill] sm:$0xff] %v19518_v61  ;;  %v19529_v33 = vpop.permute.xlu0 %899  ;;  %v1643_v52 = vrot.slane %v1635_v12, %v18227_v35  ;;  %v19538_v46 = vrot.slane %v1636_v59, %v18227_v35 }
 0x282   : > { %v19532_v44 = vrot.slane %v4819_v26, %v18244_v48  ;;  %v4514_v11 = vcombine.high %v19265_v55, %v19268_v41  ;;  %v24511_v58 = vcombine.low %v19023_v28, %v19026_v23  ;;  %v3920_v32 = vcombine.high %v19235_v4, %v19279_v45  ;;  %v19592_v55 = vpop.permute.xlu1 %3235 }
 0x283   : > { %v4835_v21 = vcombine.low %v19486_v60, %v19507_v53  ;;  %v1659_v12 = vrot.slane %v1651_v6, %v18227_v35  ;;  %v24512_v26 = vcombine.high %v19023_v28, %v19026_v23  ;;  %v3927_v6 = vrot.slane %v3919_v54, %v18227_v35 }
 0x284   : > { %v19546_v25 = vrot.slane %v24511_v58, %v18227_v35  ;;  %v1666_v58 = vrot.slane %v1652_v13, %v18227_v35  ;;  %16484 = vmatprep.subr.msk.mxu1 %vm7871_vm0, %v4514_v11  ;;  %v3988_v13 = vcombine.high %v19404_v8, %v19455_v2  ;;  %v24513_v28 = vcombine.low %v19045_v42, %v19048_v20 }
 0x285   : > { %v19554_v59 = vrot.slane %v4835_v21, %v18244_v48  ;;  %v19566_v4 = vrot.slane %v24512_v26, %v18227_v35  ;;  %v3987_v21 = vcombine.low %v19404_v8, %v19455_v2  ;;  %16485 = vmatpush3.xpose.msk.msra.mxu1 %vm7871_vm0, %v4514_v11  ;;  %v24514_v54 = vcombine.high %v19045_v42, %v19048_v20  ;;  %v19595_v2 = vpop.permute.xlu0 %995 }
 0x286   : > { %v19582_v23 = vrot.slane %v24513_v28, %v18227_v35  ;;  %v3934_v11 = vrot.slane %v3920_v32, %v18227_v35  ;;  %v1667_v8 = vcombine.low %v1643_v52, %v1659_v12  ;;  %v4988_v28 = vcombine.high %v19315_v15, %v19334_v16 }
 0x287   : > { %v4851_v41 = vcombine.low %v19532_v44, %v19554_v59  ;;  %v19588_v26 = vrot.slane %v24514_v54, %v18227_v35  ;;  %v4751_v45 = vcombine.low %v19546_v25, %v19566_v4  ;;  %v4956_v42 = vcombine.high %v19284_v9, %v19287_v57  ;;  %v24515_v9 = vld [vmem:[#allocation70_spill] sm:$0xff] }
 0x288   : > { %v1668_v20 = vcombine.high %v1643_v52, %v1659_v12  ;;  %v1683_v54 = vcombine.low %v19538_v46, %v1666_v58  ;;  %v1684_v17 = vcombine.high %v19538_v46, %v1666_v58  ;;  %16506 = vmatprep.subr.msk.mxu1 %vm7871_vm0, %v4988_v28  ;;  %v4972_v57 = vcombine.high %v24515_v9, %v19300_v31 }
 0x289   : > { %16496 = vmatprep.subr.msk.mxu0 %vm7871_vm0, %v4851_v41  ;;  %v19605_v61 = vrot.slane %v4751_v45, %v18244_v48  ;;  %v4767_v32 = vcombine.low %v19582_v23, %v19588_v26  ;;  %v19612_v15 = vrot.slane %v4956_v42, %v18244_v48  ;;  %v2246_v16 = vcombine.high %v24499_v10, %v24498_v63 }
 0x28a   : > { %16497 = vmatpush3.xpose.msk.msra.mxu0 %vm7871_vm0, %v4851_v41  ;;  %v2314_v12 = vcombine.high %v19320_v50, %v19323_v37  ;;  %v24516_v46 = vcombine.low %v19339_v56, %v19342_v49  ;;  %v24517_v58 = vcombine.high %v19339_v56, %v19342_v49  ;;  %v19636_v63 = vrot.slane %v1667_v8, %v18244_v48 }
 0x28b   : > { %v19619_v52 = vrot.slane %v4767_v32, %v18244_v48  ;;  %v19639_v10 = vrot.slane %v4972_v57, %v18244_v48  ;;  %16487 = vmatmul.mubr.msk.f32.vlgmr.msra.gmra.mxu1 %vm7871_vm0, %v2246_v16  ;;  %v24518_v50 = vcombine.low %v19351_v51, %v19361_v38  ;;  %v24519_v56 = vcombine.high %v19351_v51, %v19361_v38  ;;  %v19661_v32 = vpop.permute.xlu1 %3331  ;;  %v19666_v57 = vpop.permute.xlu0 %3283 }
 0x28c   : > { %v19627_v41 = vrot.slane %v24516_v46, %v18227_v35  ;;  %v19633_v31 = vrot.slane %v24517_v58, %v18227_v35  ;;  %v1682_v45 = vrot.slane %v1668_v20, %v18244_v48  ;;  %16489 = vmatprep.mubr.msk.f32.mxu1 %vm7871_vm0, %v2314_v12  ;;  %16507 = vmatpush3.xpose.msk.msra.mxu1 %vm7871_vm0, %v4988_v28 }
 0x28d   : > { %v19646_v37 = vrot.slane %v24518_v50, %v18227_v35  ;;  %v19652_v49 = vrot.slane %v24519_v56, %v18227_v35  ;;  %v4783_v8 = vcombine.low %v19605_v61, %v19619_v52  ;;  %v3935_v9 = vcombine.low %v19512_v43, %v3927_v6 }
 0x28e   : > { %v2551_v42 = vcombine.low %v19627_v41, %v19633_v31  ;;  %v3936_v51 = vcombine.high %v19512_v43, %v3927_v6  ;;  %v3951_v38 = vcombine.low %v19525_v22, %v3934_v11  ;;  %v3952_v16 = vcombine.high %v19525_v22, %v3934_v11 }
 0x28f   : > { %v2567_v20 = vcombine.low %v19646_v37, %v19652_v49  ;;  %16498 = vmatprep.subr.msk.mxu0 %vm7871_vm0, %v4783_v8  ;;  %v4989_v28 = vcombine.low %v19612_v15, %v19639_v10  ;;  %v4920_v43 = vcombine.high %v19407_v0, %v19410_v3  ;;  %v19680_v6 = vrot.slane %v3987_v21, %v18227_v35  ;;  %v24520_v0 = vld [vmem:[#allocation33_spill] sm:$0xff]  ;;  %v24521_v3 = vld [vmem:[#allocation23_spill] sm:$0xff] }
 0x290   : > { %v19675_v12 = vrot.slane %v2551_v42, %v18244_v48  ;;  %v1691_v46 = vrot.slane %v1683_v54, %v18244_v48  ;;  %v1698_v58 = vrot.slane %v1684_v17, %v18244_v48  ;;  %16499 = vmatpush3.xpose.msk.msra.mxu0 %vm7871_vm0, %v4783_v8  ;;  %v19689_v11 = vrot.slane %v3988_v13, %v18227_v35 }
 0x291   : > { %v19686_v22 = vrot.slane %v2567_v20, %v18244_v48  ;;  %v2723_v50 = vcombine.low %v19636_v63, %v1682_v45  ;;  %16520 = vmatprep.subr.msk.mxu0 %vm7871_vm0, %v4989_v28  ;;  %v2515_v21 = vcombine.low %v24521_v3, %v24520_v0  ;;  %16508 = vmatprep.subr.msk.mxu1 %vm7871_vm0, %v4920_v43  ;;  %v19718_v20 = vpop.permute.xlu1 %901 }
 0x292   : > { %v19697_v54 = vrot.slane %v3935_v9, %v18244_v48  ;;  %v19700_v17 = vrot.slane %v3936_v51, %v18244_v48  ;;  %v4888_v13 = vcombine.high %v19358_v5, %v19371_v24  ;;  %16509 = vmatpush3.xpose.msk.msra.mxu1 %vm7871_vm0, %v4920_v43  ;;  %v19708_v8 = vrot.slane %v3951_v38, %v18244_v48  ;;  %v19721_v43 = vpop.permute.xlu0 %949 }
 0x293   : > { %v2583_v56 = vcombine.low %v19675_v12, %v19686_v22  ;;  %v19711_v42 = vrot.slane %v3952_v16, %v18244_v48  ;;  %16501 = vmatmul.mubr.msk.f32.vlgmr.msra.gmra.mxu0 %vm7871_vm0, %v2515_v21  ;;  %v4904_v9 = vcombine.high %v19374_v14, %v19377_v40  ;;  %v2382_v51 = vcombine.high %v19395_v62, %v19413_v19  ;;  %v24527_v21 = vld [vmem:[#allocation77_spill] sm:$0xff] }
 0x294   : > { %24522 = vst [vmem:[#allocation66_spill] sm:$0xff] %v19718_v20  ;;  %v15662_v5 = vcombine.high %v19636_v63, %v1682_v45  ;;  %v2739_v24 = vcombine.low %v1691_v46, %v1698_v58  ;;  %16521 = vmatpush3.xpose.msk.msra.mxu0 %vm7871_vm0, %v4989_v28  ;;  %v19726_v38 = vrot.slane %v4888_v13, %v18244_v48 }
 0x295   : > { %16503 = vmatprep.mubr.msk.f32.mxu0 %vm7871_vm0, %v2583_v56  ;;  %v19729_v16 = vrot.slane %v2723_v50, %v18227_v35  ;;  %v15663_v14 = vcombine.high %v1691_v46, %v1698_v58  ;;  %v19732_v40 = vrot.slane %v4904_v9, %v18244_v48  ;;  %16490 = vmatmul.mubr.msk.f32.gmra.mxu1 %vm7871_vm0, %v2382_v51  ;;  %v24528_v56 = vld [vmem:[#allocation76_spill] sm:$0xff] }
 0x296   : > { %v24523_v62 = vcombine.low %v19426_v47, %v19430_v36  ;;  %v24524_v63 = vcombine.high %v19426_v47, %v19430_v36  ;;  %v24525_v28 = vcombine.low %v19442_v18, %v19445_v7  ;;  %v24526_v58 = vcombine.high %v19442_v18, %v19445_v7  ;;  %v24529_v36 = vld [vmem:[#allocation73_spill] sm:$0xff]  ;;  %v24530_v9 = vld [vmem:[#allocation72_spill] sm:$0xff] }
 0x297   : > { %v2448_v13 = vcombine.high %v24528_v56, %v24527_v21  ;;  %v4921_v47 = vcombine.low %v19726_v38, %v19732_v40  ;;  %v2416_v51 = vcombine.high %v24530_v9, %v24529_v36  ;;  %v4836_v21 = vcombine.high %v19486_v60, %v19507_v53  ;;  %v19787_v36 = vpop.permute.xlu1 %997 }
 0x298   : > { %v19739_v19 = vrot.slane %v24523_v62, %v18227_v35  ;;  %v19745_v45 = vrot.slane %v24524_v63, %v18227_v35  ;;  %v19751_v46 = vrot.slane %v24525_v28, %v18227_v35  ;;  %v19757_v50 = vrot.slane %v24526_v58, %v18227_v35  ;;  %v24531_v62 = vld [vmem:[#allocation75_spill] sm:$0xff]  ;;  %v24532_v63 = vld [vmem:[#allocation74_spill] sm:$0xff] }
 0x299   : > { %v2432_v20 = vcombine.high %v24532_v63, %v24531_v62  ;;  %v4852_v28 = vcombine.high %v19532_v44, %v19554_v59  ;;  %16514 = vmatprep.mubr.msk.f32.mxu1 %vm7871_vm0, %v2448_v13  ;;  %v4820_v58 = vcombine.high %v19465_v27, %v19480_v29  ;;  %v2738_v56 = vrot.slane %v15662_v5, %v18227_v35  ;;  %v3238_v13 = vpop.permute.xlu0 %3237 }
 0x29a   : > { %v2619_v18 = vcombine.low %v19739_v19, %v19745_v45  ;;  %v2635_v7 = vcombine.low %v19751_v46, %v19757_v50  ;;  %16522 = vmatprep.subr.msk.mxu0 %vm7871_vm0, %v4921_v47  ;;  %v19781_v44 = vrot.slane %v2416_v51, %v18244_v48  ;;  %v19800_v53 = vrot.slane %v4836_v21, %v18244_v48 }
 0x29b   : > { %v19784_v59 = vrot.slane %v2432_v20, %v18244_v48  ;;  %16510 = vmatprep.subr.msk.mxu1 %vm7871_vm0, %v4852_v28  ;;  %16523 = vmatpush3.xpose.msk.msra.mxu0 %vm7871_vm0, %v4921_v47  ;;  %v19797_v29 = vrot.slane %v4820_v58, %v18244_v48  ;;  %v4991_v20 = vcombine.low %v19697_v54, %v19700_v17 }
 0x29c   : > { %v19790_v27 = vrot.slane %v2619_v18, %v18244_v48  ;;  %v19793_v60 = vrot.slane %v2635_v7, %v18244_v48  ;;  %v2746_v9 = vrot.slane %v2739_v24, %v18227_v35  ;;  %v2754_v51 = vrot.slane %v15663_v14, %v18227_v35  ;;  %16511 = vmatpush3.xpose.msk.msra.mxu1 %vm7871_vm0, %v4852_v28 }
 0x29d   : > { %v1719_v62 = vcombine.low %v19529_v33, %v19595_v2  ;;  %v4853_v18 = vcombine.low %v19797_v29, %v19800_v53  ;;  %v2755_v7 = vcombine.low %v19729_v16, %v2738_v56  ;;  %v2756_v24 = vcombine.high %v19729_v16, %v2738_v56 }
 0x29e   : > { %v2651_v63 = vcombine.low %v19790_v27, %v19793_v60  ;;  %v1720_v14 = vcombine.high %v19529_v33, %v19595_v2  ;;  %v2449_v28 = vcombine.low %v19781_v44, %v19784_v59  ;;  %v4784_v58 = vcombine.high %v19605_v61, %v19619_v52  ;;  %v24533_v33 = vld [vmem:[#allocation30_spill] sm:$0xff] }
 0x29f   : > { %16524 = vmatprep.subr.msk.mxu0 %vm7871_vm0, %v4853_v18  ;;  %v4752_v21 = vcombine.high %v19546_v25, %v19566_v4  ;;  %v4768_v47 = vcombine.high %v19582_v23, %v19588_v26  ;;  %v2771_v16 = vcombine.low %v2746_v9, %v2754_v51  ;;  %v2772_v56 = vcombine.high %v2746_v9, %v2754_v51  ;;  %v3334_v25 = vpop.permute.xlu0 %3333 }
 0x2a0   : > { %16504 = vmatmul.mubr.msk.f32.gmra.mxu0 %vm7871_vm0, %v2651_v63  ;;  %v3971_v2 = vcombine.low %v24533_v33, %v19453_v34  ;;  %v3286_v63 = vpop.permute.xlu1 %3285  ;;  %v3972_v61 = vcombine.high %v24533_v33, %v19453_v34  ;;  %16512 = vmatprep.subr.msk.mxu1 %vm7871_vm0, %v4784_v58  ;;  %v19847_v26 = vrot.slane %v1719_v62, %v18227_v35  ;;  %v24535_v33 = vld [vmem:[#allocation34_spill] sm:$0xff] }
 0x2a1   : > { %16528 = vmatprep.mubr.msk.f32.mxu0 %vm7871_vm0, %v2449_v28  ;;  %16525 = vmatpush3.xpose.msk.msra.mxu0 %vm7871_vm0, %v4853_v18  ;;  %v19841_v4 = vrot.slane %v4752_v21, %v18244_v48  ;;  %v19844_v23 = vrot.slane %v4768_v47, %v18244_v48  ;;  %v19850_v52 = vrot.slane %v1720_v14, %v18227_v35  ;;  %v24534_v28 = vld [vmem:[#allocation36_spill] sm:$0xff] }
 0x2a2   : > { %v4123_v9 = vcombine.low %v3238_v13, %v3334_v25  ;;  %v4124_v51 = vcombine.high %v3238_v13, %v3334_v25  ;;  %16513 = vmatpush3.xpose.msk.msra.mxu1 %vm7871_vm0, %v4784_v58  ;;  %v19854_v34 = vrot.slane %v2755_v7, %v18244_v48  ;;  %v4107_v21 = vcombine.low %v24534_v28, %v3286_v63 }
 0x2a3   : > { %v4785_v18 = vcombine.low %v19841_v4, %v19844_v23  ;;  %v4108_v47 = vcombine.high %v24534_v28, %v3286_v63  ;;  %v19861_v62 = vrot.slane %v2756_v24, %v18244_v48  ;;  %v19864_v14 = vrot.slane %v2771_v16, %v18244_v48 }
 0x2a4   : > { %v19867_v13 = vrot.slane %v2772_v56, %v18244_v48  ;;  %v3979_v58 = vrot.slane %v3971_v2, %v18227_v35  ;;  %v19871_v7 = vrot.slane %v3972_v61, %v18227_v35  ;;  %v4039_v25 = vcombine.low %v24535_v33, %v19666_v57 }
 0x2a5   : > { %16526 = vmatprep.subr.msk.mxu0 %vm7871_vm0, %v4785_v18  ;;  %v4990_v24 = vcombine.high %v19612_v15, %v19639_v10  ;;  %v2516_v16 = vcombine.high %v24521_v3, %v24520_v0  ;;  %v4040_v56 = vcombine.high %v24535_v33, %v19666_v57  ;;  %v4055_v2 = vcombine.low %v19592_v55, %v19661_v32  ;;  %v24536_v15 = vld [vmem:[#allocation32_spill] sm:$0xff] }
 0x2a6   : > { %v4131_v63 = vrot.slane %v4123_v9, %v18227_v35  ;;  %v4138_v61 = vrot.slane %v4124_v51, %v18227_v35  ;;  %16527 = vmatpush3.xpose.msk.msra.mxu0 %vm7871_vm0, %v4785_v18  ;;  %v4115_v28 = vrot.slane %v4107_v21, %v18227_v35  ;;  %v4122_v5 = vrot.slane %v4108_v47, %v18227_v35 }
 0x2a7   : > { %16534 = vmatprep.subr.msk.mxu1 %vm7871_vm0, %v4990_v24  ;;  %16515 = vmatmul.mubr.msk.f32.vlgmr.msra.gmra.mxu1 %vm7871_vm0, %v2516_v16  ;;  %v2517_v10 = vcombine.low %v24536_v15, %v19421_v39  ;;  %v4003_v57 = vcombine.low %v3979_v58, %v19680_v6  ;;  %v4004_v0 = vcombine.high %v3979_v58, %v19680_v6 }
 0x2a8   : > { %v2584_v3 = vcombine.high %v19675_v12, %v19686_v22  ;;  %v2552_v9 = vcombine.high %v19627_v41, %v19633_v31  ;;  %16535 = vmatpush3.xpose.msk.msra.mxu1 %vm7871_vm0, %v4990_v24  ;;  %v4019_v51 = vcombine.low %v19871_v7, %v19689_v11  ;;  %v4020_v18 = vcombine.high %v19871_v7, %v19689_v11 }
 0x2a9   : > { %v4056_v21 = vcombine.high %v19592_v55, %v19661_v32  ;;  %16529 = vmatmul.mubr.msk.f32.vlgmr.msra.gmra.mxu0 %vm7871_vm0, %v2517_v10  ;;  %v2568_v6 = vcombine.high %v19646_v37, %v19652_v49  ;;  %v4047_v12 = vrot.slane %v4039_v25, %v18227_v35  ;;  %v4054_v41 = vrot.slane %v4040_v56, %v18227_v35 }
 0x2aa   : > { %v4063_v31 = vrot.slane %v4055_v2, %v18227_v35  ;;  %16517 = vmatprep.mubr.msk.f32.mxu1 %vm7871_vm0, %v2584_v3  ;;  %v19914_v22 = vrot.slane %v2552_v9, %v18244_v48  ;;  %v4139_v47 = vcombine.low %v4115_v28, %v4131_v63  ;;  %v4140_v58 = vcombine.high %v4115_v28, %v4131_v63  ;;  %v24537_v2 = vld [vmem:[#allocation67_spill] sm:$0xff] }
 0x2ab   : > { %v4155_v33 = vcombine.low %v4122_v5, %v4138_v61  ;;  %v19917_v55 = vrot.slane %v2568_v6, %v18244_v48  ;;  %v4156_v32 = vcombine.high %v4122_v5, %v4138_v61  ;;  %v4922_v37 = vcombine.high %v19726_v38, %v19732_v40  ;;  %v24538_v63 = vld [vmem:[#allocation31_spill] sm:$0xff] }
 0x2ac   : > { %v2652_v49 = vcombine.high %v19790_v27, %v19793_v60  ;;  %v2620_v25 = vcombine.high %v19739_v19, %v19745_v45  ;;  %v19926_v24 = vrot.slane %v4003_v57, %v18244_v48  ;;  %v19929_v16 = vrot.slane %v4004_v0, %v18244_v48  ;;  %v19941_v27 = vpop.permute.xlu1 %951 }
 0x2ad   : > { %v4070_v56 = vrot.slane %v4056_v21, %v18227_v35  ;;  %v2585_v5 = vcombine.low %v19914_v22, %v19917_v55  ;;  %v1703_v38 = vcombine.low %v24538_v63, %v24537_v2  ;;  %v4071_v40 = vcombine.low %v4047_v12, %v4063_v31  ;;  %16536 = vmatprep.subr.msk.mxu1 %vm7871_vm0, %v4922_v37 }
 0x2ae   : > { %v4072_v61 = vcombine.high %v4047_v12, %v4063_v31  ;;  %16518 = vmatmul.mubr.msk.f32.gmra.mxu1 %vm7871_vm0, %v2652_v49  ;;  %v4147_v19 = vrot.slane %v4139_v47, %v18244_v48  ;;  %v4154_v45 = vrot.slane %v4140_v58, %v18244_v48  ;;  %v19944_v60 = vrot.slane %v2620_v25, %v18244_v48  ;;  %v24541_v47 = vld [vmem:[#allocation65_spill] sm:$0xff]  ;;  %v24542_v58 = vld [vmem:[#allocation64_spill] sm:$0xff] }
 0x2af   : > { %16531 = vmatprep.mubr.msk.f32.mxu0 %vm7871_vm0, %v2585_v5  ;;  %v2636_v28 = vcombine.high %v19751_v46, %v19757_v50  ;;  %v4163_v10 = vrot.slane %v4155_v33, %v18244_v48  ;;  %v4170_v57 = vrot.slane %v4156_v32, %v18244_v48  ;;  %16537 = vmatpush3.xpose.msk.msra.mxu1 %vm7871_vm0, %v4922_v37  ;;  %v19961_v46 = vpop.permute.xlu0 %903 }
 0x2b0   : > { %v2450_v0 = vcombine.high %v19781_v44, %v19784_v59  ;;  %v24539_v3 = vcombine.low %v19491_v30, %v19499_v1  ;;  %v1704_v21 = vcombine.high %v24538_v63, %v24537_v2  ;;  %v4087_v6 = vcombine.low %v4054_v41, %v4070_v56 }
 0x2b1   : > { %v19964_v50 = vrot.slane %v2636_v28, %v18244_v48  ;;  %v24540_v12 = vcombine.high %v19491_v30, %v19499_v1  ;;  %v4079_v59 = vrot.slane %v4071_v40, %v18244_v48  ;;  %v4088_v31 = vcombine.high %v4054_v41, %v4070_v56 }
 0x2b2   : > { %v19957_v9 = vrot.slane %v24539_v3, %v18227_v35  ;;  %16542 = vmatprep.mubr.msk.f32.mxu1 %vm7871_vm0, %v2450_v0  ;;  %v24543_v33 = vcombine.low %v24541_v47, %v24542_v58  ;;  %v24544_v37 = vcombine.high %v24541_v47, %v24542_v58  ;;  %v5195_v30 = vcombine.low %v4147_v19, %v4154_v45  ;;  %v19999_v0 = vpop.permute.xlu1 %3239  ;;  %v24545_v3 = vld [vmem:[#allocation35_spill] sm:$0xff] }
 0x2b3   : > { %v19970_v44 = vrot.slane %v24540_v12, %v18227_v35  ;;  %v2653_v1 = vcombine.low %v19944_v60, %v19964_v50  ;;  %v4854_v25 = vcombine.high %v19797_v29, %v19800_v53  ;;  %v4086_v56 = vrot.slane %v4072_v61, %v18244_v48 }
 0x2b4   : > { %v19978_v32 = vrot.slane %v24543_v33, %v18227_v35  ;;  %v19984_v49 = vrot.slane %v24544_v37, %v18227_v35  ;;  %v15698_v5 = vcombine.high %v4147_v19, %v4154_v45  ;;  %v5211_v2 = vcombine.low %v4163_v10, %v4170_v57 }
 0x2b5   : > { %v2687_v41 = vcombine.low %v19957_v9, %v19970_v44  ;;  %v15699_v40 = vcombine.high %v4163_v10, %v4170_v57  ;;  %16532 = vmatmul.mubr.msk.f32.gmra.mxu0 %vm7871_vm0, %v2653_v1  ;;  %16538 = vmatprep.subr.msk.mxu1 %vm7871_vm0, %v4854_v25  ;;  %v4786_v29 = vcombine.high %v19841_v4, %v19844_v23 }
 0x2b6   : > { %v2703_v63 = vcombine.low %v19978_v32, %v19984_v49  ;;  %v20005_v53 = vrot.slane %v4019_v51, %v18244_v48  ;;  %v4095_v61 = vrot.slane %v4087_v6, %v18244_v48  ;;  %v4102_v19 = vrot.slane %v4088_v31, %v18244_v48  ;;  %16539 = vmatpush3.xpose.msk.msra.mxu1 %vm7871_vm0, %v4854_v25  ;;  %v20023_v51 = vpop.permute.xlu0 %999  ;;  %v20052_v1 = vpop.permute.xlu1 %3335 }
 0x2b7   : > { %v19997_v28 = vrot.slane %v2687_v41, %v18244_v48  ;;  %v20017_v10 = vrot.slane %v4020_v18, %v18244_v48  ;;  %v1711_v4 = vrot.slane %v1703_v38, %v18227_v35  ;;  %v20021_v23 = vrot.slane %v1704_v21, %v18227_v35  ;;  %16540 = vmatprep.subr.msk.mxu1 %vm7871_vm0, %v4786_v29  ;;  %v24546_v21 = vld [vmem:[#allocation66_spill] sm:$0xff] }
 0x2b8   : > { %v20010_v45 = vrot.slane %v2703_v63, %v18244_v48  ;;  %v20027_v57 = vrot.slane %v5195_v30, %v18227_v35  ;;  %v1771_v6 = vcombine.low %v24545_v3, %v19721_v43  ;;  %v1772_v11 = vcombine.high %v24545_v3, %v19721_v43 }
 0x2b9   : > { %v20036_v18 = vrot.slane %v15698_v5, %v18227_v35  ;;  %v5127_v38 = vcombine.low %v4079_v59, %v4086_v56  ;;  %v1787_v12 = vcombine.low %v24546_v21, %v19787_v36  ;;  %v20041_v31 = vrot.slane %v5211_v2, %v18227_v35 }
 0x2ba   : > { %v2719_v7 = vcombine.low %v19997_v28, %v20010_v45  ;;  %v20044_v47 = vrot.slane %v15699_v40, %v18227_v35  ;;  %v15696_v58 = vcombine.high %v4079_v59, %v4086_v56  ;;  %v5143_v33 = vcombine.low %v4095_v61, %v4102_v19  ;;  %16541 = vmatpush3.xpose.msk.msra.mxu1 %vm7871_vm0, %v4786_v29 }
 0x2bb   : > { %v5227_v43 = vcombine.low %v20027_v57, %v20036_v18  ;;  %v1735_v37 = vcombine.low %v1711_v4, %v19847_v26  ;;  %v1736_v30 = vcombine.high %v1711_v4, %v19847_v26  ;;  %v2518_v41 = vcombine.high %v24536_v15, %v19421_v39  ;;  %v20068_v15 = vpop.permute.xlu0 %3287 }
 0x2bc   : > { %16556 = vmatprep.mubr.msk.f32.mxu0 %vm7871_vm0, %v2719_v7  ;;  %v5243_v59 = vcombine.low %v20041_v31, %v20044_v47  ;;  %v15697_v25 = vcombine.high %v4095_v61, %v4102_v19  ;;  %v1788_v56 = vcombine.high %v24546_v21, %v19787_v36  ;;  %v2586_v2 = vcombine.high %v19914_v22, %v19917_v55 }
 0x2bd   : > { %v5235_v5 = vrot.slane %v5227_v43, %v18244_v48  ;;  %v5059_v26 = vcombine.low %v19926_v24, %v19929_v16  ;;  %v1751_v63 = vcombine.low %v20021_v23, %v19850_v52  ;;  %v1795_v39 = vrot.slane %v1787_v12, %v18227_v35  ;;  %16543 = vmatmul.mubr.msk.f32.vlgmr.msra.gmra.mxu1 %vm7871_vm0, %v2518_v41 }
 0x2be   : > { %v5251_v40 = vrot.slane %v5243_v59, %v18244_v48  ;;  %v1752_v36 = vcombine.high %v20021_v23, %v19850_v52  ;;  %16545 = vmatprep.mubr.msk.f32.mxu1 %vm7871_vm0, %v2586_v2  ;;  %v20076_v22 = vrot.slane %v5127_v38, %v18227_v35  ;;  %v20079_v55 = vrot.slane %v15696_v58, %v18227_v35 }
 0x2bf   : > { %v20082_v29 = vrot.slane %v5143_v33, %v18227_v35  ;;  %v1779_v61 = vrot.slane %v1771_v6, %v18227_v35  ;;  %v1786_v19 = vrot.slane %v1772_v11, %v18227_v35  ;;  %v20087_v7 = vrot.slane %v1735_v37, %v18244_v48  ;;  %v20098_v6 = vpop.permute.xlu1 %905  ;;  %v24547_v33 = vld [vmem:[#allocation41_spill] sm:$0xff]  ;;  %v20114_v59 = vpop.permute.xlu0 %953 }
 0x2c0   : > { %v5259_v4 = vcombine.low %v5235_v5, %v5251_v40  ;;  %v5260_v3 = vcombine.high %v5235_v5, %v5251_v40  ;;  %v20090_v52 = vrot.slane %v1736_v30, %v18244_v48  ;;  %v1802_v23 = vrot.slane %v1788_v56, %v18227_v35 }
 0x2c1   : > { %v20094_v38 = vrot.slane %v15697_v25, %v18227_v35  ;;  %v1803_v21 = vcombine.low %v1779_v61, %v1795_v39  ;;  %v1855_v12 = vcombine.low %v19961_v46, %v20023_v51  ;;  %v5159_v11 = vcombine.low %v20076_v22, %v20079_v55 }
 0x2c2   : > { %16548 = vmatprep.subr.msk.mxu0 %vm7871_vm0, %v5259_v4  ;;  %16562 = vmatprep.subr.msk.mxu1 %vm7871_vm0, %v5260_v3  ;;  %v1804_v58 = vcombine.high %v1779_v61, %v1795_v39  ;;  %v1839_v43 = vcombine.low %v24547_v33, %v19941_v27  ;;  %v1856_v30 = vcombine.high %v19961_v46, %v20023_v51 }
 0x2c3   : > { %16549 = vmatpush3.xpose.msk.msra.mxu0 %vm7871_vm0, %v5259_v4  ;;  %16563 = vmatpush3.xpose.msk.msra.mxu1 %vm7871_vm0, %v5260_v3  ;;  %v5175_v37 = vcombine.low %v20082_v29, %v20094_v38  ;;  %v1840_v41 = vcombine.high %v24547_v33, %v19941_v27  ;;  %v5167_v25 = vrot.slane %v5159_v11, %v18244_v48  ;;  %v20144_v3 = vpop.permute.xlu1 %1001 }
 0x2c4   : > { %v2654_v56 = vcombine.high %v19944_v60, %v19964_v50  ;;  %v1819_v5 = vcombine.low %v1786_v19, %v1802_v23  ;;  %v1820_v2 = vcombine.high %v1786_v19, %v1802_v23  ;;  %v2720_v40 = vcombine.high %v19997_v28, %v20010_v45 }
 0x2c5   : > { %v5183_v39 = vrot.slane %v5175_v37, %v18244_v48  ;;  %v20123_v61 = vrot.slane %v1751_v63, %v18244_v48  ;;  %v20126_v46 = vrot.slane %v1752_v36, %v18244_v48  ;;  %v20129_v27 = vrot.slane %v1803_v21, %v18244_v48 }
 0x2c6   : > { %v1863_v51 = vrot.slane %v1855_v12, %v18227_v35  ;;  %16546 = vmatmul.mubr.msk.f32.gmra.mxu1 %vm7871_vm0, %v2654_v56  ;;  %v20134_v60 = vrot.slane %v1804_v58, %v18244_v48  ;;  %v1847_v50 = vrot.slane %v1839_v43, %v18227_v35  ;;  %v15694_v45 = vcombine.high %v19926_v24, %v19929_v16 }
 0x2c7   : > { %v5191_v19 = vcombine.low %v5167_v25, %v5183_v39  ;;  %v5192_v28 = vcombine.high %v5167_v25, %v5183_v39  ;;  %16570 = vmatprep.mubr.msk.f32.mxu1 %vm7871_vm0, %v2720_v40  ;;  %v5075_v63 = vcombine.low %v20005_v53, %v20017_v10  ;;  %v1870_v36 = vrot.slane %v1856_v30, %v18227_v35  ;;  %v24548_v25 = vld [vmem:[#allocation48_spill] sm:$0xff] }
 0x2c8   : > { %v1854_v4 = vrot.slane %v1840_v41, %v18227_v35  ;;  %v15695_v23 = vcombine.high %v20005_v53, %v20017_v10  ;;  %v20149_v21 = vrot.slane %v1819_v5, %v18244_v48  ;;  %v20152_v12 = vrot.slane %v1820_v2, %v18244_v48  ;;  %v20162_v53 = vpop.permute.xlu0 %3241  ;;  %v20184_v41 = vpop.permute.xlu1 %3289 }
 0x2c9   : > { %16550 = vmatprep.subr.msk.mxu0 %vm7871_vm0, %v5191_v19  ;;  %16564 = vmatprep.subr.msk.mxu1 %vm7871_vm0, %v5192_v28  ;;  %v2791_v11 = vcombine.low %v20087_v7, %v20090_v52  ;;  %v1871_v37 = vcombine.low %v1847_v50, %v1863_v51  ;;  %v1872_v30 = vcombine.high %v1847_v50, %v1863_v51 }
 0x2ca   : > { %16551 = vmatpush3.xpose.msk.msra.mxu0 %vm7871_vm0, %v5191_v19  ;;  %16565 = vmatpush3.xpose.msk.msra.mxu1 %vm7871_vm0, %v5192_v28  ;;  %v4175_v56 = vcombine.low %v24548_v25, %v20068_v15  ;;  %v1887_v5 = vcombine.low %v1854_v4, %v1870_v36  ;;  %v1888_v2 = vcombine.high %v1854_v4, %v1870_v36  ;;  %v24549_v28 = vld [vmem:[#allocation49_spill] sm:$0xff] }
 0x2cb   : > { %v4176_v19 = vcombine.high %v24548_v25, %v20068_v15  ;;  %v1907_v51 = vcombine.low %v24549_v28, %v20114_v59  ;;  %v4191_v50 = vcombine.low %v19999_v0, %v20052_v1  ;;  %v20190_v36 = vrot.slane %v5059_v26, %v18227_v35 }
 0x2cc   : > { %v20193_v4 = vrot.slane %v15694_v45, %v18227_v35  ;;  %v20196_v40 = vrot.slane %v5075_v63, %v18227_v35  ;;  %v20199_v15 = vrot.slane %v1871_v37, %v18244_v48  ;;  %v20202_v25 = vrot.slane %v1872_v30, %v18244_v48  ;;  %v20218_v45 = vpop.permute.xlu0 %3337 }
 0x2cd   : > { %v1908_v39 = vcombine.high %v24549_v28, %v20114_v59  ;;  %v20207_v43 = vrot.slane %v15695_v23, %v18227_v35  ;;  %v20210_v24 = vrot.slane %v4175_v56, %v18227_v35  ;;  %v20213_v16 = vrot.slane %v1887_v5, %v18244_v48 }
 0x2ce   : > { %v20216_v26 = vrot.slane %v1888_v2, %v18244_v48  ;;  %v5091_v63 = vcombine.low %v20190_v36, %v20193_v4  ;;  %v20223_v37 = vrot.slane %v4176_v19, %v18227_v35  ;;  %v20226_v59 = vrot.slane %v1907_v51, %v18227_v35 }
 0x2cf   : > { %v4192_v23 = vcombine.high %v19999_v0, %v20052_v1  ;;  %v5107_v30 = vcombine.low %v20196_v40, %v20207_v43  ;;  %v4199_v56 = vrot.slane %v4191_v50, %v18227_v35  ;;  %v20238_v2 = vrot.slane %v4991_v20, %v18227_v35 }
 0x2d0   : > { %v5099_v5 = vrot.slane %v5091_v63, %v18244_v48  ;;  %v24550_v19 = vcombine.high %v19697_v54, %v19700_v17  ;;  %v20251_v51 = vrot.slane %v1908_v39, %v18227_v35  ;;  %v1923_v63 = vcombine.low %v20098_v6, %v20144_v3  ;;  %v20258_v54 = vpop.permute.xlu1 %955  ;;  %v20280_v58 = vpop.permute.xlu0 %907 }
 0x2d1   : > { %v5115_v50 = vrot.slane %v5107_v30, %v18244_v48  ;;  %v24551_v17 = vcombine.low %v19708_v8, %v19711_v42  ;;  %v24552_v39 = vcombine.high %v19708_v8, %v19711_v42  ;;  %v20273_v30 = vrot.slane %v4192_v23, %v18227_v35 }
 0x2d2   : > { %v20244_v28 = vrot.slane %v24550_v19, %v18227_v35  ;;  %v1924_v20 = vcombine.high %v20098_v6, %v20144_v3  ;;  %v4259_v23 = vcombine.low %v20162_v53, %v20218_v45  ;;  %v4260_v6 = vcombine.high %v20162_v53, %v20218_v45 }
 0x2d3   : > { %v20264_v19 = vrot.slane %v24551_v17, %v18227_v35  ;;  %v20270_v1 = vrot.slane %v24552_v39, %v18227_v35  ;;  %v5123_v0 = vcombine.low %v5099_v5, %v5115_v50  ;;  %v5124_v10 = vcombine.high %v5099_v5, %v5115_v50 }
 0x2d4   : > { %v4207_v17 = vcombine.low %v20210_v24, %v4199_v56  ;;  %v5023_v8 = vcombine.low %v20238_v2, %v20244_v28  ;;  %v5228_v3 = vcombine.high %v20027_v57, %v20036_v18  ;;  %v4208_v5 = vcombine.high %v20210_v24, %v4199_v56  ;;  %v20308_v24 = vpop.permute.xlu1 %3243 }
 0x2d5   : > { %v5039_v42 = vcombine.low %v20264_v19, %v20270_v1  ;;  %16552 = vmatprep.subr.msk.mxu0 %vm7871_vm0, %v5123_v0  ;;  %16566 = vmatprep.subr.msk.mxu1 %vm7871_vm0, %v5124_v10  ;;  %v1931_v50 = vrot.slane %v1923_v63, %v18227_v35  ;;  %v4223_v53 = vcombine.low %v20223_v37, %v20273_v30 }
 0x2d6   : > { %16553 = vmatpush3.xpose.msk.msra.mxu0 %vm7871_vm0, %v5123_v0  ;;  %16567 = vmatpush3.xpose.msk.msra.mxu1 %vm7871_vm0, %v5124_v10  ;;  %v5031_v39 = vrot.slane %v5023_v8, %v18244_v48  ;;  %v4224_v45 = vcombine.high %v20223_v37, %v20273_v30  ;;  %v1938_v33 = vrot.slane %v1924_v20, %v18227_v35 }
 0x2d7   : > { %v5047_v57 = vrot.slane %v5039_v42, %v18244_v48  ;;  %v20306_v18 = vrot.slane %v4207_v17, %v18244_v48  ;;  %v5242_v56 = vrot.slane %v5228_v3, %v18244_v48  ;;  %v5244_v10 = vcombine.high %v20041_v31, %v20044_v47 }
 0x2d8   : > { %v20317_v0 = vrot.slane %v2791_v11, %v18227_v35  ;;  %v24553_v63 = vcombine.high %v20087_v7, %v20090_v52  ;;  %v24554_v17 = vcombine.low %v20123_v61, %v20126_v46  ;;  %v1939_v31 = vcombine.low %v20226_v59, %v1931_v50  ;;  %v20333_v11 = vpop.permute.xlu0 %1003 }
 0x2d9   : > { %v5055_v37 = vcombine.low %v5031_v39, %v5047_v57  ;;  %v5056_v20 = vcombine.high %v5031_v39, %v5047_v57  ;;  %v1940_v47 = vcombine.high %v20226_v59, %v1931_v50  ;;  %v5258_v42 = vrot.slane %v5244_v10, %v18244_v48 }
 0x2da   : > { %v20323_v30 = vrot.slane %v24553_v63, %v18227_v35  ;;  %v20329_v8 = vrot.slane %v24554_v17, %v18227_v35  ;;  %v24555_v7 = vcombine.high %v20123_v61, %v20126_v46  ;;  %v1955_v3 = vcombine.low %v20251_v51, %v1938_v33 }
 0x2db   : > { %v1956_v39 = vcombine.high %v20251_v51, %v1938_v33  ;;  %16554 = vmatprep.subr.msk.mxu0 %vm7871_vm0, %v5055_v37  ;;  %16568 = vmatprep.subr.msk.mxu1 %vm7871_vm0, %v5056_v20  ;;  %v5261_v50 = vcombine.low %v5242_v56, %v5258_v42  ;;  %v5262_v57 = vcombine.high %v5242_v56, %v5258_v42 }
 0x2dc   : > { %v20340_v52 = vrot.slane %v24555_v7, %v18227_v35  ;;  %v2823_v59 = vcombine.low %v20317_v0, %v20323_v30  ;;  %16555 = vmatpush3.xpose.msk.msra.mxu0 %vm7871_vm0, %v5055_v37  ;;  %16569 = vmatpush3.xpose.msk.msra.mxu1 %vm7871_vm0, %v5056_v20  ;;  %v20353_v46 = vrot.slane %v4208_v5, %v18244_v48  ;;  %v20366_v20 = vpop.permute.xlu1 %3339  ;;  %v20376_v17 = vpop.permute.xlu0 %3291 }
 0x2dd   : > { %v2787_v33 = vcombine.low %v19854_v34, %v19864_v14  ;;  %v2788_v51 = vcombine.high %v19854_v34, %v19864_v14  ;;  %v20361_v37 = vrot.slane %v4259_v23, %v18227_v35  ;;  %16576 = vmatprep.subr.msk.mxu0 %vm7871_vm0, %v5261_v50  ;;  %16590 = vmatprep.subr.msk.mxu1 %vm7871_vm0, %v5262_v57 }
 0x2de   : > { %v2839_v61 = vcombine.low %v20329_v8, %v20340_v52  ;;  %v2831_v10 = vrot.slane %v2823_v59, %v18244_v48  ;;  %v5160_v5 = vcombine.high %v20076_v22, %v20079_v55  ;;  %v1947_v63 = vrot.slane %v1939_v31, %v18244_v48 }
 0x2df   : > { %v1954_v34 = vrot.slane %v1940_v47, %v18244_v48  ;;  %v1963_v14 = vrot.slane %v1955_v3, %v18244_v48  ;;  %16557 = vmatmul.mubr.msk.f32.vlgmr.msra.gmra.mxu0 %vm7871_vm0, %v2787_v33  ;;  %16571 = vmatmul.mubr.msk.f32.vlgmr.msra.gmra.mxu1 %vm7871_vm0, %v2788_v51  ;;  %v1970_v23 = vrot.slane %v1956_v39, %v18244_v48 }
 0x2e0   : > { %v2847_v56 = vrot.slane %v2839_v61, %v18244_v48  ;;  %16577 = vmatpush3.xpose.msk.msra.mxu0 %vm7871_vm0, %v5261_v50  ;;  %16591 = vmatpush3.xpose.msk.msra.mxu1 %vm7871_vm0, %v5262_v57  ;;  %v20381_v22 = vrot.slane %v4223_v53, %v18244_v48  ;;  %v20384_v55 = vrot.slane %v4224_v45, %v18244_v48 }
 0x2e1   : > { %v5263_v31 = vcombine.low %v20306_v18, %v20353_v46  ;;  %v20389_v47 = vrot.slane %v4260_v6, %v18227_v35  ;;  %v5174_v3 = vrot.slane %v5160_v5, %v18244_v48  ;;  %v5176_v39 = vcombine.high %v20082_v29, %v20094_v38  ;;  %v20414_v29 = vpop.f32.mrf.mxu1 }
 0x2e2   : > { %v2855_v42 = vcombine.low %v2831_v10, %v2847_v56  ;;  %v2856_v7 = vcombine.high %v2831_v10, %v2847_v56  ;;  %v24556_v53 = vcombine.low %v20129_v27, %v20134_v60  ;;  %v2995_v59 = vcombine.low %v1947_v63, %v1954_v34  ;;  %24559 = vst [vmem:[#allocation54_spill] sm:$0xff] %v20414_v29 }
 0x2e3   : > { %v15670_v50 = vcombine.high %v1947_v63, %v1954_v34  ;;  %v24557_v6 = vcombine.high %v20129_v27, %v20134_v60  ;;  %v24558_v61 = vcombine.low %v20149_v21, %v20152_v12  ;;  %v3011_v38 = vcombine.low %v1963_v14, %v1970_v23  ;;  %v20423_v27 = vpop.permute.xlu1 %909  ;;  %v24561_v60 = vld [vmem:[#allocation50_spill] sm:$0xff] }
 0x2e4   : > { %16559 = vmatprep.mubr.msk.f32.mxu0 %vm7871_vm0, %v2855_v42  ;;  %16573 = vmatprep.mubr.msk.f32.mxu1 %vm7871_vm0, %v2856_v7  ;;  %v20400_v45 = vrot.slane %v24556_v53, %v18227_v35  ;;  %v15671_v51 = vcombine.high %v1963_v14, %v1970_v23  ;;  %v5190_v10 = vrot.slane %v5176_v39, %v18244_v48 }
 0x2e5   : > { %v20406_v57 = vrot.slane %v24557_v6, %v18227_v35  ;;  %v20412_v33 = vrot.slane %v24558_v61, %v18227_v35  ;;  %v24560_v56 = vcombine.high %v20149_v21, %v20152_v12  ;;  %v4243_v63 = vcombine.low %v24561_v60, %v20184_v41  ;;  %v20435_v21 = vpop.permute.xlu0 %957 }
 0x2e6   : > { %v2688_v42 = vcombine.high %v19957_v9, %v19970_v44  ;;  %v2704_v14 = vcombine.high %v19978_v32, %v19984_v49  ;;  %v4244_v23 = vcombine.high %v24561_v60, %v20184_v41  ;;  %v5193_v12 = vcombine.low %v5174_v3, %v5190_v10  ;;  %v20445_v32 = vpop.f32.mrf.mxu1 }
 0x2e7   : > { %v20421_v5 = vrot.slane %v24560_v56, %v18227_v35  ;;  %v2891_v34 = vcombine.low %v20400_v45, %v20406_v57  ;;  %v5194_v7 = vcombine.high %v5174_v3, %v5190_v10  ;;  %v20440_v53 = vrot.slane %v2995_v59, %v18227_v35  ;;  %24562 = vst [vmem:[#allocation61_spill] sm:$0xff] %v20445_v32 }
 0x2e8   : > { %v2702_v9 = vrot.slane %v2688_v42, %v18244_v48  ;;  %v2718_v44 = vrot.slane %v2704_v14, %v18244_v48  ;;  %v3010_v49 = vrot.slane %v15670_v50, %v18227_v35  ;;  %16578 = vmatprep.subr.msk.mxu0 %vm7871_vm0, %v5193_v12  ;;  %v5092_v3 = vcombine.high %v20190_v36, %v20193_v4  ;;  %v20460_v42 = vpop.permute.xlu1 %1005 }
 0x2e9   : > { %v2907_v39 = vcombine.low %v20412_v33, %v20421_v5  ;;  %v2899_v6 = vrot.slane %v2891_v34, %v18244_v48  ;;  %16592 = vmatprep.subr.msk.mxu1 %vm7871_vm0, %v5194_v7  ;;  %v3018_v59 = vrot.slane %v3011_v38, %v18227_v35  ;;  %v3026_v61 = vrot.slane %v15671_v51, %v18227_v35  ;;  %v20467_v51 = vpop.f32.mrf.mxu1 }
 0x2ea   : > { %16579 = vmatpush3.xpose.msk.msra.mxu0 %vm7871_vm0, %v5193_v12  ;;  %16593 = vmatpush3.xpose.msk.msra.mxu1 %vm7871_vm0, %v5194_v7  ;;  %v5108_v50 = vcombine.high %v20196_v40, %v20207_v43  ;;  %v2721_v60 = vcombine.low %v2702_v9, %v2718_v44  ;;  %v5106_v34 = vrot.slane %v5092_v3, %v18244_v48  ;;  %v20474_v7 = vpop.permute.xlu0 %3245 }
 0x2eb   : > { %v2915_v41 = vrot.slane %v2907_v39, %v18244_v48  ;;  %v2722_v14 = vcombine.high %v2702_v9, %v2718_v44  ;;  %v5024_v4 = vcombine.high %v20238_v2, %v20244_v28  ;;  %v5040_v38 = vcombine.high %v20264_v19, %v20270_v1  ;;  %24563 = vst [vmem:[#allocation60_spill] sm:$0xff] %v20467_v51 }
 0x2ec   : > { %v5122_v36 = vrot.slane %v5108_v50, %v18244_v48  ;;  %v15700_v43 = vcombine.high %v20306_v18, %v20353_v46  ;;  %v1991_v40 = vcombine.low %v20280_v58, %v20333_v11  ;;  %v4251_v12 = vrot.slane %v4243_v63, %v18227_v35  ;;  %v3294_v50 = vpop.permute.xlu1 %3293 }
 0x2ed   : > { %v2923_v10 = vcombine.low %v2899_v6, %v2915_v41  ;;  %v2924_v56 = vcombine.high %v2899_v6, %v2915_v41  ;;  %v1992_v2 = vcombine.high %v20280_v58, %v20333_v11  ;;  %v3027_v19 = vcombine.low %v20440_v53, %v3010_v49  ;;  %v20491_v11 = vpop.f32.mrf.mxu1 }
 0x2ee   : > { %v5125_v28 = vcombine.low %v5106_v34, %v5122_v36  ;;  %v5126_v1 = vcombine.high %v5106_v34, %v5122_v36  ;;  %v4258_v39 = vrot.slane %v4244_v23, %v18227_v35  ;;  %v5038_v63 = vrot.slane %v5024_v4, %v18244_v48  ;;  %24564 = vst [vmem:[#allocation63_spill] sm:$0xff] %v20491_v11  ;;  %v24565_v34 = vld [vmem:[#allocation68_spill] sm:$0xff]  ;;  %v3342_v36 = vpop.permute.xlu0 %3341 }
 0x2ef   : > { %16560 = vmatmul.mubr.msk.f32.gmra.mxu0 %vm7871_vm0, %v2923_v10  ;;  %16574 = vmatmul.mubr.msk.f32.gmra.mxu1 %vm7871_vm0, %v2924_v56  ;;  %v5054_v6 = vrot.slane %v5040_v38, %v18244_v48  ;;  %v5279_v9 = vcombine.low %v20381_v22, %v20384_v55  ;;  %v3028_v44 = vcombine.high %v20440_v53, %v3010_v49 }
 0x2f0   : > { %16584 = vmatprep.mubr.msk.f32.mxu0 %vm7871_vm0, %v2721_v60  ;;  %16598 = vmatprep.mubr.msk.f32.mxu1 %vm7871_vm0, %v2722_v14  ;;  %v3043_v58 = vcombine.low %v3018_v59, %v3026_v61  ;;  %v3044_v41 = vcombine.high %v3018_v59, %v3026_v61  ;;  %v4275_v3 = vcombine.low %v4251_v12, %v20361_v37 }
 0x2f1   : > { %16580 = vmatprep.subr.msk.mxu0 %vm7871_vm0, %v5125_v28  ;;  %16594 = vmatprep.subr.msk.mxu1 %vm7871_vm0, %v5126_v1  ;;  %v5057_v23 = vcombine.low %v5038_v63, %v5054_v6  ;;  %v15701_v10 = vcombine.high %v20381_v22, %v20384_v55  ;;  %v20499_v53 = vrot.slane %v1991_v40, %v18227_v35  ;;  %v24566_v40 = vld [vmem:[#allocation71_spill] sm:$0xff] }
 0x2f2   : > { %16581 = vmatpush3.xpose.msk.msra.mxu0 %vm7871_vm0, %v5125_v28  ;;  %16595 = vmatpush3.xpose.msk.msra.mxu1 %vm7871_vm0, %v5126_v1  ;;  %v4276_v49 = vcombine.high %v4251_v12, %v20361_v37  ;;  %v5058_v56 = vcombine.high %v5038_v63, %v5054_v6  ;;  %v20503_v60 = vrot.slane %v3027_v19, %v18244_v48 }
 0x2f3   : > { %v20506_v59 = vrot.slane %v1992_v2, %v18227_v35  ;;  %v4291_v61 = vcombine.low %v4258_v39, %v20389_v47  ;;  %v4311_v14 = vcombine.low %v24565_v34, %v20376_v17  ;;  %16582 = vmatprep.subr.msk.mxu0 %vm7871_vm0, %v5057_v23  ;;  %v20513_v4 = vrot.slane %v3028_v44, %v18244_v48  ;;  %v20521_v2 = vpop.f32.mrf.mxu1 }
 0x2f4   : > { %v20516_v37 = vrot.slane %v3043_v58, %v18244_v48  ;;  %v4395_v38 = vcombine.low %v20474_v7, %v3342_v36  ;;  %16596 = vmatprep.subr.msk.mxu1 %vm7871_vm0, %v5058_v56  ;;  %v4379_v12 = vcombine.low %v24566_v40, %v3294_v50  ;;  %24567 = vst [vmem:[#allocation62_spill] sm:$0xff] %v20521_v2 }
 0x2f5   : > { %v20524_v28 = vrot.slane %v3044_v41, %v18244_v48  ;;  %v20527_v1 = vrot.slane %v4275_v3, %v18244_v48  ;;  %v4292_v19 = vcombine.high %v4258_v39, %v20389_v47  ;;  %v20533_v63 = vrot.slane %v4276_v49, %v18244_v48 }
 0x2f6   : > { %16583 = vmatpush3.xpose.msk.msra.mxu0 %vm7871_vm0, %v5057_v23  ;;  %16597 = vmatpush3.xpose.msk.msra.mxu1 %vm7871_vm0, %v5058_v56  ;;  %v2789_v6 = vcombine.low %v19861_v62, %v19867_v13  ;;  %v2790_v44 = vcombine.high %v19861_v62, %v19867_v13  ;;  %v2824_v58 = vcombine.high %v20317_v0, %v20323_v30  ;;  %v20553_v13 = vpop.f32.mrf.mxu1 }
 0x2f7   : > { %v20542_v41 = vrot.slane %v4291_v61, %v18244_v48  ;;  %v4396_v47 = vcombine.high %v20474_v7, %v3342_v36  ;;  %v4380_v39 = vcombine.high %v24566_v40, %v3294_v50  ;;  %v2840_v3 = vcombine.high %v20329_v8, %v20340_v52  ;;  %24568 = vst [vmem:[#allocation21_spill] sm:$0xff] %v20553_v13 }
 0x2f8   : > { %v4403_v23 = vrot.slane %v4395_v38, %v18227_v35  ;;  %v4387_v49 = vrot.slane %v4379_v12, %v18227_v35  ;;  %v2838_v62 = vrot.slane %v2824_v58, %v18244_v48  ;;  %v4312_v0 = vcombine.high %v24565_v34, %v20376_v17 }
 0x2f9   : > { %16585 = vmatmul.mubr.msk.f32.vlgmr.msra.gmra.mxu0 %vm7871_vm0, %v2789_v6  ;;  %16599 = vmatmul.mubr.msk.f32.vlgmr.msra.gmra.mxu1 %vm7871_vm0, %v2790_v44  ;;  %v4319_v30 = vrot.slane %v4311_v14, %v18227_v35  ;;  %v4327_v8 = vcombine.low %v20308_v24, %v20366_v20  ;;  %v2854_v52 = vrot.slane %v2840_v3, %v18244_v48  ;;  %v24573_v3 = vld [vmem:[#allocation59_spill] sm:$0xff] }
 0x2fa   : > { %v20562_v7 = vrot.slane %v4292_v19, %v18244_v48  ;;  %v4328_v50 = vcombine.high %v20308_v24, %v20366_v20  ;;  %v2892_v56 = vcombine.high %v20400_v45, %v20406_v57  ;;  %v2908_v61 = vcombine.high %v20412_v33, %v20421_v5  ;;  %v20575_v24 = vpop.f32.mrf.mxu1 }
 0x2fb   : > { %v4410_v17 = vrot.slane %v4396_v47, %v18227_v35  ;;  %v4394_v34 = vrot.slane %v4380_v39, %v18227_v35  ;;  %v2857_v14 = vcombine.low %v2838_v62, %v2854_v52  ;;  %v2858_v36 = vcombine.high %v2838_v62, %v2854_v52  ;;  %24569 = vst [vmem:[#allocation22_spill] sm:$0xff] %v20575_v24 }
 0x2fc   : > { %v5331_v38 = vcombine.low %v20527_v1, %v20533_v63  ;;  %v4411_v40 = vcombine.low %v4387_v49, %v4403_v23  ;;  %v4412_v12 = vcombine.high %v4387_v49, %v4403_v23  ;;  %v2906_v19 = vrot.slane %v2892_v56, %v18244_v48  ;;  %v20611_v56 = vpop.f32.mrf.mxu1 }
 0x2fd   : > { %v4326_v20 = vrot.slane %v4312_v0, %v18227_v35  ;;  %v4335_v45 = vrot.slane %v4327_v8, %v18227_v35  ;;  %16587 = vmatprep.mubr.msk.f32.mxu0 %vm7871_vm0, %v2857_v14  ;;  %16601 = vmatprep.mubr.msk.f32.mxu1 %vm7871_vm0, %v2858_v36  ;;  %v24570_v57 = vcombine.low %v20199_v15, %v20202_v25 }
 0x2fe   : > { %v4342_v5 = vrot.slane %v4328_v50, %v18227_v35  ;;  %v2922_v6 = vrot.slane %v2908_v61, %v18244_v48  ;;  %v24571_v44 = vcombine.high %v20199_v15, %v20202_v25  ;;  %v24572_v47 = vcombine.low %v20213_v16, %v20216_v26  ;;  %24575 = vst [vmem:[#allocation45_spill] sm:$0xff] %v20611_v56 }
 0x2ff   : > { %v20585_v33 = vrot.slane %v24570_v57, %v18227_v35  ;;  %v1975_v23 = vcombine.low %v24573_v3, %v20258_v54  ;;  %v4427_v49 = vcombine.low %v4394_v34, %v4410_v17  ;;  %v4428_v62 = vcombine.high %v4394_v34, %v4410_v17 }
 0x300   : > { %v20593_v58 = vrot.slane %v24571_v44, %v18227_v35  ;;  %v20599_v39 = vrot.slane %v24572_v47, %v18227_v35  ;;  %v24574_v0 = vcombine.high %v20213_v16, %v20216_v26  ;;  %v4419_v15 = vrot.slane %v4411_v40, %v18244_v48 }
 0x301   : > { %v4426_v25 = vrot.slane %v4412_v12, %v18244_v48  ;;  %v2925_v52 = vcombine.low %v2906_v19, %v2922_v6  ;;  %v2926_v50 = vcombine.high %v2906_v19, %v2922_v6  ;;  %v1976_v61 = vcombine.high %v24573_v3, %v20258_v54  ;;  %v24576_v6 = vld [vmem:[#allocation69_spill] sm:$0xff] }
 0x302   : > { %v20607_v8 = vrot.slane %v24574_v0, %v18227_v35  ;;  %v4343_v14 = vcombine.low %v4319_v30, %v4335_v45  ;;  %v2959_v17 = vcombine.low %v20585_v33, %v20593_v58  ;;  %v4344_v26 = vcombine.high %v4319_v30, %v4335_v45 }
 0x303   : > { %v4359_v34 = vcombine.low %v4326_v20, %v4342_v5  ;;  %v4360_v36 = vcombine.high %v4326_v20, %v4342_v5  ;;  %16588 = vmatmul.mubr.msk.f32.gmra.mxu0 %vm7871_vm0, %v2925_v52  ;;  %16602 = vmatmul.mubr.msk.f32.gmra.mxu1 %vm7871_vm0, %v2926_v50  ;;  %v4435_v40 = vrot.slane %v4427_v49, %v18244_v48 }
 0x304   : > { %v2975_v16 = vcombine.low %v20599_v39, %v20607_v8  ;;  %v4442_v12 = vrot.slane %v4428_v62, %v18244_v48  ;;  %v2967_v54 = vrot.slane %v2959_v17, %v18244_v48  ;;  %v15702_v57 = vcombine.high %v20527_v1, %v20533_v63 }
 0x305   : > { %v2043_v30 = vcombine.low %v24576_v6, %v20435_v21  ;;  %v5467_v45 = vcombine.low %v4419_v15, %v4426_v25  ;;  %v15706_v20 = vcombine.high %v4419_v15, %v4426_v25  ;;  %v20629_v5 = vpop.f32.mrf.mxu1  ;;  %v1983_v44 = vrot.slane %v1975_v23, %v18227_v35 }
 0x306   : > { %v2983_v19 = vrot.slane %v2975_v16, %v18244_v48  ;;  %v2059_v47 = vcombine.low %v20423_v27, %v20460_v42  ;;  %v1990_v62 = vrot.slane %v1976_v61, %v18227_v35  ;;  %v2044_v0 = vcombine.high %v24576_v6, %v20435_v21 }
 0x307   : > { %v4351_v52 = vrot.slane %v4343_v14, %v18244_v48  ;;  %v4358_v50 = vrot.slane %v4344_v26, %v18244_v48  ;;  %v4367_v15 = vrot.slane %v4359_v34, %v18244_v48  ;;  %v4374_v25 = vrot.slane %v4360_v36, %v18244_v48 }
 0x308   : > { %v2991_v3 = vcombine.low %v2967_v54, %v2983_v19  ;;  %v2992_v49 = vcombine.high %v2967_v54, %v2983_v19  ;;  %v5483_v17 = vcombine.low %v4435_v40, %v4442_v12  ;;  %v9619_v23 = vsel %vm7871_vm0, %v20629_v5, -inf }
 0x309   : > { %v2060_v61 = vcombine.high %v20423_v27, %v20460_v42  ;;  %v15707_v21 = vcombine.high %v4435_v40, %v4442_v12  ;;  %v20648_v14 = vrot.slane %v5467_v45, %v18227_v35  ;;  %v20651_v16 = vrot.slane %v15706_v20, %v18227_v35  ;;  %9620 = vmax.xlane.f32.xlu0 %v9619_v23 }
 0x30a   : > { %16612 = vmatprep.mubr.msk.f32.mxu0 %vm7871_vm0, %v2991_v3  ;;  %16626 = vmatprep.mubr.msk.f32.mxu1 %vm7871_vm0, %v2992_v49  ;;  %v5347_v26 = vcombine.low %v20542_v41, %v20562_v7  ;;  %v2007_v34 = vcombine.low %v1983_v44, %v20499_v53  ;;  %v2008_v36 = vcombine.high %v1983_v44, %v20499_v53 }
 0x30b   : > { %v2067_v54 = vrot.slane %v2059_v47, %v18227_v35  ;;  %v15703_v27 = vcombine.high %v20542_v41, %v20562_v7  ;;  %v2051_v42 = vrot.slane %v2043_v30, %v18227_v35  ;;  %v5399_v40 = vcombine.low %v4351_v52, %v4358_v50 }
 0x30c   : > { %v15704_v12 = vcombine.high %v4351_v52, %v4358_v50  ;;  %v2023_v19 = vcombine.low %v1990_v62, %v20506_v59  ;;  %v5415_v6 = vcombine.low %v4367_v15, %v4374_v25  ;;  %v15705_v45 = vcombine.high %v4367_v15, %v4374_v25 }
 0x30d   : > { %v20663_v20 = vrot.slane %v5483_v17, %v18227_v35  ;;  %v2058_v3 = vrot.slane %v2044_v0, %v18227_v35  ;;  %v2074_v53 = vrot.slane %v2060_v61, %v18227_v35  ;;  %v20668_v44 = vrot.slane %v15707_v21, %v18227_v35 }
 0x30e   : > { %v5499_v41 = vcombine.low %v20648_v14, %v20651_v16  ;;  %v20673_v7 = vrot.slane %v2007_v34, %v18244_v48  ;;  %v20676_v30 = vrot.slane %v2008_v36, %v18244_v48  ;;  %v2024_v47 = vcombine.high %v1990_v62, %v20506_v59 }
 0x30f   : > { %v2075_v49 = vcombine.low %v2051_v42, %v2067_v54  ;;  %v5515_v0 = vcombine.low %v20663_v20, %v20668_v44  ;;  %v20683_v50 = vrot.slane %v5399_v40, %v18227_v35  ;;  %v20686_v15 = vrot.slane %v15704_v12, %v18227_v35 }
 0x310   : > { %v5507_v52 = vrot.slane %v5499_v41, %v18244_v48  ;;  %v20689_v25 = vrot.slane %v2023_v19, %v18244_v48  ;;  %v2076_v17 = vcombine.high %v2051_v42, %v2067_v54  ;;  %v20692_v23 = vrot.slane %v5415_v6, %v18227_v35 }
 0x311   : > { %v20695_v59 = vrot.slane %v15705_v45, %v18227_v35  ;;  %v2091_v62 = vcombine.low %v2058_v3, %v2074_v53  ;;  %v2092_v61 = vcombine.high %v2058_v3, %v2074_v53  ;;  %v5523_v21 = vrot.slane %v5515_v0, %v18244_v48  ;;  %v20718_v3 = vpop.f32.mrf.mxu1 }
 0x312   : > { %v5431_v34 = vcombine.low %v20683_v50, %v20686_v15  ;;  %v20701_v36 = vrot.slane %v2024_v47, %v18244_v48  ;;  %v20709_v54 = vrot.slane %v5331_v38, %v18227_v35  ;;  %v20712_v42 = vrot.slane %v15702_v57, %v18227_v35 }
 0x313   : > { %v5447_v40 = vcombine.low %v20692_v23, %v20695_v59  ;;  %v20715_v12 = vrot.slane %v2075_v49, %v18244_v48  ;;  %v5531_v19 = vcombine.low %v5507_v52, %v5523_v21  ;;  %v5532_v6 = vcombine.high %v5507_v52, %v5523_v21 }
 0x314   : > { %v5439_v45 = vrot.slane %v5431_v34, %v18244_v48  ;;  %v20722_v41 = vrot.slane %v5347_v26, %v18227_v35  ;;  %v20725_v1 = vrot.slane %v15703_v27, %v18227_v35  ;;  %v5363_v63 = vcombine.low %v20709_v54, %v20712_v42 }
 0x315   : > { %v5455_v53 = vrot.slane %v5447_v40, %v18244_v48  ;;  %v20730_v38 = vrot.slane %v2076_v17, %v18244_v48  ;;  %v20733_v57 = vrot.slane %v2091_v62, %v18244_v48  ;;  %v20736_v47 = vrot.slane %v2092_v61, %v18244_v48  ;;  %16604 = vmatprep.subr.msk.mxu0 %vm7871_vm0, %v5531_v19 }
 0x316   : > { %16618 = vmatprep.subr.msk.mxu1 %vm7871_vm0, %v5532_v6  ;;  %16605 = vmatpush3.xpose.msk.msra.mxu0 %vm7871_vm0, %v5531_v19  ;;  %v20746_v49 = vrot.slane %v5263_v31, %v18227_v35  ;;  %v9616_v52 = vsel %vm7871_vm0, %v20718_v3, -inf  ;;  %v3063_v0 = vcombine.low %v20673_v7, %v20676_v30  ;;  %v15672_v17 = vcombine.high %v20673_v7, %v20676_v30  ;;  %v20758_v21 = vpop.f32.mrf.mxu1 }
 0x317   : > { %16619 = vmatpush3.xpose.msk.msra.mxu1 %vm7871_vm0, %v5532_v6  ;;  %v5463_v26 = vcombine.low %v5439_v45, %v5455_v53  ;;  %v5464_v27 = vcombine.high %v5439_v45, %v5455_v53  ;;  %v3079_v62 = vcombine.low %v20689_v25, %v20701_v36  ;;  %v15673_v61 = vcombine.high %v20689_v25, %v20701_v36 }
 0x318   : > { %9617 = vmax.xlane.f32.xlu0 %v9616_v52  ;;  %v5371_v31 = vrot.slane %v5363_v63, %v18244_v48  ;;  %v5379_v34 = vcombine.low %v20722_v41, %v20725_v1  ;;  %v20769_v7 = vrot.slane %v15700_v43, %v18227_v35  ;;  %v9625_v30 = vsel %vm7871_vm0, %v20758_v21, -inf  ;;  %v20785_v18 = vpop.f32.mrf.mxu1 }
 0x319   : > { %16606 = vmatprep.subr.msk.mxu0 %vm7871_vm0, %v5463_v26  ;;  %16620 = vmatprep.subr.msk.mxu1 %vm7871_vm0, %v5464_v27  ;;  %v3131_v25 = vcombine.low %v20715_v12, %v20730_v38  ;;  %v15674_v36 = vcombine.high %v20715_v12, %v20730_v38  ;;  %v3147_v40 = vcombine.low %v20733_v57, %v20736_v47  ;;  %v9622_v53 = vsel %vm7871_vm0, %v20785_v18, -inf }
 0x31a   : > { %v20783_v19 = vrot.slane %v5279_v9, %v18227_v35  ;;  %9626 = vmax.xlane.f32.xlu1 %v9625_v30  ;;  %16607 = vmatpush3.xpose.msk.msra.mxu0 %vm7871_vm0, %v5463_v26  ;;  %v5387_v46 = vrot.slane %v5379_v34, %v18244_v48  ;;  %v20794_v43 = vrot.slane %v15701_v10, %v18227_v35 }
 0x31b   : > { %16621 = vmatpush3.xpose.msk.msra.mxu1 %vm7871_vm0, %v5464_v27  ;;  %v5295_v12 = vcombine.low %v20746_v49, %v20769_v7  ;;  %v15675_v9 = vcombine.high %v20733_v57, %v20736_v47  ;;  %v5500_v6 = vcombine.high %v20648_v14, %v20651_v16  ;;  %v5516_v45 = vcombine.high %v20663_v20, %v20668_v44  ;;  %v20806_v63 = vpop.f32.mrf.mxu1 }
 0x31c   : > { %v5395_v22 = vcombine.low %v5371_v31, %v5387_v46  ;;  %v5396_v55 = vcombine.high %v5371_v31, %v5387_v46  ;;  %v5311_v38 = vcombine.low %v20783_v19, %v20794_v43  ;;  %v3059_v14 = vcombine.low %v20503_v60, %v20516_v37 }
 0x31d   : > { %v5303_v10 = vrot.slane %v5295_v12, %v18244_v48  ;;  %v5514_v57 = vrot.slane %v5500_v6, %v18244_v48  ;;  %v5530_v47 = vrot.slane %v5516_v45, %v18244_v48  ;;  %v3060_v16 = vcombine.high %v20503_v60, %v20516_v37  ;;  %v20833_v31 = vpop.f32.mrf.mxu1 }
 0x31e   : > { %9623 = vmax.xlane.f32.xlu1 %v9622_v53  ;;  %16608 = vmatprep.subr.msk.mxu0 %vm7871_vm0, %v5395_v22  ;;  %v5319_v20 = vrot.slane %v5311_v38, %v18244_v48  ;;  %v20821_v44 = vrot.slane %v3063_v0, %v18227_v35  ;;  %v20824_v26 = vrot.slane %v15672_v17, %v18227_v35  ;;  %v9631_v27 = vsel %vm7871_vm0, %v20806_v63, -inf }
 0x31f   : > { %16622 = vmatprep.subr.msk.mxu1 %vm7871_vm0, %v5396_v55  ;;  %16609 = vmatpush3.xpose.msk.msra.mxu0 %vm7871_vm0, %v5395_v22  ;;  %v5533_v60 = vcombine.low %v5514_v57, %v5530_v47  ;;  %v5534_v37 = vcombine.high %v5514_v57, %v5530_v47  ;;  %v20831_v52 = vrot.slane %v3079_v62, %v18227_v35 }
 0x320   : > { %16623 = vmatpush3.xpose.msk.msra.mxu1 %vm7871_vm0, %v5396_v55  ;;  %v5327_v34 = vcombine.low %v5303_v10, %v5319_v20  ;;  %v5328_v0 = vcombine.high %v5303_v10, %v5319_v20  ;;  %v20836_v30 = vrot.slane %v15673_v61, %v18227_v35  ;;  %v3095_v17 = vcombine.low %v20821_v44, %v20824_v26 }
 0x321   : > { %9632 = vmax.xlane.f32.xlu0 %v9631_v27  ;;  %v5432_v46 = vcombine.high %v20683_v50, %v20686_v15  ;;  %v5448_v12 = vcombine.high %v20692_v23, %v20695_v59  ;;  %v20845_v62 = vrot.slane %v3131_v25, %v18227_v35  ;;  %v20848_v6 = vrot.slane %v15674_v36, %v18227_v35  ;;  %v20865_v25 = vpop.f32.mrf.mxu1 }
 0x322   : > { %16610 = vmatprep.subr.msk.mxu0 %vm7871_vm0, %v5327_v34  ;;  %16624 = vmatprep.subr.msk.mxu1 %vm7871_vm0, %v5328_v0  ;;  %v3103_v61 = vrot.slane %v3095_v17, %v18244_v48  ;;  %v3111_v45 = vcombine.low %v20831_v52, %v20836_v30  ;;  %v20856_v50 = vrot.slane %v3147_v40, %v18227_v35  ;;  %v9637_v22 = vsel %vm7871_vm0, %v20865_v25, -inf }
 0x323   : > { %16611 = vmatpush3.xpose.msk.msra.mxu0 %vm7871_vm0, %v5327_v34  ;;  %v5446_v15 = vrot.slane %v5432_v46, %v18244_v48  ;;  %v5462_v23 = vrot.slane %v5448_v12, %v18244_v48  ;;  %v20863_v59 = vrot.slane %v15675_v9, %v18227_v35  ;;  %v3163_v40 = vcombine.low %v20845_v62, %v20848_v6 }
 0x324   : > { %16625 = vmatpush3.xpose.msk.msra.mxu1 %vm7871_vm0, %v5328_v0  ;;  %16632 = vmatprep.subr.msk.mxu0 %vm7871_vm0, %v5533_v60  ;;  %v3119_v36 = vrot.slane %v3111_v45, %v18244_v48  ;;  %v2960_v53 = vcombine.high %v20585_v33, %v20593_v58  ;;  %v2976_v38 = vcombine.high %v20599_v39, %v20607_v8  ;;  %v20883_v58 = vpop.f32.mrf.mxu1 }
 0x325   : > { %16646 = vmatprep.subr.msk.mxu1 %vm7871_vm0, %v5534_v37  ;;  %v5465_v55 = vcombine.low %v5446_v15, %v5462_v23  ;;  %v5466_v9 = vcombine.high %v5446_v15, %v5462_v23  ;;  %v3179_v10 = vcombine.low %v20856_v50, %v20863_v59  ;;  %9638 = vmax.xlane.f32.xlu0 %v9637_v22  ;;  %v9634_v0 = vsel %vm7871_vm0, %v20883_v58, -inf }
 0x326   : > { %16613 = vmatmul.mubr.msk.f32.vlgmr.msra.gmra.mxu0 %vm7871_vm0, %v3059_v14  ;;  %v3127_v57 = vcombine.low %v3103_v61, %v3119_v36  ;;  %v3128_v47 = vcombine.high %v3103_v61, %v3119_v36  ;;  %v3171_v33 = vrot.slane %v3163_v40, %v18244_v48  ;;  %v2974_v27 = vrot.slane %v2960_v53, %v18244_v48 }
 0x327   : > { %16627 = vmatmul.mubr.msk.f32.vlgmr.msra.gmra.mxu1 %vm7871_vm0, %v3060_v16  ;;  %16633 = vmatpush3.xpose.msk.msra.mxu0 %vm7871_vm0, %v5533_v60  ;;  %v3187_v20 = vrot.slane %v3179_v10, %v18244_v48  ;;  %v2990_v39 = vrot.slane %v2976_v38, %v18244_v48  ;;  %v5364_v8 = vcombine.high %v20709_v54, %v20712_v42 }
 0x328   : > { %16647 = vmatpush3.xpose.msk.msra.mxu1 %vm7871_vm0, %v5534_v37  ;;  %16615 = vmatprep.mubr.msk.f32.mxu0 %vm7871_vm0, %v3127_v57  ;;  %v5380_v14 = vcombine.high %v20722_v41, %v20725_v1  ;;  %v5296_v16 = vcombine.high %v20746_v49, %v20769_v7  ;;  %v5312_v41 = vcombine.high %v20783_v19, %v20794_v43  ;;  %v24577_v1 = vld [vmem:[#allocation51_spill] sm:$0xff]  ;;  %v24578_v49 = vld [vmem:[#allocation52_spill] sm:$0xff]  ;;  %v24581_v19 = vld [vmem:[#allocation53_spill] sm:$0xff] }
 0x329   : > { %16629 = vmatprep.mubr.msk.f32.mxu1 %vm7871_vm0, %v3128_v47  ;;  %16634 = vmatprep.subr.msk.mxu0 %vm7871_vm0, %v5465_v55  ;;  %v3195_v60 = vcombine.low %v3171_v33, %v3187_v20  ;;  %v3196_v37 = vcombine.high %v3171_v33, %v3187_v20  ;;  %v2993_v34 = vcombine.low %v2974_v27, %v2990_v39  ;;  %v24582_v43 = vld [vmem:[#allocation55_spill] sm:$0xff] }
 0x32a   : > { %16648 = vmatprep.subr.msk.mxu1 %vm7871_vm0, %v5466_v9  ;;  %v2994_v17 = vcombine.high %v2974_v27, %v2990_v39  ;;  %v5378_v46 = vrot.slane %v5364_v8, %v18244_v48  ;;  %v5394_v54 = vrot.slane %v5380_v14, %v18244_v48  ;;  %v5310_v42 = vrot.slane %v5296_v16, %v18244_v48  ;;  %v24585_v14 = vld [vmem:[#allocation78_spill] sm:$0xff] }
 0x32b   : > { %9635 = vmax.xlane.f32.xlu0 %v9634_v0  ;;  %16616 = vmatmul.mubr.msk.f32.gmra.mxu0 %vm7871_vm0, %v3195_v60  ;;  %v24579_v7 = vcombine.low %v24577_v1, %v24578_v49  ;;  %v24580_v61 = vcombine.high %v24577_v1, %v24578_v49  ;;  %v24583_v36 = vcombine.low %v24581_v19, %v24582_v43 }
 0x32c   : > { %16630 = vmatmul.mubr.msk.f32.gmra.mxu1 %vm7871_vm0, %v3196_v37  ;;  %16635 = vmatpush3.xpose.msk.msra.mxu0 %vm7871_vm0, %v5465_v55  ;;  %v5397_v15 = vcombine.low %v5378_v46, %v5394_v54  ;;  %v5398_v23 = vcombine.high %v5378_v46, %v5394_v54  ;;  %v5326_v53 = vrot.slane %v5312_v41, %v18244_v48 }
 0x32d   : > { %v20913_v12 = vrot.slane %v24579_v7, %v18227_v35  ;;  %v20919_v45 = vrot.slane %v24580_v61, %v18227_v35  ;;  %16640 = vmatprep.mubr.msk.f32.mxu0 %vm7871_vm0, %v2993_v34  ;;  %v20927_v40 = vrot.slane %v24583_v36, %v18227_v35  ;;  %16649 = vmatpush3.xpose.msk.msra.mxu1 %vm7871_vm0, %v5466_v9  ;;  %v24593_v61 = vld [vmem:[#allocation37_spill] sm:$0xff] }
 0x32e   : > { %16654 = vmatprep.mubr.msk.f32.mxu1 %vm7871_vm0, %v2994_v17  ;;  %v24584_v22 = vcombine.high %v24581_v19, %v24582_v43  ;;  %16636 = vmatprep.subr.msk.mxu0 %vm7871_vm0, %v5397_v15  ;;  %v3061_v9 = vcombine.low %v20513_v4, %v20524_v28  ;;  %v3062_v38 = vcombine.high %v20513_v4, %v20524_v28  ;;  %v24586_v4 = vld [vmem:[#allocation79_spill] sm:$0xff] }
 0x32f   : > { %v7019_v10 = vcombine.low %v20913_v12, %v20919_v45  ;;  %16650 = vmatprep.subr.msk.mxu1 %vm7871_vm0, %v5398_v23  ;;  %v3096_v57 = vcombine.high %v20821_v44, %v20824_v26  ;;  %v5329_v47 = vcombine.low %v5310_v42, %v5326_v53  ;;  %v5330_v33 = vcombine.high %v5310_v42, %v5326_v53 }
 0x330   : > { %v20936_v55 = vrot.slane %v24584_v22, %v18227_v35  ;;  %16637 = vmatpush3.xpose.msk.msra.mxu0 %vm7871_vm0, %v5397_v15  ;;  %v3112_v8 = vcombine.high %v20831_v52, %v20836_v30  ;;  %v24587_v28 = vcombine.low %v24585_v14, %v24586_v4  ;;  %v24588_v44 = vcombine.high %v24585_v14, %v24586_v4  ;;  %v24589_v52 = vld [vmem:[#allocation80_spill] sm:$0xff]  ;;  %v24590_v30 = vld [vmem:[#allocation81_spill] sm:$0xff]  ;;  %v24594_v15 = vld [vmem:[#allocation38_spill] sm:$0xff] }
 0x331   : > { %v7027_v20 = vrot.slane %v7019_v10, %v18244_v48  ;;  %v3110_v39 = vrot.slane %v3096_v57, %v18244_v48  ;;  %16651 = vmatpush3.xpose.msk.msra.mxu1 %vm7871_vm0, %v5398_v23  ;;  %16638 = vmatprep.subr.msk.mxu0 %vm7871_vm0, %v5329_v47  ;;  %v24591_v37 = vcombine.low %v24589_v52, %v24590_v30  ;;  %v24597_v10 = vld [vmem:[#allocation39_spill] sm:$0xff]  ;;  %v24598_v57 = vld [vmem:[#allocation40_spill] sm:$0xff] }
 0x332   : > { %v7035_v27 = vcombine.low %v20927_v40, %v20936_v55  ;;  %v20959_v16 = vrot.slane %v24587_v28, %v18227_v35  ;;  %v20965_v26 = vrot.slane %v24588_v44, %v18227_v35  ;;  %v24592_v0 = vcombine.high %v24589_v52, %v24590_v30  ;;  %16652 = vmatprep.subr.msk.mxu1 %vm7871_vm0, %v5330_v33 }
 0x333   : > { %v20974_v34 = vrot.slane %v24591_v37, %v18227_v35  ;;  %v3126_v46 = vrot.slane %v3112_v8, %v18244_v48  ;;  %v3164_v42 = vcombine.high %v20845_v62, %v20848_v6  ;;  %v3180_v41 = vcombine.high %v20856_v50, %v20863_v59  ;;  %v24602_v8 = vld [vmem:[#allocation43_spill] sm:$0xff] }
 0x334   : > { %v7043_v60 = vrot.slane %v7035_v27, %v18244_v48  ;;  %v20980_v17 = vrot.slane %v24592_v0, %v18227_v35  ;;  %v6951_v54 = vcombine.low %v20959_v16, %v20965_v26  ;;  %v24595_v23 = vcombine.low %v24593_v61, %v24594_v15  ;;  %16639 = vmatpush3.xpose.msk.msra.mxu0 %vm7871_vm0, %v5329_v47 }
 0x335   : > { %v3129_v43 = vcombine.low %v3110_v39, %v3126_v46  ;;  %v3130_v36 = vcombine.high %v3110_v39, %v3126_v46  ;;  %v3178_v6 = vrot.slane %v3164_v42, %v18244_v48  ;;  %16653 = vmatpush3.xpose.msk.msra.mxu1 %vm7871_vm0, %v5330_v33  ;;  %v3194_v59 = vrot.slane %v3180_v41, %v18244_v48  ;;  %v24601_v39 = vld [vmem:[#allocation42_spill] sm:$0xff]  ;;  %v24606_v42 = vld [vmem:[#allocation47_spill] sm:$0xff] }
 0x336   : > { %v7051_v1 = vcombine.low %v7027_v20, %v7043_v60  ;;  %v7052_v49 = vcombine.high %v7027_v20, %v7043_v60  ;;  %v6967_v7 = vcombine.low %v20974_v34, %v20980_v17  ;;  %v20996_v19 = vrot.slane %v24595_v23, %v18227_v35 }
 0x337   : > { %v6959_v62 = vrot.slane %v6951_v54, %v18244_v48  ;;  %v24596_v53 = vcombine.high %v24593_v61, %v24594_v15  ;;  %v24599_v47 = vcombine.low %v24597_v10, %v24598_v57  ;;  %v24600_v33 = vcombine.high %v24597_v10, %v24598_v57  ;;  %16641 = vmatmul.mubr.msk.f32.vlgmr.msra.gmra.mxu0 %vm7871_vm0, %v3061_v9  ;;  %v24605_v54 = vld [vmem:[#allocation46_spill] sm:$0xff] }
 0x338   : > { %16660 = vmatprep.subr.mxu0 %v7051_v1  ;;  %v6975_v50 = vrot.slane %v6967_v7, %v18244_v48  ;;  %16674 = vmatprep.subr.mxu1 %v7052_v49  ;;  %v24603_v14 = vcombine.low %v24601_v39, %v24602_v8  ;;  %v24604_v28 = vcombine.high %v24601_v39, %v24602_v8  ;;  %v21060_v39 = vpop.f32.mrf.mxu1 }
 0x339   : > { %v6866_v22 = vrot.slane %v24596_v53, %v18227_v35  ;;  %v6874_v20 = vrot.slane %v24599_v47, %v18227_v35  ;;  %v6882_v27 = vrot.slane %v24600_v33, %v18227_v35  ;;  %v3197_v30 = vcombine.low %v3178_v6, %v3194_v59  ;;  %16655 = vmatmul.mubr.msk.f32.vlgmr.msra.gmra.mxu1 %vm7871_vm0, %v3062_v38 }
 0x33a   : > { %v21020_v4 = vrot.slane %v24603_v14, %v18227_v35  ;;  %v6798_v44 = vrot.slane %v24604_v28, %v18227_v35  ;;  %v6983_v60 = vcombine.low %v6959_v62, %v6975_v50  ;;  %v6984_v52 = vcombine.high %v6959_v62, %v6975_v50  ;;  %16643 = vmatprep.mubr.msk.f32.mxu0 %vm7871_vm0, %v3129_v43 }
 0x33b   : > { %v3198_v37 = vcombine.high %v3178_v6, %v3194_v59  ;;  %v6883_v0 = vcombine.low %v20996_v19, %v6866_v22  ;;  %v6899_v46 = vcombine.low %v6874_v20, %v6882_v27  ;;  %v24607_v41 = vcombine.low %v24605_v54, %v24606_v42  ;;  %16657 = vmatprep.mubr.msk.f32.mxu1 %vm7871_vm0, %v3130_v36 }
 0x33c   : > { %16661 = vmatpush3.msra.mxu0 %v7051_v1  ;;  %v24608_v9 = vcombine.high %v24605_v54, %v24606_v42  ;;  %v6815_v38 = vcombine.low %v21020_v4, %v6798_v44  ;;  %v7020_v15 = vcombine.high %v20913_v12, %v20919_v45  ;;  %16675 = vmatpush3.msra.mxu1 %v7052_v49 }
 0x33d   : > { %v6806_v7 = vrot.slane %v24607_v41, %v18227_v35  ;;  %16662 = vmatprep.subr.mxu0 %v6983_v60  ;;  %v6891_v23 = vrot.slane %v6883_v0, %v18244_v48  ;;  %v6907_v43 = vrot.slane %v6899_v46, %v18244_v48  ;;  %v7036_v36 = vcombine.high %v20927_v40, %v20936_v55 }
 0x33e   : > { %v6814_v61 = vrot.slane %v24608_v9, %v18227_v35  ;;  %16676 = vmatprep.subr.mxu1 %v6984_v52  ;;  %16663 = vmatpush3.msra.mxu0 %v6983_v60  ;;  %v6823_v1 = vrot.slane %v6815_v38, %v18244_v48  ;;  %v7034_v6 = vrot.slane %v7020_v15, %v18244_v48  ;;  %v9628_v15 = vsel %vm7871_vm0, %v20833_v31, -inf }
 0x33f   : > { %16677 = vmatpush3.msra.mxu1 %v6984_v52  ;;  %16644 = vmatmul.mubr.msk.f32.gmra.mxu0 %vm7871_vm0, %v3197_v30  ;;  %v6915_v12 = vcombine.low %v6891_v23, %v6907_v43  ;;  %v6916_v45 = vcombine.high %v6891_v23, %v6907_v43  ;;  %v7050_v49 = vrot.slane %v7036_v36, %v18244_v48 }
 0x340   : > { %v6831_v62 = vcombine.low %v6806_v7, %v6814_v61  ;;  %16658 = vmatmul.mubr.msk.f32.gmra.mxu1 %vm7871_vm0, %v3198_v37  ;;  %v6952_v40 = vcombine.high %v20959_v16, %v20965_v26  ;;  %v6968_v55 = vcombine.high %v20974_v34, %v20980_v17  ;;  %v6884_v59 = vcombine.high %v20996_v19, %v6866_v22 }
 0x341   : > { %16664 = vmatprep.subr.mxu0 %v6915_v12  ;;  %16678 = vmatprep.subr.mxu1 %v6916_v45  ;;  %v6900_v53 = vcombine.high %v6874_v20, %v6882_v27  ;;  %v21058_v33 = vcombine.low %v7034_v6, %v7050_v49  ;;  %v21065_v17 = vcombine.high %v7034_v6, %v7050_v49 }
 0x342   : > { %v6839_v50 = vrot.slane %v6831_v62, %v18244_v48  ;;  %16665 = vmatpush3.msra.mxu0 %v6915_v12  ;;  %16679 = vmatpush3.msra.mxu1 %v6916_v45  ;;  %v6966_v47 = vrot.slane %v6952_v40, %v18244_v48  ;;  %v6982_v16 = vrot.slane %v6968_v55, %v18244_v48  ;;  %v9643_v40 = vsel %vm7871_vm0, %v21060_v39, -inf }
 0x343   : > { %24609 = vst [vmem:[#allocation44_spill] sm:$0xff] %v21058_v33  ;;  %v6898_v26 = vrot.slane %v6884_v59, %v18244_v48  ;;  %v6914_v34 = vrot.slane %v6900_v53, %v18244_v48  ;;  %24610 = vst [vmem:[#allocation57_spill] sm:$0xff] %v21065_v17  ;;  %v6816_v19 = vcombine.high %v21020_v4, %v6798_v44  ;;  %v21080_v4 = vpop.f32.mrf.mxu1 }
 0x344   : > { %v6847_v10 = vcombine.low %v6823_v1, %v6839_v50  ;;  %v6848_v57 = vcombine.high %v6823_v1, %v6839_v50  ;;  %v6832_v22 = vcombine.high %v6806_v7, %v6814_v61  ;;  %v21068_v20 = vcombine.low %v6966_v47, %v6982_v16 }
 0x345   : > { %v21070_v27 = vcombine.low %v6898_v26, %v6914_v34  ;;  %v21072_v8 = vcombine.high %v6966_v47, %v6982_v16  ;;  %v6830_v14 = vrot.slane %v6816_v19, %v18244_v48  ;;  %v21078_v60 = vcombine.high %v6898_v26, %v6914_v34  ;;  %v21086_v30 = vpop.f32.mrf.mxu1 }
 0x346   : > { %16666 = vmatprep.subr.mxu0 %v6847_v10  ;;  %16680 = vmatprep.subr.mxu1 %v6848_v57  ;;  %24611 = vst [vmem:[#allocation56_spill] sm:$0xff] %v21068_v20  ;;  %v6846_v28 = vrot.slane %v6832_v22, %v18244_v48  ;;  %v9640_v16 = vsel %vm7871_vm0, %v21080_v4, -inf  ;;  %v9649_v22 = vsel %vm7871_vm0, %v21086_v30, -inf }
 0x347   : > { %16667 = vmatpush3.msra.mxu0 %v6847_v10  ;;  %16681 = vmatpush3.msra.mxu1 %v6848_v57  ;;  %24612 = vst [vmem:[#allocation25_spill] sm:$0xff] %v21070_v27  ;;  %24613 = vst [vmem:[#allocation27_spill] sm:$0xff] %v21072_v8  ;;  %v21088_v37 = vpop.f32.mrf.mxu1 }
 0x348   : > { %16688 = vmatprep.subr.mxu0 %v21058_v33  ;;  %16702 = vmatprep.subr.mxu1 %v21065_v17  ;;  %24614 = vst [vmem:[#allocation29_spill] sm:$0xff] %v21078_v60  ;;  %v21082_v44 = vcombine.low %v6830_v14, %v6846_v28  ;;  %v21084_v52 = vcombine.high %v6830_v14, %v6846_v28 }
 0x34a   : > { %24615 = vst [vmem:[#allocation70_spill] sm:$0xff] %v21082_v44  ;;  %24616 = vst [vmem:[#allocation33_spill] sm:$0xff] %v21084_v52 }
 0x34b   : > { %v21090_v0 = vpop.f32.mrf.mxu1 }
 0x34c   : > { %v9655_v46 = vsel %vm7871_vm0, %v21090_v0, -inf }
 0x34d   : > { %v21094_v54 = vpop.f32.mrf.mxu1  ;;  %9656 = vmax.xlane.f32.xlu0 %v9655_v46 }
 0x34e   : > { %v9652_v42 = vsel %vm7871_vm0, %v21094_v54, -inf }
 0x351   : > { %9653 = vmax.xlane.f32.xlu0 %v9652_v42 }
 0x353   : > { %v21098_v41 = vpop.f32.mrf.mxu0 }
 0x354   : > { %v9667_v7 = vsel %vm7871_vm0, %v21098_v41, -inf }
 0x355   : > { %9668 = vmax.xlane.f32.xlu1 %v9667_v7  ;;  %v21102_v9 = vpop.f32.mrf.mxu1  ;;  %v21110_v23 = vpop.f32.mrf.mxu0 }
 0x356   : > { %v9661_v61 = vsel %vm7871_vm0, %v21102_v9, -inf  ;;  %v9664_v36 = vsel %vm7871_vm0, %v21110_v23, -inf }
 0x357   : > { %v21106_v38 = vpop.f32.mrf.mxu1  ;;  %9662 = vmax.xlane.f32.xlu0 %v9661_v61  ;;  %v9646_v61 = vsel %vm7871_vm0, %v21088_v37, -inf }
 0x358   : > { %v9658_v43 = vsel %vm7871_vm0, %v21106_v38, -inf }
 0x359   : > { %9629 = vmax.xlane.f32.xlu1 %v9628_v15 }
 0x35b   : > { %9659 = vmax.xlane.f32.xlu0 %v9658_v43 }
 0x35d   : > { %9665 = vmax.xlane.f32.xlu1 %v9664_v36 }
 0x360   : > { %v21116_v1 = vpop.f32.mrf.mxu0 }
 0x361   : > { %v9673_v62 = vsel %vm7871_vm0, %v21116_v1, -inf }
 0x362   : > { %v21120_v6 = vpop.f32.mrf.mxu0  ;;  %9674 = vmax.xlane.f32.xlu1 %v9673_v62 }
 0x363   : > { %v9670_v12 = vsel %vm7871_vm0, %v21120_v6, -inf }
 0x366   : > { %9671 = vmax.xlane.f32.xlu1 %v9670_v12 }
 0x367   : > { %v21124_v45 = vpop.f32.mrf.mxu1 }
 0x368   : > { %v9679_v49 = vsel %vm7871_vm0, %v21124_v45, -inf }
 0x369   : > { %v21128_v50 = vpop.f32.mrf.mxu1  ;;  %9680 = vmax.xlane.f32.xlu0 %v9679_v49  ;;  %v21132_v55 = vpop.f32.mrf.mxu0 }
 0x36a   : > { %9644 = vmax.xlane.f32.xlu1 %v9643_v40  ;;  %v9676_v59 = vsel %vm7871_vm0, %v21128_v50, -inf  ;;  %v9691_v53 = vsel %vm7871_vm0, %v21132_v55, -inf }
 0x36b   : > { %v21146_v26 = vpop.f32.mrf.mxu0 }
 0x36c   : > { %v9688_v19 = vsel %vm7871_vm0, %v21146_v26, -inf }
 0x36d   : > { %9677 = vmax.xlane.f32.xlu0 %v9676_v59 }
 0x36e   : > { %v21138_v10 = vpop.f32.mrf.mxu1  ;;  %9692 = vmax.xlane.f32.xlu1 %v9691_v53 }
 0x36f   : > { %v9685_v57 = vsel %vm7871_vm0, %v21138_v10, -inf }
 0x370   : > { %v21142_v47 = vpop.f32.mrf.mxu1 }
 0x371   : > { %9686 = vmax.xlane.f32.xlu0 %v9685_v57  ;;  %v9682_v34 = vsel %vm7871_vm0, %v21142_v47, -inf }
 0x372   : > { %9641 = vmax.xlane.f32.xlu1 %v9640_v16 }
 0x375   : > { %9683 = vmax.xlane.f32.xlu0 %v9682_v34  ;;  %v21154_v14 = vpop.f32.mrf.mxu0 }
 0x376   : > { %9689 = vmax.xlane.f32.xlu1 %v9688_v19  ;;  %v9697_v46 = vsel %vm7871_vm0, %v21154_v14, -inf }
 0x377   : > { %v21166_v15 = vpop.f32.mrf.mxu0 }
 0x378   : > { %v9694_v62 = vsel %vm7871_vm0, %v21166_v15, -inf }
 0x37a   : > { %9650 = vmax.xlane.f32.xlu1 %v9649_v22 }
 0x37d   : > { %v21156_v28 = vpop.f32.mrf.mxu1 }
 0x37e   : > { %v9703_v42 = vsel %vm7871_vm0, %v21156_v28, -inf  ;;  %9698 = vmax.xlane.f32.xlu1 %v9697_v46 }
 0x37f   : > { %v21162_v7 = vpop.f32.mrf.mxu1  ;;  %9704 = vmax.xlane.f32.xlu0 %v9703_v42 }
 0x380   : > { %v9700_v43 = vsel %vm7871_vm0, %v21162_v7, -inf }
 0x382   : > { %9647 = vmax.xlane.f32.xlu1 %v9646_v61 }
 0x383   : > { %9701 = vmax.xlane.f32.xlu0 %v9700_v43 }
 0x386   : > { %v21170_v36 = vpop.f32.mrf.mxu1  ;;  %9695 = vmax.xlane.f32.xlu1 %v9694_v62 }
 0x387   : > { %v9709_v12 = vsel %vm7871_vm0, %v21170_v36, -inf }
 0x388   : > { %v21176_v49 = vpop.f32.mrf.mxu1  ;;  %9710 = vmax.xlane.f32.xlu0 %v9709_v12 }
 0x389   : > { %v9706_v40 = vsel %vm7871_vm0, %v21176_v49, -inf }
 0x38c   : > { %9707 = vmax.xlane.f32.xlu0 %v9706_v40 }
 0x39f   : > { %v21180_v59 = vpop.f32.mrf.mxu0  ;;  %v21182_v53 = vpop.f32.mrf.mxu1 }
 0x3a0   : > { %v9727_v57 = vsel %vm7871_vm0, %v21182_v53, -inf  ;;  %v9715_v16 = vsel %vm7871_vm0, %v21180_v59, -inf }
 0x3a1   : > { %v21188_v34 = vpop.f32.mrf.mxu1  ;;  %9728 = vmax.xlane.f32.xlu0 %v9727_v57  ;;  %v21190_v19 = vpop.f32.mrf.mxu0  ;;  %9716 = vmax.xlane.f32.xlu1 %v9715_v16 }
 0x3a2   : > { %v9724_v22 = vsel %vm7871_vm0, %v21188_v34, -inf  ;;  %v9712_v46 = vsel %vm7871_vm0, %v21190_v19, -inf }
 0x3a5   : > { %9725 = vmax.xlane.f32.xlu0 %v9724_v22  ;;  %9713 = vmax.xlane.f32.xlu1 %v9712_v46  ;;  %v21212_v22 = vpop.permute.xlu0 %5613  ;;  %v21214_v46 = vpop.permute.xlu1 %5661 }
 0x3a6   : > { %24619 = vst [vmem:[#allocation76_spill] sm:$0xff] %v21212_v22  ;;  %24620 = vst [vmem:[#allocation73_spill] sm:$0xff] %v21214_v46 }
 0x3a9   : > { %v21220_v56 = vpop.permute.xlu0 %5563 }
 0x3aa   : > { %24623 = vst [vmem:[#allocation74_spill] sm:$0xff] %v21220_v56 }
 0x3af   : > { %v21196_v42 = vpop.f32.mrf.mxu0  ;;  %v21198_v61 = vpop.f32.mrf.mxu1 }
 0x3b0   : > { %24617 = vst [vmem:[#allocation23_spill] sm:$0xff] %v21196_v42  ;;  %24618 = vst [vmem:[#allocation77_spill] sm:$0xff] %v21198_v61  ;;  %v9733_v43 = vsel %vm7871_vm0, %v21198_v61, -inf  ;;  %v9721_v62 = vsel %vm7871_vm0, %v21196_v42, -inf }
 0x3b1   : > { %v21204_v12 = vpop.f32.mrf.mxu1  ;;  %v21206_v40 = vpop.f32.mrf.mxu0  ;;  %9734 = vmax.xlane.f32.xlu0 %v9733_v43  ;;  %9722 = vmax.xlane.f32.xlu1 %v9721_v62 }
 0x3b2   : > { %v9730_v57 = vsel %vm7871_vm0, %v21204_v12, -inf  ;;  %v9718_v16 = vsel %vm7871_vm0, %v21206_v40, -inf  ;;  %v21222_v43 = vpop.permute.xlu1 %5611 }
 0x3b3   : > { %24624 = vst [vmem:[#allocation30_spill] sm:$0xff] %v21222_v43 }
 0x3b5   : > { %9731 = vmax.xlane.f32.xlu0 %v9730_v57  ;;  %9719 = vmax.xlane.f32.xlu1 %v9718_v16 }
 0x3b6   : > { %v21236_v52 = vpop.permute.xlu1 %5659 }
 0x3b7   : > { %24627 = vst [vmem:[#allocation32_spill] sm:$0xff] %v21236_v52 }
 0x3b9   : > { %v21216_v13 = vpop.f32.mrf.mxu0  ;;  %v21218_v2 = vpop.f32.mrf.mxu1 }
 0x3ba   : > { %24621 = vst [vmem:[#allocation72_spill] sm:$0xff] %v21216_v13  ;;  %24622 = vst [vmem:[#allocation75_spill] sm:$0xff] %v21218_v2  ;;  %v9751_v62 = vsel %vm7871_vm0, %v21218_v2, -inf  ;;  %v9739_v24 = vsel %vm7871_vm0, %v21216_v13, -inf  ;;  %v21238_v2 = vpop.permute.xlu0 %5561 }
 0x3bb   : > { %v21228_v32 = vpop.f32.mrf.mxu1  ;;  %9752 = vmax.xlane.f32.xlu0 %v9751_v62  ;;  %v21230_v29 = vpop.f32.mrf.mxu0  ;;  %9740 = vmax.xlane.f32.xlu1 %v9739_v24  ;;  %24628 = vst [vmem:[#allocation67_spill] sm:$0xff] %v21238_v2 }
 0x3bc   : > { %24625 = vst [vmem:[#allocation36_spill] sm:$0xff] %v21228_v32  ;;  %24626 = vst [vmem:[#allocation34_spill] sm:$0xff] %v21230_v29  ;;  %v9748_v57 = vsel %vm7871_vm0, %v21228_v32, -inf  ;;  %v9736_v16 = vsel %vm7871_vm0, %v21230_v29, -inf }
 0x3bf   : > { %9749 = vmax.xlane.f32.xlu0 %v9748_v57  ;;  %9737 = vmax.xlane.f32.xlu1 %v9736_v16  ;;  %v21252_v57 = vpop.permute.xlu1 %5609  ;;  %v21254_v16 = vpop.permute.xlu0 %5657 }
 0x3c0   : > { %24633 = vst [vmem:[#allocation66_spill] sm:$0xff] %v21252_v57  ;;  %24634 = vst [vmem:[#allocation41_spill] sm:$0xff] %v21254_v16 }
 0x3c3   : > { %v21240_v60 = vpop.f32.mrf.mxu0  ;;  %v21242_v13 = vpop.f32.mrf.mxu1 }
 0x3c4   : > { %24629 = vst [vmem:[#allocation31_spill] sm:$0xff] %v21240_v60  ;;  %24630 = vst [vmem:[#allocation65_spill] sm:$0xff] %v21242_v13  ;;  %v9757_v62 = vsel %vm7871_vm0, %v21242_v13, -inf  ;;  %v9745_v24 = vsel %vm7871_vm0, %v21240_v60, -inf  ;;  %v21260_v13 = vpop.permute.xlu1 %5607  ;;  %v21262_v60 = vpop.permute.xlu0 %5559 }
 0x3c5   : > { %v21248_v32 = vpop.f32.mrf.mxu1  ;;  %v21250_v8 = vpop.f32.mrf.mxu0  ;;  %9758 = vmax.xlane.f32.xlu0 %v9757_v62  ;;  %9746 = vmax.xlane.f32.xlu1 %v9745_v24  ;;  %24635 = vst [vmem:[#allocation48_spill] sm:$0xff] %v21260_v13  ;;  %24636 = vst [vmem:[#allocation49_spill] sm:$0xff] %v21262_v60 }
 0x3c6   : > { %24631 = vst [vmem:[#allocation64_spill] sm:$0xff] %v21248_v32  ;;  %24632 = vst [vmem:[#allocation35_spill] sm:$0xff] %v21250_v8  ;;  %v9754_v29 = vsel %vm7871_vm0, %v21248_v32, -inf  ;;  %v9742_v17 = vsel %vm7871_vm0, %v21250_v8, -inf }
 0x3c8   : > { %v9621_v44 = vpop.xlane.xlu0 %9620  ;;  %v21264_v27 = vpop.permute.xlu1 %5655 }
 0x3c9   : > { %9755 = vmax.xlane.f32.xlu0 %v9754_v29  ;;  %9743 = vmax.xlane.f32.xlu1 %v9742_v17  ;;  %24637 = vst [vmem:[#allocation50_spill] sm:$0xff] %v21264_v27 }
 0x3cc   : > { %v9627_v62 = vpop.xlane.xlu1 %9626  ;;  %v9618_v24 = vpop.xlane.xlu0 %9617 }
 0x3cd   : > { %v9811_v52 = vsub.f32 %v20758_v21, %v9627_v62 }
 0x3d0   : > { %v9633_v20 = vpop.xlane.xlu0 %9632  ;;  %v9624_v33 = vpop.xlane.xlu1 %9623 }
 0x3d1   : > { %v9810_v46 = vsub.f32 %v20785_v18, %v9624_v33 }
 0x3d4   : > { %v21268_v61 = vpop.xlane.xlu0 %9638 }
 0x3d8   : > { %v21278_v13 = vpop.xlane.xlu0 %9635 }
 0x3de   : > { %v21266_v42 = vpop.xlane.xlu1 %9668 }
 0x3e2   : > { %v9630_v32 = vpop.xlane.xlu1 %9629 }
 0x3e3   : > { %v9812_v62 = vsub.f32 %v20833_v31, %v9630_v32 }
 0x3e5   : > { %v9880_v31 = vmul.f32 1.442695, %v9812_v62 }
 0x3e6   : > { %v21270_v2 = vpop.f32.mrf.mxu0  ;;  %v21284_v16 = vpop.xlane.xlu1 %9665 }
 0x3e7   : > { %24638 = vst [vmem:[#allocation68_spill] sm:$0xff] %v21270_v2  ;;  %v21272_v29 = vpop.f32.mrf.mxu1  ;;  %v9763_v8 = vsel %vm7871_vm0, %v21270_v2, -inf }
 0x3e8   : > { %24639 = vst [vmem:[#allocation71_spill] sm:$0xff] %v21272_v29  ;;  %v9775_v17 = vsel %vm7871_vm0, %v21272_v29, -inf  ;;  %9764 = vmax.xlane.f32.xlu1 %v9763_v8  ;;  %v21282_v27 = vpop.f32.mrf.mxu0  ;;  %v21290_v29 = vpop.xlane.xlu0 %9656 }
 0x3e9   : > { %9776 = vmax.xlane.f32.xlu0 %v9775_v17  ;;  %v21280_v60 = vpop.f32.mrf.mxu1  ;;  %24641 = vst [vmem:[#allocation69_spill] sm:$0xff] %v21282_v27  ;;  %v9760_v43 = vsel %vm7871_vm0, %v21282_v27, -inf }
 0x3ea   : > { %24640 = vst [vmem:[#allocation59_spill] sm:$0xff] %v21280_v60  ;;  %v9772_v57 = vsel %vm7871_vm0, %v21280_v60, -inf  ;;  %v9809_v60 = vsub.f32 %v20629_v5, %v9621_v44  ;;  %v9808_v5 = vsub.f32 %v20718_v3, %v9618_v24  ;;  %v9878_v44 = vmul.f32 1.442695, %v9811_v52 }
 0x3eb   : > { %v21292_v48 = vpop.f32.mrf.mxu0  ;;  %v9675_v17 = vpop.xlane.xlu1 %9674 }
 0x3ec   : > { %24642 = vst [vmem:[#allocation51_spill] sm:$0xff] %v21292_v48  ;;  %v21294_v2 = vpop.f32.mrf.mxu1  ;;  %9761 = vmax.xlane.f32.xlu1 %v9760_v43  ;;  %v9769_v11 = vsel %vm7871_vm0, %v21292_v48, -inf  ;;  %v21306_v35 = vpop.xlane.xlu0 %9653  ;;  %v9827_v33 = vsub.f32 %v21116_v1, %v9675_v17  ;;  %v9814_v17 = vsub.f32 %v20883_v58, %v21278_v13 }
 0x3ed   : > { %24643 = vst [vmem:[#allocation52_spill] sm:$0xff] %v21294_v2  ;;  %9773 = vmax.xlane.f32.xlu0 %v9772_v57  ;;  %v9781_v8 = vsel %vm7871_vm0, %v21294_v2, -inf  ;;  %v21303_v27 = vpop.f32.mrf.mxu0  ;;  %v9874_v2 = vmul.f32 1.442695, %v9809_v60  ;;  %v9876_v60 = vmul.f32 1.442695, %v9810_v46 }
 0x3ee   : > { %v21301_v56 = vpop.f32.mrf.mxu1  ;;  %24645 = vst [vmem:[#allocation55_spill] sm:$0xff] %v21303_v27  ;;  %v9766_v48 = vsel %vm7871_vm0, %v21303_v27, -inf }
 0x3ef   : > { %24644 = vst [vmem:[#allocation53_spill] sm:$0xff] %v21301_v56  ;;  %v21308_v43 = vpop.xlane.xlu1 %9671  ;;  %v9778_v57 = vsel %vm7871_vm0, %v21301_v56, -inf  ;;  %17161 = vpow2.f32 %v9874_v2  ;;  %v9872_v56 = vmul.f32 1.442695, %v9808_v5  ;;  %v9825_v2 = vsub.f32 %v21098_v41, %v21266_v42 }
 0x3f0   : > { %9770 = vmax.xlane.f32.xlu1 %v9769_v11  ;;  %v9813_v11 = vsub.f32 %v20806_v63, %v9633_v20  ;;  %v21319_v22 = vpop.xlane.xlu0 %9662  ;;  %17163 = vpow2.f32 %v9878_v44  ;;  %v9910_v42 = vmul.f32 1.442695, %v9827_v33 }
 0x3f1   : > { %9782 = vmax.xlane.f32.xlu0 %v9781_v8  ;;  %17165 = vpow2.f32 %v9872_v56  ;;  %v9906_v41 = vmul.f32 1.442695, %v9825_v2  ;;  %v9824_v56 = vsub.f32 %v21110_v23, %v21284_v16 }
 0x3f3   : > { %v9645_v8 = vpop.xlane.xlu1 %9644  ;;  %v9904_v23 = vmul.f32 1.442695, %v9824_v56 }
 0x3f4   : > { %9767 = vmax.xlane.f32.xlu1 %v9766_v48  ;;  %v9882_v48 = vmul.f32 1.442695, %v9813_v11  ;;  %v21341_v5 = vpop.xlane.xlu0 %9659 }
 0x3f5   : > { %9779 = vmax.xlane.f32.xlu0 %v9778_v57 }
 0x3f6   : > { %17167 = vpow2.f32 %v9882_v48  ;;  %v9817_v48 = vsub.f32 %v21060_v39, %v9645_v8  ;;  %v9826_v39 = vsub.f32 %v21120_v6, %v21308_v43 }
 0x3f7   : > { %v21316_v21 = vpop.f32.mrf.mxu0  ;;  %v9693_v18 = vpop.xlane.xlu1 %9692  ;;  %17169 = vpow2.f32 %v9880_v31  ;;  %v9884_v31 = vmul.f32 1.442695, %v9814_v17 }
 0x3f8   : > { %24646 = vst [vmem:[#allocation78_spill] sm:$0xff] %v21316_v21  ;;  %v9787_v3 = vsel %vm7871_vm0, %v21316_v21, -inf  ;;  %17171 = vpow2.f32 %v9876_v60  ;;  %v21362_v58 = vpop.xlane.xlu0 %9680  ;;  %v9833_v8 = vsub.f32 %v21132_v55, %v9693_v18 }
 0x3f9   : > { %v21322_v27 = vpop.f32.mrf.mxu1  ;;  %9788 = vmax.xlane.f32.xlu1 %v9787_v3  ;;  %v21328_v20 = vpop.f32.mrf.mxu0  ;;  %17173 = vpow2.f32 %v9906_v41 }
 0x3fa   : > { %24647 = vst [vmem:[#allocation79_spill] sm:$0xff] %v21322_v27  ;;  %v9799_v63 = vsel %vm7871_vm0, %v21322_v27, -inf  ;;  %24648 = vst [vmem:[#allocation80_spill] sm:$0xff] %v21328_v20  ;;  %v9784_v52 = vsel %vm7871_vm0, %v21328_v20, -inf  ;;  %17175 = vpow2.f32 %v9910_v42  ;;  %v9922_v18 = vmul.f32 1.442695, %v9833_v8 }
 0x3fb   : > { %9800 = vmax.xlane.f32.xlu0 %v9799_v63  ;;  %v21330_v32 = vpop.f32.mrf.mxu1  ;;  %v9642_v1 = vpop.xlane.xlu1 %9641  ;;  %v9815_v63 = vsub.f32 %v20865_v25, %v21268_v61  ;;  %17177 = vpow2.f32 %v9904_v23  ;;  %v9890_v61 = vmul.f32 1.442695, %v9817_v48 }
 0x3fc   : > { %24649 = vst [vmem:[#allocation81_spill] sm:$0xff] %v21330_v32  ;;  %v9796_v57 = vsel %vm7871_vm0, %v21330_v32, -inf  ;;  %v21364_v2 = vpop.eup %17161  ;;  %17179 = vpow2.f32 %v9884_v31  ;;  %v21381_v6 = vpop.xlane.xlu0 %9677  ;;  %v9816_v43 = vsub.f32 %v21080_v4, %v9642_v1 }
 0x3fd   : > { %9785 = vmax.xlane.f32.xlu1 %v9784_v52  ;;  %v21368_v60 = vpop.eup %17163  ;;  %v9886_v52 = vmul.f32 1.442695, %v9815_v63  ;;  %17181 = vpow2.f32 %v9890_v61 }
 0x3fe   : > { %v21375_v41 = vpop.eup %17165  ;;  %v10009_v56 = vsel %vm7871_vm0, %v21368_v60, 0.0  ;;  %v9888_v63 = vmul.f32 1.442695, %v9816_v43 }
 0x3ff   : > { %v21337_v24 = vpop.f32.mrf.mxu0  ;;  %9797 = vmax.xlane.f32.xlu0 %v9796_v57  ;;  %v9690_v16 = vpop.xlane.xlu1 %9689  ;;  %v10003_v57 = vsel %vm7871_vm0, %v21364_v2, 0.0  ;;  %17183 = vpow2.f32 %v9886_v52 }
 0x400   : > { %24650 = vst [vmem:[#allocation37_spill] sm:$0xff] %v21337_v24  ;;  %v21343_v44 = vpop.f32.mrf.mxu1  ;;  %v9793_v46 = vsel %vm7871_vm0, %v21337_v24, -inf  ;;  %v9832_v4 = vsub.f32 %v21146_v26, %v9690_v16  ;;  %v21402_v8 = vpop.xlane.xlu0 %9686 }
 0x401   : > { %24651 = vst [vmem:[#allocation38_spill] sm:$0xff] %v21343_v44  ;;  %v21351_v11 = vpop.f32.mrf.mxu0  ;;  %v9805_v62 = vsel %vm7871_vm0, %v21343_v44, -inf  ;;  %9794 = vmax.xlane.f32.xlu1 %v9793_v46  ;;  %v9908_v46 = vmul.f32 1.442695, %v9826_v39 }
 0x402   : > { %24652 = vst [vmem:[#allocation39_spill] sm:$0xff] %v21351_v11  ;;  %v21355_v3 = vpop.f32.mrf.mxu1  ;;  %v9790_v13 = vsel %vm7871_vm0, %v21351_v11, -inf  ;;  %v9920_v16 = vmul.f32 1.442695, %v9832_v4 }
 0x403   : > { %24653 = vst [vmem:[#allocation40_spill] sm:$0xff] %v21355_v3  ;;  %9806 = vmax.xlane.f32.xlu0 %v9805_v62  ;;  %v9802_v33 = vsel %vm7871_vm0, %v21355_v3, -inf  ;;  %v9651_v25 = vpop.xlane.xlu1 %9650  ;;  %v21379_v42 = vpop.eup %17167  ;;  %v10000_v62 = vsel %vm7871_vm0, %v21375_v41, 0.0  ;;  %17185 = vpow2.f32 %v9908_v46 }
 0x404   : > { %v21384_v17 = vpop.eup %17169  ;;  %v10015_v48 = vsel %vm7871_vm0, %v21379_v42, 0.0  ;;  %17187 = vpow2.f32 %v9922_v18  ;;  %v9820_v18 = vsub.f32 %v21094_v54, %v21306_v35  ;;  %v9823_v35 = vsub.f32 %v21102_v9, %v21319_v22 }
 0x405   : > { %9791 = vmax.xlane.f32.xlu1 %v9790_v13  ;;  %v21388_v23 = vpop.eup %17171  ;;  %v10012_v31 = vsel %vm7871_vm0, %v21384_v17, 0.0  ;;  %17189 = vpow2.f32 %v9888_v63  ;;  %v21416_v63 = vpop.xlane.xlu0 %9683 }
 0x406   : > { %v21393_v13 = vpop.eup %17173  ;;  %v10006_v61 = vsel %vm7871_vm0, %v21388_v23, 0.0  ;;  %v9902_v9 = vmul.f32 1.442695, %v9823_v35 }
 0x407   : > { %9803 = vmax.xlane.f32.xlu0 %v9802_v33  ;;  %v9699_v55 = vpop.xlane.xlu1 %9698  ;;  %v21398_v39 = vpop.eup %17175  ;;  %v10051_v26 = vsel %vm7871_vm0, %v21393_v13, 0.0 }
 0x408   : > { %v21407_v46 = vpop.eup %17177  ;;  %v9835_v4 = vsub.f32 %v21154_v14, %v9699_v55 }
 0x409   : > { %10004 = vadd.xlane.f32.xlu1 %v10003_v57  ;;  %v9819_v57 = vsub.f32 %v21086_v30, %v9651_v25  ;;  %v10048_v30 = vsel %vm7871_vm0, %v21407_v46, 0.0  ;;  %v21437_v22 = vpop.xlane.xlu0 %9704 }
 0x40b   : > { %10010 = vadd.xlane.f32.xlu0 %v10009_v56  ;;  %v9648_v1 = vpop.xlane.xlu1 %9647  ;;  %v9894_v25 = vmul.f32 1.442695, %v9819_v57 }
 0x40c   : > { %v9818_v33 = vsub.f32 %v21088_v37, %v9648_v1  ;;  %v10057_v37 = vsel %vm7871_vm0, %v21398_v39, 0.0 }
 0x40d   : > { %10001 = vadd.xlane.f32.xlu1 %v10000_v62 }
 0x40e   : > { %v9892_v52 = vmul.f32 1.442695, %v9818_v33  ;;  %v9926_v33 = vmul.f32 1.442695, %v9835_v4 }
 0x40f   : > { %10016 = vadd.xlane.f32.xlu0 %v10015_v48  ;;  %v9696_v56 = vpop.xlane.xlu1 %9695  ;;  %v21414_v48 = vpop.eup %17179 }
 0x410   : > { %17191 = vpow2.f32 %v9892_v52  ;;  %v9834_v43 = vsub.f32 %v21166_v15, %v9696_v56  ;;  %v21421_v1 = vpop.eup %17181  ;;  %v9896_v15 = vmul.f32 1.442695, %v9820_v18  ;;  %v9821_v52 = vsub.f32 %v21090_v0, %v21290_v29 }
 0x411   : > { %10007 = vadd.xlane.f32.xlu1 %v10006_v61  ;;  %17193 = vpow2.f32 %v9920_v16  ;;  %v21425_v54 = vpop.eup %17183  ;;  %v10027_v14 = vsel %vm7871_vm0, %v21421_v1, 0.0  ;;  %v9822_v16 = vsub.f32 %v21106_v38, %v21341_v5  ;;  %v9829_v18 = vsub.f32 %v21124_v45, %v21362_v58  ;;  %v9702_v38 = vpop.xlane.xlu0 %9701 }
 0x412   : > { %v9924_v62 = vmul.f32 1.442695, %v9834_v43  ;;  %v21429_v61 = vpop.eup %17185 }
 0x413   : > { %10013 = vadd.xlane.f32.xlu0 %v10012_v31  ;;  %v10018_v31 = vsel %vm7871_vm0, %v21414_v48, 0.0  ;;  %v21433_v55 = vpop.eup %17187  ;;  %v10054_v57 = vsel %vm7871_vm0, %v21429_v61, 0.0  ;;  %v9900_v43 = vmul.f32 1.442695, %v9822_v16  ;;  %v9914_v4 = vmul.f32 1.442695, %v9829_v18 }
 0x414   : > { %17195 = vpow2.f32 %v9924_v62  ;;  %v21445_v56 = vpop.eup %17189  ;;  %v10075_v0 = vsel %vm7871_vm0, %v21433_v55, 0.0  ;;  %v9831_v18 = vsub.f32 %v21138_v10, %v21402_v8  ;;  %v9837_v10 = vsub.f32 %v21156_v28, %v21437_v22 }
 0x415   : > { %10052 = vadd.xlane.f32.xlu1 %v10051_v26  ;;  %17197 = vpow2.f32 %v9894_v25  ;;  %v10021_v26 = vsel %vm7871_vm0, %v21425_v54, 0.0  ;;  %v10024_v5 = vsel %vm7871_vm0, %v21445_v56, 0.0 }
 0x416   : > { %17199 = vpow2.f32 %v9896_v15  ;;  %v9828_v15 = vsub.f32 %v21128_v50, %v21381_v6 }
 0x417   : > { %10058 = vadd.xlane.f32.xlu0 %v10057_v37  ;;  %17201 = vpow2.f32 %v9926_v33  ;;  %v9898_v37 = vmul.f32 1.442695, %v9821_v52  ;;  %v9830_v52 = vsub.f32 %v21142_v47, %v21416_v63 }
 0x418   : > { %17203 = vpow2.f32 %v9902_v9 }
 0x419   : > { %10049 = vadd.xlane.f32.xlu1 %v10048_v30  ;;  %17205 = vpow2.f32 %v9898_v37 }
 0x41a   : > { %17207 = vpow2.f32 %v9900_v43 }
 0x41b   : > { %10019 = vadd.xlane.f32.xlu0 %v10018_v31  ;;  %v9711_v31 = vpop.xlane.xlu0 %9710  ;;  %17209 = vpow2.f32 %v9914_v4 }
 0x41d   : > { %10022 = vadd.xlane.f32.xlu1 %v10021_v26  ;;  %v21449_v29 = vpop.eup %17191 }
 0x41e   : > { %v21455_v62 = vpop.eup %17193  ;;  %v10030_v30 = vsel %vm7871_vm0, %v21449_v29, 0.0 }
 0x41f   : > { %10028 = vadd.xlane.f32.xlu0 %v10027_v14  ;;  %v10072_v45 = vsel %vm7871_vm0, %v21455_v62, 0.0  ;;  %v9912_v14 = vmul.f32 1.442695, %v9828_v15  ;;  %v9708_v47 = vpop.xlane.xlu0 %9707 }
 0x421   : > { %10055 = vadd.xlane.f32.xlu1 %v10054_v57  ;;  %v21459_v25 = vpop.eup %17195  ;;  %17211 = vpow2.f32 %v9912_v14  ;;  %v9916_v57 = vmul.f32 1.442695, %v9830_v52 }
 0x422   : > { %v21465_v58 = vpop.eup %17197  ;;  %v10078_v35 = vsel %vm7871_vm0, %v21459_v25, 0.0 }
 0x423   : > { %10076 = vadd.xlane.f32.xlu0 %v10075_v0  ;;  %v21469_v33 = vpop.eup %17199  ;;  %v10033_v50 = vsel %vm7871_vm0, %v21465_v58, 0.0  ;;  %v9836_v0 = vsub.f32 %v21162_v7, %v9702_v38  ;;  %17213 = vpow2.f32 %v9916_v57 }
 0x424   : > { %v21475_v6 = vpop.eup %17201  ;;  %v10036_v26 = vsel %vm7871_vm0, %v21469_v33, 0.0 }
 0x425   : > { %10025 = vadd.xlane.f32.xlu1 %v10024_v5  ;;  %24654 = vst [vmem:[#allocation42_spill] sm:$0xff] %v21475_v6  ;;  %v21479_v16 = vpop.eup %17203  ;;  %v10081_v63 = vsel %vm7871_vm0, %v21475_v6, 0.0  ;;  %v9928_v7 = vmul.f32 1.442695, %v9836_v0 }
 0x426   : > { %24655 = vst [vmem:[#allocation43_spill] sm:$0xff] %v21479_v16  ;;  %v21489_v4 = vpop.eup %17205 }
 0x427   : > { %10031 = vadd.xlane.f32.xlu0 %v10030_v30  ;;  %v10045_v30 = vsel %vm7871_vm0, %v21479_v16, 0.0  ;;  %v21493_v15 = vpop.eup %17207  ;;  %v10039_v14 = vsel %vm7871_vm0, %v21489_v4, 0.0  ;;  %v24715_v16 = vld [vmem:[#allocation44_spill] sm:$0xff] }
 0x429   : > { %10073 = vadd.xlane.f32.xlu1 %v10072_v45 }
 0x42a   : > { %v9717_v9 = vpop.xlane.xlu1 %9716  ;;  %v9729_v8 = vpop.xlane.xlu0 %9728 }
 0x42b   : > { %10079 = vadd.xlane.f32.xlu0 %v10078_v35  ;;  %v9841_v37 = vsub.f32 %v21180_v59, %v9717_v9  ;;  %v9839_v59 = vsub.f32 %v21170_v36, %v9711_v31  ;;  %v9918_v35 = vmul.f32 1.442695, %v9831_v18  ;;  %v9838_v36 = vsub.f32 %v21176_v49, %v9708_v47  ;;  %v21502_v31 = vpop.eup %17209 }
 0x42c   : > { %24656 = vst [vmem:[#allocation46_spill] sm:$0xff] %v21502_v31  ;;  %v9845_v22 = vsub.f32 %v21182_v53, %v9729_v8  ;;  %v10063_v9 = vsel %vm7871_vm0, %v21502_v31, 0.0 }
 0x42d   : > { %10034 = vadd.xlane.f32.xlu1 %v10033_v50  ;;  %v9938_v43 = vmul.f32 1.442695, %v9841_v37  ;;  %v9934_v52 = vmul.f32 1.442695, %v9839_v59  ;;  %v9930_v50 = vmul.f32 1.442695, %v9837_v10 }
 0x42e   : > { %v9714_v5 = vpop.xlane.xlu1 %9713  ;;  %v9932_v28 = vmul.f32 1.442695, %v9838_v36  ;;  %v9726_v49 = vpop.xlane.xlu0 %9725  ;;  %v9946_v57 = vmul.f32 1.442695, %v9845_v22 }
 0x42f   : > { %10037 = vadd.xlane.f32.xlu0 %v10036_v26  ;;  %v9840_v38 = vsub.f32 %v21190_v19, %v9714_v5  ;;  %17215 = vpow2.f32 %v9938_v43  ;;  %v10042_v19 = vsel %vm7871_vm0, %v21493_v15, 0.0  ;;  %v21507_v26 = vpop.eup %17211  ;;  %v9844_v0 = vsub.f32 %v21188_v34, %v9726_v49 }
 0x430   : > { %17217 = vpow2.f32 %v9928_v7  ;;  %24657 = vst [vmem:[#allocation47_spill] sm:$0xff] %v21507_v26  ;;  %v10060_v37 = vsel %vm7871_vm0, %v21507_v26, 0.0  ;;  %v21512_v47 = vpop.eup %17213 }
 0x431   : > { %10082 = vadd.xlane.f32.xlu1 %v10081_v63  ;;  %v9936_v45 = vmul.f32 1.442695, %v9840_v38  ;;  %24658 = vst [vmem:[#allocation83_spill] sm:$0xff] %v21512_v47  ;;  %v9944_v43 = vmul.f32 1.442695, %v9844_v0  ;;  %v10066_v18 = vsel %vm7871_vm0, %v21512_v47, 0.0 }
 0x433   : > { %10046 = vadd.xlane.f32.xlu0 %v10045_v30  ;;  %17219 = vpow2.f32 %v9936_v45 }
 0x434   : > { %17221 = vpow2.f32 %v9918_v35 }
 0x435   : > { %10040 = vadd.xlane.f32.xlu1 %v10039_v14  ;;  %17223 = vpow2.f32 %v9934_v52 }
 0x436   : > { %17225 = vpow2.f32 %v9930_v50 }
 0x437   : > { %10043 = vadd.xlane.f32.xlu0 %v10042_v19  ;;  %17227 = vpow2.f32 %v9932_v28 }
 0x438   : > { %17229 = vpow2.f32 %v9946_v57 }
 0x439   : > { %17231 = vpow2.f32 %v9944_v43 }
 0x43a   : > { %v21546_v19 = vpop.xlane.xlu0 %9734  ;;  %v21548_v50 = vpop.xlane.xlu1 %9722 }
 0x43b   : > { %10064 = vadd.xlane.f32.xlu0 %v10063_v9 }
 0x43c   : > { %v21514_v63 = vpop.eup %17215 }
 0x43d   : > { %24659 = vst [vmem:[#allocation84_spill] sm:$0xff] %v21514_v63  ;;  %v10099_v53 = vsel %vm7871_vm0, %v21514_v63, 0.0  ;;  %v21520_v5 = vpop.eup %17217 }
 0x43e   : > { %10100 = vadd.xlane.f32.xlu1 %v10099_v53  ;;  %24660 = vst [vmem:[#allocation85_spill] sm:$0xff] %v21520_v5  ;;  %v10084_v59 = vsel %vm7871_vm0, %v21520_v5, 0.0  ;;  %v9732_v9 = vpop.xlane.xlu0 %9731  ;;  %v9720_v49 = vpop.xlane.xlu1 %9719  ;;  %v24713_v5 = vld [vmem:[#allocation77_spill] sm:$0xff] }
 0x43f   : > { %10061 = vadd.xlane.f32.xlu0 %v10060_v37 }
 0x440   : > { %v21522_v34 = vpop.eup %17219 }
 0x441   : > { %24661 = vst [vmem:[#allocation86_spill] sm:$0xff] %v21522_v34  ;;  %v10096_v30 = vsel %vm7871_vm0, %v21522_v34, 0.0  ;;  %v21526_v7 = vpop.eup %17221  ;;  %v24714_v34 = vld [vmem:[#allocation23_spill] sm:$0xff] }
 0x442   : > { %24662 = vst [vmem:[#allocation87_spill] sm:$0xff] %v21526_v7  ;;  %10097 = vadd.xlane.f32.xlu1 %v10096_v30  ;;  %v21530_v38 = vpop.eup %17223  ;;  %v10069_v45 = vsel %vm7871_vm0, %v21526_v7, 0.0  ;;  %v9843_v31 = vsub.f32 %v24714_v34, %v21548_v50 }
 0x443   : > { %10067 = vadd.xlane.f32.xlu0 %v10066_v18  ;;  %24663 = vst [vmem:[#allocation88_spill] sm:$0xff] %v21530_v38  ;;  %v21534_v35 = vpop.eup %17225  ;;  %v10093_v10 = vsel %vm7871_vm0, %v21530_v38, 0.0 }
 0x444   : > { %24664 = vst [vmem:[#allocation89_spill] sm:$0xff] %v21534_v35  ;;  %v21538_v8 = vpop.eup %17227  ;;  %v10087_v14 = vsel %vm7871_vm0, %v21534_v35, 0.0  ;;  %v21556_v0 = vpop.xlane.xlu0 %9752  ;;  %v9942_v6 = vmul.f32 1.442695, %v9843_v31 }
 0x445   : > { %24665 = vst [vmem:[#allocation90_spill] sm:$0xff] %v21538_v8  ;;  %v10090_v52 = vsel %vm7871_vm0, %v21538_v8, 0.0  ;;  %v21544_v36 = vpop.eup %17229  ;;  %24668 = vst [vmem:[#allocation93_spill] sm:$0xff] %v21556_v0  ;;  %v21558_v37 = vpop.xlane.xlu1 %9740 }
 0x446   : > { %10070 = vadd.xlane.f32.xlu1 %v10069_v45  ;;  %24666 = vst [vmem:[#allocation91_spill] sm:$0xff] %v21544_v36  ;;  %v10111_v28 = vsel %vm7871_vm0, %v21544_v36, 0.0  ;;  %v21552_v22 = vpop.eup %17231  ;;  %24669 = vst [vmem:[#allocation94_spill] sm:$0xff] %v21558_v37  ;;  %v24706_v37 = vld [vmem:[#allocation18_spill] sm:$0xff] }
 0x447   : > { %10085 = vadd.xlane.f32.xlu0 %v10084_v59  ;;  %24667 = vst [vmem:[#allocation92_spill] sm:$0xff] %v21552_v22  ;;  %v10108_v57 = vsel %vm7871_vm0, %v21552_v22, 0.0  ;;  %v9842_v59 = vsub.f32 %v21206_v40, %v9720_v49 }
 0x448   : > { %v21562_v53 = vpop.xlane.xlu0 %9749 }
 0x449   : > { %24670 = vst [vmem:[#allocation95_spill] sm:$0xff] %v21562_v53  ;;  %v21564_v43 = vpop.xlane.xlu1 %9737 }
 0x44a   : > { %10088 = vadd.xlane.f32.xlu1 %v10087_v14  ;;  %24671 = vst [vmem:[#allocation96_spill] sm:$0xff] %v21564_v43  ;;  %v9940_v14 = vmul.f32 1.442695, %v9842_v59 }
 0x44b   : > { %10094 = vadd.xlane.f32.xlu0 %v10093_v10 }
 0x44c   : > { %17233 = vpow2.f32 %v9940_v14 }
 0x44e   : > { %v21568_v18 = vpop.xlane.xlu0 %9758  ;;  %v21570_v30 = vpop.xlane.xlu1 %9746 }
 0x44f   : > { %10091 = vadd.xlane.f32.xlu0 %v10090_v52  ;;  %24672 = vst [vmem:[#allocation97_spill] sm:$0xff] %v21568_v18  ;;  %24673 = vst [vmem:[#allocation98_spill] sm:$0xff] %v21570_v30 }
 0x452   : > { %v21575_v45 = vpop.xlane.xlu0 %9755  ;;  %v21577_v10 = vpop.xlane.xlu1 %9743 }
 0x453   : > { %10112 = vadd.xlane.f32.xlu0 %v10111_v28  ;;  %24674 = vst [vmem:[#allocation99_spill] sm:$0xff] %v21575_v45  ;;  %24675 = vst [vmem:[#allocation100_spill] sm:$0xff] %v21577_v10  ;;  %v24700_v45 = vld [vmem:[#allocation74_spill] sm:$0xff] }
 0x454   : > { %v24704_v10 = vld [vmem:[#allocation82_spill] sm:$0xff] }
 0x457   : > { %10109 = vadd.xlane.f32.xlu0 %v10108_v57  ;;  %v9846_v57 = vsub.f32 %v21204_v12, %v9732_v9 }
 0x459   : > { %v9948_v44 = vmul.f32 1.442695, %v9846_v57  ;;  %v21596_v27 = vpop.eup %17233 }
 0x45a   : > { %24684 = vst [vmem:[#allocation109_spill] sm:$0xff] %v21596_v27  ;;  %v10102_v9 = vsel %vm7871_vm0, %v21596_v27, 0.0 }
 0x45b   : > { %5573 = vrot.lane.b32.xlu1 %v20467_v51, %s17780_s29  ;;  %17235 = vpow2.f32 %v9948_v44 }
 0x45f   : > { %5669 = vrot.lane.b32.xlu1 %v20467_v51, %s17781_s20 }
 0x468   : > { %v21606_v57 = vpop.eup %17235 }
 0x469   : > { %24688 = vst [vmem:[#allocation113_spill] sm:$0xff] %v21606_v57  ;;  %v10114_v20 = vsel %vm7871_vm0, %v21606_v57, 0.0  ;;  %v24698_v57 = vld [vmem:[#allocation26_spill] sm:$0xff] }
 0x46d   : > { %5621 = vrot.lane.b32.xlu0 %v20467_v51, %s17779_s27 }
 0x471   : > { %v21581_v28 = vpop.xlane.xlu1 %9764 }
 0x472   : > { %v21579_v52 = vpop.xlane.xlu0 %9776  ;;  %24677 = vst [vmem:[#allocation102_spill] sm:$0xff] %v21581_v28 }
 0x473   : > { %24676 = vst [vmem:[#allocation101_spill] sm:$0xff] %v21579_v52 }
 0x475   : > { %v21586_v11 = vpop.xlane.xlu1 %9761 }
 0x476   : > { %v21584_v3 = vpop.xlane.xlu0 %9773  ;;  %24679 = vst [vmem:[#allocation104_spill] sm:$0xff] %v21586_v11 }
 0x477   : > { %24678 = vst [vmem:[#allocation103_spill] sm:$0xff] %v21584_v3 }
 0x479   : > { %v21590_v40 = vpop.xlane.xlu1 %9770 }
 0x47a   : > { %v21588_v24 = vpop.xlane.xlu0 %9782  ;;  %24681 = vst [vmem:[#allocation106_spill] sm:$0xff] %v21590_v40  ;;  %v24696_v40 = vld [vmem:[#allocation20_spill] sm:$0xff] }
 0x47b   : > { %24680 = vst [vmem:[#allocation105_spill] sm:$0xff] %v21588_v24 }
 0x47d   : > { %v21594_v59 = vpop.xlane.xlu1 %9767 }
 0x47e   : > { %v21592_v49 = vpop.xlane.xlu0 %9779  ;;  %24683 = vst [vmem:[#allocation108_spill] sm:$0xff] %v21594_v59 }
 0x47f   : > { %24682 = vst [vmem:[#allocation107_spill] sm:$0xff] %v21592_v49 }
 0x482   : > { %v21598_v21 = vpop.xlane.xlu1 %9788 }
 0x483   : > { %24685 = vst [vmem:[#allocation110_spill] sm:$0xff] %v21598_v21  ;;  %10103 = vadd.xlane.f32.xlu1 %v10102_v9  ;;  %v24692_v21 = vld [vmem:[#allocation73_spill] sm:$0xff]  ;;  %v24695_v9 = vld [vmem:[#allocation76_spill] sm:$0xff] }
 0x484   : > { %v21600_v12 = vpop.xlane.xlu0 %9800  ;;  %v6171_v24 = vcombine.low %v24696_v40, %v24695_v9 }
 0x485   : > { %24686 = vst [vmem:[#allocation111_spill] sm:$0xff] %v21600_v12  ;;  %v24693_v12 = vld [vmem:[#allocation58_spill] sm:$0xff] }
 0x486   : > { %v21604_v14 = vpop.xlane.xlu1 %9785  ;;  %v6187_v63 = vcombine.low %v24693_v12, %v24692_v21  ;;  %v6188_v27 = vcombine.high %v24693_v12, %v24692_v21  ;;  %v6179_v59 = vrot.slane %v6171_v24, %v24698_v57  ;;  %v24703_v24 = vld [vmem:[#allocation30_spill] sm:$0xff] }
 0x487   : > { %24687 = vst [vmem:[#allocation112_spill] sm:$0xff] %v21604_v14  ;;  %v6103_v30 = vcombine.low %v24704_v10, %v24703_v24 }
 0x488   : > { %v21608_v32 = vpop.xlane.xlu0 %9797  ;;  %v6195_v49 = vrot.slane %v6187_v63, %v24698_v57  ;;  %v24701_v63 = vld [vmem:[#allocation63_spill] sm:$0xff] }
 0x489   : > { %24689 = vst [vmem:[#allocation114_spill] sm:$0xff] %v21608_v32 }
 0x48a   : > { %v21610_v44 = vpop.xlane.xlu1 %9794  ;;  %v6203_v12 = vcombine.low %v6179_v59, %v6195_v49 }
 0x48b   : > { %24690 = vst [vmem:[#allocation115_spill] sm:$0xff] %v21610_v44  ;;  %v6172_v44 = vcombine.high %v24696_v40, %v24695_v9 }
 0x48c   : > { %v21614_v36 = vpop.xlane.xlu0 %9806  ;;  %10115 = vadd.xlane.f32.xlu0 %v10114_v20  ;;  %v6202_v20 = vrot.slane %v6188_v27, %v24698_v57  ;;  %v24702_v27 = vld [vmem:[#allocation28_spill] sm:$0xff] }
 0x48d   : > { %24691 = vst [vmem:[#allocation116_spill] sm:$0xff] %v21614_v36  ;;  %v6186_v21 = vrot.slane %v6172_v44, %v24698_v57  ;;  %v6211_v9 = vrot.slane %v6203_v12, %v24702_v27  ;;  %v24705_v12 = vld [vmem:[#allocation66_spill] sm:$0xff] }
 0x48e   : > { %v21620_v14 = vpop.xlane.xlu1 %9791  ;;  %v6035_v0 = vcombine.low %v24706_v37, %v24705_v12 }
 0x48f   : > { %24694 = vst [vmem:[#allocation73_spill] sm:$0xff] %v21620_v14  ;;  %v6204_v14 = vcombine.high %v6179_v59, %v6195_v49  ;;  %v6219_v3 = vcombine.low %v6186_v21, %v6202_v20  ;;  %v6220_v18 = vcombine.high %v6186_v21, %v6202_v20  ;;  %v6104_v20 = vcombine.high %v24704_v10, %v24703_v24 }
 0x490   : > { %v21624_v32 = vpop.xlane.xlu0 %9803 }
 0x491   : > { %24697 = vst [vmem:[#allocation58_spill] sm:$0xff] %v21624_v32  ;;  %v24699_v32 = vld [vmem:[#allocation32_spill] sm:$0xff]  ;;  %v6227_v59 = vrot.slane %v6219_v3, %v24702_v27  ;;  %v6234_v44 = vrot.slane %v6220_v18, %v24702_v27  ;;  %v21664_v8 = vrot.slane %v6104_v20, %v24698_v57 }
 0x492   : > { %v10005_v36 = vpop.xlane.xlu1 %10004  ;;  %v6119_v11 = vcombine.low %v24700_v45, %v24699_v32  ;;  %v6120_v49 = vcombine.high %v24700_v45, %v24699_v32  ;;  %v24707_v32 = vld [vmem:[#allocation41_spill] sm:$0xff]  ;;  %v24708_v45 = vld [vmem:[#allocation67_spill] sm:$0xff] }
 0x493   : > { %17237 = vrcp.f32 %v10005_v36  ;;  %v6218_v36 = vrot.slane %v6204_v14, %v24702_v27  ;;  %v6051_v3 = vcombine.low %v24708_v45, %v24707_v32  ;;  %v6052_v18 = vcombine.high %v24708_v45, %v24707_v32  ;;  %v24712_v32 = vld [vmem:[#allocation19_spill] sm:$0xff] }
 0x494   : > { %v10011_v52 = vpop.xlane.xlu0 %10010  ;;  %5619 = vrot.lane.b32.xlu1 %v24701_v63, %s17779_s27  ;;  %v6127_v21 = vrot.slane %v6119_v11, %v24698_v57  ;;  %v21657_v10 = vrot.slane %v6120_v49, %v24698_v57  ;;  %v6036_v11 = vcombine.high %v24706_v37, %v24705_v12  ;;  %v7275_v24 = vcombine.low %v6227_v59, %v6234_v44 }
 0x495   : > { %v7259_v14 = vcombine.low %v6211_v9, %v6218_v36  ;;  %v21672_v49 = vrot.slane %v6051_v3, %v24698_v57  ;;  %v21675_v37 = vrot.slane %v6052_v18, %v24698_v57 }
 0x496   : > { %v10002_v28 = vpop.xlane.xlu1 %10001  ;;  %v6151_v20 = vcombine.low %v21664_v8, %v21657_v10  ;;  %v21682_v12 = vrot.slane %v6036_v11, %v24698_v57 }
 0x497   : > { %17239 = vrcp.f32 %v10002_v28 }
 0x498   : > { %v10017_v40 = vpop.xlane.xlu0 %10016  ;;  %17241 = vrcp.f32 %v10011_v52  ;;  %5667 = vrot.lane.b32.xlu1 %v24701_v63, %s17781_s20  ;;  %v6111_v52 = vrot.slane %v6103_v30, %v24698_v57  ;;  %v6083_v34 = vcombine.low %v21682_v12, %v21675_v37  ;;  %v6084_v50 = vcombine.high %v21682_v12, %v21675_v37 }
 0x499   : > { %17243 = vrcp.f32 %v10017_v40  ;;  %v15722_v40 = vcombine.high %v6211_v9, %v6218_v36  ;;  %v24709_v36 = vld [vmem:[#allocation50_spill] sm:$0xff] }
 0x49a   : > { %v10008_v28 = vpop.xlane.xlu1 %10007  ;;  %v6135_v35 = vcombine.low %v6111_v52, %v6127_v21  ;;  %v6136_v9 = vcombine.high %v6111_v52, %v6127_v21  ;;  %v21691_v21 = vrot.slane %v7259_v14, %v24698_v57  ;;  %v21697_v52 = vrot.slane %v7275_v24, %v24698_v57 }
 0x49b   : > { %17245 = vrcp.f32 %v10008_v28  ;;  %v15723_v28 = vcombine.high %v6227_v59, %v6234_v44  ;;  %v24710_v59 = vld [vmem:[#allocation49_spill] sm:$0xff]  ;;  %v21694_v18 = vrot.slane %v15722_v40, %v24698_v57 }
 0x49c   : > { %v10014_v22 = vpop.xlane.xlu0 %10013  ;;  %v5983_v44 = vcombine.low %v24710_v59, %v24709_v36  ;;  %v5984_v3 = vcombine.high %v24710_v59, %v24709_v36  ;;  %v21705_v36 = vrot.slane %v6135_v35, %v24702_v27  ;;  %v6152_v59 = vcombine.high %v21664_v8, %v21657_v10 }
 0x49d   : > { %17247 = vrcp.f32 %v10014_v22  ;;  %v21667_v22 = vrot.slane %v6035_v0, %v24698_v57  ;;  %v24711_v0 = vld [vmem:[#allocation48_spill] sm:$0xff]  ;;  %v21700_v11 = vrot.slane %v15723_v28, %v24698_v57  ;;  %v21714_v28 = vrot.slane %v6136_v9, %v24702_v27 }
 0x49e   : > { %v21661_v38 = vpop.xlane.xlu1 %10052  ;;  %v5967_v45 = vcombine.low %v24712_v32, %v24711_v0  ;;  %v5968_v40 = vcombine.high %v24712_v32, %v24711_v0  ;;  %v5991_v53 = vrot.slane %v5983_v44, %v24698_v57  ;;  %v9847_v35 = vsub.f32 %v24713_v5, %v21546_v19 }
 0x49f   : > { %v6067_v14 = vcombine.low %v21667_v22, %v21672_v49  ;;  %v6068_v8 = vcombine.high %v21667_v22, %v21672_v49  ;;  %v5998_v10 = vrot.slane %v5984_v3, %v24698_v57  ;;  %v7291_v44 = vcombine.low %v21691_v21, %v21694_v18 }
 0x4a0   : > { %v21669_v30 = vpop.xlane.xlu0 %10058  ;;  %v17238_v7 = vpop.eup %17237  ;;  %v5975_v9 = vrot.slane %v5967_v45, %v24698_v57  ;;  %v7307_v5 = vcombine.low %v21697_v52, %v21700_v11  ;;  %v21732_v49 = vrot.slane %v6151_v20, %v24702_v27  ;;  %v9950_v3 = vmul.f32 1.442695, %v9847_v35 }
 0x4a1   : > { %v10195_v43 = vmul.f32 %v17238_v7, %v21364_v2  ;;  %v7299_v26 = vrot.slane %v7291_v44, %v24702_v27  ;;  %v6166_v12 = vrot.slane %v6152_v59, %v24702_v27  ;;  %v7191_v31 = vcombine.low %v21705_v36, %v21714_v28 }
 0x4a2   : > { %5571 = vrot.lane.b32.xlu0 %v24701_v63, %s17780_s29  ;;  %v21702_v51 = vpop.xlane.xlu1 %10049  ;;  %v6000_v45 = vcombine.high %v5975_v9, %v5991_v53  ;;  %v7315_v37 = vrot.slane %v7307_v5, %v24702_v27  ;;  %v6091_v35 = vrot.slane %v6083_v34, %v24702_v27  ;;  %v6098_v59 = vrot.slane %v6084_v50, %v24702_v27 }
 0x4a3   : > { %v15721_v34 = vcombine.high %v21732_v49, %v6166_v12 }
 0x4a4   : > { %v10020_v24 = vpop.xlane.xlu0 %10019  ;;  %v17240_v63 = vpop.eup %17239  ;;  %v21771_v44 = vcombine.low %v7299_v26, %v7315_v37 }
 0x4a5   : > { %17249 = vrcp.f32 %v10020_v24  ;;  %v10193_v0 = vmul.f32 %v17240_v63, %v21375_v41  ;;  %v17242_v32 = vpop.eup %17241  ;;  %v5982_v41 = vrot.slane %v5968_v40, %v24698_v57  ;;  %v5999_v63 = vcombine.low %v5975_v9, %v5991_v53 }
 0x4a6   : > { %v10023_v19 = vpop.xlane.xlu1 %10022  ;;  %v17244_v22 = vpop.eup %17243 }
 0x4a7   : > { %16668 = vmatprep.mubr.msk.f32.mxu0 %vm7871_vm0, %v10193_v0  ;;  %17251 = vrcp.f32 %v10023_v19  ;;  %v6015_v24 = vcombine.low %v5982_v41, %v5998_v10  ;;  %v6016_v47 = vcombine.high %v5982_v41, %v5998_v10  ;;  %v24716_v0 = vld [vmem:[#allocation56_spill] sm:$0xff]  ;;  %v10199_v19 = vmul.f32 %v17242_v32, %v21368_v60  ;;  %v24717_v10 = vld [vmem:[#allocation25_spill] sm:$0xff] }
 0x4a8   : > { %v10029_v2 = vpop.xlane.xlu0 %10028  ;;  %v17246_v7 = vpop.eup %17245  ;;  %16669 = vmatmul.mubr.msk.f32.vlgmr.msra.gmra.mxu0 %vm7871_vm0, %v10195_v43  ;;  %17253 = vpow2.f32 %v9950_v3  ;;  %v6014_v32 = vrot.slane %v6000_v45, %v24702_v27  ;;  %v24719_v41 = vld [vmem:[#allocation57_spill] sm:$0xff]  ;;  %v7139_v45 = vcombine.low %v6091_v35, %v6098_v59 }
 0x4a9   : > { %16689 = vmatpush3.msra.mxu0 %v24715_v16  ;;  %v10197_v40 = vmul.f32 %v17246_v7, %v21388_v23  ;;  %v6075_v16 = vrot.slane %v6067_v14, %v24702_v27  ;;  %v6082_v23 = vrot.slane %v6068_v8, %v24702_v27  ;;  %v6007_v14 = vrot.slane %v5999_v63, %v24702_v27 }
 0x4aa   : > { %v17248_v20 = vpop.eup %17247  ;;  %16690 = vmatprep.subr.mxu0 %v24716_v0  ;;  %v21747_v53 = vpop.xlane.xlu1 %10055  ;;  %17255 = vpow2.f32 %v9942_v6  ;;  %v6023_v8 = vrot.slane %v6015_v24, %v24702_v27  ;;  %v6030_v9 = vrot.slane %v6016_v47, %v24702_v27  ;;  %v7207_v6 = vcombine.low %v21732_v49, %v6166_v12 }
 0x4ab   : > { %v10201_v43 = vmul.f32 %v17248_v20, %v21384_v17  ;;  %16691 = vmatpush3.msra.mxu0 %v24716_v0  ;;  %16671 = vmatprep.mubr.msk.f32.mxu0 %vm7871_vm0, %v10197_v40  ;;  %v10203_v17 = vmul.f32 %v17244_v22, %v21379_v42  ;;  %v24718_v42 = vld [vmem:[#allocation70_spill] sm:$0xff]  ;;  %17257 = vrcp.f32 %v10029_v2  ;;  %v15720_v22 = vcombine.high %v21705_v36, %v21714_v28  ;;  %v24720_v2 = vld [vmem:[#allocation27_spill] sm:$0xff]  ;;  %v24721_v20 = vld [vmem:[#allocation29_spill] sm:$0xff] }
 0x4ac   : > { %v21756_v60 = vpop.xlane.xlu0 %10076  ;;  %16692 = vmatprep.subr.mxu0 %v24717_v10  ;;  %16672 = vmatmul.mubr.msk.f32.gmra.mxu0 %vm7871_vm0, %v10199_v19  ;;  %v7123_v7 = vcombine.low %v6075_v16, %v6082_v23  ;;  %v15718_v63 = vcombine.high %v6075_v16, %v6082_v23  ;;  %v15719_v36 = vcombine.high %v6091_v35, %v6098_v59 }
 0x4ad   : > { %16693 = vmatpush3.msra.mxu0 %v24717_v10  ;;  %16682 = vmatprep.mubr.msk.f32.mxu1 %vm7871_vm0, %v10201_v43  ;;  %v7055_v28 = vcombine.low %v6007_v14, %v6014_v32  ;;  %v15716_v49 = vcombine.high %v6007_v14, %v6014_v32  ;;  %v7071_v3 = vcombine.low %v6023_v8, %v6030_v9 }
 0x4ae   : > { %16694 = vmatprep.subr.mxu0 %v24718_v42  ;;  %16683 = vmatmul.mubr.msk.f32.vlgmr.msra.gmra.mxu1 %vm7871_vm0, %v10203_v17  ;;  %v10026_v5 = vpop.xlane.xlu1 %10025  ;;  %v21789_v0 = vrot.slane %v7191_v31, %v24698_v57  ;;  %v21792_v19 = vrot.slane %v15720_v22, %v24698_v57  ;;  %v21795_v43 = vrot.slane %v7207_v6, %v24698_v57  ;;  %v24722_v17 = vld [vmem:[#allocation33_spill] sm:$0xff] }
 0x4af   : > { %16695 = vmatpush3.msra.mxu0 %v24718_v42  ;;  %16703 = vmatpush3.msra.mxu1 %v24719_v41  ;;  %17259 = vrcp.f32 %v10026_v5  ;;  %v21798_v12 = vrot.slane %v15721_v34, %v24698_v57  ;;  %v15717_v35 = vcombine.high %v6023_v8, %v6030_v9  ;;  %v21807_v31 = vrot.slane %v7123_v7, %v24698_v57 }
 0x4b0   : > { %v10032_v47 = vpop.xlane.xlu0 %10031  ;;  %16716 = vmatprep.subr.mxu0 %v21771_v44  ;;  %16704 = vmatprep.subr.mxu1 %v24720_v2  ;;  %v21812_v59 = vrot.slane %v15718_v63, %v24698_v57  ;;  %v21815_v14 = vrot.slane %v7139_v45, %v24698_v57  ;;  %v21818_v32 = vrot.slane %v15719_v36, %v24698_v57 }
 0x4b1   : > { %17261 = vrcp.f32 %v10032_v47  ;;  %16705 = vmatpush3.msra.mxu1 %v24720_v2  ;;  %v21828_v8 = vrot.slane %v7055_v28, %v24698_v57  ;;  %v21831_v42 = vrot.slane %v15716_v49, %v24698_v57  ;;  %v21837_v5 = vrot.slane %v15717_v35, %v24698_v57 }
 0x4b2   : > { %v17250_v50 = vpop.eup %17249  ;;  %16706 = vmatprep.subr.mxu1 %v24721_v20  ;;  %v21784_v24 = vpop.xlane.xlu1 %10073  ;;  %17263 = vrcp.f32 %v21702_v51  ;;  %v21834_v51 = vrot.slane %v7071_v3, %v24698_v57  ;;  %v7155_v6 = vcombine.low %v21807_v31, %v21812_v59  ;;  %v7171_v34 = vcombine.low %v21815_v14, %v21818_v32 }
 0x4b3   : > { %v10205_v40 = vmul.f32 %v17250_v50, %v21414_v48  ;;  %16707 = vmatpush3.msra.mxu1 %v24721_v20  ;;  %v21803_v48 = vcombine.high %v7299_v26, %v7315_v37  ;;  %v7239_v37 = vcombine.low %v21795_v43, %v21798_v12  ;;  %v7292_v2 = vcombine.high %v21691_v21, %v21694_v18 }
 0x4b4   : > { %v21800_v16 = vpop.xlane.xlu0 %10079  ;;  %v17252_v23 = vpop.eup %17251  ;;  %16708 = vmatprep.subr.mxu1 %v24722_v17  ;;  %v7087_v28 = vcombine.low %v21828_v8, %v21831_v42  ;;  %v21863_v3 = vrot.slane %v7155_v6, %v24702_v27  ;;  %v21866_v21 = vrot.slane %v7171_v34, %v24702_v27  ;;  %v7308_v18 = vcombine.high %v21697_v52, %v21700_v11 }
 0x4b5   : > { %16685 = vmatprep.mubr.msk.f32.mxu1 %vm7871_vm0, %v10205_v40  ;;  %16709 = vmatpush3.msra.mxu1 %v24722_v17  ;;  %v10207_v10 = vmul.f32 %v17252_v23, %v21425_v54  ;;  %v7223_v54 = vcombine.low %v21789_v0, %v21792_v19  ;;  %v21839_v22 = vpop.eup %17253  ;;  %v21855_v36 = vrot.slane %v7239_v37, %v24702_v27 }
 0x4b6   : > { %16730 = vmatprep.subr.mxu1 %v21803_v48  ;;  %v10035_v26 = vpop.xlane.xlu1 %10034  ;;  %v10117_v40 = vsel %vm7871_vm0, %v21839_v22, 0.0  ;;  %v21893_v11 = vrot.slane %v7308_v18, %v24702_v27  ;;  %v7224_v37 = vcombine.high %v21789_v0, %v21792_v19  ;;  %v7156_v34 = vcombine.high %v21807_v31, %v21812_v59 }
 0x4b7   : > { %16686 = vmatmul.mubr.msk.f32.gmra.mxu1 %vm7871_vm0, %v10207_v10  ;;  %17265 = vrcp.f32 %v10035_v26  ;;  %v21845_v41 = vpop.eup %17255  ;;  %v21852_v45 = vrot.slane %v7223_v54, %v24702_v27  ;;  %v7187_v10 = vcombine.low %v21863_v3, %v21866_v21  ;;  %v7172_v0 = vcombine.high %v21815_v14, %v21818_v32 }
 0x4b8   : > { %v10038_v9 = vpop.xlane.xlu0 %10037  ;;  %v17258_v7 = vpop.eup %17257  ;;  %v10105_v17 = vsel %vm7871_vm0, %v21845_v41, 0.0  ;;  %v21917_v31 = vrot.slane %v7224_v37, %v24702_v27  ;;  %v21932_v32 = vrot.slane %v7156_v34, %v24702_v27  ;;  %v24728_v34 = vld [vmem:[#allocation96_spill] sm:$0xff] }
 0x4b9   : > { %17267 = vrcp.f32 %v10038_v9  ;;  %v10211_v20 = vmul.f32 %v17258_v7, %v21421_v1  ;;  %v21882_v1 = vrot.slane %v7087_v28, %v24702_v27 }
 0x4ba   : > { %17269 = vrcp.f32 %v21661_v38  ;;  %v10083_v47 = vpop.xlane.xlu1 %10082  ;;  %v7103_v38 = vcombine.low %v21834_v51, %v21837_v5 }
 0x4bb   : > { %17271 = vrcp.f32 %v21747_v53 }
 0x4bc   : > { %v10047_v50 = vpop.xlane.xlu0 %10046  ;;  %v17260_v63 = vpop.eup %17259  ;;  %17273 = vrcp.f32 %v21669_v30  ;;  %10118 = vadd.xlane.f32.xlu1 %v10117_v40  ;;  %v7255_v30 = vcombine.low %v21852_v45, %v21855_v36  ;;  %v21885_v52 = vrot.slane %v7103_v38, %v24702_v27  ;;  %v24723_v40 = vld [vmem:[#allocation54_spill] sm:$0xff] }
 0x4bd   : > { %v10209_v53 = vmul.f32 %v17260_v63, %v21445_v56 }
 0x4be   : > { %v17262_v49 = vpop.eup %17261  ;;  %v10041_v23 = vpop.xlane.xlu1 %10040 }
 0x4bf   : > { %v10213_v35 = vmul.f32 %v17262_v49, %v21449_v29  ;;  %17275 = vrcp.f32 %v10041_v23  ;;  %16696 = vmatprep.mubr.msk.f32.mxu0 %vm7871_vm0, %v10209_v53  ;;  %v21890_v29 = vrot.slane %v7292_v2, %v24702_v27  ;;  %v17264_v26 = vpop.eup %17263  ;;  %v7256_v23 = vcombine.high %v21852_v45, %v21855_v36 }
 0x4c0   : > { %v10044_v56 = vpop.xlane.xlu0 %10043  ;;  %16697 = vmatmul.mubr.msk.f32.vlgmr.msra.gmra.mxu0 %vm7871_vm0, %v10211_v20  ;;  %17277 = vrcp.f32 %v21784_v24  ;;  %v7188_v45 = vcombine.high %v21863_v3, %v21866_v21  ;;  %v24724_v3 = vld [vmem:[#allocation47_spill] sm:$0xff] }
 0x4c1   : > { %10106 = vadd.xlane.f32.xlu0 %v10105_v17  ;;  %16717 = vmatpush3.msra.mxu0 %v21771_v44  ;;  %17279 = vrcp.f32 %v21756_v60  ;;  %v7119_v44 = vcombine.low %v21882_v1, %v21885_v52  ;;  %v7240_v60 = vcombine.high %v21795_v43, %v21798_v12  ;;  %v7325_v6 = vcombine.low %v21890_v29, %v21893_v11 }
 0x4c2   : > { %16699 = vmatprep.mubr.msk.f32.mxu0 %vm7871_vm0, %v10213_v35  ;;  %16718 = vmatprep.subr.mxu0 %v7255_v30  ;;  %17281 = vrcp.f32 %v10044_v56  ;;  %v10225_v43 = vmul.f32 %v17264_v26, %v21407_v46  ;;  %v7104_v46 = vcombine.high %v21834_v51, %v21837_v5 }
 0x4c3   : > { %16719 = vmatpush3.msra.mxu0 %v7255_v30  ;;  %17283 = vrcp.f32 %v21800_v16 }
 0x4c4   : > { %v10065_v24 = vpop.xlane.xlu0 %10064  ;;  %v17266_v54 = vpop.eup %17265  ;;  %16720 = vmatprep.subr.mxu0 %v7187_v10  ;;  %17285 = vrcp.f32 %v10083_v47  ;;  %v21935_v47 = vrot.slane %v7172_v0, %v24702_v27  ;;  %v21947_v51 = vrot.slane %v7104_v46, %v24702_v27  ;;  %v24730_v0 = vld [vmem:[#allocation46_spill] sm:$0xff] }
 0x4c5   : > { %16721 = vmatpush3.msra.mxu0 %v7187_v10  ;;  %v10215_v16 = vmul.f32 %v17266_v54, %v21465_v58  ;;  %17287 = vrcp.f32 %v10047_v50  ;;  %v21920_v58 = vrot.slane %v7240_v60, %v24702_v27 }
 0x4c6   : > { %v17268_v9 = vpop.eup %17267  ;;  %16722 = vmatprep.subr.mxu0 %v7119_v44  ;;  %v7189_v49 = vcombine.low %v21932_v32, %v21935_v47 }
 0x4c7   : > { %v10217_v7 = vmul.f32 %v17268_v9, %v21469_v33  ;;  %v17270_v19 = vpop.eup %17269  ;;  %16723 = vmatpush3.msra.mxu0 %v7119_v44  ;;  %v7088_v33 = vcombine.high %v21828_v8, %v21831_v42  ;;  %v21929_v14 = vpop.xlane.xlu1 %10100  ;;  %v7257_v8 = vcombine.low %v21917_v31, %v21920_v58  ;;  %v24726_v9 = vld [vmem:[#allocation42_spill] sm:$0xff] }
 0x4c8   : > { %v10062_v12 = vpop.xlane.xlu0 %10061  ;;  %v17272_v2 = vpop.eup %17271  ;;  %16744 = vmatprep.subr.mxu0 %v7325_v6  ;;  %16700 = vmatmul.mubr.msk.f32.gmra.mxu0 %vm7871_vm0, %v10215_v16  ;;  %v10227_v59 = vmul.f32 %v17270_v19, %v21393_v13  ;;  %v24729_v16 = vld [vmem:[#allocation34_spill] sm:$0xff] }
 0x4c9   : > { %17289 = vrcp.f32 %v10062_v12  ;;  %16724 = vmatprep.mubr.msk.f32.mxu0 %vm7871_vm0, %v10225_v43  ;;  %16710 = vmatprep.mubr.msk.f32.mxu1 %vm7871_vm0, %v10217_v7  ;;  %v17274_v50 = vpop.eup %17273  ;;  %v10229_v63 = vmul.f32 %v17272_v2, %v21429_v61  ;;  %v21944_v42 = vrot.slane %v7088_v33, %v24702_v27  ;;  %v9848_v7 = vsub.f32 %v24729_v16, %v24728_v34  ;;  %v24731_v33 = vld [vmem:[#allocation86_spill] sm:$0xff] }
 0x4ca   : > { %17291 = vrcp.f32 %v10065_v24 }
 0x4cb   : > { %v10098_v5 = vpop.xlane.xlu1 %10097  ;;  %v7121_v56 = vcombine.low %v21944_v42, %v21947_v51 }
 0x4cc   : > { %v10068_v28 = vpop.xlane.xlu0 %10067  ;;  %v17276_v38 = vpop.eup %17275  ;;  %16725 = vmatmul.mubr.msk.f32.vlgmr.msra.gmra.mxu0 %vm7871_vm0, %v10227_v59  ;;  %v7258_v59 = vcombine.high %v21917_v31, %v21920_v58 }
 0x4cd   : > { %17293 = vrcp.f32 %v10068_v28  ;;  %v10219_v13 = vmul.f32 %v17276_v38, %v21489_v4  ;;  %16745 = vmatpush3.msra.mxu0 %v7325_v6  ;;  %16727 = vmatprep.mubr.msk.f32.mxu0 %vm7871_vm0, %v10229_v63  ;;  %v17278_v61 = vpop.eup %17277  ;;  %v10231_v4 = vmul.f32 %v17274_v50, %v21398_v39  ;;  %v9952_v63 = vmul.f32 1.442695, %v9848_v7 }
 0x4ce   : > { %16746 = vmatprep.subr.mxu0 %v7257_v8  ;;  %v17280_v53 = vpop.eup %17279  ;;  %17295 = vrcp.f32 %v10098_v5  ;;  %5617 = vrot.lane.b32.xlu1 %v24723_v40, %s17779_s27  ;;  %v10241_v39 = vmul.f32 %v17278_v61, %v21455_v62  ;;  %v7190_v28 = vcombine.high %v21932_v32, %v21935_v47  ;;  %v24733_v5 = vld [vmem:[#allocation95_spill] sm:$0xff] }
 0x4cf   : > { %16747 = vmatpush3.msra.mxu0 %v7257_v8  ;;  %16711 = vmatmul.mubr.msk.f32.vlgmr.msra.gmra.mxu1 %vm7871_vm0, %v10219_v13  ;;  %v17282_v20 = vpop.eup %17281  ;;  %v10071_v17 = vpop.xlane.xlu1 %10070  ;;  %v10243_v10 = vmul.f32 %v17280_v53, %v21433_v55  ;;  %v7120_v55 = vcombine.high %v21882_v1, %v21885_v52  ;;  %v24732_v13 = vld [vmem:[#allocation85_spill] sm:$0xff]  ;;  %v24735_v53 = vld [vmem:[#allocation87_spill] sm:$0xff] }
 0x4d0   : > { %v10086_v18 = vpop.xlane.xlu0 %10085  ;;  %16748 = vmatprep.subr.mxu0 %v7189_v49  ;;  %v17284_v35 = vpop.eup %17283  ;;  %16728 = vmatmul.mubr.msk.f32.gmra.mxu0 %vm7871_vm0, %v10231_v4 }
 0x4d1   : > { %17297 = vrcp.f32 %v10086_v18  ;;  %16731 = vmatpush3.msra.mxu1 %v21803_v48  ;;  %16749 = vmatpush3.msra.mxu0 %v7189_v49  ;;  %v17286_v30 = vpop.eup %17285  ;;  %v10221_v48 = vmul.f32 %v17282_v20, %v21493_v15  ;;  %v10245_v62 = vmul.f32 %v17284_v35, %v21459_v25  ;;  %v7326_v25 = vcombine.high %v21890_v29, %v21893_v11  ;;  %v24725_v15 = vld [vmem:[#allocation43_spill] sm:$0xff]  ;;  %v24734_v49 = vld [vmem:[#allocation36_spill] sm:$0xff] }
 0x4d2   : > { %16732 = vmatprep.subr.mxu1 %v7256_v23  ;;  %17299 = vrcp.f32 %v10071_v17  ;;  %16750 = vmatprep.subr.mxu0 %v7121_v56  ;;  %v17288_v26 = vpop.eup %17287  ;;  %v10247_v1 = vmul.f32 %v17286_v30, %v24726_v9  ;;  %v24727_v29 = vld [vmem:[#allocation83_spill] sm:$0xff]  ;;  %v9852_v31 = vsub.f32 %v24734_v49, %v24733_v5  ;;  %v7122_v18 = vcombine.high %v21944_v42, %v21947_v51  ;;  %v24737_v30 = vld [vmem:[#allocation89_spill] sm:$0xff] }
 0x4d3   : > { %16752 = vmatprep.mubr.msk.f32.mxu0 %vm7871_vm0, %v10241_v39  ;;  %16733 = vmatpush3.msra.mxu1 %v7256_v23  ;;  %v10089_v54 = vpop.xlane.xlu1 %10088  ;;  %v10223_v44 = vmul.f32 %v17288_v26, %v24725_v15  ;;  %v24736_v23 = vld [vmem:[#allocation60_spill] sm:$0xff]  ;;  %v24738_v26 = vld [vmem:[#allocation90_spill] sm:$0xff]  ;;  %v24742_v49 = vld [vmem:[#allocation93_spill] sm:$0xff] }
 0x4d4   : > { %v10095_v36 = vpop.xlane.xlu0 %10094  ;;  %16751 = vmatpush3.msra.mxu0 %v7121_v56  ;;  %16734 = vmatprep.subr.mxu1 %v7188_v45  ;;  %17301 = vrcp.f32 %v10089_v54  ;;  %v9960_v17 = vmul.f32 1.442695, %v9852_v31  ;;  %v24743_v31 = vld [vmem:[#allocation75_spill] sm:$0xff] }
 0x4d5   : > { %16753 = vmatmul.mubr.msk.f32.vlgmr.msra.gmra.mxu0 %vm7871_vm0, %v10243_v10  ;;  %16735 = vmatpush3.msra.mxu1 %v7188_v45 }
 0x4d6   : > { %v17290_v24 = vpop.eup %17289  ;;  %16755 = vmatprep.mubr.msk.f32.mxu0 %vm7871_vm0, %v10245_v62  ;;  %16736 = vmatprep.subr.mxu1 %v7120_v55 }
 0x4d7   : > { %v10233_v21 = vmul.f32 %v17290_v24, %v24724_v3  ;;  %16713 = vmatprep.mubr.msk.f32.mxu1 %vm7871_vm0, %v10221_v48  ;;  %v17292_v60 = vpop.eup %17291  ;;  %16737 = vmatpush3.msra.mxu1 %v7120_v55  ;;  %v5574_v6 = vpop.permute.xlu1 %5573 }
 0x4d8   : > { %v10092_v37 = vpop.xlane.xlu0 %10091  ;;  %5569 = vrot.lane.b32.xlu0 %v24723_v40, %s17780_s29  ;;  %16758 = vmatprep.subr.mxu1 %v7326_v25  ;;  %v10235_v19 = vmul.f32 %v17292_v60, %v24730_v0 }
 0x4d9   : > { %17303 = vrcp.f32 %v10092_v37  ;;  %16714 = vmatmul.mubr.msk.f32.gmra.mxu1 %vm7871_vm0, %v10223_v44  ;;  %16756 = vmatmul.mubr.msk.f32.gmra.mxu0 %vm7871_vm0, %v10247_v1 }
 0x4da   : > { %v17294_v52 = vpop.eup %17293  ;;  %17305 = vrcp.f32 %v10095_v36  ;;  %16738 = vmatprep.mubr.msk.f32.mxu1 %vm7871_vm0, %v10233_v21  ;;  %v24739_v21 = vld [vmem:[#allocation88_spill] sm:$0xff] }
 0x4db   : > { %v10237_v11 = vmul.f32 %v17294_v52, %v24727_v29  ;;  %v17296_v12 = vpop.eup %17295  ;;  %v5670_v50 = vpop.permute.xlu1 %5669 }
 0x4dc   : > { %v21987_v43 = vpop.xlane.xlu0 %10112  ;;  %5665 = vrot.lane.b32.xlu0 %v24723_v40, %s17781_s20  ;;  %v10257_v46 = vmul.f32 %v17296_v12, %v24731_v33  ;;  %v6459_v58 = vcombine.low %v5574_v6, %v5670_v50  ;;  %v6460_v20 = vcombine.high %v5574_v6, %v5670_v50 }
 0x4dd   : > { %16739 = vmatmul.mubr.msk.f32.vlgmr.msra.gmra.mxu1 %vm7871_vm0, %v10235_v19 }
 0x4de   : > { %v17298_v2 = vpop.eup %17297  ;;  %16759 = vmatpush3.msra.mxu1 %v7326_v25  ;;  %16741 = vmatprep.mubr.msk.f32.mxu1 %vm7871_vm0, %v10237_v11  ;;  %v6467_v42 = vrot.slane %v6459_v58, %v24698_v57  ;;  %v6474_v45 = vrot.slane %v6460_v20, %v24698_v57  ;;  %v24740_v11 = vld [vmem:[#allocation92_spill] sm:$0xff]  ;;  %v9853_v58 = vsub.f32 %v24743_v31, %v24742_v49  ;;  %v24757_v31 = vld [vmem:[#allocation97_spill] sm:$0xff] }
 0x4df   : > { %16780 = vmatprep.mubr.msk.f32.mxu0 %vm7871_vm0, %v10257_v46  ;;  %16760 = vmatprep.subr.mxu1 %v7258_v59  ;;  %v17300_v8 = vpop.eup %17299  ;;  %v10249_v61 = vmul.f32 %v17298_v2, %v24732_v13  ;;  %v24741_v13 = vld [vmem:[#allocation61_spill] sm:$0xff] }
 0x4e0   : > { %v10110_v38 = vpop.xlane.xlu0 %10109  ;;  %16761 = vmatpush3.msra.mxu1 %v7258_v59  ;;  %v10239_v4 = vmul.f32 %v17300_v8, %v24735_v53 }
 0x4e1   : > { %17307 = vrcp.f32 %v10110_v38  ;;  %16762 = vmatprep.subr.mxu1 %v7190_v28  ;;  %v17302_v47 = vpop.eup %17301 }
 0x4e2   : > { %16763 = vmatpush3.msra.mxu1 %v7190_v28  ;;  %17309 = vpow2.f32 %v9952_v63  ;;  %v10251_v10 = vmul.f32 %v17302_v47, %v24737_v30 }
 0x4e3   : > { %16742 = vmatmul.mubr.msk.f32.gmra.mxu1 %vm7871_vm0, %v10239_v4  ;;  %16764 = vmatprep.subr.mxu1 %v7122_v18  ;;  %17311 = vpow2.f32 %v9960_v17  ;;  %v24744_v4 = vld [vmem:[#allocation94_spill] sm:$0xff] }
 0x4e4   : > { %v5622_v32 = vpop.permute.xlu0 %5621  ;;  %16765 = vmatpush3.msra.mxu1 %v7122_v18  ;;  %16766 = vmatprep.mubr.msk.f32.mxu1 %vm7871_vm0, %v10249_v61  ;;  %v24745_v18 = vld [vmem:[#allocation72_spill] sm:$0xff] }
 0x4e5   : > { %v6443_v35 = vcombine.low %v24736_v23, %v5622_v32  ;;  %v6444_v56 = vcombine.high %v24736_v23, %v5622_v32  ;;  %v9849_v20 = vsub.f32 %v24745_v18, %v24744_v4  ;;  %v24746_v32 = vld [vmem:[#allocation63_spill] sm:$0xff] }
 0x4e6   : > { %v17304_v39 = vpop.eup %17303 }
 0x4e7   : > { %v17306_v51 = vpop.eup %17305  ;;  %v6451_v48 = vrot.slane %v6443_v35, %v24698_v57  ;;  %v6458_v36 = vrot.slane %v6444_v56, %v24698_v57  ;;  %v10253_v62 = vmul.f32 %v17304_v39, %v24738_v26  ;;  %16767 = vmatmul.mubr.msk.f32.vlgmr.msra.gmra.mxu1 %vm7871_vm0, %v10251_v10  ;;  %v9962_v35 = vmul.f32 1.442695, %v9853_v58  ;;  %v24747_v56 = vld [vmem:[#allocation98_spill] sm:$0xff]  ;;  %v24748_v39 = vld [vmem:[#allocation31_spill] sm:$0xff]  ;;  %v24758_v58 = vld [vmem:[#allocation65_spill] sm:$0xff] }
 0x4e8   : > { %v10255_v25 = vmul.f32 %v17306_v51, %v24739_v21  ;;  %v9851_v17 = vsub.f32 %v24748_v39, %v24747_v56  ;;  %v24751_v21 = vld [vmem:[#allocation104_spill] sm:$0xff]  ;;  %v9855_v4 = vsub.f32 %v24758_v58, %v24757_v31 }
 0x4e9   : > { %v6475_v24 = vcombine.low %v6451_v48, %v6467_v42  ;;  %v6476_v55 = vcombine.high %v6451_v48, %v6467_v42  ;;  %v6491_v54 = vcombine.low %v6458_v36, %v6474_v45  ;;  %v6492_v3 = vcombine.high %v6458_v36, %v6474_v45  ;;  %16769 = vmatprep.mubr.msk.f32.mxu1 %vm7871_vm0, %v10253_v62  ;;  %v24749_v48 = vld [vmem:[#allocation100_spill] sm:$0xff]  ;;  %v24750_v36 = vld [vmem:[#allocation35_spill] sm:$0xff] }
 0x4ea   : > { %v9954_v45 = vmul.f32 1.442695, %v9849_v20  ;;  %v9850_v26 = vsub.f32 %v24750_v36, %v24749_v48  ;;  %17313 = vpow2.f32 %v9962_v35 }
 0x4eb   : > { %v6483_v15 = vrot.slane %v6475_v24, %v24702_v27  ;;  %v6490_v44 = vrot.slane %v6476_v55, %v24702_v27  ;;  %v6499_v37 = vrot.slane %v6491_v54, %v24702_v27  ;;  %v6506_v60 = vrot.slane %v6492_v3, %v24702_v27  ;;  %16770 = vmatmul.mubr.msk.f32.gmra.mxu1 %vm7871_vm0, %v10255_v25  ;;  %v24752_v25 = vld [vmem:[#allocation69_spill] sm:$0xff] }
 0x4ec   : > { %v9958_v3 = vmul.f32 1.442695, %v9851_v17  ;;  %17315 = vpow2.f32 %v9954_v45  ;;  %v9966_v17 = vmul.f32 1.442695, %v9855_v4 }
 0x4ed   : > { %v7531_v9 = vcombine.low %v6483_v15, %v6490_v44  ;;  %v15730_v1 = vcombine.high %v6483_v15, %v6490_v44  ;;  %v7547_v6 = vcombine.low %v6499_v37, %v6506_v60  ;;  %v15731_v29 = vcombine.high %v6499_v37, %v6506_v60 }
 0x4ee   : > { %v17308_v52 = vpop.eup %17307  ;;  %v9856_v15 = vsub.f32 %v24752_v25, %v24751_v21  ;;  %17317 = vpow2.f32 %v9958_v3 }
 0x4ef   : > { %v10265_v34 = vmul.f32 %v17308_v52, %v24740_v11  ;;  %v22025_v16 = vrot.slane %v7531_v9, %v24698_v57  ;;  %v22028_v7 = vrot.slane %v15730_v1, %v24698_v57  ;;  %v22031_v0 = vrot.slane %v7547_v6, %v24698_v57  ;;  %v22036_v12 = vpop.eup %17309  ;;  %v24753_v1 = vld [vmem:[#allocation99_spill] sm:$0xff]  ;;  %v24754_v52 = vld [vmem:[#allocation64_spill] sm:$0xff] }
 0x4f0   : > { %v22034_v19 = vrot.slane %v15731_v29, %v24698_v57  ;;  %v10120_v59 = vsel %vm7871_vm0, %v22036_v12, 0.0  ;;  %v22047_v38 = vpop.eup %17311  ;;  %v9854_v6 = vsub.f32 %v24754_v52, %v24753_v1  ;;  %v9956_v29 = vmul.f32 1.442695, %v9850_v26 }
 0x4f1   : > { %16794 = vmatprep.mubr.msk.f32.mxu1 %vm7871_vm0, %v10265_v34  ;;  %v7563_v2 = vcombine.low %v22025_v16, %v22028_v7  ;;  %v10132_v8 = vsel %vm7871_vm0, %v22047_v38, 0.0 }
 0x4f2   : > { %v7579_v33 = vcombine.low %v22031_v0, %v22034_v19  ;;  %10121 = vadd.xlane.f32.xlu1 %v10120_v59  ;;  %v24756_v59 = vld [vmem:[#allocation68_spill] sm:$0xff]  ;;  %v9964_v18 = vmul.f32 1.442695, %v9854_v6  ;;  %17319 = vpow2.f32 %v9956_v29 }
 0x4f3   : > { %v7571_v46 = vrot.slane %v7563_v2, %v24702_v27 }
 0x4f4   : > { %v7587_v50 = vrot.slane %v7579_v33, %v24702_v27 }
 0x4f6   : > { %v7595_v63 = vcombine.low %v7571_v46, %v7587_v50  ;;  %v7596_v28 = vcombine.high %v7571_v46, %v7587_v50  ;;  %v24755_v46 = vld [vmem:[#allocation102_spill] sm:$0xff] }
 0x4f7   : > { %v9857_v50 = vsub.f32 %v24756_v59, %v24755_v46  ;;  %v22095_v48 = vpop.eup %17313 }
 0x4f8   : > { %16772 = vmatprep.subr.mxu0 %v7595_v63  ;;  %16786 = vmatprep.subr.mxu1 %v7596_v28  ;;  %v10135_v21 = vsel %vm7871_vm0, %v22095_v48, 0.0 }
 0x4f9   : > { %16773 = vmatpush3.msra.mxu0 %v7595_v63  ;;  %16787 = vmatpush3.msra.mxu1 %v7596_v28  ;;  %v9968_v63 = vmul.f32 1.442695, %v9856_v15  ;;  %v9970_v35 = vmul.f32 1.442695, %v9857_v50 }
 0x4fb   : > { %10133 = vadd.xlane.f32.xlu0 %v10132_v8  ;;  %17321 = vpow2.f32 %v9968_v63 }
 0x4fc   : > { %17323 = vpow2.f32 %v9964_v18 }
 0x4fd   : > { %17325 = vpow2.f32 %v9970_v35 }
 0x4fe   : > { %17327 = vpow2.f32 %v9966_v17 }
 0x503   : > { %5615 = vrot.lane.b32.xlu1 %v24741_v13, %s17779_s27 }
 0x507   : > { %5663 = vrot.lane.b32.xlu1 %v24741_v13, %s17781_s20 }
 0x50c   : > { %v22055_v61 = vpop.xlane.xlu1 %10103 }
 0x510   : > { %v5620_v5 = vpop.permute.xlu1 %5619 }
 0x511   : > { %5567 = vrot.lane.b32.xlu0 %v24741_v13, %s17780_s29  ;;  %v6375_v47 = vcombine.low %v24746_v32, %v5620_v5  ;;  %v6376_v23 = vcombine.high %v24746_v32, %v5620_v5 }
 0x513   : > { %v6383_v62 = vrot.slane %v6375_v47, %v24698_v57  ;;  %v6390_v24 = vrot.slane %v6376_v23, %v24698_v57 }
 0x514   : > { %v5668_v30 = vpop.permute.xlu1 %5667 }
 0x515   : > { %v22061_v53 = vpop.xlane.xlu0 %10115 }
 0x519   : > { %v5572_v10 = vpop.permute.xlu0 %5571 }
 0x51a   : > { %v6391_v42 = vcombine.low %v5572_v10, %v5668_v30  ;;  %v6392_v51 = vcombine.high %v5572_v10, %v5668_v30  ;;  %v24759_v30 = vld [vmem:[#allocation103_spill] sm:$0xff] }
 0x51b   : > { %v24760_v10 = vld [vmem:[#allocation59_spill] sm:$0xff] }
 0x51c   : > { %v6399_v55 = vrot.slane %v6391_v42, %v24698_v57  ;;  %v6406_v54 = vrot.slane %v6392_v51, %v24698_v57  ;;  %v9860_v42 = vsub.f32 %v24760_v10, %v24759_v30 }
 0x51e   : > { %v6407_v44 = vcombine.low %v6383_v62, %v6399_v55  ;;  %v6408_v37 = vcombine.high %v6383_v62, %v6399_v55  ;;  %v6423_v60 = vcombine.low %v6390_v24, %v6406_v54  ;;  %v6424_v9 = vcombine.high %v6390_v24, %v6406_v54  ;;  %v22097_v62 = vpop.eup %17315  ;;  %v24761_v24 = vld [vmem:[#allocation101_spill] sm:$0xff]  ;;  %v24762_v55 = vld [vmem:[#allocation71_spill] sm:$0xff] }
 0x51f   : > { %v9861_v54 = vsub.f32 %v24762_v55, %v24761_v24  ;;  %v9976_v3 = vmul.f32 1.442695, %v9860_v42  ;;  %v22103_v25 = vpop.eup %17317 }
 0x520   : > { %v6415_v11 = vrot.slane %v6407_v44, %v24702_v27  ;;  %v6422_v34 = vrot.slane %v6408_v37, %v24702_v27  ;;  %v6431_v2 = vrot.slane %v6423_v60, %v24702_v27  ;;  %v6438_v33 = vrot.slane %v6424_v9, %v24702_v27  ;;  %v22105_v15 = vpop.eup %17319 }
 0x521   : > { %v9978_v44 = vmul.f32 1.442695, %v9861_v54  ;;  %17329 = vpow2.f32 %v9976_v3  ;;  %v10123_v37 = vsel %vm7871_vm0, %v22097_v62, 0.0  ;;  %v10129_v60 = vsel %vm7871_vm0, %v22103_v25, 0.0  ;;  %v22111_v9 = vpop.eup %17321 }
 0x522   : > { %v7463_v28 = vcombine.low %v6415_v11, %v6422_v34  ;;  %v15728_v8 = vcombine.high %v6415_v11, %v6422_v34  ;;  %v7479_v5 = vcombine.low %v6431_v2, %v6438_v33  ;;  %v15729_v49 = vcombine.high %v6431_v2, %v6438_v33  ;;  %v22115_v52 = vpop.eup %17323 }
 0x523   : > { %17331 = vpow2.f32 %v9978_v44  ;;  %v10126_v1 = vsel %vm7871_vm0, %v22105_v15, 0.0  ;;  %v10144_v6 = vsel %vm7871_vm0, %v22111_v9, 0.0  ;;  %v22119_v29 = vpop.eup %17325  ;;  %v10138_v2 = vsel %vm7871_vm0, %v22115_v52, 0.0  ;;  %v24767_v44 = vld [vmem:[#allocation55_spill] sm:$0xff] }
 0x524   : > { %v7470_v20 = vrot.slane %v7463_v28, %v24698_v57  ;;  %v7478_v32 = vrot.slane %v15728_v8, %v24698_v57  ;;  %v7486_v47 = vrot.slane %v7479_v5, %v24698_v57  ;;  %v7494_v23 = vrot.slane %v15729_v49, %v24698_v57  ;;  %24763 = vst [vmem:[#allocation76_spill] sm:$0xff] %v22119_v29  ;;  %v22123_v33 = vpop.eup %17327 }
 0x525   : > { %v10147_v46 = vsel %vm7871_vm0, %v22119_v29, 0.0  ;;  %v10141_v8 = vsel %vm7871_vm0, %v22123_v33, 0.0 }
 0x526   : > { %v7495_v56 = vcombine.low %v7470_v20, %v7478_v32  ;;  %v7511_v39 = vcombine.low %v7486_v47, %v7494_v23  ;;  %v7496_v11 = vcombine.high %v7470_v20, %v7478_v32  ;;  %v7512_v34 = vcombine.high %v7486_v47, %v7494_v23  ;;  %v24765_v20 = vld [vmem:[#allocation22_spill] sm:$0xff] }
 0x528   : > { %v7503_v51 = vrot.slane %v7495_v56, %v24702_v27  ;;  %v7519_v45 = vrot.slane %v7511_v39, %v24702_v27  ;;  %v7510_v59 = vrot.slane %v7496_v11, %v24702_v27  ;;  %v7526_v50 = vrot.slane %v7512_v34, %v24702_v27 }
 0x52a   : > { %v7527_v36 = vcombine.low %v7503_v51, %v7519_v45  ;;  %v7528_v26 = vcombine.high %v7503_v51, %v7519_v45  ;;  %v22129_v63 = vcombine.low %v7510_v59, %v7526_v50  ;;  %v22131_v28 = vcombine.high %v7510_v59, %v7526_v50 }
 0x52b   : > { %10136 = vadd.xlane.f32.xlu1 %v10135_v21  ;;  %v24766_v21 = vld [vmem:[#allocation108_spill] sm:$0xff] }
 0x52c   : > { %16774 = vmatprep.subr.mxu0 %v7527_v36  ;;  %16788 = vmatprep.subr.mxu1 %v7528_v26 }
 0x52d   : > { %16775 = vmatpush3.msra.mxu0 %v7527_v36  ;;  %16789 = vmatpush3.msra.mxu1 %v7528_v26 }
 0x52e   : > { %v22135_v5 = vpop.eup %17329 }
 0x52f   : > { %10130 = vadd.xlane.f32.xlu1 %v10129_v60  ;;  %v10156_v49 = vsel %vm7871_vm0, %v22135_v5, 0.0 }
 0x530   : > { %10124 = vadd.xlane.f32.xlu0 %v10123_v37  ;;  %v22139_v31 = vpop.eup %17331  ;;  %v9858_v37 = vsub.f32 %v24767_v44, %v24766_v21 }
 0x531   : > { %24764 = vst [vmem:[#allocation20_spill] sm:$0xff] %v22139_v31  ;;  %v10159_v58 = vsel %vm7871_vm0, %v22139_v31, 0.0 }
 0x532   : > { %v9972_v50 = vmul.f32 1.442695, %v9858_v37 }
 0x533   : > { %10145 = vadd.xlane.f32.xlu1 %v10144_v6 }
 0x534   : > { %10127 = vadd.xlane.f32.xlu0 %v10126_v1  ;;  %17333 = vpow2.f32 %v9972_v50 }
 0x537   : > { %10148 = vadd.xlane.f32.xlu1 %v10147_v46 }
 0x538   : > { %10139 = vadd.xlane.f32.xlu0 %v10138_v2 }
 0x53c   : > { %10142 = vadd.xlane.f32.xlu0 %v10141_v8 }
 0x540   : > { %10157 = vadd.xlane.f32.xlu0 %v10156_v49 }
 0x544   : > { %10160 = vadd.xlane.f32.xlu0 %v10159_v58 }
 0x545   : > { %v22143_v4 = vpop.xlane.xlu1 %10118 }
 0x548   : > { %5581 = vrot.lane.b32.xlu1 %v24765_v20, %s17780_s29 }
 0x549   : > { %v5618_v32 = vpop.permute.xlu1 %5617 }
 0x54a   : > { %v22145_v18 = vpop.xlane.xlu0 %10106  ;;  %v6307_v23 = vcombine.low %v24723_v40, %v5618_v32  ;;  %v6308_v35 = vcombine.high %v24723_v40, %v5618_v32 }
 0x54c   : > { %5677 = vrot.lane.b32.xlu1 %v24765_v20, %s17781_s20  ;;  %v6315_v30 = vrot.slane %v6307_v23, %v24698_v57  ;;  %v6322_v10 = vrot.slane %v6308_v35, %v24698_v57  ;;  %v24769_v23 = vld [vmem:[#allocation53_spill] sm:$0xff] }
 0x54e   : > { %v5570_v47 = vpop.permute.xlu0 %5569 }
 0x552   : > { %v5666_v56 = vpop.permute.xlu0 %5665 }
 0x553   : > { %v6323_v39 = vcombine.low %v5570_v47, %v5666_v56  ;;  %v6324_v17 = vcombine.high %v5570_v47, %v5666_v56  ;;  %v24768_v47 = vld [vmem:[#allocation107_spill] sm:$0xff] }
 0x554   : > { %v9862_v35 = vsub.f32 %v24769_v23, %v24768_v47 }
 0x555   : > { %v6331_v42 = vrot.slane %v6323_v39, %v24698_v57  ;;  %v6338_v51 = vrot.slane %v6324_v17, %v24698_v57 }
 0x557   : > { %v6339_v45 = vcombine.low %v6315_v30, %v6331_v42  ;;  %v6340_v36 = vcombine.high %v6315_v30, %v6331_v42  ;;  %v6355_v26 = vcombine.low %v6322_v10, %v6338_v51  ;;  %v6356_v24 = vcombine.high %v6322_v10, %v6338_v51 }
 0x559   : > { %v6347_v55 = vrot.slane %v6339_v45, %v24702_v27  ;;  %v6354_v54 = vrot.slane %v6340_v36, %v24702_v27  ;;  %v6363_v40 = vrot.slane %v6355_v26, %v24702_v27  ;;  %v6370_v3 = vrot.slane %v6356_v24, %v24702_v27  ;;  %v22179_v26 = vpop.eup %17333 }
 0x55a   : > { %5629 = vrot.lane.b32.xlu0 %v24765_v20, %s17779_s27  ;;  %v9980_v36 = vmul.f32 1.442695, %v9862_v35  ;;  %24770 = vst [vmem:[#allocation26_spill] sm:$0xff] %v22179_v26  ;;  %v10150_v24 = vsel %vm7871_vm0, %v22179_v26, 0.0 }
 0x55b   : > { %v7395_v60 = vcombine.low %v6347_v55, %v6354_v54  ;;  %v15726_v1 = vcombine.high %v6347_v55, %v6354_v54  ;;  %v7411_v6 = vcombine.low %v6363_v40, %v6370_v3  ;;  %v15727_v11 = vcombine.high %v6363_v40, %v6370_v3  ;;  %v24772_v40 = vld [vmem:[#allocation45_spill] sm:$0xff] }
 0x55c   : > { %17335 = vpow2.f32 %v9980_v36 }
 0x55d   : > { %v7402_v34 = vrot.slane %v7395_v60, %v24698_v57  ;;  %v7410_v2 = vrot.slane %v15726_v1, %v24698_v57  ;;  %v7418_v46 = vrot.slane %v7411_v6, %v24698_v57  ;;  %v7426_v59 = vrot.slane %v15727_v11, %v24698_v57  ;;  %v24773_v60 = vld [vmem:[#allocation105_spill] sm:$0xff]  ;;  %v24774_v1 = vld [vmem:[#allocation52_spill] sm:$0xff] }
 0x55e   : > { %v9863_v6 = vsub.f32 %v24774_v1, %v24773_v60 }
 0x55f   : > { %v7427_v8 = vcombine.low %v7402_v34, %v7410_v2  ;;  %v7443_v49 = vcombine.low %v7418_v46, %v7426_v59  ;;  %v7428_v58 = vcombine.high %v7402_v34, %v7410_v2  ;;  %v7444_v32 = vcombine.high %v7418_v46, %v7426_v59  ;;  %v24775_v46 = vld [vmem:[#allocation106_spill] sm:$0xff]  ;;  %v24776_v59 = vld [vmem:[#allocation51_spill] sm:$0xff] }
 0x560   : > { %v9859_v50 = vsub.f32 %v24776_v59, %v24775_v46 }
 0x561   : > { %v7435_v56 = vrot.slane %v7427_v8, %v24702_v27  ;;  %v7451_v39 = vrot.slane %v7443_v49, %v24702_v27  ;;  %v7442_v17 = vrot.slane %v7428_v58, %v24702_v27  ;;  %v7458_v30 = vrot.slane %v7444_v32, %v24702_v27 }
 0x562   : > { %v9982_v58 = vmul.f32 1.442695, %v9863_v6  ;;  %v9974_v23 = vmul.f32 1.442695, %v9859_v50 }
 0x563   : > { %v7459_v10 = vcombine.low %v7435_v56, %v7451_v39  ;;  %v7460_v42 = vcombine.high %v7435_v56, %v7451_v39  ;;  %v22175_v51 = vcombine.low %v7442_v17, %v7458_v30  ;;  %v22177_v45 = vcombine.high %v7442_v17, %v7458_v30 }
 0x564   : > { %17337 = vpow2.f32 %v9982_v58  ;;  %v24779_v58 = vld [vmem:[#allocation84_spill] sm:$0xff] }
 0x565   : > { %16776 = vmatprep.subr.mxu0 %v7459_v10  ;;  %16790 = vmatprep.subr.mxu1 %v7460_v42  ;;  %17339 = vpow2.f32 %v9974_v23 }
 0x566   : > { %16777 = vmatpush3.msra.mxu0 %v7459_v10  ;;  %16791 = vmatpush3.msra.mxu1 %v7460_v42  ;;  %17341 = vrcp.f32 %v21929_v14 }
 0x567   : > { %17343 = vrcp.f32 %v21987_v43 }
 0x568   : > { %17345 = vrcp.f32 %v22055_v61 }
 0x569   : > { %v22183_v55 = vpop.eup %17335  ;;  %17347 = vrcp.f32 %v22061_v53 }
 0x56a   : > { %24771 = vst [vmem:[#allocation32_spill] sm:$0xff] %v22183_v55  ;;  %v10162_v54 = vsel %vm7871_vm0, %v22183_v55, 0.0  ;;  %17349 = vrcp.f32 %v22143_v4  ;;  %v7564_v4 = vcombine.high %v22025_v16, %v22028_v7 }
 0x56b   : > { %17351 = vrcp.f32 %v22145_v18  ;;  %v7580_v18 = vcombine.high %v22031_v0, %v22034_v19 }
 0x56d   : > { %v7594_v16 = vrot.slane %v7580_v18, %v24702_v27 }
 0x570   : > { %10151 = vadd.xlane.f32.xlu1 %v10150_v24 }
 0x571   : > { %v22213_v14 = vpop.eup %17337 }
 0x572   : > { %24777 = vst [vmem:[#allocation74_spill] sm:$0xff] %v22213_v14  ;;  %v22219_v53 = vpop.eup %17339 }
 0x573   : > { %24778 = vst [vmem:[#allocation28_spill] sm:$0xff] %v22219_v53 }
 0x579   : > { %10163 = vadd.xlane.f32.xlu0 %v10162_v54 }
 0x57b   : > { %v10122_v3 = vpop.xlane.xlu1 %10121 }
 0x57c   : > { %17353 = vrcp.f32 %v10122_v3 }
 0x57f   : > { %v5616_v44 = vpop.permute.xlu1 %5615 }
 0x580   : > { %v6239_v8 = vcombine.low %v24741_v13, %v5616_v44  ;;  %v6240_v49 = vcombine.high %v24741_v13, %v5616_v44 }
 0x581   : > { %5627 = vrot.lane.b32.xlu1 %v24772_v40, %s17779_s27 }
 0x582   : > { %v6247_v35 = vrot.slane %v6239_v8, %v24698_v57  ;;  %v6254_v56 = vrot.slane %v6240_v49, %v24698_v57  ;;  %v7578_v49 = vrot.slane %v7564_v4, %v24702_v27 }
 0x583   : > { %v5664_v11 = vpop.permute.xlu1 %5663 }
 0x584   : > { %v10134_v21 = vpop.xlane.xlu0 %10133 }
 0x585   : > { %5675 = vrot.lane.b32.xlu1 %v24772_v40, %s17781_s20  ;;  %17355 = vrcp.f32 %v10134_v21  ;;  %v10153_v21 = vsel %vm7871_vm0, %v22219_v53, 0.0 }
 0x588   : > { %v5568_v37 = vpop.permute.xlu0 %5567 }
 0x589   : > { %v6255_v34 = vcombine.low %v5568_v37, %v5664_v11  ;;  %v6256_v2 = vcombine.high %v5568_v37, %v5664_v11  ;;  %v10165_v11 = vsel %vm7871_vm0, %v22213_v14, 0.0 }
 0x58b   : > { %v6263_v32 = vrot.slane %v6255_v34, %v24698_v57  ;;  %v6270_v47 = vrot.slane %v6256_v2, %v24698_v57  ;;  %v17342_v34 = vpop.eup %17341 }
 0x58c   : > { %v17344_v59 = vpop.eup %17343 }
 0x58d   : > { %v6271_v39 = vcombine.low %v6247_v35, %v6263_v32  ;;  %v6272_v17 = vcombine.high %v6247_v35, %v6263_v32  ;;  %v6287_v30 = vcombine.low %v6254_v56, %v6270_v47  ;;  %v6288_v10 = vcombine.high %v6254_v56, %v6270_v47  ;;  %v17346_v8 = vpop.eup %17345  ;;  %v24780_v47 = vld [vmem:[#allocation91_spill] sm:$0xff] }
 0x58e   : > { %v17348_v7 = vpop.eup %17347  ;;  %v10259_v32 = vmul.f32 %v17342_v34, %v24779_v58  ;;  %v10267_v23 = vmul.f32 %v17344_v59, %v24780_v47  ;;  %v7597_v56 = vcombine.low %v7578_v49, %v7594_v16 }
 0x58f   : > { %5579 = vrot.lane.b32.xlu0 %v24772_v40, %s17780_s29  ;;  %v6279_v13 = vrot.slane %v6271_v39, %v24702_v27  ;;  %v6286_v42 = vrot.slane %v6272_v17, %v24702_v27  ;;  %v6295_v36 = vrot.slane %v6287_v30, %v24702_v27  ;;  %v6302_v24 = vrot.slane %v6288_v10, %v24702_v27  ;;  %v17350_v35 = vpop.eup %17349  ;;  %v24781_v17 = vld [vmem:[#allocation109_spill] sm:$0xff] }
 0x590   : > { %v7598_v39 = vcombine.high %v7578_v49, %v7594_v16  ;;  %v10261_v30 = vmul.f32 %v17346_v8, %v24781_v17  ;;  %v17352_v10 = vpop.eup %17351  ;;  %v24784_v49 = vld [vmem:[#allocation112_spill] sm:$0xff] }
 0x591   : > { %v7327_v54 = vcombine.low %v6279_v13, %v6286_v42  ;;  %v15724_v44 = vcombine.high %v6279_v13, %v6286_v42  ;;  %v7343_v37 = vcombine.low %v6295_v36, %v6302_v24  ;;  %v15725_v60 = vcombine.high %v6295_v36, %v6302_v24  ;;  %v24782_v13 = vld [vmem:[#allocation113_spill] sm:$0xff]  ;;  %v24785_v16 = vld [vmem:[#allocation80_spill] sm:$0xff] }
 0x592   : > { %v10269_v42 = vmul.f32 %v17348_v7, %v24782_v13  ;;  %v9864_v7 = vsub.f32 %v24785_v16, %v24784_v49 }
 0x593   : > { %v7334_v1 = vrot.slane %v7327_v54, %v24698_v57  ;;  %v7342_v6 = vrot.slane %v15724_v44, %v24698_v57  ;;  %v7350_v43 = vrot.slane %v7343_v37, %v24698_v57  ;;  %v7358_v61 = vrot.slane %v15725_v60, %v24698_v57  ;;  %v17354_v54 = vpop.eup %17353 }
 0x594   : > { %v10271_v44 = vmul.f32 %v17350_v35, %v21839_v22  ;;  %v17356_v60 = vpop.eup %17355  ;;  %v10273_v22 = vmul.f32 %v17354_v54, %v22036_v12 }
 0x595   : > { %v7359_v2 = vcombine.low %v7334_v1, %v7342_v6  ;;  %v7375_v46 = vcombine.low %v7350_v43, %v7358_v61  ;;  %v7360_v36 = vcombine.high %v7334_v1, %v7342_v6  ;;  %v7376_v24 = vcombine.high %v7350_v43, %v7358_v61 }
 0x596   : > { %v10263_v1 = vmul.f32 %v17352_v10, %v21845_v41  ;;  %v10281_v41 = vmul.f32 %v17356_v60, %v22047_v38  ;;  %v24783_v38 = vld [vmem:[#allocation62_spill] sm:$0xff] }
 0x597   : > { %v7367_v50 = vrot.slane %v7359_v2, %v24702_v27  ;;  %v7383_v3 = vrot.slane %v7375_v46, %v24702_v27  ;;  %v7374_v6 = vrot.slane %v7360_v36, %v24702_v27  ;;  %v7390_v43 = vrot.slane %v7376_v24, %v24702_v27 }
 0x599   : > { %v7391_v0 = vcombine.low %v7367_v50, %v7383_v3  ;;  %v7392_v19 = vcombine.high %v7367_v50, %v7383_v3  ;;  %v22267_v50 = vpop.f32.mrf.mxu0 }
 0x59b   : > { %16778 = vmatprep.subr.mxu0 %v7391_v0  ;;  %16792 = vmatprep.subr.mxu1 %v7392_v19 }
 0x59c   : > { %16779 = vmatpush3.msra.mxu0 %v7391_v0  ;;  %16793 = vmatpush3.msra.mxu1 %v7392_v19  ;;  %v22275_v0 = vpop.f32.mrf.mxu0 }
 0x59d   : > { %16781 = vmatmul.mubr.msk.f32.vlgmr.msra.gmra.mxu0 %vm7871_vm0, %v10259_v32  ;;  %16795 = vmatmul.mubr.msk.f32.vlgmr.msra.gmra.mxu1 %vm7871_vm0, %v10267_v23  ;;  %v24786_v32 = vld [vmem:[#allocation114_spill] sm:$0xff] }
 0x59e   : > { %16800 = vmatprep.subr.mxu0 %v7597_v56  ;;  %16814 = vmatprep.subr.mxu1 %v7598_v39  ;;  %v22287_v13 = vpop.f32.mrf.mxu0 }
 0x59f   : > { %16783 = vmatprep.mubr.msk.f32.mxu0 %vm7871_vm0, %v10261_v30  ;;  %16797 = vmatprep.mubr.msk.f32.mxu1 %vm7871_vm0, %v10269_v42 }
 0x5a0   : > { %16801 = vmatpush3.msra.mxu0 %v7597_v56  ;;  %16815 = vmatpush3.msra.mxu1 %v7598_v39  ;;  %v9984_v39 = vmul.f32 1.442695, %v9864_v7 }
 0x5a1   : > { %16802 = vmatprep.subr.mxu0 %v22129_v63  ;;  %16816 = vmatprep.subr.mxu1 %v22131_v28 }
 0x5a2   : > { %16803 = vmatpush3.msra.mxu0 %v22129_v63  ;;  %16817 = vmatpush3.msra.mxu1 %v22131_v28  ;;  %v7393_v63 = vcombine.low %v7374_v6, %v7390_v43  ;;  %v7394_v28 = vcombine.high %v7374_v6, %v7390_v43 }
 0x5a3   : > { %16784 = vmatmul.mubr.msk.f32.gmra.mxu0 %vm7871_vm0, %v10263_v1  ;;  %16798 = vmatmul.mubr.msk.f32.gmra.mxu1 %vm7871_vm0, %v10271_v44  ;;  %v22295_v1 = vpop.f32.mrf.mxu0 }
 0x5a4   : > { %16804 = vmatprep.subr.mxu0 %v22175_v51  ;;  %16818 = vmatprep.subr.mxu1 %v22177_v45 }
 0x5a5   : > { %16805 = vmatpush3.msra.mxu0 %v22175_v51  ;;  %16808 = vmatprep.mubr.msk.f32.mxu0 %vm7871_vm0, %v10273_v22 }
 0x5a6   : > { %16819 = vmatpush3.msra.mxu1 %v22177_v45  ;;  %16822 = vmatprep.mubr.msk.f32.mxu1 %vm7871_vm0, %v10281_v41 }
 0x5a7   : > { %16806 = vmatprep.subr.mxu0 %v7393_v63  ;;  %16820 = vmatprep.subr.mxu1 %v7394_v28 }
 0x5a8   : > { %16807 = vmatpush3.msra.mxu0 %v7393_v63  ;;  %16821 = vmatpush3.msra.mxu1 %v7394_v28  ;;  %v16684_v28 = vpop.f32.mrf.mxu1 }
 0x5a9   : > { %10166 = vadd.xlane.f32.xlu1 %v10165_v11 }
 0x5aa   : > { %v22313_v49 = vpop.f32.mrf.mxu1 }
 0x5ae   : > { %10154 = vadd.xlane.f32.xlu0 %v10153_v21 }
 0x5b4   : > { %v10137_v37 = vpop.xlane.xlu1 %10136 }
 0x5b5   : > { %17357 = vrcp.f32 %v10137_v37 }
 0x5b8   : > { %v10131_v11 = vpop.xlane.xlu1 %10130 }
 0x5b9   : > { %v10125_v61 = vpop.xlane.xlu0 %10124 }
 0x5ba   : > { %17359 = vrcp.f32 %v10125_v61  ;;  %5625 = vrot.lane.b32.xlu1 %v24783_v38, %s17779_s27 }
 0x5bb   : > { %17361 = vrcp.f32 %v10131_v11  ;;  %v22298_v11 = vpop.f32.mrf.mxu0 }
 0x5bc   : > { %v10146_v4 = vpop.xlane.xlu1 %10145 }
 0x5bd   : > { %v10128_v12 = vpop.xlane.xlu0 %10127 }
 0x5be   : > { %17363 = vrcp.f32 %v10128_v12 }
 0x5bf   : > { %17365 = vrcp.f32 %v10146_v4 }
 0x5c0   : > { %v22261_v18 = vpop.xlane.xlu1 %10148 }
 0x5c1   : > { %v10140_v51 = vpop.xlane.xlu0 %10139 }
 0x5c2   : > { %v17358_v34 = vpop.eup %17357  ;;  %17367 = vrcp.f32 %v10140_v51 }
 0x5c3   : > { %v10283_v45 = vmul.f32 %v17358_v34, %v22095_v48 }
 0x5c4   : > { %5577 = vrot.lane.b32.xlu0 %v24783_v38, %s17780_s29  ;;  %v5582_v59 = vpop.permute.xlu1 %5581 }
 0x5c5   : > { %v10143_v2 = vpop.xlane.xlu0 %10142  ;;  %16823 = vmatmul.mubr.msk.f32.vlgmr.msra.gmra.mxu1 %vm7871_vm0, %v10283_v45 }
 0x5c6   : > { %17369 = vrcp.f32 %v10143_v2 }
 0x5c7   : > { %v17360_v46 = vpop.eup %17359 }
 0x5c8   : > { %v10275_v3 = vmul.f32 %v17360_v46, %v22097_v62  ;;  %5673 = vrot.lane.b32.xlu0 %v24783_v38, %s17781_s20  ;;  %v17362_v8 = vpop.eup %17361  ;;  %v24787_v62 = vld [vmem:[#allocation81_spill] sm:$0xff]  ;;  %v5678_v23 = vpop.permute.xlu1 %5677 }
 0x5c9   : > { %v10158_v21 = vpop.xlane.xlu0 %10157  ;;  %v9868_v47 = vsub.f32 %v24787_v62, %v24786_v32  ;;  %v10279_v56 = vmul.f32 %v17362_v8, %v22103_v25  ;;  %v6731_v30 = vcombine.low %v5582_v59, %v5678_v23  ;;  %v6732_v10 = vcombine.high %v5582_v59, %v5678_v23 }
 0x5ca   : > { %17371 = vrcp.f32 %v10158_v21  ;;  %16809 = vmatmul.mubr.msk.f32.vlgmr.msra.gmra.mxu0 %vm7871_vm0, %v10275_v3  ;;  %v22308_v3 = vpop.f32.mrf.mxu0  ;;  %v24789_v21 = vld [vmem:[#allocation78_spill] sm:$0xff] }
 0x5cb   : > { %v17364_v48 = vpop.eup %17363  ;;  %17373 = vpow2.f32 %v9984_v39  ;;  %v6739_v54 = vrot.slane %v6731_v30, %v24698_v57 }
 0x5cc   : > { %v10277_v19 = vmul.f32 %v17364_v48, %v22105_v15  ;;  %v17366_v58 = vpop.eup %17365  ;;  %v9992_v15 = vmul.f32 1.442695, %v9868_v47  ;;  %v24790_v48 = vld [vmem:[#allocation111_spill] sm:$0xff]  ;;  %v22326_v32 = vpop.f32.mrf.mxu0 }
 0x5cd   : > { %v22280_v35 = vpop.xlane.xlu0 %10160  ;;  %v10289_v17 = vmul.f32 %v17366_v58, %v22111_v9  ;;  %v6746_v9 = vrot.slane %v6732_v10, %v24698_v57  ;;  %v22331_v47 = vpop.f32.mrf.mxu1 }
 0x5ce   : > { %16811 = vmatprep.mubr.msk.f32.mxu0 %vm7871_vm0, %v10277_v19  ;;  %17375 = vpow2.f32 %v9992_v15  ;;  %v24791_v19 = vld [vmem:[#allocation79_spill] sm:$0xff]  ;;  %v22340_v15 = vpop.f32.mrf.mxu0 }
 0x5cf   : > { %16812 = vmatmul.mubr.msk.f32.gmra.mxu0 %vm7871_vm0, %v10279_v56  ;;  %v17368_v24 = vpop.eup %17367  ;;  %v9869_v58 = vsub.f32 %v24791_v19, %v24790_v48 }
 0x5d0   : > { %16836 = vmatprep.mubr.msk.f32.mxu0 %vm7871_vm0, %v10289_v17  ;;  %v10285_v6 = vmul.f32 %v17368_v24, %v22115_v52 }
 0x5d1   : > { %v5630_v42 = vpop.permute.xlu0 %5629  ;;  %v9994_v10 = vmul.f32 1.442695, %v9869_v58 }
 0x5d2   : > { %v6715_v36 = vcombine.low %v24765_v20, %v5630_v42  ;;  %v6716_v25 = vcombine.high %v24765_v20, %v5630_v42  ;;  %16825 = vmatprep.mubr.msk.f32.mxu1 %vm7871_vm0, %v10285_v6 }
 0x5d3   : > { %v17370_v60 = vpop.eup %17369 }
 0x5d4   : > { %v6723_v44 = vrot.slane %v6715_v36, %v24698_v57  ;;  %v6730_v37 = vrot.slane %v6716_v25, %v24698_v57  ;;  %v10287_v63 = vmul.f32 %v17370_v60, %v22123_v33  ;;  %v24788_v33 = vld [vmem:[#allocation110_spill] sm:$0xff]  ;;  %v22345_v25 = vpop.f32.mrf.mxu1 }
 0x5d5   : > { %v9865_v8 = vsub.f32 %v24789_v21, %v24788_v33  ;;  %v24801_v33 = vld [vmem:[#allocation40_spill] sm:$0xff] }
 0x5d6   : > { %v6747_v43 = vcombine.low %v6723_v44, %v6739_v54  ;;  %v6748_v22 = vcombine.high %v6723_v44, %v6739_v54  ;;  %v6763_v61 = vcombine.low %v6730_v37, %v6746_v9  ;;  %v6764_v41 = vcombine.high %v6730_v37, %v6746_v9  ;;  %16826 = vmatmul.mubr.msk.f32.gmra.mxu1 %vm7871_vm0, %v10287_v63  ;;  %v16712_v44 = vpop.f32.mrf.mxu1  ;;  %v22349_v37 = vpop.f32.mrf.mxu0  ;;  %v24797_v63 = vld [vmem:[#allocation38_spill] sm:$0xff] }
 0x5d7   : > { %v17372_v20 = vpop.eup %17371  ;;  %v9986_v17 = vmul.f32 1.442695, %v9865_v8  ;;  %v11956_v6 = vcombine.low %v16684_v28, %v16712_v44 }
 0x5d8   : > { %v6755_v12 = vrot.slane %v6747_v43, %v24702_v27  ;;  %v6762_v4 = vrot.slane %v6748_v22, %v24702_v27  ;;  %v6771_v51 = vrot.slane %v6763_v61, %v24702_v27  ;;  %v6778_v52 = vrot.slane %v6764_v41, %v24702_v27  ;;  %v22335_v56 = vpop.eup %17373  ;;  %v24794_v43 = vld [vmem:[#allocation115_spill] sm:$0xff]  ;;  %v24795_v22 = vld [vmem:[#allocation37_spill] sm:$0xff] }
 0x5d9   : > { %v10297_v34 = vmul.f32 %v17372_v20, %v22135_v5  ;;  %24792 = vst [vmem:[#allocation30_spill] sm:$0xff] %v22335_v56  ;;  %v10168_v24 = vsel %vm7871_vm0, %v22335_v56, 0.0  ;;  %17377 = vpow2.f32 %v9986_v17  ;;  %v9867_v61 = vsub.f32 %v24795_v22, %v24794_v43  ;;  %v24796_v20 = vld [vmem:[#allocation116_spill] sm:$0xff] }
 0x5da   : > { %v7803_v45 = vcombine.low %v6755_v12, %v6762_v4  ;;  %v15738_v2 = vcombine.high %v6755_v12, %v6762_v4  ;;  %v7819_v46 = vcombine.low %v6771_v51, %v6778_v52  ;;  %v15739_v59 = vcombine.high %v6771_v51, %v6778_v52  ;;  %v22359_v51 = vpop.f32.mrf.mxu0  ;;  %v10689_v52 = vpop.f32.mrf.mxu1 }
 0x5db   : > { %16850 = vmatprep.mubr.msk.f32.mxu1 %vm7871_vm0, %v10297_v34  ;;  %v22343_v36 = vpop.eup %17375  ;;  %17379 = vpow2.f32 %v9994_v10  ;;  %v11957_v41 = vcombine.high %v16684_v28, %v16712_v44  ;;  %v9871_v12 = vsub.f32 %v24797_v63, %v24796_v20  ;;  %v11940_v4 = vcombine.low %v22267_v50, %v22298_v11  ;;  %v24798_v34 = vld [vmem:[#allocation73_spill] sm:$0xff] }
 0x5dc   : > { %v22316_v16 = vrot.slane %v7803_v45, %v24698_v57  ;;  %v22319_v7 = vrot.slane %v15738_v2, %v24698_v57  ;;  %v22322_v5 = vrot.slane %v7819_v46, %v24698_v57  ;;  %v22329_v62 = vrot.slane %v15739_v59, %v24698_v57  ;;  %24793 = vst [vmem:[#allocation82_spill] sm:$0xff] %v22343_v36  ;;  %v24799_v45 = vld [vmem:[#allocation39_spill] sm:$0xff]  ;;  %v24800_v59 = vld [vmem:[#allocation58_spill] sm:$0xff] }
 0x5dd   : > { %v10180_v60 = vsel %vm7871_vm0, %v22343_v36, 0.0  ;;  %v9866_v2 = vsub.f32 %v24799_v45, %v24798_v34  ;;  %v11941_v46 = vcombine.high %v22267_v50, %v22298_v11  ;;  %v9870_v21 = vsub.f32 %v24801_v33, %v24800_v59  ;;  %v24804_v59 = vld [vmem:[#allocation21_spill] sm:$0xff] }
 0x5de   : > { %v7835_v23 = vcombine.low %v22316_v16, %v22319_v7  ;;  %v7851_v39 = vcombine.low %v22322_v5, %v22329_v62  ;;  %10169 = vadd.xlane.f32.xlu1 %v10168_v24  ;;  %v11964_v28 = vrot.slane %v11956_v6, %v24698_v57  ;;  %v9990_v8 = vmul.f32 1.442695, %v9867_v61 }
 0x5df   : > { %v11971_v48 = vrot.slane %v11957_v41, %v24698_v57  ;;  %v11888_v19 = vcombine.low %v22313_v49, %v10689_v52  ;;  %v9998_v58 = vmul.f32 1.442695, %v9871_v12  ;;  %v11889_v17 = vcombine.high %v22313_v49, %v10689_v52 }
 0x5e0   : > { %v7843_v30 = vrot.slane %v7835_v23, %v24702_v27  ;;  %v7859_v42 = vrot.slane %v7851_v39, %v24702_v27  ;;  %v11948_v23 = vrot.slane %v11940_v4, %v24698_v57  ;;  %v22371_v39 = vpop.f32.mrf.mxu0  ;;  %v9988_v50 = vmul.f32 1.442695, %v9866_v2 }
 0x5e1   : > { %v11955_v11 = vrot.slane %v11941_v46, %v24698_v57  ;;  %v11872_v10 = vcombine.low %v22275_v0, %v22308_v3  ;;  %v11873_v24 = vcombine.high %v22275_v0, %v22308_v3  ;;  %17381 = vpow2.f32 %v9990_v8 }
 0x5e2   : > { %v7867_v54 = vcombine.low %v7843_v30, %v7859_v42  ;;  %v7868_v9 = vcombine.high %v7843_v30, %v7859_v42  ;;  %v22374_v30 = vpop.f32.mrf.mxu1  ;;  %v9996_v42 = vmul.f32 1.442695, %v9870_v21  ;;  %v11896_v6 = vrot.slane %v11888_v19, %v24698_v57  ;;  %v22385_v22 = vpop.f32.mrf.mxu0 }
 0x5e3   : > { %v11988_v44 = vcombine.low %v11955_v11, %v11971_v48  ;;  %17383 = vpow2.f32 %v9998_v58  ;;  %v11903_v43 = vrot.slane %v11889_v17, %v24698_v57  ;;  %v11880_v0 = vrot.slane %v11872_v10, %v24698_v57 }
 0x5e4   : > { %16828 = vmatprep.subr.mxu0 %v7867_v54  ;;  %16842 = vmatprep.subr.mxu1 %v7868_v9  ;;  %v22387_v61 = vpop.f32.mrf.mxu1  ;;  %17385 = vpow2.f32 %v9988_v50  ;;  %v12076_v3 = vcombine.low %v22287_v13, %v22326_v32  ;;  %v12077_v20 = vcombine.high %v22287_v13, %v22326_v32  ;;  %v11887_v63 = vrot.slane %v11873_v24, %v24698_v57  ;;  %v16754_v32 = vpop.f32.mrf.mxu0 }
 0x5e5   : > { %16829 = vmatpush3.msra.mxu0 %v7867_v54  ;;  %16843 = vmatpush3.msra.mxu1 %v7868_v9  ;;  %v11972_v54 = vcombine.low %v11948_v23, %v11964_v28  ;;  %v11973_v9 = vcombine.high %v11948_v23, %v11964_v28  ;;  %17387 = vpow2.f32 %v9996_v42  ;;  %v11996_v34 = vrot.slane %v11988_v44, %v24702_v27 }
 0x5e6   : > { %v22382_v49 = vpop.eup %17377  ;;  %v22399_v52 = vpop.f32.mrf.mxu1  ;;  %v11904_v2 = vcombine.low %v11880_v0, %v11896_v6  ;;  %v11905_v46 = vcombine.high %v11880_v0, %v11896_v6  ;;  %v11920_v33 = vcombine.low %v11887_v63, %v11903_v43  ;;  %v11921_v13 = vcombine.high %v11887_v63, %v11903_v43 }
 0x5e7   : > { %10181 = vadd.xlane.f32.xlu0 %v10180_v60  ;;  %v11989_v60 = vcombine.high %v11955_v11, %v11971_v48  ;;  %24802 = vst [vmem:[#allocation66_spill] sm:$0xff] %v22382_v49  ;;  %v11980_v12 = vrot.slane %v11972_v54, %v24702_v27  ;;  %v11987_v4 = vrot.slane %v11973_v9, %v24702_v27  ;;  %v22411_v28 = vsel %vm7871_vm0, %v22382_v49, 0.0 }
 0x5e8   : > { %v22389_v41 = vpop.eup %17379  ;;  %v22414_v8 = vrot.slane %v12076_v3, %v24698_v57  ;;  %v22417_v48 = vrot.slane %v12077_v20, %v24698_v57  ;;  %v12008_v19 = vcombine.low %v22295_v1, %v22340_v15  ;;  %v12092_v58 = vcombine.low %v22331_v47, %v22374_v30  ;;  %v22427_v10 = vpop.f32.mrf.mxu1 }
 0x5e9   : > { %24803 = vst [vmem:[#allocation18_spill] sm:$0xff] %v22389_v41  ;;  %v12003_v45 = vrot.slane %v11989_v60, %v24702_v27  ;;  %v22407_v21 = vsel %vm7871_vm0, %v22389_v41, 0.0  ;;  %v12009_v23 = vcombine.high %v22295_v1, %v22340_v15  ;;  %v13028_v17 = vcombine.low %v11980_v12, %v11987_v4 }
 0x5ea   : > { %v15934_v50 = vcombine.high %v11980_v12, %v11987_v4  ;;  %v12093_v11 = vcombine.high %v22331_v47, %v22374_v30  ;;  %v11912_v24 = vrot.slane %v11904_v2, %v24702_v27  ;;  %v11919_v54 = vrot.slane %v11905_v46, %v24702_v27  ;;  %v10980_v30 = vpop.f32.mrf.mxu0  ;;  %v22451_v4 = vpop.f32.mrf.mxu1 }
 0x5eb   : > { %v13044_v42 = vcombine.low %v11996_v34, %v12003_v45  ;;  %v12024_v9 = vcombine.low %v22345_v25, %v22387_v61  ;;  %v15935_v44 = vcombine.high %v11996_v34, %v12003_v45  ;;  %v11928_v1 = vrot.slane %v11920_v33, %v24702_v27 }
 0x5ec   : > { %v11935_v15 = vrot.slane %v11921_v13, %v24702_v27  ;;  %v12212_v47 = vcombine.low %v22349_v37, %v16754_v32  ;;  %v12016_v60 = vrot.slane %v12008_v19, %v24698_v57  ;;  %v12213_v6 = vcombine.high %v22349_v37, %v16754_v32  ;;  %v16757_v19 = vpop.f32.mrf.mxu0 }
 0x5ed   : > { %v12100_v43 = vrot.slane %v12092_v58, %v24698_v57  ;;  %v12025_v0 = vcombine.high %v22345_v25, %v22387_v61  ;;  %v12023_v3 = vrot.slane %v12009_v23, %v24698_v57  ;;  %v22445_v20 = vrot.slane %v13028_v17, %v24698_v57 }
 0x5ee   : > { %v22448_v63 = vrot.slane %v15934_v50, %v24698_v57  ;;  %v12107_v12 = vrot.slane %v12093_v11, %v24698_v57  ;;  %v22456_v37 = vrot.slane %v13044_v42, %v24698_v57  ;;  %v12960_v45 = vcombine.low %v11912_v24, %v11919_v54  ;;  %v22459_v61 = vpop.eup %17381 }
 0x5ef   : > { %5623 = vrot.lane.b32.xlu1 %v24804_v59, %s17779_s27  ;;  %v15932_v2 = vcombine.high %v11912_v24, %v11919_v54  ;;  %v12032_v25 = vrot.slane %v12024_v9, %v24698_v57  ;;  %v22462_v46 = vrot.slane %v15935_v44, %v24698_v57  ;;  %v12976_v33 = vcombine.low %v11928_v1, %v11935_v15 }
 0x5f0   : > { %v15933_v13 = vcombine.high %v11928_v1, %v11935_v15  ;;  %v22465_v32 = vrot.slane %v12212_v47, %v24698_v57  ;;  %v22469_v58 = vpop.eup %17383  ;;  %v22472_v23 = vrot.slane %v12213_v6, %v24698_v57  ;;  %v12108_v17 = vcombine.low %v22414_v8, %v12100_v43  ;;  %v22483_v1 = vpop.f32.mrf.mxu1 }
 0x5f1   : > { %v12109_v50 = vcombine.high %v22414_v8, %v12100_v43  ;;  %v12039_v11 = vrot.slane %v12025_v0, %v24698_v57  ;;  %v22477_v42 = vpop.eup %17385  ;;  %v12144_v24 = vcombine.low %v22359_v51, %v10980_v30  ;;  %v12145_v54 = vcombine.high %v22359_v51, %v10980_v30 }
 0x5f2   : > { %v12124_v9 = vcombine.low %v22417_v48, %v12107_v12  ;;  %v12125_v44 = vcombine.high %v22417_v48, %v12107_v12  ;;  %v22485_v15 = vpop.eup %17387  ;;  %v22488_v47 = vrot.slane %v12960_v45, %v24698_v57  ;;  %v22491_v8 = vrot.slane %v15932_v2, %v24698_v57  ;;  %v22501_v12 = vpop.f32.mrf.mxu0 }
 0x5f3   : > { %5671 = vrot.lane.b32.xlu1 %v24804_v59, %s17781_s20  ;;  %v12040_v6 = vcombine.low %v12016_v60, %v12032_v25  ;;  %v12041_v43 = vcombine.high %v12016_v60, %v12032_v25  ;;  %v22494_v49 = vrot.slane %v12976_v33, %v24698_v57  ;;  %v22497_v51 = vrot.slane %v15933_v13, %v24698_v57 }
 0x5f4   : > { %v12348_v48 = vcombine.low %v22371_v39, %v16757_v19  ;;  %v12349_v30 = vcombine.high %v22371_v39, %v16757_v19  ;;  %v22504_v45 = vrot.slane %v12108_v17, %v24702_v27  ;;  %v22507_v2 = vrot.slane %v12109_v50, %v24702_v27  ;;  %v16768_v17 = vpop.f32.mrf.mxu1 }
 0x5f5   : > { %v12056_v60 = vcombine.low %v12023_v3, %v12039_v11  ;;  %v12057_v25 = vcombine.high %v12023_v3, %v12039_v11  ;;  %v22512_v33 = vrot.slane %v12144_v24, %v24698_v57  ;;  %v22515_v13 = vrot.slane %v12145_v54, %v24698_v57 }
 0x5f6   : > { %v22518_v39 = vrot.slane %v12124_v9, %v24702_v27  ;;  %v22521_v19 = vrot.slane %v12125_v44, %v24702_v27  ;;  %v22524_v50 = vrot.slane %v12040_v6, %v24702_v27  ;;  %v22527_v3 = vrot.slane %v12041_v43, %v24702_v27 }
 0x5f7   : > { %v22534_v54 = vrot.slane %v12348_v48, %v24698_v57  ;;  %v22537_v9 = vrot.slane %v12349_v30, %v24698_v57  ;;  %v13164_v43 = vcombine.low %v22504_v45, %v22507_v2  ;;  %v15938_v36 = vcombine.high %v22504_v45, %v22507_v2 }
 0x5f8   : > { %v22546_v11 = vrot.slane %v12056_v60, %v24702_v27  ;;  %v22549_v24 = vrot.slane %v12057_v25, %v24702_v27  ;;  %v13180_v30 = vcombine.low %v22518_v39, %v22521_v19  ;;  %v13096_v45 = vcombine.low %v22524_v50, %v22527_v3 }
 0x5f9   : > { %v22453_v34 = vpop.xlane.xlu1 %10151  ;;  %v15936_v2 = vcombine.high %v22524_v50, %v22527_v3  ;;  %v12228_v60 = vcombine.low %v22399_v52, %v16768_v17  ;;  %v12229_v25 = vcombine.high %v22399_v52, %v16768_v17  ;;  %17389 = vrcp.f32 %v22261_v18 }
 0x5fa   : > { %17391 = vrcp.f32 %v22280_v35 }
 0x5fb   : > { %17393 = vrcp.f32 %v22453_v34 }
 0x5fd   : > { %5575 = vrot.lane.b32.xlu0 %v24804_v59, %s17780_s29  ;;  %v5628_v0 = vpop.permute.xlu1 %5627 }
 0x5fe   : > { %v6647_v44 = vcombine.low %v24772_v40, %v5628_v0  ;;  %v6648_v6 = vcombine.high %v24772_v40, %v5628_v0  ;;  %v15939_v40 = vcombine.high %v22518_v39, %v22521_v19  ;;  %v11077_v0 = vpop.f32.mrf.mxu1  ;;  %v13112_v19 = vcombine.low %v22546_v11, %v22549_v24 }
 0x5ff   : > { %v12160_v3 = vcombine.low %v22427_v10, %v11077_v0 }
 0x600   : > { %v6655_v55 = vrot.slane %v6647_v44, %v24698_v57  ;;  %v6662_v26 = vrot.slane %v6648_v6, %v24698_v57  ;;  %v12236_v6 = vrot.slane %v12228_v60, %v24698_v57 }
 0x601   : > { %v5676_v48 = vpop.permute.xlu1 %5675 }
 0x602   : > { %v22509_v41 = vpop.xlane.xlu0 %10163 }
 0x603   : > { %24805 = vst [vmem:[#allocation41_spill] sm:$0xff] %v22509_v41 }
 0x606   : > { %v5580_v56 = vpop.permute.xlu0 %5579 }
 0x607   : > { %v6663_v14 = vcombine.low %v5580_v56, %v5676_v48  ;;  %v6664_v53 = vcombine.high %v5580_v56, %v5676_v48  ;;  %v22566_v56 = vrot.slane %v13164_v43, %v24698_v57  ;;  %v7852_v43 = vcombine.high %v22322_v5, %v22329_v62 }
 0x608   : > { %v12244_v62 = vcombine.low %v22465_v32, %v12236_v6 }
 0x609   : > { %v6671_v31 = vrot.slane %v6663_v14, %v24698_v57  ;;  %v6678_v39 = vrot.slane %v6664_v53, %v24698_v57  ;;  %v12243_v14 = vrot.slane %v12229_v25, %v24698_v57  ;;  %v7836_v53 = vcombine.high %v22316_v16, %v22319_v7 }
 0x60a   : > { %v7866_v25 = vrot.slane %v7852_v43, %v24702_v27 }
 0x60b   : > { %v6679_v52 = vcombine.low %v6655_v55, %v6671_v31  ;;  %v6680_v17 = vcombine.high %v6655_v55, %v6671_v31  ;;  %v6695_v44 = vcombine.low %v6662_v26, %v6678_v39  ;;  %v6696_v48 = vcombine.high %v6662_v26, %v6678_v39 }
 0x60c   : > { %v12161_v26 = vcombine.high %v22427_v10, %v11077_v0  ;;  %v12168_v55 = vrot.slane %v12160_v3, %v24698_v57  ;;  %v7850_v60 = vrot.slane %v7836_v53, %v24702_v27 }
 0x60d   : > { %v6687_v29 = vrot.slane %v6679_v52, %v24702_v27  ;;  %v6694_v50 = vrot.slane %v6680_v17, %v24702_v27  ;;  %v6703_v41 = vrot.slane %v6695_v44, %v24702_v27  ;;  %v6710_v31 = vrot.slane %v6696_v48, %v24702_v27  ;;  %v16771_v48 = vpop.f32.mrf.mxu1 }
 0x60e   : > { %v12245_v52 = vcombine.high %v22465_v32, %v12236_v6  ;;  %v22589_v17 = vcombine.low %v7850_v60, %v7866_v25  ;;  %v22591_v44 = vcombine.high %v7850_v60, %v7866_v25  ;;  %v22604_v32 = vrot.slane %v15939_v40, %v24698_v57 }
 0x60f   : > { %v7735_v16 = vcombine.low %v6687_v29, %v6694_v50  ;;  %v15736_v7 = vcombine.high %v6687_v29, %v6694_v50  ;;  %v7751_v39 = vcombine.low %v6703_v41, %v6710_v31  ;;  %v15737_v5 = vcombine.high %v6703_v41, %v6710_v31 }
 0x610   : > { %24806 = vst [vmem:[#allocation67_spill] sm:$0xff] %v22589_v17  ;;  %24807 = vst [vmem:[#allocation50_spill] sm:$0xff] %v22591_v44  ;;  %v22598_v29 = vrot.slane %v15938_v36, %v24698_v57  ;;  %v22601_v41 = vrot.slane %v13180_v30, %v24698_v57  ;;  %v22607_v50 = vrot.slane %v13096_v45, %v24698_v57 }
 0x611   : > { %v7742_v10 = vrot.slane %v7735_v16, %v24698_v57  ;;  %v7750_v0 = vrot.slane %v15736_v7, %v24698_v57  ;;  %v7758_v3 = vrot.slane %v7751_v39, %v24698_v57  ;;  %v7766_v53 = vrot.slane %v15737_v5, %v24698_v57  ;;  %v11087_v7 = vpop.f32.mrf.mxu1 }
 0x612   : > { %v22610_v6 = vrot.slane %v15936_v2, %v24698_v57  ;;  %v12175_v43 = vrot.slane %v12161_v26, %v24698_v57  ;;  %v22614_v25 = vrot.slane %v13112_v19, %v24698_v57  ;;  %v12252_v36 = vrot.slane %v12244_v62, %v24702_v27 }
 0x613   : > { %v7767_v31 = vcombine.low %v7742_v10, %v7750_v0  ;;  %v7783_v60 = vcombine.low %v7758_v3, %v7766_v53  ;;  %v12260_v30 = vcombine.low %v22472_v23, %v12243_v14  ;;  %v12261_v40 = vcombine.high %v22472_v23, %v12243_v14 }
 0x614   : > { %v12259_v16 = vrot.slane %v12245_v52, %v24702_v27  ;;  %v12176_v45 = vcombine.low %v22512_v33, %v12168_v55  ;;  %v12177_v39 = vcombine.high %v22512_v33, %v12168_v55  ;;  %v12364_v19 = vcombine.low %v22451_v4, %v16771_v48 }
 0x615   : > { %v7775_v2 = vrot.slane %v7767_v31, %v24702_v27  ;;  %v7791_v26 = vrot.slane %v7783_v60, %v24702_v27  ;;  %v7768_v5 = vcombine.high %v7742_v10, %v7750_v0  ;;  %v7784_v44 = vcombine.high %v7758_v3, %v7766_v53 }
 0x616   : > { %v12192_v62 = vcombine.low %v22515_v13, %v12175_v43  ;;  %v12193_v17 = vcombine.high %v22515_v13, %v12175_v43  ;;  %v12365_v52 = vcombine.high %v22451_v4, %v16771_v48  ;;  %v12296_v59 = vcombine.low %v22483_v1, %v11087_v7 }
 0x617   : > { %v7799_v23 = vcombine.low %v7775_v2, %v7791_v26  ;;  %v7800_v14 = vcombine.high %v7775_v2, %v7791_v26  ;;  %v7782_v31 = vrot.slane %v7768_v5, %v24702_v27  ;;  %v7798_v60 = vrot.slane %v7784_v44, %v24702_v27  ;;  %10184 = vadd.xlane.f32.xlu1 %v22407_v21 }
 0x618   : > { %v12268_v33 = vrot.slane %v12260_v30, %v24702_v27  ;;  %v12275_v55 = vrot.slane %v12261_v40, %v24702_v27  ;;  %v13300_v10 = vcombine.low %v12252_v36, %v12259_v16  ;;  %v10177_v0 = vsel %vm7871_vm0, %v22459_v61, 0.0 }
 0x619   : > { %16830 = vmatprep.subr.mxu0 %v7799_v23  ;;  %16844 = vmatprep.subr.mxu1 %v7800_v14  ;;  %v12372_v13 = vrot.slane %v12364_v19, %v24698_v57  ;;  %v22638_v4 = vsel %vm7871_vm0, %v22469_v58, 0.0  ;;  %v22640_v48 = vcombine.low %v7782_v31, %v7798_v60  ;;  %v22642_v44 = vcombine.high %v7782_v31, %v7798_v60 }
 0x61a   : > { %16831 = vmatpush3.msra.mxu0 %v7799_v23  ;;  %16845 = vmatpush3.msra.mxu1 %v7800_v14  ;;  %v12184_v3 = vrot.slane %v12176_v45, %v24702_v27  ;;  %v12191_v53 = vrot.slane %v12177_v39, %v24702_v27  ;;  %v12200_v43 = vrot.slane %v12192_v62, %v24702_v27  ;;  %v10174_v45 = vsel %vm7871_vm0, %v22477_v42, 0.0 }
 0x61b   : > { %v12207_v30 = vrot.slane %v12193_v17, %v24702_v27  ;;  %v24808_v40 = vcombine.high %v22546_v11, %v22549_v24  ;;  %v12379_v26 = vrot.slane %v12365_v52, %v24698_v57  ;;  %v12304_v19 = vrot.slane %v12296_v59, %v24698_v57  ;;  %10178 = vadd.xlane.f32.xlu1 %v10177_v0 }
 0x61c   : > { %10172 = vadd.xlane.f32.xlu0 %v22411_v28  ;;  %v24809_v17 = vcombine.low %v22385_v22, %v22501_v12  ;;  %v15942_v5 = vcombine.high %v12252_v36, %v12259_v16  ;;  %v13316_v11 = vcombine.low %v12268_v33, %v12275_v55  ;;  %v12297_v24 = vcombine.high %v22483_v1, %v11087_v7 }
 0x61d   : > { %v22652_v2 = vrot.slane %v24808_v40, %v24698_v57  ;;  %v24810_v59 = vcombine.high %v22385_v22, %v22501_v12  ;;  %v15943_v21 = vcombine.high %v12268_v33, %v12275_v55  ;;  %v12380_v28 = vcombine.low %v22534_v54, %v12372_v13 }
 0x61e   : > { %v12288_v39 = vrot.slane %v24809_v17, %v24698_v57  ;;  %v12381_v23 = vcombine.high %v22534_v54, %v12372_v13  ;;  %v22672_v14 = vrot.slane %v13300_v10, %v24698_v57  ;;  %v13232_v52 = vcombine.low %v12184_v3, %v12191_v53 }
 0x61f   : > { %v12295_v62 = vrot.slane %v24810_v59, %v24698_v57  ;;  %v15940_v31 = vcombine.high %v12184_v3, %v12191_v53  ;;  %v13248_v60 = vcombine.low %v12200_v43, %v12207_v30  ;;  %v12396_v36 = vcombine.low %v22537_v9, %v12379_v26 }
 0x620   : > { %v12397_v1 = vcombine.high %v22537_v9, %v12379_v26  ;;  %v12312_v16 = vcombine.low %v12288_v39, %v12304_v19  ;;  %10175 = vadd.xlane.f32.xlu0 %v10174_v45  ;;  %v10186_v22 = vsel %vm7871_vm0, %v22485_v15, 0.0  ;;  %v22679_v12 = vrot.slane %v15942_v5, %v24698_v57 }
 0x621   : > { %v22682_v54 = vrot.slane %v13316_v11, %v24698_v57  ;;  %v12311_v7 = vrot.slane %v12297_v24, %v24698_v57  ;;  %v12313_v33 = vcombine.high %v12288_v39, %v12304_v19  ;;  %v22686_v55 = vrot.slane %v15943_v21, %v24698_v57 }
 0x622   : > { %v15941_v10 = vcombine.high %v12200_v43, %v12207_v30  ;;  %v22689_v9 = vrot.slane %v12380_v28, %v24702_v27  ;;  %v22692_v0 = vrot.slane %v12381_v23, %v24702_v27  ;;  %v22695_v13 = vrot.slane %v13232_v52, %v24698_v57 }
 0x623   : > { %v22698_v3 = vrot.slane %v15940_v31, %v24698_v57  ;;  %v12992_v53 = vcombine.low %v22488_v47, %v22491_v8  ;;  %v13008_v40 = vcombine.low %v22494_v49, %v22497_v51  ;;  %v22705_v43 = vrot.slane %v13248_v60, %v24698_v57 }
 0x624   : > { %v22708_v30 = vrot.slane %v12396_v36, %v24702_v27  ;;  %v22711_v26 = vrot.slane %v12397_v1, %v24702_v27  ;;  %v12320_v19 = vrot.slane %v12312_v16, %v24702_v27  ;;  %10187 = vadd.xlane.f32.xlu0 %v10186_v22  ;;  %v12327_v45 = vrot.slane %v12313_v33, %v24702_v27 }
 0x625   : > { %v12328_v17 = vcombine.low %v12295_v62, %v12311_v7  ;;  %v13060_v39 = vcombine.low %v22445_v20, %v22448_v63  ;;  %v13076_v5 = vcombine.low %v22456_v37, %v22462_v46  ;;  %v22720_v11 = vrot.slane %v15941_v10, %v24698_v57 }
 0x626   : > { %v13436_v24 = vcombine.low %v22689_v9, %v22692_v0  ;;  %v15946_v59 = vcombine.high %v22689_v9, %v22692_v0  ;;  %v12329_v21 = vcombine.high %v12295_v62, %v12311_v7  ;;  %v22727_v28 = vrot.slane %v12992_v53, %v24702_v27 }
 0x627   : > { %v22730_v23 = vrot.slane %v13008_v40, %v24702_v27  ;;  %v12993_v52 = vcombine.high %v22488_v47, %v22491_v8  ;;  %v13009_v31 = vcombine.high %v22494_v49, %v22497_v51  ;;  %v13452_v60 = vcombine.low %v22708_v30, %v22711_v26 }
 0x628   : > { %v15947_v36 = vcombine.high %v22708_v30, %v22711_v26  ;;  %v13061_v62 = vcombine.high %v22445_v20, %v22448_v63  ;;  %v13077_v1 = vcombine.high %v22456_v37, %v22462_v46  ;;  %10190 = vadd.xlane.f32.xlu0 %v22638_v4  ;;  %v12336_v16 = vrot.slane %v12328_v17, %v24702_v27 }
 0x629   : > { %v13368_v47 = vcombine.low %v12320_v19, %v12327_v45  ;;  %v22747_v8 = vrot.slane %v13060_v39, %v24702_v27  ;;  %v22750_v49 = vrot.slane %v13076_v5, %v24702_v27  ;;  %v12343_v51 = vrot.slane %v12329_v21, %v24702_v27 }
 0x62a   : > { %v15944_v22 = vcombine.high %v12320_v19, %v12327_v45  ;;  %v13128_v20 = vcombine.low %v22607_v50, %v22610_v6  ;;  %v13144_v63 = vcombine.low %v22614_v25, %v22652_v2  ;;  %v22758_v37 = vrot.slane %v13436_v24, %v24698_v57 }
 0x62b   : > { %v13025_v46 = vcombine.high %v22727_v28, %v22730_v23  ;;  %v22763_v4 = vrot.slane %v12993_v52, %v24702_v27  ;;  %v22766_v7 = vrot.slane %v13009_v31, %v24702_v27  ;;  %v22769_v33 = vrot.slane %v13061_v62, %v24702_v27 }
 0x62c   : > { %v22772_v10 = vrot.slane %v13077_v1, %v24702_v27  ;;  %v13196_v9 = vcombine.low %v22566_v56, %v22598_v29  ;;  %v13212_v0 = vcombine.low %v22601_v41, %v22604_v32  ;;  %v22779_v53 = vrot.slane %v13368_v47, %v24698_v57 }
 0x62d   : > { %v13093_v40 = vcombine.high %v22747_v8, %v22750_v49  ;;  %v13129_v30 = vcombine.high %v22607_v50, %v22610_v6  ;;  %v13145_v26 = vcombine.high %v22614_v25, %v22652_v2  ;;  %v13384_v19 = vcombine.low %v12336_v16, %v12343_v51 }
 0x62e   : > { %v15945_v45 = vcombine.high %v12336_v16, %v12343_v51  ;;  %v22788_v17 = vrot.slane %v13128_v20, %v24702_v27  ;;  %v22791_v39 = vrot.slane %v13144_v63, %v24702_v27  ;;  %v13027_v24 = vcombine.high %v22763_v4, %v22766_v7 }
 0x62f   : > { %v17041_v5 = vpack.i.bf16 %v13093_v40, %v13025_v46  ;;  %v13197_v21 = vcombine.high %v22566_v56, %v22598_v29  ;;  %v13213_v50 = vcombine.high %v22601_v41, %v22604_v32  ;;  %v22800_v6 = vrot.slane %v15944_v22, %v24698_v57 }
 0x630   : > { %v13095_v25 = vcombine.high %v22769_v33, %v22772_v10  ;;  %v22805_v2 = vrot.slane %v13196_v9, %v24702_v27  ;;  %v22808_v52 = vrot.slane %v13212_v0, %v24702_v27  ;;  %v22812_v31 = vrot.slane %v13129_v30, %v24702_v27 }
 0x631   : > { %17042 = vrot.lane.b32.xlu1 %v17041_v5, %s17781_s20  ;;  %v22815_v56 = vrot.slane %v13145_v26, %v24702_v27  ;;  %v13265_v29 = vcombine.high %v22695_v13, %v22698_v3  ;;  %v13281_v41 = vcombine.high %v22705_v43, %v22720_v11  ;;  %v13391_v32 = vrot.slane %v13384_v19, %v24698_v57 }
 0x632   : > { %v13161_v62 = vcombine.high %v22788_v17, %v22791_v39  ;;  %v13333_v1 = vcombine.high %v22672_v14, %v22679_v12  ;;  %v13349_v16 = vcombine.high %v22682_v54, %v22686_v55  ;;  %v13399_v47 = vrot.slane %v15945_v45, %v24698_v57  ;;  %v22837_v40 = vpop.xlane.xlu1 %10166 }
 0x633   : > { %v17051_v51 = vpack.i.bf16 %v13095_v25, %v13027_v24  ;;  %v13211_v22 = vrot.slane %v13197_v21, %v24702_v27  ;;  %v13227_v20 = vrot.slane %v13213_v50, %v24702_v27  ;;  %v13451_v63 = vrot.slane %v15946_v59, %v24698_v57 }
 0x634   : > { %v13459_v46 = vrot.slane %v13452_v60, %v24698_v57  ;;  %v13467_v9 = vrot.slane %v15947_v36, %v24698_v57  ;;  %v13229_v0 = vcombine.high %v22805_v2, %v22808_v52  ;;  %v13163_v30 = vcombine.high %v22812_v31, %v22815_v56 }
 0x635   : > { %17052 = vrot.lane.b32.xlu1 %v17051_v51, %s17780_s29  ;;  %v22842_v26 = vrot.slane %v13265_v29, %v24702_v27  ;;  %v22845_v19 = vrot.slane %v13281_v41, %v24702_v27  ;;  %v22848_v60 = vrot.slane %v13333_v1, %v24702_v27  ;;  %v22851_v36 = vrot.slane %v13349_v16, %v24702_v27 }
 0x636   : > { %v17056_v59 = vpack.i.bf16 %v13229_v0, %v13161_v62  ;;  %v13400_v45 = vcombine.low %v22779_v53, %v22800_v6  ;;  %v13231_v5 = vcombine.high %v13211_v22, %v13227_v20  ;;  %v13416_v24 = vcombine.low %v13391_v32, %v13399_v47 }
 0x637   : > { %v22855_v21 = vpop.xlane.xlu0 %10154  ;;  %v13264_v50 = vcombine.low %v22695_v13, %v22698_v3  ;;  %v13280_v25 = vcombine.low %v22705_v43, %v22720_v11  ;;  %v13468_v29 = vcombine.low %v22758_v37, %v13451_v63  ;;  %v13484_v41 = vcombine.low %v13459_v46, %v13467_v9 }
 0x638   : > { %v13026_v62 = vcombine.low %v22763_v4, %v22766_v7  ;;  %v17066_v1 = vpack.i.bf16 %v13231_v5, %v13163_v30  ;;  %v13298_v16 = vcombine.low %v22842_v26, %v22845_v19  ;;  %v13332_v51 = vcombine.low %v22672_v14, %v22679_v12  ;;  %v5626_v7 = vpop.permute.xlu1 %5625 }
 0x639   : > { %17057 = vrot.lane.b32.xlu1 %v17056_v59, %s17781_s20  ;;  %v13348_v13 = vcombine.low %v22682_v54, %v22686_v55  ;;  %v13366_v3 = vcombine.low %v22848_v60, %v22851_v36  ;;  %v22874_v43 = vrot.slane %v13400_v45, %v24702_v27  ;;  %v13401_v11 = vcombine.high %v22779_v53, %v22800_v6 }
 0x63a   : > { %v13094_v4 = vcombine.low %v22769_v33, %v22772_v10  ;;  %v22881_v0 = vrot.slane %v13416_v24, %v24702_v27  ;;  %v13417_v14 = vcombine.high %v13391_v32, %v13399_v47  ;;  %v22884_v54 = vrot.slane %v13264_v50, %v24702_v27 }
 0x63b   : > { %v5578_v12 = vpop.permute.xlu0 %5577  ;;  %v22887_v55 = vrot.slane %v13280_v25, %v24702_v27  ;;  %v22890_v30 = vrot.slane %v13468_v29, %v24702_v27  ;;  %v22893_v53 = vrot.slane %v13484_v41, %v24702_v27  ;;  %v13162_v33 = vcombine.low %v22812_v31, %v22815_v56 }
 0x63c   : > { %v17046_v6 = vpack.i.bf16 %v13094_v4, %v13026_v62  ;;  %v13469_v10 = vcombine.high %v22758_v37, %v13451_v63  ;;  %v13485_v32 = vcombine.high %v13459_v46, %v13467_v9  ;;  %v22900_v47 = vrot.slane %v13332_v51, %v24702_v27 }
 0x63d   : > { %17067 = vrot.lane.b32.xlu1 %v17066_v1, %s17780_s29  ;;  %v22903_v59 = vrot.slane %v13348_v13, %v24702_v27  ;;  %v6579_v45 = vcombine.low %v24783_v38, %v5626_v7  ;;  %v6580_v5 = vcombine.high %v24783_v38, %v5626_v7  ;;  %v13415_v24 = vrot.slane %v13401_v11, %v24702_v27 }
 0x63e   : > { %17047 = vrot.lane.b32.xlu0 %v17046_v6, %s17779_s27  ;;  %v13230_v31 = vcombine.low %v13211_v22, %v13227_v20  ;;  %v17076_v56 = vpack.i.bf16 %v13366_v3, %v13298_v16  ;;  %v13433_v37 = vcombine.high %v22874_v43, %v22881_v0  ;;  %v13431_v63 = vrot.slane %v13417_v14, %v24702_v27 }
 0x63f   : > { %v5674_v46 = vpop.permute.xlu0 %5673  ;;  %v13297_v9 = vcombine.high %v22884_v54, %v22887_v55  ;;  %v13501_v38 = vcombine.high %v22890_v30, %v22893_v53  ;;  %v13483_v22 = vrot.slane %v13469_v10, %v24702_v27  ;;  %v13499_v20 = vrot.slane %v13485_v32, %v24702_v27 }
 0x640   : > { %v6595_v50 = vcombine.low %v5578_v12, %v5674_v46  ;;  %v6596_v25 = vcombine.high %v5578_v12, %v5674_v46  ;;  %v17061_v29 = vpack.i.bf16 %v13230_v31, %v13162_v33  ;;  %v13365_v41 = vcombine.high %v22900_v47, %v22903_v59 }
 0x641   : > { %17077 = vrot.lane.b32.xlu1 %v17076_v56, %s17779_s27  ;;  %v6587_v62 = vrot.slane %v6579_v45, %v24698_v57  ;;  %v6594_v1 = vrot.slane %v6580_v5, %v24698_v57  ;;  %v17086_v13 = vpack.i.bf16 %v13501_v38, %v13433_v37  ;;  %v13435_v3 = vcombine.high %v13415_v24, %v13431_v63 }
 0x642   : > { %v6603_v16 = vrot.slane %v6595_v50, %v24698_v57  ;;  %v6610_v51 = vrot.slane %v6596_v25, %v24698_v57  ;;  %17062 = vrot.lane.b32.xlu0 %v17061_v29, %s17779_s27  ;;  %v17071_v11 = vpack.i.bf16 %v13365_v41, %v13297_v9  ;;  %v13299_v4 = vcombine.high %v22842_v26, %v22845_v19 }
 0x643   : > { %v13503_v33 = vcombine.high %v13483_v22, %v13499_v20  ;;  %v13367_v10 = vcombine.high %v22848_v60, %v22851_v36  ;;  %v13434_v56 = vcombine.low %v13415_v24, %v13431_v63  ;;  %v13502_v60 = vcombine.low %v13483_v22, %v13499_v20 }
 0x644   : > { %v6611_v7 = vcombine.low %v6587_v62, %v6603_v16  ;;  %v6612_v14 = vcombine.high %v6587_v62, %v6603_v16  ;;  %v6627_v12 = vcombine.low %v6594_v1, %v6610_v51  ;;  %v6628_v6 = vcombine.high %v6594_v1, %v6610_v51 }
 0x645   : > { %17087 = vrot.lane.b32.xlu1 %v17086_v13, %s17781_s20  ;;  %v17096_v26 = vpack.i.bf16 %v13503_v33, %v13435_v3  ;;  %v17081_v19 = vpack.i.bf16 %v13367_v10, %v13299_v4  ;;  %v17091_v41 = vpack.i.bf16 %v13502_v60, %v13434_v56 }
 0x646   : > { %v6619_v32 = vrot.slane %v6611_v7, %v24702_v27  ;;  %v6626_v45 = vrot.slane %v6612_v14, %v24702_v27  ;;  %v6635_v5 = vrot.slane %v6627_v12, %v24702_v27  ;;  %v6642_v31 = vrot.slane %v6628_v6, %v24702_v27  ;;  %17072 = vrot.lane.b32.xlu0 %v17071_v11, %s17781_s20  ;;  %v24811_v6 = vld [vmem:[#allocation21_spill] sm:$0xff] }
 0x648   : > { %v7667_v37 = vcombine.low %v6619_v32, %v6626_v45  ;;  %v15734_v46 = vcombine.high %v6619_v32, %v6626_v45  ;;  %v7683_v9 = vcombine.low %v6635_v5, %v6642_v31  ;;  %v15735_v50 = vcombine.high %v6635_v5, %v6642_v31  ;;  %v24812_v32 = vld [vmem:[#allocation41_spill] sm:$0xff] }
 0x649   : > { %17097 = vrot.lane.b32.xlu1 %v17096_v26, %s17780_s29  ;;  %17395 = vrcp.f32 %v24812_v32 }
 0x64a   : > { %17082 = vrot.lane.b32.xlu0 %v17081_v19, %s17780_s29  ;;  %v7674_v36 = vrot.slane %v7667_v37, %v24698_v57  ;;  %v7682_v25 = vrot.slane %v15734_v46, %v24698_v57  ;;  %v7690_v29 = vrot.slane %v7683_v9, %v24698_v57  ;;  %v7698_v38 = vrot.slane %v15735_v50, %v24698_v57 }
 0x64b   : > { %17397 = vrcp.f32 %v22837_v40 }
 0x64c   : > { %v7699_v62 = vcombine.low %v7674_v36, %v7682_v25  ;;  %v7715_v24 = vcombine.low %v7690_v29, %v7698_v38  ;;  %v7700_v63 = vcombine.high %v7674_v36, %v7682_v25  ;;  %v7716_v1 = vcombine.high %v7690_v29, %v7698_v38 }
 0x64d   : > { %17399 = vrcp.f32 %v22855_v21 }
 0x64e   : > { %17092 = vrot.lane.b32.xlu0 %v17091_v41, %s17779_s27  ;;  %v7707_v16 = vrot.slane %v7699_v62, %v24702_v27  ;;  %v7723_v22 = vrot.slane %v7715_v24, %v24702_v27  ;;  %v7714_v20 = vrot.slane %v7700_v63, %v24702_v27  ;;  %v7730_v51 = vrot.slane %v7716_v1, %v24702_v27  ;;  %v17390_v63 = vpop.eup %17389 }
 0x64f   : > { %v17392_v1 = vpop.eup %17391 }
 0x650   : > { %v7731_v13 = vcombine.low %v7707_v16, %v7723_v22  ;;  %v7732_v3 = vcombine.high %v7707_v16, %v7723_v22  ;;  %v22947_v11 = vcombine.low %v7714_v20, %v7730_v51  ;;  %v22949_v4 = vcombine.high %v7714_v20, %v7730_v51 }
 0x652   : > { %16832 = vmatprep.subr.mxu0 %v7731_v13  ;;  %16846 = vmatprep.subr.mxu1 %v7732_v3 }
 0x653   : > { %16833 = vmatpush3.msra.mxu0 %v7731_v13  ;;  %16847 = vmatpush3.msra.mxu1 %v7732_v3  ;;  %v17394_v13 = vpop.eup %17393 }
 0x65d   : > { %v22963_v56 = vpop.f32.mrf.mxu1  ;;  %v22969_v25 = vpop.f32.mrf.mxu0 }
 0x65f   : > { %v22971_v29 = vpop.f32.mrf.mxu1  ;;  %v22977_v3 = vpop.f32.mrf.mxu0 }
 0x667   : > { %v10170_v7 = vpop.xlane.xlu1 %10169 }
 0x668   : > { %17401 = vrcp.f32 %v10170_v7  ;;  %v17396_v7 = vpop.eup %17395 }
 0x66b   : > { %v5624_v14 = vpop.permute.xlu1 %5623 }
 0x66c   : > { %v6511_v33 = vcombine.low %v24811_v6, %v5624_v14  ;;  %v6512_v10 = vcombine.high %v24811_v6, %v5624_v14  ;;  %v22979_v14 = vpop.f32.mrf.mxu1 }
 0x66e   : > { %v6519_v18 = vrot.slane %v6511_v33, %v24698_v57  ;;  %v6526_v35 = vrot.slane %v6512_v10, %v24698_v57  ;;  %v17398_v33 = vpop.eup %17397 }
 0x66f   : > { %v5672_v45 = vpop.permute.xlu1 %5671  ;;  %v17400_v10 = vpop.eup %17399 }
 0x670   : > { %v10182_v12 = vpop.xlane.xlu0 %10181 }
 0x671   : > { %17403 = vrcp.f32 %v10182_v12 }
 0x674   : > { %v5576_v5 = vpop.permute.xlu0 %5575 }
 0x675   : > { %v6527_v31 = vcombine.low %v5576_v5, %v5672_v45  ;;  %v6528_v26 = vcombine.high %v5576_v5, %v5672_v45 }
 0x677   : > { %v6535_v34 = vrot.slane %v6527_v31, %v24698_v57  ;;  %v6542_v19 = vrot.slane %v6528_v26, %v24698_v57  ;;  %v22983_v26 = vpop.f32.mrf.mxu0 }
 0x679   : > { %v6543_v37 = vcombine.low %v6519_v18, %v6535_v34  ;;  %v6544_v46 = vcombine.high %v6519_v18, %v6535_v34  ;;  %v6559_v9 = vcombine.low %v6526_v35, %v6542_v19  ;;  %v6560_v50 = vcombine.high %v6526_v35, %v6542_v19  ;;  %v17402_v18 = vpop.eup %17401  ;;  %v22985_v35 = vpop.f32.mrf.mxu1 }
 0x67b   : > { %v6551_v40 = vrot.slane %v6543_v37, %v24702_v27  ;;  %v6558_v21 = vrot.slane %v6544_v46, %v24702_v27  ;;  %v6567_v60 = vrot.slane %v6559_v9, %v24702_v27  ;;  %v6574_v36 = vrot.slane %v6560_v50, %v24702_v27  ;;  %v24813_v37 = vld [vmem:[#allocation76_spill] sm:$0xff] }
 0x67c   : > { %v10291_v46 = vmul.f32 %v17390_v63, %v24813_v37  ;;  %v24814_v50 = vld [vmem:[#allocation20_spill] sm:$0xff]  ;;  %v24822_v37 = vld [vmem:[#allocation50_spill] sm:$0xff] }
 0x67d   : > { %v7599_v38 = vcombine.low %v6551_v40, %v6558_v21  ;;  %v15732_v41 = vcombine.high %v6551_v40, %v6558_v21  ;;  %v7615_v62 = vcombine.low %v6567_v60, %v6574_v36  ;;  %v15733_v24 = vcombine.high %v6567_v60, %v6574_v36 }
 0x67e   : > { %v17404_v9 = vpop.eup %17403  ;;  %v10299_v40 = vmul.f32 %v17392_v1, %v24814_v50  ;;  %v24816_v1 = vld [vmem:[#allocation32_spill] sm:$0xff] }
 0x67f   : > { %v7606_v16 = vrot.slane %v7599_v38, %v24698_v57  ;;  %v7614_v22 = vrot.slane %v15732_v41, %v24698_v57  ;;  %v7622_v20 = vrot.slane %v7615_v62, %v24698_v57  ;;  %v7630_v51 = vrot.slane %v15733_v24, %v24698_v57  ;;  %v22991_v38 = vpop.f32.mrf.mxu0  ;;  %v24815_v24 = vld [vmem:[#allocation26_spill] sm:$0xff] }
 0x680   : > { %v10293_v63 = vmul.f32 %v17394_v13, %v24815_v24 }
 0x681   : > { %v7631_v12 = vcombine.low %v7606_v16, %v7614_v22  ;;  %v7647_v6 = vcombine.low %v7622_v20, %v7630_v51  ;;  %v7632_v5 = vcombine.high %v7606_v16, %v7614_v22  ;;  %v7648_v31 = vcombine.high %v7622_v20, %v7630_v51  ;;  %v24817_v20 = vld [vmem:[#allocation28_spill] sm:$0xff] }
 0x682   : > { %v10301_v22 = vmul.f32 %v17396_v7, %v24816_v1  ;;  %v10295_v51 = vmul.f32 %v17400_v10, %v24817_v20 }
 0x683   : > { %v7639_v32 = vrot.slane %v7631_v12, %v24702_v27  ;;  %v7655_v45 = vrot.slane %v7647_v6, %v24702_v27  ;;  %v7646_v60 = vrot.slane %v7632_v5, %v24702_v27  ;;  %v7662_v36 = vrot.slane %v7648_v31, %v24702_v27  ;;  %v24818_v12 = vld [vmem:[#allocation74_spill] sm:$0xff] }
 0x684   : > { %v10303_v6 = vmul.f32 %v17398_v33, %v24818_v12  ;;  %v24820_v31 = vld [vmem:[#allocation30_spill] sm:$0xff] }
 0x685   : > { %v7663_v34 = vcombine.low %v7639_v32, %v7655_v45  ;;  %v7664_v19 = vcombine.high %v7639_v32, %v7655_v45  ;;  %v16824_v21 = vpop.f32.mrf.mxu1  ;;  %v10305_v13 = vmul.f32 %v17402_v18, %v24820_v31  ;;  %v23012_v33 = vcombine.low %v7646_v60, %v7662_v36 }
 0x686   : > { %v12500_v41 = vcombine.low %v22963_v56, %v16824_v21  ;;  %v12501_v62 = vcombine.high %v22963_v56, %v16824_v21  ;;  %v24819_v56 = vld [vmem:[#allocation67_spill] sm:$0xff] }
 0x687   : > { %16834 = vmatprep.subr.mxu0 %v7663_v34  ;;  %16848 = vmatprep.subr.mxu1 %v7664_v19  ;;  %v11465_v16 = vpop.f32.mrf.mxu1 }
 0x688   : > { %16835 = vmatpush3.msra.mxu0 %v7663_v34  ;;  %16849 = vmatpush3.msra.mxu1 %v7664_v19  ;;  %v12432_v32 = vcombine.low %v22971_v29, %v11465_v16  ;;  %v12433_v45 = vcombine.high %v22971_v29, %v11465_v16  ;;  %v24821_v34 = vld [vmem:[#allocation82_spill] sm:$0xff]  ;;  %v12508_v29 = vrot.slane %v12500_v41, %v24698_v57 }
 0x689   : > { %16837 = vmatmul.mubr.msk.f32.vlgmr.msra.gmra.mxu0 %vm7871_vm0, %v10291_v46  ;;  %16851 = vmatmul.mubr.msk.f32.vlgmr.msra.gmra.mxu1 %vm7871_vm0, %v10299_v40  ;;  %v23006_v19 = vmul.f32 %v17404_v9, %v24821_v34  ;;  %v12515_v46 = vrot.slane %v12501_v62, %v24698_v57  ;;  %v23018_v9 = vcombine.high %v7646_v60, %v7662_v36 }
 0x68a   : > { %16856 = vmatprep.subr.mxu0 %v24819_v56  ;;  %v16810_v5 = vpop.f32.mrf.mxu0  ;;  %16870 = vmatprep.subr.mxu1 %v24822_v37  ;;  %v12440_v21 = vrot.slane %v12432_v32, %v24698_v57  ;;  %v12447_v41 = vrot.slane %v12433_v45, %v24698_v57 }
 0x68b   : > { %v12484_v7 = vcombine.low %v22969_v25, %v16810_v5  ;;  %v12485_v10 = vcombine.high %v22969_v25, %v16810_v5  ;;  %16839 = vmatprep.mubr.msk.f32.mxu0 %vm7871_vm0, %v10293_v63  ;;  %16853 = vmatprep.mubr.msk.f32.mxu1 %vm7871_vm0, %v10301_v22 }
 0x68c   : > { %16857 = vmatpush3.msra.mxu0 %v24819_v56  ;;  %v11368_v18 = vpop.f32.mrf.mxu0  ;;  %16871 = vmatpush3.msra.mxu1 %v24822_v37 }
 0x68d   : > { %v12492_v50 = vrot.slane %v12484_v7, %v24698_v57  ;;  %v12499_v40 = vrot.slane %v12485_v10, %v24698_v57  ;;  %16858 = vmatprep.subr.mxu0 %v22640_v48  ;;  %v12416_v25 = vcombine.low %v22977_v3, %v11368_v18  ;;  %16872 = vmatprep.subr.mxu1 %v22642_v44 }
 0x68e   : > { %v12417_v62 = vcombine.high %v22977_v3, %v11368_v18  ;;  %16859 = vmatpush3.msra.mxu0 %v22640_v48  ;;  %16873 = vmatpush3.msra.mxu1 %v22642_v44 }
 0x68f   : > { %v12516_v60 = vcombine.low %v12492_v50, %v12508_v29  ;;  %v12517_v36 = vcombine.high %v12492_v50, %v12508_v29  ;;  %v12532_v24 = vcombine.low %v12499_v40, %v12515_v46  ;;  %v12533_v63 = vcombine.high %v12499_v40, %v12515_v46  ;;  %v16813_v16 = vpop.f32.mrf.mxu0  ;;  %16840 = vmatmul.mubr.msk.f32.gmra.mxu0 %vm7871_vm0, %v10295_v51 }
 0x690   : > { %v12424_v1 = vrot.slane %v12416_v25, %v24698_v57  ;;  %v12431_v22 = vrot.slane %v12417_v62, %v24698_v57  ;;  %16854 = vmatmul.mubr.msk.f32.gmra.mxu1 %vm7871_vm0, %v10303_v6  ;;  %v12620_v20 = vcombine.low %v22983_v26, %v16813_v16  ;;  %16860 = vmatprep.subr.mxu0 %v22947_v11 }
 0x691   : > { %v12524_v3 = vrot.slane %v12516_v60, %v24702_v27  ;;  %v12531_v48 = vrot.slane %v12517_v36, %v24702_v27  ;;  %v12540_v12 = vrot.slane %v12532_v24, %v24702_v27  ;;  %v12547_v32 = vrot.slane %v12533_v63, %v24702_v27  ;;  %16874 = vmatprep.subr.mxu1 %v22949_v4  ;;  %v11378_v46 = vpop.f32.mrf.mxu0  ;;  %v23068_v24 = vld [vmem:[#allocation7 + $0x78] sm:$0xff] }
 0x692   : > { %v12448_v44 = vcombine.low %v12424_v1, %v12440_v21  ;;  %v12449_v45 = vcombine.high %v12424_v1, %v12440_v21  ;;  %v12464_v56 = vcombine.low %v12431_v22, %v12447_v41  ;;  %v12465_v5 = vcombine.high %v12431_v22, %v12447_v41  ;;  %16861 = vmatpush3.msra.mxu0 %v22947_v11 }
 0x693   : > { %v13572_v51 = vcombine.low %v12524_v3, %v12531_v48  ;;  %v15950_v6 = vcombine.high %v12524_v3, %v12531_v48  ;;  %v13588_v31 = vcombine.low %v12540_v12, %v12547_v32  ;;  %v15951_v34 = vcombine.high %v12540_v12, %v12547_v32  ;;  %16864 = vmatprep.mubr.msk.f32.mxu0 %vm7871_vm0, %v10305_v13 }
 0x694   : > { %v12456_v37 = vrot.slane %v12448_v44, %v24702_v27  ;;  %v12463_v7 = vrot.slane %v12449_v45, %v24702_v27  ;;  %v12472_v10 = vrot.slane %v12464_v56, %v24702_v27  ;;  %v12479_v29 = vrot.slane %v12465_v5, %v24702_v27  ;;  %16875 = vmatpush3.msra.mxu1 %v22949_v4 }
 0x695   : > { %v23049_v18 = vrot.slane %v13572_v51, %v24698_v57  ;;  %v23052_v50 = vrot.slane %v15950_v6, %v24698_v57  ;;  %v23055_v40 = vrot.slane %v13588_v31, %v24698_v57  ;;  %v23058_v11 = vrot.slane %v15951_v34, %v24698_v57  ;;  %16878 = vmatprep.mubr.msk.f32.mxu1 %vm7871_vm0, %v23006_v19 }
 0x696   : > { %v13504_v25 = vcombine.low %v12456_v37, %v12463_v7  ;;  %v15948_v21 = vcombine.high %v12456_v37, %v12463_v7  ;;  %v13520_v41 = vcombine.low %v12472_v10, %v12479_v29  ;;  %v15949_v62 = vcombine.high %v12472_v10, %v12479_v29  ;;  %16862 = vmatprep.subr.mxu0 %v23012_v33 }
 0x697   : > { %v12621_v13 = vcombine.high %v22983_v26, %v16813_v16  ;;  %v12628_v60 = vrot.slane %v12620_v20, %v24698_v57  ;;  %16876 = vmatprep.subr.mxu1 %v23018_v9  ;;  %v12552_v36 = vcombine.low %v22991_v38, %v11378_v46  ;;  %16863 = vmatpush3.msra.mxu0 %v23012_v33  ;;  %v16827_v20 = vpop.f32.mrf.mxu1 }
 0x698   : > { %v13511_v4 = vrot.slane %v13504_v25, %v24698_v57  ;;  %v13519_v63 = vrot.slane %v15948_v21, %v24698_v57  ;;  %v23073_v1 = vrot.slane %v13520_v41, %v24698_v57  ;;  %v23076_v19 = vrot.slane %v15949_v62, %v24698_v57  ;;  %16877 = vmatpush3.msra.mxu1 %v23018_v9 }
 0x699   : > { %v12635_v26 = vrot.slane %v12621_v13, %v24698_v57  ;;  %v12553_v16 = vcombine.high %v22991_v38, %v11378_v46  ;;  %v12560_v22 = vrot.slane %v12552_v36, %v24698_v57  ;;  %v13605_v3 = vcombine.high %v23049_v18, %v23052_v50  ;;  %16884 = vmatprep.subr.mxu0 %v23068_v24  ;;  %v11475_v44 = vpop.f32.mrf.mxu1 }
 0x69a   : > { %v12636_v48 = vcombine.low %v22979_v14, %v16827_v20  ;;  %v12637_v12 = vcombine.high %v22979_v14, %v16827_v20  ;;  %v13537_v32 = vcombine.high %v13511_v4, %v13519_v63  ;;  %v13553_v33 = vcombine.high %v23073_v1, %v23076_v19 }
 0x69b   : > { %v12567_v9 = vrot.slane %v12553_v16, %v24698_v57  ;;  %v23092_v38 = vrot.slane %v13605_v3, %v24702_v27  ;;  %v13621_v45 = vcombine.high %v23055_v40, %v23058_v11  ;;  %v13536_v56 = vcombine.low %v13511_v4, %v13519_v63 }
 0x69c   : > { %v12644_v5 = vrot.slane %v12636_v48, %v24698_v57  ;;  %v12651_v14 = vrot.slane %v12637_v12, %v24698_v57  ;;  %v12568_v51 = vcombine.low %v22985_v35, %v11475_v44  ;;  %v12569_v6 = vcombine.high %v22985_v35, %v11475_v44 }
 0x69d   : > { %v23101_v31 = vrot.slane %v13537_v32, %v24702_v27  ;;  %v23104_v34 = vrot.slane %v13553_v33, %v24702_v27  ;;  %v23107_v37 = vrot.slane %v13621_v45, %v24702_v27  ;;  %v23110_v7 = vrot.slane %v13536_v56, %v24702_v27 }
 0x69e   : > { %v12652_v10 = vcombine.low %v12628_v60, %v12644_v5  ;;  %v12653_v29 = vcombine.high %v12628_v60, %v12644_v5  ;;  %v12668_v46 = vcombine.low %v12635_v26, %v12651_v14  ;;  %v12669_v25 = vcombine.high %v12635_v26, %v12651_v14 }
 0x69f   : > { %v12576_v21 = vrot.slane %v12568_v51, %v24698_v57  ;;  %v12583_v35 = vrot.slane %v12569_v6, %v24698_v57  ;;  %v13570_v41 = vcombine.low %v23101_v31, %v23104_v34  ;;  %v13638_v62 = vcombine.low %v23092_v38, %v23107_v37 }
 0x6a0   : > { %v12660_v13 = vrot.slane %v12652_v10, %v24702_v27  ;;  %v12667_v36 = vrot.slane %v12653_v29, %v24702_v27  ;;  %v12676_v4 = vrot.slane %v12668_v46, %v24702_v27  ;;  %v12683_v60 = vrot.slane %v12669_v25, %v24702_v27  ;;  %v10185_v51 = vpop.xlane.xlu1 %10184 }
 0x6a1   : > { %v12584_v63 = vcombine.low %v12560_v22, %v12576_v21  ;;  %v12585_v26 = vcombine.high %v12560_v22, %v12576_v21  ;;  %v12600_v16 = vcombine.low %v12567_v9, %v12583_v35  ;;  %v12601_v20 = vcombine.high %v12567_v9, %v12583_v35 }
 0x6a2   : > { %v13708_v3 = vcombine.low %v12660_v13, %v12667_v36  ;;  %v15954_v48 = vcombine.high %v12660_v13, %v12667_v36  ;;  %v13724_v12 = vcombine.low %v12676_v4, %v12683_v60  ;;  %v15955_v32 = vcombine.high %v12676_v4, %v12683_v60 }
 0x6a3   : > { %v12592_v33 = vrot.slane %v12584_v63, %v24702_v27  ;;  %v12599_v44 = vrot.slane %v12585_v26, %v24702_v27  ;;  %v12608_v45 = vrot.slane %v12600_v16, %v24702_v27  ;;  %v12615_v56 = vrot.slane %v12601_v20, %v24702_v27 }
 0x6a4   : > { %v13715_v5 = vrot.slane %v13708_v3, %v24698_v57  ;;  %v13723_v14 = vrot.slane %v15954_v48, %v24698_v57  ;;  %v13731_v22 = vrot.slane %v13724_v12, %v24698_v57  ;;  %v13739_v9 = vrot.slane %v15955_v32, %v24698_v57 }
 0x6a5   : > { %v13640_v6 = vcombine.low %v12592_v33, %v12599_v44  ;;  %v15952_v10 = vcombine.high %v12592_v33, %v12599_v44  ;;  %v13656_v29 = vcombine.low %v12608_v45, %v12615_v56  ;;  %v15953_v46 = vcombine.high %v12608_v45, %v12615_v56  ;;  %v10173_v25 = vpop.xlane.xlu0 %10172 }
 0x6a6   : > { %17405 = vrcp.f32 %v10185_v51  ;;  %v17106_v21 = vpack.i.bf16 %v13638_v62, %v13570_v41  ;;  %v13552_v35 = vcombine.low %v23073_v1, %v23076_v19  ;;  %v13604_v13 = vcombine.low %v23049_v18, %v23052_v50  ;;  %v10179_v18 = vpop.xlane.xlu1 %10178 }
 0x6a7   : > { %v13647_v36 = vrot.slane %v13640_v6, %v24698_v57  ;;  %v13655_v4 = vrot.slane %v15952_v10, %v24698_v57  ;;  %v13663_v60 = vrot.slane %v13656_v29, %v24698_v57  ;;  %v13671_v63 = vrot.slane %v15953_v46, %v24698_v57 }
 0x6a8   : > { %17107 = vrot.lane.b32.xlu1 %v17106_v21, %s17779_s27  ;;  %v23140_v26 = vrot.slane %v13552_v35, %v24702_v27  ;;  %v23143_v41 = vrot.slane %v13604_v13, %v24702_v27  ;;  %v13620_v1 = vcombine.low %v23055_v40, %v23058_v11  ;;  %17407 = vrcp.f32 %v10173_v25 }
 0x6a9   : > { %v10176_v50 = vpop.xlane.xlu0 %10175  ;;  %v13673_v19 = vcombine.high %v13647_v36, %v13655_v4  ;;  %v13689_v62 = vcombine.high %v13663_v60, %v13671_v63  ;;  %17409 = vrcp.f32 %v10179_v18  ;;  %v13741_v3 = vcombine.high %v13715_v5, %v13723_v14  ;;  %v24823_v18 = vld [vmem:[#allocation18_spill] sm:$0xff] }
 0x6aa   : > { %v13569_v16 = vcombine.high %v23110_v7, %v23140_v26  ;;  %v23150_v20 = vrot.slane %v13620_v1, %v24702_v27  ;;  %17411 = vrcp.f32 %v10176_v50  ;;  %v13757_v11 = vcombine.high %v13731_v22, %v13739_v9 }
 0x6ab   : > { %v13687_v48 = vrot.slane %v13673_v19, %v24702_v27  ;;  %v13703_v40 = vrot.slane %v13689_v62, %v24702_v27  ;;  %v13672_v32 = vcombine.low %v13647_v36, %v13655_v4  ;;  %v13688_v44 = vcombine.low %v13663_v60, %v13671_v63 }
 0x6ac   : > { %v13637_v12 = vcombine.high %v23143_v41, %v23150_v20  ;;  %v13740_v45 = vcombine.low %v13715_v5, %v13723_v14  ;;  %v13756_v56 = vcombine.low %v13731_v22, %v13739_v9  ;;  %v13571_v6 = vcombine.high %v23101_v31, %v23104_v34  ;;  %v23169_v5 = vpop.permute.xlu1 %17042 }
 0x6ad   : > { %v10188_v33 = vpop.xlane.xlu0 %10187  ;;  %v13755_v10 = vrot.slane %v13741_v3, %v24702_v27  ;;  %v13771_v29 = vrot.slane %v13757_v11, %v24702_v27  ;;  %v23161_v46 = vrot.slane %v13672_v32, %v24702_v27  ;;  %v23164_v25 = vrot.slane %v13688_v44, %v24702_v27 }
 0x6ae   : > { %v17101_v51 = vpack.i.bf16 %v13637_v12, %v13569_v16  ;;  %17413 = vrcp.f32 %v10188_v33  ;;  %v23167_v21 = vrot.slane %v13740_v45, %v24702_v27  ;;  %v13639_v31 = vcombine.high %v23092_v38, %v23107_v37 }
 0x6af   : > { %v13706_v34 = vcombine.low %v13687_v48, %v13703_v40  ;;  %v23175_v14 = vrot.slane %v13756_v56, %v24702_v27  ;;  %v13705_v22 = vcombine.high %v23161_v46, %v23164_v25  ;;  %v13568_v35 = vcombine.low %v23110_v7, %v23140_v26  ;;  %v14304_v56 = vld [vmem:[#allocation7 + $0x70] sm:$0xff] }
 0x6b0   : > { %17102 = vrot.lane.b32.xlu0 %v17101_v51, %s17781_s20  ;;  %v17111_v13 = vpack.i.bf16 %v13639_v31, %v13571_v6  ;;  %v13774_v36 = vcombine.low %v13755_v10, %v13771_v29  ;;  %v17044_v38 = vunpack.i.l.bf16 %v23169_v5  ;;  %v13707_v37 = vcombine.high %v13687_v48, %v13703_v40  ;;  %v24824_v48 = vld [vmem:[#allocation66_spill] sm:$0xff]  ;;  %v23199_v44 = vpop.permute.xlu1 %17052 }
 0x6b1   : > { %v10191_v9 = vpop.xlane.xlu0 %10190  ;;  %v13773_v4 = vcombine.high %v23167_v21, %v23175_v14  ;;  %v13636_v63 = vcombine.low %v23143_v41, %v23150_v20  ;;  %v13704_v1 = vcombine.low %v23161_v46, %v23164_v25  ;;  %v13772_v16 = vcombine.low %v23167_v21, %v23175_v14 }
 0x6b2   : > { %17415 = vrcp.f32 %v10191_v9  ;;  %v17121_v19 = vpack.i.bf16 %v13774_v36, %v13706_v34  ;;  %v13775_v11 = vcombine.high %v13755_v10, %v13771_v29  ;;  %v13024_v32 = vcombine.low %v22727_v28, %v22730_v23  ;;  %v14303_v10 = vld [vmem:[#allocation7 + $0x68] sm:$0xff]  ;;  %v14302_v9 = vld [vmem:[#allocation7 + $0x60] sm:$0xff] }
 0x6b3   : > { %v17406_v60 = vpop.eup %17405  ;;  %v17116_v62 = vpack.i.bf16 %v13773_v4, %v13705_v22  ;;  %v17054_v23 = vunpack.i.l.bf16 %v23199_v44 }
 0x6b4   : > { %v10315_v50 = vmul.f32 %v17406_v60, %v24823_v18  ;;  %17112 = vrot.lane.b32.xlu0 %v17111_v13, %s17780_s29  ;;  %v17126_v6 = vpack.i.bf16 %v13775_v11, %v13707_v37  ;;  %v14240_v31 = vsel %vm7871_vm0, %v13024_v32, %v17044_v38  ;;  %v14301_v13 = vld [vmem:[#allocation7 + $0x58] sm:$0xff]  ;;  %v14299_v60 = vld [vmem:[#allocation7 + $0x48] sm:$0xff]  ;;  %v17058_v38 = vpop.permute.xlu1 %17057  ;;  %v24825_v37 = vmov 0.0  }
 0x6b5   : > { %v17408_v3 = vpop.eup %17407  ;;  %v23192_v12 = vpop.permute.xlu0 %17047  ;;  %17117 = vrot.lane.b32.xlu1 %v17116_v62, %s17781_s20  ;;  %v17045_v11 = vunpack.i.h.bf16 %v23169_v5  ;;  %v13160_v5 = vcombine.low %v22788_v17, %v22791_v39 }
 0x6b6   : > { %16879 = vmatmul.mubr.msk.f32.vlgmr.msra.gmra.mxu1 %vm7871_vm0, %v10315_v50  ;;  %v10307_v40 = vmul.f32 %v17408_v3, %v24824_v48  ;;  %v17410_v33 = vpop.eup %17409  ;;  %v17049_v45 = vunpack.i.l.bf16 %v23192_v12  ;;  %v14297_v50 = vld [vmem:[#allocation7 + $0x38] sm:$0xff]  ;;  %v14294_v48 = vld [vmem:[#allocation7 + $0x20] sm:$0xff] }
 0x6b7   : > { %v17412_v51 = vpop.eup %17411  ;;  %v10311_v34 = vmul.f32 %v17410_v33, %v22459_v61  ;;  %v14300_v61 = vld [vmem:[#allocation7 + $0x50] sm:$0xff] }
 0x6b8   : > { %17122 = vrot.lane.b32.xlu0 %v17121_v19, %s17779_s27  ;;  %16865 = vmatmul.mubr.msk.f32.vlgmr.msra.gmra.mxu0 %vm7871_vm0, %v10307_v40  ;;  %v10309_v29 = vmul.f32 %v17412_v51, %v22477_v42  ;;  %v14257_v28 = vsel %vm14256_vm1, %v14240_v31, %v17049_v45  ;;  %v14296_v19 = vld [vmem:[#allocation7 + $0x30] sm:$0xff]  ;;  %v17068_v62 = vpop.permute.xlu1 %17067  ;;  %v14293_v40 = vld [vmem:[#allocation7 + $0x18] sm:$0xff]  ;;  %v17059_v45 = vunpack.i.l.bf16 %v17058_v38 }
 0x6b9   : > { %16885 = vmatpush3.msra.mxu0 %v23068_v24  ;;  %17127 = vrot.lane.b32.xlu1 %v17126_v6, %s17780_s29  ;;  %v14274_v42 = vsel %vm14273_vm2, %v14257_v28, %v17054_v23  ;;  %v17063_v18 = vpop.permute.xlu0 %17062  ;;  %v14292_v33 = vld [vmem:[#allocation7 + $0x10] sm:$0xff]  ;;  %v13092_v6 = vcombine.low %v22747_v8, %v22750_v49  ;;  %v13228_v49 = vcombine.low %v22805_v2, %v22808_v52  ;;  %v17069_v39 = vunpack.i.l.bf16 %v17068_v62 }
 0x6ba   : > { %16886 = vmatprep.subr.mxu0 %v14304_v56  ;;  %16867 = vmatprep.mubr.msk.f32.mxu0 %vm7871_vm0, %v10309_v29  ;;  %v17064_v31 = vunpack.i.l.bf16 %v17063_v18  ;;  %v17060_v29 = vunpack.i.h.bf16 %v17058_v38  ;;  %v17065_v23 = vunpack.i.h.bf16 %v17063_v18  ;;  %v14242_v8 = vsel %vm7871_vm0, %v13160_v5, %v17059_v45 }
 0x6bb   : > { %v17414_v22 = vpop.eup %17413  ;;  %16887 = vmatpush3.msra.mxu0 %v14304_v56  ;;  %v17050_v56 = vunpack.i.h.bf16 %v23192_v12  ;;  %v14241_v28 = vsel %vm7871_vm0, %v13092_v6, %v17045_v11 }
 0x6bc   : > { %16888 = vmatprep.subr.mxu0 %v14303_v10  ;;  %16868 = vmatmul.mubr.msk.f32.gmra.mxu0 %vm7871_vm0, %v10311_v34  ;;  %v10317_v24 = vmul.f32 %v17414_v22, %v22485_v15  ;;  %v14298_v15 = vld [vmem:[#allocation7 + $0x40] sm:$0xff]  ;;  %v23222_v32 = vpop.permute.xlu1 %17077  ;;  %v14259_v17 = vsel %vm14256_vm1, %v14242_v8, %v17064_v31 }
 0x6bd   : > { %16889 = vmatpush3.msra.mxu0 %v14303_v10  ;;  %16916 = vmatprep.mubr.f32.mxu0 %v14274_v42  ;;  %v23219_v3 = vpop.permute.xlu0 %17072  ;;  %v14291_v10 = vld [vmem:[#allocation7 + $0x8] sm:$0xff]  ;;  %v14290_v34 = vld [vmem:[#allocation7] sm:$0xff]  ;;  %v14258_v12 = vsel %vm14256_vm1, %v14241_v28, %v17050_v56  ;;  %v14276_v38 = vsel %vm14273_vm2, %v14259_v17, %v17069_v39  ;;  %v17079_v18 = vunpack.i.l.bf16 %v23222_v32  ;;  %v17080_v11 = vunpack.i.h.bf16 %v23222_v32 }
 0x6be   : > { %16890 = vmatprep.subr.mxu0 %v14302_v9  ;;  %16881 = vmatprep.mubr.msk.f32.mxu1 %vm7871_vm0, %v10317_v24  ;;  %v17074_v22 = vunpack.i.l.bf16 %v23219_v3 }
 0x6bf   : > { %v17416_v36 = vpop.eup %17415  ;;  %16891 = vmatpush3.msra.mxu0 %v14302_v9  ;;  %v17055_v9 = vunpack.i.h.bf16 %v23199_v44 }
 0x6c0   : > { %16892 = vmatprep.subr.mxu0 %v14301_v13  ;;  %v10319_v4 = vmul.f32 %v17416_v36, %v22469_v58  ;;  %v14295_v58 = vld [vmem:[#allocation7 + $0x28] sm:$0xff]  ;;  %v17088_v42 = vpop.permute.xlu1 %17087  ;;  %v13296_v36 = vcombine.low %v22884_v54, %v22887_v55  ;;  %v13364_v54 = vcombine.low %v22900_v47, %v22903_v59 }
 0x6c1   : > { %16893 = vmatpush3.msra.mxu0 %v14301_v13  ;;  %v17083_v51 = vpop.permute.xlu0 %17082  ;;  %v14243_v13 = vsel %vm7871_vm0, %v13228_v49, %v17060_v29  ;;  %v14275_v2 = vsel %vm14273_vm2, %v14258_v12, %v17055_v9  ;;  %v17089_v44 = vunpack.i.l.bf16 %v17088_v42 }
 0x6c2   : > { %16894 = vmatprep.subr.mxu0 %v14300_v61  ;;  %16882 = vmatmul.mubr.msk.f32.gmra.mxu1 %vm7871_vm0, %v10319_v4  ;;  %v17075_v4 = vunpack.i.h.bf16 %v23219_v3  ;;  %v14260_v52 = vsel %vm14256_vm1, %v14243_v13, %v17065_v23  ;;  %v17085_v3 = vunpack.i.h.bf16 %v17083_v51 }
 0x6c3   : > { %16895 = vmatpush3.msra.mxu0 %v14300_v61  ;;  %14805 = vmatprep.mubr.f32.mxu1 %v24825_v37  ;;  %v17070_v61 = vunpack.i.h.bf16 %v17068_v62  ;;  %v17090_v62 = vunpack.i.h.bf16 %v17088_v42 }
 0x6c4   : > { %16896 = vmatprep.subr.mxu0 %v14299_v60 }
 0x6c5   : > { %16897 = vmatpush3.msra.mxu0 %v14299_v60  ;;  %v17093_v24 = vpop.permute.xlu0 %17092  ;;  %v17084_v60 = vunpack.i.l.bf16 %v17083_v51  ;;  %v14277_v55 = vsel %vm14273_vm2, %v14260_v52, %v17070_v61 }
 0x6c6   : > { %16898 = vmatprep.subr.mxu0 %v14298_v15 }
 0x6c7   : > { %16899 = vmatpush3.msra.mxu0 %v14298_v15  ;;  %v14244_v15 = vsel %vm7871_vm0, %v13296_v36, %v17074_v22 }
 0x6c8   : > { %16900 = vmatprep.subr.mxu0 %v14297_v50 }
 0x6c9   : > { %16901 = vmatpush3.msra.mxu0 %v14297_v50  ;;  %v17094_v50 = vunpack.i.l.bf16 %v17093_v24 }
 0x6ca   : > { %16902 = vmatprep.subr.mxu0 %v14296_v19 }
 0x6cb   : > { %16903 = vmatpush3.msra.mxu0 %v14296_v19  ;;  %v13432_v19 = vcombine.low %v22874_v43, %v22881_v0  ;;  %v13500_v43 = vcombine.low %v22890_v30, %v22893_v53 }
 0x6cc   : > { %16904 = vmatprep.subr.mxu0 %v14295_v58 }
 0x6cd   : > { %16905 = vmatpush3.msra.mxu0 %v14295_v58  ;;  %v17098_v58 = vpop.permute.xlu1 %17097  ;;  %v14246_v47 = vsel %vm7871_vm0, %v13432_v19, %v17089_v44  ;;  %v14247_v6 = vsel %vm7871_vm0, %v13500_v43, %v17090_v62 }
 0x6ce   : > { %16906 = vmatprep.subr.mxu0 %v14294_v48  ;;  %v14263_v59 = vsel %vm14256_vm1, %v14246_v47, %v17094_v50  ;;  %v17099_v0 = vunpack.i.l.bf16 %v17098_v58 }
 0x6cf   : > { %16907 = vmatpush3.msra.mxu0 %v14294_v48  ;;  %v14261_v48 = vsel %vm14256_vm1, %v14244_v15, %v17079_v18 }
 0x6d0   : > { %16908 = vmatprep.subr.mxu0 %v14293_v40  ;;  %v14278_v45 = vsel %vm14273_vm2, %v14261_v48, %v17084_v60  ;;  %v14280_v32 = vsel %vm14273_vm2, %v14263_v59, %v17099_v0 }
 0x6d1   : > { %16909 = vmatpush3.msra.mxu0 %v14293_v40  ;;  %v14245_v40 = vsel %vm7871_vm0, %v13364_v54, %v17075_v4 }
 0x6d2   : > { %16910 = vmatprep.subr.mxu0 %v14292_v33  ;;  %v14262_v56 = vsel %vm14256_vm1, %v14245_v40, %v17080_v11 }
 0x6d3   : > { %16911 = vmatpush3.msra.mxu0 %v14292_v33  ;;  %v17095_v33 = vunpack.i.h.bf16 %v17093_v24  ;;  %v14279_v51 = vsel %vm14273_vm2, %v14262_v56, %v17085_v3 }
 0x6d4   : > { %16912 = vmatprep.subr.mxu0 %v14291_v10 }
 0x6d5   : > { %16913 = vmatpush3.msra.mxu0 %v14291_v10  ;;  %v14264_v31 = vsel %vm14256_vm1, %v14247_v6, %v17095_v33  ;;  %v17100_v10 = vunpack.i.h.bf16 %v17098_v58 }
 0x6d6   : > { %16914 = vmatprep.subr.mxu0 %v14290_v34 }
 0x6d7   : > { %16915 = vmatpush3.msra.mxu0 %v14290_v34  ;;  %v14281_v29 = vsel %vm14273_vm2, %v14264_v31, %v17100_v10 }
 0x6d8   : > { %16917 = vmatmul.mubr.f32.vlgmr.msra.gmra.mxu0 %v14275_v2 }
 0x6d9   : > { %16919 = vmatprep.mubr.f32.mxu0 %v14276_v38 }
 0x6dc   : > { %16920 = vmatmul.mubr.f32.gmra.mxu0 %v14277_v55 }
 0x6dd   : > { %16922 = vmatprep.mubr.f32.mxu0 %v14278_v45 }
 0x6e0   : > { %16923 = vmatmul.mubr.f32.gmra.mxu0 %v14279_v51 }
 0x6e1   : > { %16925 = vmatprep.mubr.f32.mxu0 %v14280_v32 }
 0x6e4   : > { %16926 = vmatmul.mubr.f32.gmra.mxu0 %v14281_v29 }
 0x71a   : > { %v17108_v5 = vpop.permute.xlu1 %17107 }
 0x71b   : > { %v17110_v23 = vunpack.i.h.bf16 %v17108_v5  ;;  %v17109_v34 = vunpack.i.l.bf16 %v17108_v5 }
 0x722   : > { %v17103_v28 = vpop.permute.xlu0 %17102 }
 0x723   : > { %v17105_v30 = vunpack.i.h.bf16 %v17103_v28  ;;  %v17104_v53 = vunpack.i.l.bf16 %v17103_v28 }
 0x725   : > { %v14248_v12 = vsel %vm7871_vm0, %v13568_v35, %v17104_v53  ;;  %v14249_v22 = vsel %vm7871_vm0, %v13636_v63, %v17105_v30 }
 0x726   : > { %v17113_v8 = vpop.permute.xlu0 %17112  ;;  %v14265_v42 = vsel %vm14256_vm1, %v14248_v12, %v17109_v34  ;;  %v14266_v17 = vsel %vm14256_vm1, %v14249_v22, %v17110_v23 }
 0x727   : > { %v17115_v49 = vunpack.i.h.bf16 %v17113_v8  ;;  %v17114_v9 = vunpack.i.l.bf16 %v17113_v8  ;;  %v17118_v39 = vpop.permute.xlu1 %17117 }
 0x728   : > { %v17120_v7 = vunpack.i.h.bf16 %v17118_v39  ;;  %v17119_v26 = vunpack.i.l.bf16 %v17118_v39 }
 0x729   : > { %v14282_v24 = vsel %vm14273_vm2, %v14265_v42, %v17114_v9  ;;  %v14283_v13 = vsel %vm14273_vm2, %v14266_v17, %v17115_v49 }
 0x72a   : > { %16928 = vmatprep.mubr.f32.mxu0 %v14282_v24  ;;  %v17123_v35 = vpop.permute.xlu0 %17122  ;;  %v14250_v63 = vsel %vm7871_vm0, %v13704_v1, %v17119_v26  ;;  %v14251_v36 = vsel %vm7871_vm0, %v13772_v16, %v17120_v7 }
 0x72b   : > { %16929 = vmatmul.mubr.f32.gmra.mxu0 %v14283_v13  ;;  %v17125_v41 = vunpack.i.h.bf16 %v17123_v35  ;;  %v17124_v20 = vunpack.i.l.bf16 %v17123_v35  ;;  %v17128_v61 = vpop.permute.xlu1 %17127 }
 0x72c   : > { %v17130_v4 = vunpack.i.h.bf16 %v17128_v61  ;;  %v17129_v2 = vunpack.i.l.bf16 %v17128_v61 }
 0x72d   : > { %v14267_v52 = vsel %vm14256_vm1, %v14250_v63, %v17124_v20  ;;  %v14268_v44 = vsel %vm14256_vm1, %v14251_v36, %v17125_v41 }
 0x72e   : > { %v14284_v60 = vsel %vm14273_vm2, %v14267_v52, %v17129_v2  ;;  %v14285_v38 = vsel %vm14273_vm2, %v14268_v44, %v17130_v4 }
 0x72f   : > { %16931 = vmatprep.mubr.f32.mxu0 %v14284_v60 }
 0x730   : > { %16932 = vmatmul.mubr.f32.gmra.mxu0 %v14285_v38 }
 0x749   : > { %v16852_v46 = vpop.f32.mrf.mxu1  ;;  %v16838_v25 = vpop.f32.mrf.mxu0 }
 0x74b   : > { %v11659_v1 = vpop.f32.mrf.mxu1  ;;  %v11562_v15 = vpop.f32.mrf.mxu0 }
 0x74f   : > { %v23291_v14 = vpop.f32.mrf.mxu0 }
 0x750   : > { %v23289_v21 = vpop.f32.mrf.mxu1 }
 0x751   : > { %v23295_v18 = vpop.f32.mrf.mxu0 }
 0x752   : > { %v23293_v16 = vpop.f32.mrf.mxu1 }
 0x776   : > { %v16880_v50 = vpop.f32.mrf.mxu1 }
 0x777   : > { %v12772_v54 = vcombine.low %v16852_v46, %v16880_v50  ;;  %v12773_v55 = vcombine.high %v16852_v46, %v16880_v50 }
 0x778   : > { %v11853_v19 = vpop.f32.mrf.mxu1  ;;  %v16866_v62 = vpop.f32.mrf.mxu0 }
 0x779   : > { %v12704_v58 = vcombine.low %v11659_v1, %v11853_v19  ;;  %v12705_v3 = vcombine.high %v11659_v1, %v11853_v19  ;;  %v12756_v48 = vcombine.low %v16838_v25, %v16866_v62  ;;  %v12757_v40 = vcombine.high %v16838_v25, %v16866_v62 }
 0x77a   : > { %v11756_v11 = vpop.f32.mrf.mxu0  ;;  %v12780_v33 = vrot.slane %v12772_v54, %v24698_v57  ;;  %v12787_v45 = vrot.slane %v12773_v55, %v24698_v57 }
 0x77b   : > { %v12688_v47 = vcombine.low %v11562_v15, %v11756_v11  ;;  %v12689_v59 = vcombine.high %v11562_v15, %v11756_v11  ;;  %v12712_v43 = vrot.slane %v12704_v58, %v24698_v57  ;;  %v12719_v0 = vrot.slane %v12705_v3, %v24698_v57 }
 0x77c   : > { %v12764_v56 = vrot.slane %v12756_v48, %v24698_v57  ;;  %v12771_v51 = vrot.slane %v12757_v40, %v24698_v57  ;;  %v16869_v6 = vpop.f32.mrf.mxu0 }
 0x77d   : > { %v12696_v32 = vrot.slane %v12688_v47, %v24698_v57  ;;  %v12703_v31 = vrot.slane %v12689_v59, %v24698_v57  ;;  %v12892_v10 = vcombine.low %v23291_v14, %v16869_v6  ;;  %v12893_v29 = vcombine.high %v23291_v14, %v16869_v6 }
 0x77e   : > { %v12788_v5 = vcombine.low %v12764_v56, %v12780_v33  ;;  %v12789_v28 = vcombine.high %v12764_v56, %v12780_v33  ;;  %v12804_v30 = vcombine.low %v12771_v51, %v12787_v45  ;;  %v12805_v53 = vcombine.high %v12771_v51, %v12787_v45  ;;  %v11766_v2 = vpop.f32.mrf.mxu0 }
 0x77f   : > { %v12720_v23 = vcombine.low %v12696_v32, %v12712_v43  ;;  %v12721_v34 = vcombine.high %v12696_v32, %v12712_v43  ;;  %v12736_v12 = vcombine.low %v12703_v31, %v12719_v0  ;;  %v12737_v22 = vcombine.high %v12703_v31, %v12719_v0 }
 0x780   : > { %v12796_v8 = vrot.slane %v12788_v5, %v24702_v27  ;;  %v12803_v49 = vrot.slane %v12789_v28, %v24702_v27  ;;  %v12812_v9 = vrot.slane %v12804_v30, %v24702_v27  ;;  %v12819_v42 = vrot.slane %v12805_v53, %v24702_v27 }
 0x781   : > { %v12728_v17 = vrot.slane %v12720_v23, %v24702_v27  ;;  %v12735_v39 = vrot.slane %v12721_v34, %v24702_v27  ;;  %v12744_v24 = vrot.slane %v12736_v12, %v24702_v27  ;;  %v12751_v13 = vrot.slane %v12737_v22, %v24702_v27 }
 0x782   : > { %v13844_v7 = vcombine.low %v12796_v8, %v12803_v49  ;;  %v15958_v26 = vcombine.high %v12796_v8, %v12803_v49  ;;  %v13860_v35 = vcombine.low %v12812_v9, %v12819_v42  ;;  %v15959_v41 = vcombine.high %v12812_v9, %v12819_v42  ;;  %v16883_v20 = vpop.f32.mrf.mxu1 }
 0x783   : > { %v13776_v63 = vcombine.low %v12728_v17, %v12735_v39  ;;  %v15956_v36 = vcombine.high %v12728_v17, %v12735_v39  ;;  %v13792_v61 = vcombine.low %v12744_v24, %v12751_v13  ;;  %v15957_v4 = vcombine.high %v12744_v24, %v12751_v13 }
 0x784   : > { %v23316_v52 = vrot.slane %v13844_v7, %v24698_v57  ;;  %v23319_v44 = vrot.slane %v15958_v26, %v24698_v57  ;;  %v23322_v60 = vrot.slane %v13860_v35, %v24698_v57  ;;  %v23325_v38 = vrot.slane %v15959_v41, %v24698_v57  ;;  %v11863_v46 = vpop.f32.mrf.mxu1 }
 0x785   : > { %v23328_v25 = vrot.slane %v13776_v63, %v24698_v57  ;;  %v23331_v1 = vrot.slane %v15956_v36, %v24698_v57  ;;  %v23334_v15 = vrot.slane %v13792_v61, %v24698_v57  ;;  %v23337_v14 = vrot.slane %v15957_v4, %v24698_v57 }
 0x786   : > { %v12900_v50 = vrot.slane %v12892_v10, %v24698_v57  ;;  %v12907_v54 = vrot.slane %v12893_v29, %v24698_v57  ;;  %v12824_v55 = vcombine.low %v23295_v18, %v11766_v2  ;;  %v12825_v19 = vcombine.high %v23295_v18, %v11766_v2 }
 0x787   : > { %v12908_v62 = vcombine.low %v23289_v21, %v16883_v20  ;;  %v12909_v58 = vcombine.high %v23289_v21, %v16883_v20  ;;  %v12840_v3 = vcombine.low %v23293_v16, %v11863_v46  ;;  %v12841_v48 = vcombine.high %v23293_v16, %v11863_v46 }
 0x788   : > { %v12832_v40 = vrot.slane %v12824_v55, %v24698_v57  ;;  %v12839_v11 = vrot.slane %v12825_v19, %v24698_v57  ;;  %v13809_v33 = vcombine.high %v23328_v25, %v23331_v1  ;;  %v13825_v45 = vcombine.high %v23334_v15, %v23337_v14 }
 0x789   : > { %v12916_v18 = vrot.slane %v12908_v62, %v24698_v57  ;;  %v12923_v47 = vrot.slane %v12909_v58, %v24698_v57  ;;  %v12848_v21 = vrot.slane %v12840_v3, %v24698_v57  ;;  %v12855_v59 = vrot.slane %v12841_v48, %v24698_v57 }
 0x78a   : > { %v23358_v16 = vrot.slane %v13809_v33, %v24702_v27  ;;  %v23361_v43 = vrot.slane %v13825_v45, %v24702_v27  ;;  %v13877_v0 = vcombine.high %v23316_v52, %v23319_v44  ;;  %v13893_v56 = vcombine.high %v23322_v60, %v23325_v38 }
 0x78b   : > { %v12924_v51 = vcombine.low %v12900_v50, %v12916_v18  ;;  %v12925_v6 = vcombine.high %v12900_v50, %v12916_v18  ;;  %v12940_v32 = vcombine.low %v12907_v54, %v12923_v47  ;;  %v12941_v31 = vcombine.high %v12907_v54, %v12923_v47 }
 0x78c   : > { %v12856_v10 = vcombine.low %v12832_v40, %v12848_v21  ;;  %v12857_v29 = vcombine.high %v12832_v40, %v12848_v21  ;;  %v12872_v5 = vcombine.low %v12839_v11, %v12855_v59  ;;  %v12873_v28 = vcombine.high %v12839_v11, %v12855_v59 }
 0x78d   : > { %v12932_v30 = vrot.slane %v12924_v51, %v24702_v27  ;;  %v12939_v53 = vrot.slane %v12925_v6, %v24702_v27  ;;  %v12948_v23 = vrot.slane %v12940_v32, %v24702_v27  ;;  %v12955_v34 = vrot.slane %v12941_v31, %v24702_v27 }
 0x78e   : > { %v12864_v12 = vrot.slane %v12856_v10, %v24702_v27  ;;  %v12871_v22 = vrot.slane %v12857_v29, %v24702_v27  ;;  %v12880_v8 = vrot.slane %v12872_v5, %v24702_v27  ;;  %v12887_v49 = vrot.slane %v12873_v28, %v24702_v27 }
 0x78f   : > { %v13980_v9 = vcombine.low %v12932_v30, %v12939_v53  ;;  %v15962_v42 = vcombine.high %v12932_v30, %v12939_v53  ;;  %v13996_v17 = vcombine.low %v12948_v23, %v12955_v34  ;;  %v15963_v39 = vcombine.high %v12948_v23, %v12955_v34 }
 0x790   : > { %v13912_v24 = vcombine.low %v12864_v12, %v12871_v22  ;;  %v15960_v13 = vcombine.high %v12864_v12, %v12871_v22  ;;  %v13928_v7 = vcombine.low %v12880_v8, %v12887_v49  ;;  %v15961_v26 = vcombine.high %v12880_v8, %v12887_v49 }
 0x791   : > { %v13987_v35 = vrot.slane %v13980_v9, %v24698_v57  ;;  %v13995_v41 = vrot.slane %v15962_v42, %v24698_v57  ;;  %v14003_v20 = vrot.slane %v13996_v17, %v24698_v57  ;;  %v13842_v2 = vcombine.low %v23358_v16, %v23361_v43 }
 0x792   : > { %v13919_v63 = vrot.slane %v13912_v24, %v24698_v57  ;;  %v13927_v36 = vrot.slane %v15960_v13, %v24698_v57  ;;  %v13935_v61 = vrot.slane %v13928_v7, %v24698_v57  ;;  %v13943_v4 = vrot.slane %v15961_v26, %v24698_v57  ;;  %v23450_v13 = vld [vmem:[%s24154_s3] ss:$0 sm:$0xff] }
 0x793   : > { %v13891_v46 = vrot.slane %v13877_v0, %v24702_v27  ;;  %v13907_v50 = vrot.slane %v13893_v56, %v24702_v27  ;;  %v13808_v54 = vcombine.low %v23328_v25, %v23331_v1  ;;  %v14011_v55 = vrot.slane %v15963_v39, %v24698_v57 }
 0x794   : > { %v13824_v19 = vcombine.low %v23334_v15, %v23337_v14  ;;  %v13876_v62 = vcombine.low %v23316_v52, %v23319_v44  ;;  %v13892_v58 = vcombine.low %v23322_v60, %v23325_v38  ;;  %v13945_v40 = vcombine.high %v13919_v63, %v13927_v36 }
 0x795   : > { %v13910_v3 = vcombine.low %v13891_v46, %v13907_v50  ;;  %v23396_v48 = vrot.slane %v13808_v54, %v24702_v27  ;;  %v13961_v1 = vcombine.high %v13935_v61, %v13943_v4  ;;  %v14013_v44 = vcombine.high %v13987_v35, %v13995_v41 }
 0x796   : > { %v23399_v11 = vrot.slane %v13824_v19, %v24702_v27  ;;  %v23402_v25 = vrot.slane %v13876_v62, %v24702_v27  ;;  %v23405_v57 = vrot.slane %v13892_v58, %v24702_v27  ;;  %v13959_v52 = vrot.slane %v13945_v40, %v24702_v27  ;;  %v17548_v19 = vld [vmem:[%s18010_s1 + $0x8] sm:$0xff] }
 0x797   : > { %v17136_v15 = vpack.i.bf16 %v13910_v3, %v13842_v2  ;;  %v13975_v14 = vrot.slane %v13961_v1, %v24702_v27  ;;  %v14029_v33 = vcombine.high %v14003_v20, %v14011_v55  ;;  %v13843_v45 = vcombine.high %v23358_v16, %v23361_v43  ;;  %v17549_v40 = vld [vmem:[%s18010_s1 + $0x28] sm:$0xff] }
 0x798   : > { %v13841_v60 = vcombine.high %v23396_v48, %v23399_v11  ;;  %v13909_v38 = vcombine.high %v23402_v25, %v23405_v57  ;;  %v14027_v18 = vrot.slane %v14013_v44, %v24702_v27  ;;  %v13944_v47 = vcombine.low %v13919_v63, %v13927_v36  ;;  %v16918_v42 = vpop.f32.mrf.mxu0 }
 0x799   : > { %17137 = vrot.lane.b32.xlu1 %v17136_v15, %s17779_s27  ;;  %v13960_v21 = vcombine.low %v13935_v61, %v13943_v4  ;;  %v14043_v0 = vrot.slane %v14029_v33, %v24702_v27  ;;  %v14012_v56 = vcombine.low %v13987_v35, %v13995_v41  ;;  %v13911_v51 = vcombine.high %v13891_v46, %v13907_v50  ;;  %v17545_v35 = vld [vmem:[%s18010_s1] sm:$0xff]  ;;  %v17546_v61 = vld [vmem:[%s18010_s1 + $0x10] sm:$0xff]  ;;  %v17547_v50 = vld [vmem:[%s18010_s1 + $0x18] sm:$0xff] }
 0x79a   : > { %v17131_v59 = vpack.i.bf16 %v13909_v38, %v13841_v60  ;;  %v23419_v6 = vrot.slane %v13944_v47, %v24702_v27  ;;  %v13978_v31 = vcombine.low %v13959_v52, %v13975_v14  ;;  %v14028_v43 = vcombine.low %v14003_v20, %v14011_v55  ;;  %v14379_v17 = vpop.f32.mrf.mxu0  ;;  %v17551_v38 = vld [vmem:[%s18010_s1 + $0x38] sm:$0xff]  ;;  %v17552_v33 = vld [vmem:[%s18010_s1 + $0x30] sm:$0xff] }
 0x79b   : > { %v23422_v32 = vrot.slane %v13960_v21, %v24702_v27  ;;  %v23426_v16 = vrot.slane %v14012_v56, %v24702_v27  ;;  %v17141_v10 = vpack.i.bf16 %v13911_v51, %v13843_v45  ;;  %v14046_v29 = vcombine.low %v14027_v18, %v14043_v0  ;;  %v17554_v51 = vld [vmem:[%s18010_s1 + $0x40] sm:$0xff] }
 0x79c   : > { %17132 = vrot.lane.b32.xlu0 %v17131_v59, %s17781_s20  ;;  %v23431_v28 = vrot.slane %v14028_v43, %v24702_v27  ;;  %v13840_v30 = vcombine.low %v23396_v48, %v23399_v11  ;;  %v13908_v53 = vcombine.low %v23402_v25, %v23405_v57  ;;  %v13979_v8 = vcombine.high %v13959_v52, %v13975_v14  ;;  %v16921_v39 = vpop.f32.mrf.mxu0  ;;  %v17550_v52 = vld [vmem:[%s18010_s1 + $0x20] sm:$0xff]  ;;  %v17553_v59 = vld [vmem:[%s18010_s1 + $0x48] sm:$0xff] }
 0x79d   : > { %v13977_v5 = vcombine.high %v23419_v6, %v23422_v32  ;;  %v13976_v23 = vcombine.low %v23419_v6, %v23422_v32  ;;  %v17151_v34 = vpack.i.bf16 %v14046_v29, %v13978_v31  ;;  %v14047_v49 = vcombine.high %v14027_v18, %v14043_v0 }
 0x79e   : > { %v14045_v12 = vcombine.high %v23426_v16, %v23431_v28  ;;  %v14044_v27 = vcombine.low %v23426_v16, %v23431_v28  ;;  %v14389_v24 = vpop.f32.mrf.mxu0  ;;  %v14380_v7 = vadd.f32 %v23450_v13, %v14379_v17  ;;  %v14395_v36 = vadd.f32 %v16921_v39, %v23450_v13 }
 0x79f   : > { %v17156_v9 = vpack.i.bf16 %v14047_v49, %v13979_v8  ;;  %v14390_v20 = vadd.f32 %v23450_v13, %v14389_v24  ;;  %v14385_v2 = vadd.f32 %v16918_v42, %v23450_v13 }
 0x7a0   : > { %17142 = vrot.lane.b32.xlu0 %v17141_v10, %s17780_s29  ;;  %v17146_v22 = vpack.i.bf16 %v14045_v12, %v13977_v5  ;;  %v16924_v26 = vpop.f32.mrf.mxu0  ;;  %v23454_v41 = vadd.f32 %v17545_v35, %v14380_v7  ;;  %v23465_v54 = vadd.f32 %v17547_v50, %v14395_v36  ;;  %v17555_v5 = vld [vmem:[%s18010_s1 + $0x58] sm:$0xff] }
 0x7a1   : > { %v23460_v4 = vadd.f32 %v17546_v61, %v14390_v20  ;;  %v14405_v55 = vadd.f32 %v16924_v26, %v23450_v13  ;;  %v23469_v62 = vadd.f32 %v17548_v19, %v14385_v2 }
 0x7a2   : > { %17147 = vrot.lane.b32.xlu1 %v17146_v22, %s17781_s20  ;;  %v14399_v63 = vpop.f32.mrf.mxu0  ;;  %v17556_v22 = vld [vmem:[%s18010_s1 + $0x50] sm:$0xff] }
 0x7a3   : > { %v14400_v58 = vadd.f32 %v23450_v13, %v14399_v63  ;;  %v23475_v1 = vadd.f32 %v17549_v40, %v14405_v55 }
 0x7a4   : > { %17152 = vrot.lane.b32.xlu0 %v17151_v34, %s17779_s27  ;;  %v16927_v46 = vpop.f32.mrf.mxu0 }
 0x7a5   : > { %v14415_v15 = vadd.f32 %v16927_v46, %v23450_v13  ;;  %v23479_v44 = vadd.f32 %v17550_v52, %v14400_v58 }
 0x7a6   : > { %17157 = vrot.lane.b32.xlu1 %v17156_v9, %s17780_s29  ;;  %v14409_v3 = vpop.f32.mrf.mxu0 }
 0x7a7   : > { %v14410_v60 = vadd.f32 %v23450_v13, %v14409_v3  ;;  %v23485_v14 = vadd.f32 %v17551_v38, %v14415_v15 }
 0x7a9   : > { %v23488_v45 = vadd.f32 %v17552_v33, %v14410_v60  ;;  %v17557_v60 = vld [vmem:[%s18010_s1 + $0x68] sm:$0xff] }
 0x7c3   : > { %14474 = vadd.xlane.f32.xlu0 %v23454_v41 }
 0x7c7   : > { %14478 = vadd.xlane.f32.xlu0 %v23460_v4 }
 0x7ca   : > { %14476 = vadd.xlane.f32.xlu1 %v23469_v62 }
 0x7cb   : > { %14480 = vadd.xlane.f32.xlu0 %v23465_v54 }
 0x7ce   : > { %14482 = vadd.xlane.f32.xlu1 %v23479_v44 }
 0x7cf   : > { %14484 = vadd.xlane.f32.xlu0 %v23475_v1 }
 0x7d2   : > { %14486 = vadd.xlane.f32.xlu1 %v23488_v45 }
 0x7d3   : > { %14488 = vadd.xlane.f32.xlu0 %v23485_v14 }
 0x7eb   : > { %v16930_v18 = vpop.f32.mrf.mxu0 }
 0x7ec   : > { %v14425_v47 = vadd.f32 %v16930_v18, %v23450_v13 }
 0x7ed   : > { %v14419_v21 = vpop.f32.mrf.mxu0 }
 0x7ee   : > { %v23494_v0 = vadd.f32 %v17553_v59, %v14425_v47  ;;  %v14420_v56 = vadd.f32 %v23450_v13, %v14419_v21  ;;  %v17558_v21 = vld [vmem:[%s18010_s1 + $0x60] sm:$0xff] }
 0x7f0   : > { %v23498_v31 = vadd.f32 %v17554_v51, %v14420_v56  ;;  %14492 = vadd.xlane.f32.xlu0 %v23494_v0  ;;  %v16933_v43 = vpop.f32.mrf.mxu0 }
 0x7f1   : > { %v14435_v10 = vadd.f32 %v16933_v43, %v23450_v13 }
 0x7f2   : > { %14490 = vadd.xlane.f32.xlu1 %v23498_v31  ;;  %v14429_v29 = vpop.f32.mrf.mxu0 }
 0x7f3   : > { %v23504_v34 = vadd.f32 %v17555_v5, %v14435_v10  ;;  %v14430_v12 = vadd.f32 %v23450_v13, %v14429_v29 }
 0x7f5   : > { %v23508_v8 = vadd.f32 %v17556_v22, %v14430_v12  ;;  %14496 = vadd.xlane.f32.xlu0 %v23504_v34 }
 0x7f7   : > { %14494 = vadd.xlane.f32.xlu1 %v23508_v8 }
 0x80b   : > { %v17138_v49 = vpop.permute.xlu1 %17137 }
 0x80c   : > { %v17140_v39 = vunpack.i.h.bf16 %v17138_v49  ;;  %v17139_v24 = vunpack.i.l.bf16 %v17138_v49  ;;  %v17559_v49 = vld [vmem:[%s18010_s1 + $0x78] sm:$0xff] }
 0x80e   : > { %v17133_v9 = vpop.permute.xlu0 %17132 }
 0x80f   : > { %v17135_v42 = vunpack.i.h.bf16 %v17133_v9  ;;  %v17134_v17 = vunpack.i.l.bf16 %v17133_v9 }
 0x811   : > { %v14252_v7 = vsel %vm7871_vm0, %v13840_v30, %v17134_v17  ;;  %v14253_v26 = vsel %vm7871_vm0, %v13908_v53, %v17135_v42 }
 0x812   : > { %v17143_v35 = vpop.permute.xlu0 %17142  ;;  %v14269_v36 = vsel %vm14256_vm1, %v14252_v7, %v17139_v24  ;;  %v14270_v61 = vsel %vm14256_vm1, %v14253_v26, %v17140_v39  ;;  %v17560_v7 = vld [vmem:[%s18010_s1 + $0x70] sm:$0xff]  ;;  %s17699_s1 = scalar_lea.vmem %s17698_s15, 4096 }
 0x813   : > { %v17145_v20 = vunpack.i.h.bf16 %v17143_v35  ;;  %v17144_v63 = vunpack.i.l.bf16 %v17143_v35  ;;  %p17701_p10 = scmp.lt.s32.totalorder %s17699_s1, %s17693_s17 }
 0x814   : > { %v17148_v11 = vpop.permute.xlu1 %17147 }
 0x815   : > { %v14286_v2 = vsel %vm14273_vm2, %v14269_v36, %v17144_v63  ;;  %v14287_v46 = vsel %vm14273_vm2, %v14270_v61, %v17145_v20  ;;  %v17150_v30 = vunpack.i.h.bf16 %v17148_v11  ;;  %v17149_v50 = vunpack.i.l.bf16 %v17148_v11  ;;  %p17702_p1 = por %p17701_p10, %p17700_p5 }
 0x816   : > { %16934 = vmatprep.mubr.f32.mxu0 %v14286_v2  ;;  %v17153_v48 = vpop.permute.xlu0 %17152 }
 0x817   : > { %16935 = vmatmul.mubr.f32.gmra.mxu0 %v14287_v46  ;;  %v17155_v25 = vunpack.i.h.bf16 %v17153_v48  ;;  %v17154_v57 = vunpack.i.l.bf16 %v17153_v48  ;;  %v14254_v53 = vsel %vm7871_vm0, %v13976_v23, %v17149_v50  ;;  %v14255_v55 = vsel %vm7871_vm0, %v14044_v27, %v17150_v30  ;;  %p17703_p2 = pnand %p17702_p1, %p17696_p13 }
 0x818   : > { %v17158_v19 = vpop.permute.xlu1 %17157 }
 0x819   : > { %v17160_v58 = vunpack.i.h.bf16 %v17158_v19  ;;  %v17159_v3 = vunpack.i.l.bf16 %v17158_v19  ;;  %v14271_v40 = vsel %vm14256_vm1, %v14254_v53, %v17154_v57  ;;  %v14272_v15 = vsel %vm14256_vm1, %v14255_v55, %v17155_v25  ;;  %v14728_v53 = vld [vmem:[#allocation8 + $0xf8] sm:$0xff]  ;;  %v14727_v55 = vld [vmem:[#allocation8 + $0xf0] sm:$0xff] }
 0x81a   : > { %14741 = vmatprep.subr.mxu1 %v14728_v53 }
 0x81b   : > { %v14288_v52 = vsel %vm14273_vm2, %v14271_v40, %v17159_v3  ;;  %v14289_v6 = vsel %vm14273_vm2, %v14272_v15, %v17160_v58  ;;  %14742 = vmatpush1.msra.mxu1 %v14727_v55  ;;  %v14725_v40 = vld [vmem:[#allocation8 + $0xe0] sm:$0xff] }
 0x81c   : > { %16937 = vmatprep.mubr.f32.mxu0 %v14288_v52 }
 0x81d   : > { %16938 = vmatmul.mubr.f32.gmra.mxu0 %v14289_v6 }
 0x84c   : > { %v14475_v32 = vpop.xlane.xlu0 %14474 }
 0x84d   : > { %v14507_v43 = vmul.f32 0.0078125, %v14475_v32 }
 0x84f   : > { %v23555_v39 = vsub.f32 %v23454_v41, %v14507_v43  ;;  %v14718_v43 = vld [vmem:[#allocation8 + $0xa8] sm:$0xff] }
 0x850   : > { %v14479_v23 = vpop.xlane.xlu0 %14478 }
 0x851   : > { %v14509_v24 = vmul.f32 0.0078125, %v14479_v23  ;;  %v14539_v36 = vmul.f32 %v23555_v39, %v23555_v39  ;;  %v14723_v23 = vld [vmem:[#allocation8 + $0xd0] sm:$0xff] }
 0x853   : > { %v14477_v47 = vpop.xlane.xlu1 %14476  ;;  %v23568_v63 = vsub.f32 %v23460_v4, %v14509_v24  ;;  %v14709_v24 = vld [vmem:[#allocation8 + $0x60] sm:$0xff] }
 0x854   : > { %v14481_v18 = vpop.xlane.xlu0 %14480  ;;  %v14508_v56 = vmul.f32 0.0078125, %v14477_v47 }
 0x855   : > { %v14510_v12 = vmul.f32 0.0078125, %v14481_v18  ;;  %v14541_v30 = vmul.f32 %v23568_v63, %v23568_v63  ;;  %v14721_v18 = vld [vmem:[#allocation8 + $0xc0] sm:$0xff] }
 0x856   : > { %v23548_v22 = vsub.f32 %v23469_v62, %v14508_v56  ;;  %v14720_v56 = vld [vmem:[#allocation8 + $0xb8] sm:$0xff] }
 0x857   : > { %v14483_v17 = vpop.xlane.xlu1 %14482  ;;  %v23562_v35 = vsub.f32 %v23465_v54, %v14510_v12  ;;  %v14713_v12 = vld [vmem:[#allocation8 + $0x80] sm:$0xff] }
 0x858   : > { %v14485_v29 = vpop.xlane.xlu0 %14484  ;;  %v14540_v20 = vmul.f32 %v23548_v22, %v23548_v22  ;;  %v14511_v41 = vmul.f32 0.0078125, %v14483_v17  ;;  %v14710_v17 = vld [vmem:[#allocation8 + $0x68] sm:$0xff] }
 0x859   : > { %v14512_v62 = vmul.f32 0.0078125, %v14485_v29  ;;  %v14542_v46 = vmul.f32 %v23562_v35, %v23562_v35  ;;  %v14715_v29 = vld [vmem:[#allocation8 + $0x90] sm:$0xff] }
 0x85a   : > { %v23578_v11 = vsub.f32 %v23479_v44, %v14511_v41  ;;  %v14704_v41 = vld [vmem:[#allocation8 + $0x38] sm:$0xff] }
 0x85b   : > { %v14487_v61 = vpop.xlane.xlu1 %14486  ;;  %v23573_v2 = vsub.f32 %v23475_v1, %v14512_v62  ;;  %v14707_v62 = vld [vmem:[#allocation8 + $0x50] sm:$0xff] }
 0x85c   : > { %v14513_v4 = vmul.f32 0.0078125, %v14487_v61  ;;  %v14543_v3 = vmul.f32 %v23578_v11, %v23578_v11  ;;  %v14702_v61 = vld [vmem:[#allocation8 + $0x28] sm:$0xff] }
 0x85d   : > { %v14544_v57 = vmul.f32 %v23573_v2, %v23573_v2 }
 0x85e   : > { %v23588_v44 = vsub.f32 %v23488_v45, %v14513_v4  ;;  %v14724_v45 = vld [vmem:[#allocation8 + $0xd8] sm:$0xff]  ;;  %v14698_v4 = vld [vmem:[#allocation8 + $0x8] sm:$0xff] }
 0x87b   : > { %v14491_v50 = vpop.xlane.xlu1 %14490 }
 0x87c   : > { %v14515_v58 = vmul.f32 0.0078125, %v14491_v50 }
 0x880   : > { %v14495_v15 = vpop.xlane.xlu1 %14494 }
 0x8d7   : > { %v16936_v16 = vpop.f32.mrf.mxu0 }
 0x8d8   : > { %v14445_v28 = vadd.f32 %v16936_v16, %v23450_v13  ;;  %v23598_v16 = vsub.f32 %v23498_v31, %v14515_v58 }
 0x8d9   : > { %v14439_v27 = vpop.f32.mrf.mxu0 }
 0x8da   : > { %v23538_v38 = vadd.f32 %v17557_v60, %v14445_v28  ;;  %v14440_v33 = vadd.f32 %v23450_v13, %v14439_v27  ;;  %v14517_v28 = vmul.f32 0.0078125, %v14495_v15  ;;  %v14545_v27 = vmul.f32 %v23588_v44, %v23588_v44 }
 0x8db   : > { %v14547_v31 = vmul.f32 %v23598_v16, %v23598_v16 }
 0x8dc   : > { %v23542_v59 = vadd.f32 %v17558_v21, %v14440_v33  ;;  %14500 = vadd.xlane.f32.xlu0 %v23538_v38  ;;  %v14722_v33 = vld [vmem:[#allocation8 + $0xc8] sm:$0xff]  ;;  %v23608_v47 = vsub.f32 %v23508_v8, %v14517_v28  ;;  %v14717_v8 = vld [vmem:[#allocation8 + $0xa0] sm:$0xff] }
 0x8dd   : > { %v16939_v51 = vpop.f32.mrf.mxu0 }
 0x8de   : > { %14498 = vadd.xlane.f32.xlu1 %v23542_v59  ;;  %v14455_v10 = vadd.f32 %v16939_v51, %v23450_v13  ;;  %v14549_v21 = vmul.f32 %v23608_v47, %v23608_v47  ;;  %v14719_v51 = vld [vmem:[#allocation8 + $0xb0] sm:$0xff] }
 0x8df   : > { %v14449_v5 = vpop.f32.mrf.mxu0 }
 0x8e0   : > { %v23551_v9 = vadd.f32 %v17559_v49, %v14455_v10  ;;  %v14450_v42 = vadd.f32 %v23450_v13, %v14449_v5  ;;  %v14489_v13 = vpop.xlane.xlu0 %14488  ;;  %v14716_v10 = vld [vmem:[#allocation8 + $0x98] sm:$0xff]  ;;  %v14714_v5 = vld [vmem:[#allocation8 + $0x88] sm:$0xff] }
 0x8e1   : > { %v14514_v54 = vmul.f32 0.0078125, %v14489_v13  ;;  %v14712_v49 = vld [vmem:[#allocation8 + $0x78] sm:$0xff]  ;;  %v14705_v13 = vld [vmem:[#allocation8 + $0x40] sm:$0xff] }
 0x8e2   : > { %v23558_v26 = vadd.f32 %v17560_v7, %v14450_v42  ;;  %14504 = vadd.xlane.f32.xlu0 %v23551_v9  ;;  %v14711_v42 = vld [vmem:[#allocation8 + $0x70] sm:$0xff]  ;;  %v14708_v7 = vld [vmem:[#allocation8 + $0x58] sm:$0xff] }
 0x8e3   : > { %v23583_v25 = vsub.f32 %v23485_v14, %v14514_v54  ;;  %v14726_v14 = vld [vmem:[#allocation8 + $0xe8] sm:$0xff]  ;;  %v14701_v54 = vld [vmem:[#allocation8 + $0x20] sm:$0xff] }
 0x8e4   : > { %14502 = vadd.xlane.f32.xlu1 %v23558_v26  ;;  %v14493_v48 = vpop.xlane.xlu0 %14492  ;;  %14743 = vmatprep.subr.mxu1 %v14726_v14 }
 0x8e5   : > { %v14516_v1 = vmul.f32 0.0078125, %v14493_v48  ;;  %v14546_v32 = vmul.f32 %v23583_v25, %v23583_v25  ;;  %14744 = vmatpush1.msra.mxu1 %v14725_v40  ;;  %v14699_v48 = vld [vmem:[#allocation8 + $0x10] sm:$0xff] }
 0x8e6   : > { %14557 = vadd.xlane.f32.xlu0 %v14540_v20  ;;  %14745 = vmatprep.subr.mxu1 %v14724_v45  ;;  %v14706_v20 = vld [vmem:[#allocation8 + $0x48] sm:$0xff] }
 0x8e7   : > { %v23593_v52 = vsub.f32 %v23494_v0, %v14516_v1  ;;  %14746 = vmatpush1.msra.mxu1 %v14723_v23 }
 0x8e8   : > { %14555 = vadd.xlane.f32.xlu1 %v14539_v36  ;;  %v14497_v19 = vpop.xlane.xlu0 %14496  ;;  %14747 = vmatprep.subr.mxu1 %v14722_v33  ;;  %v14703_v36 = vld [vmem:[#allocation8 + $0x30] sm:$0xff] }
 0x8e9   : > { %v14518_v6 = vmul.f32 0.0078125, %v14497_v19  ;;  %v14548_v60 = vmul.f32 %v23593_v52, %v23593_v52  ;;  %14748 = vmatpush1.msra.mxu1 %v14721_v18 }
 0x8ea   : > { %14561 = vadd.xlane.f32.xlu0 %v14542_v46  ;;  %14749 = vmatprep.subr.mxu1 %v14720_v56  ;;  %v14700_v46 = vld [vmem:[#allocation8 + $0x18] sm:$0xff] }
 0x8eb   : > { %v23603_v0 = vsub.f32 %v23504_v34, %v14518_v6  ;;  %14750 = vmatpush1.msra.mxu1 %v14719_v51 }
 0x8ec   : > { %14559 = vadd.xlane.f32.xlu1 %v14541_v30  ;;  %14751 = vmatprep.subr.mxu1 %v14718_v43  ;;  %v14697_v30 = vld [vmem:[#allocation8] sm:$0xff] }
 0x8ed   : > { %v14550_v34 = vmul.f32 %v23603_v0, %v23603_v0  ;;  %14752 = vmatpush1.msra.mxu1 %v14717_v8 }
 0x8ee   : > { %14565 = vadd.xlane.f32.xlu0 %v14544_v57  ;;  %14753 = vmatprep.subr.mxu1 %v14716_v10 }
 0x8ef   : > { %14754 = vmatpush1.msra.mxu1 %v14715_v29 }
 0x8f0   : > { %14563 = vadd.xlane.f32.xlu1 %v14543_v3  ;;  %14755 = vmatprep.subr.mxu1 %v14714_v5 }
 0x8f1   : > { %14756 = vmatpush1.msra.mxu1 %v14713_v12 }
 0x8f2   : > { %14569 = vadd.xlane.f32.xlu0 %v14546_v32  ;;  %14757 = vmatprep.subr.mxu1 %v14712_v49 }
 0x8f3   : > { %14758 = vmatpush1.msra.mxu1 %v14711_v42 }
 0x8f4   : > { %14567 = vadd.xlane.f32.xlu1 %v14545_v27  ;;  %14759 = vmatprep.subr.mxu1 %v14710_v17 }
 0x8f5   : > { %14760 = vmatpush1.msra.mxu1 %v14709_v24 }
 0x8f6   : > { %14573 = vadd.xlane.f32.xlu0 %v14548_v60  ;;  %14761 = vmatprep.subr.mxu1 %v14708_v7 }
 0x8f7   : > { %14762 = vmatpush1.msra.mxu1 %v14707_v62 }
 0x8f8   : > { %14571 = vadd.xlane.f32.xlu1 %v14547_v31  ;;  %14763 = vmatprep.subr.mxu1 %v14706_v20 }
 0x8f9   : > { %14764 = vmatpush1.msra.mxu1 %v14705_v13 }
 0x8fa   : > { %14577 = vadd.xlane.f32.xlu0 %v14550_v34  ;;  %14765 = vmatprep.subr.mxu1 %v14704_v41 }
 0x8fb   : > { %14766 = vmatpush1.msra.mxu1 %v14703_v36  ;;  %v23641_v36 = vld [vmem:[%s24155_s4] ss:$0 sm:$0xff] }
 0x8fc   : > { %14575 = vadd.xlane.f32.xlu1 %v14549_v21  ;;  %14767 = vmatprep.subr.mxu1 %v14702_v61 }
 0x8fd   : > { %14768 = vmatpush1.msra.mxu1 %v14701_v54 }
 0x8fe   : > { %14769 = vmatprep.subr.mxu1 %v14700_v46 }
 0x8ff   : > { %14770 = vmatpush1.msra.mxu1 %v14699_v48 }
 0x900   : > { %14771 = vmatprep.subr.mxu1 %v14698_v4  ;;  %v23647_v4 = vld [vmem:[%s24156_s5] ss:$0 sm:$0xff] }
 0x901   : > { %14772 = vmatpush1.msra.mxu1 %v14697_v30 }
 0x965   : > { %v14501_v50 = vpop.xlane.xlu0 %14500 }
 0x966   : > { %v14520_v1 = vmul.f32 0.0078125, %v14501_v50 }
 0x967   : > { %v14499_v57 = vpop.xlane.xlu1 %14498 }
 0x968   : > { %v23617_v53 = vsub.f32 %v23538_v38, %v14520_v1  ;;  %v14519_v55 = vmul.f32 0.0078125, %v14499_v57 }
 0x96a   : > { %v23620_v19 = vsub.f32 %v23542_v59, %v14519_v55  ;;  %v14552_v58 = vmul.f32 %v23617_v53, %v23617_v53 }
 0x96b   : > { %v14505_v14 = vpop.xlane.xlu0 %14504 }
 0x96c   : > { %14581 = vadd.xlane.f32.xlu0 %v14552_v58  ;;  %v14551_v3 = vmul.f32 %v23620_v19, %v23620_v19  ;;  %v14522_v40 = vmul.f32 0.0078125, %v14505_v14 }
 0x96d   : > { %v14503_v15 = vpop.xlane.xlu1 %14502 }
 0x96e   : > { %14579 = vadd.xlane.f32.xlu1 %v14551_v3  ;;  %v23627_v6 = vsub.f32 %v23551_v9, %v14522_v40  ;;  %v14521_v38 = vmul.f32 0.0078125, %v14503_v15 }
 0x96f   : > { %v14558_v32 = vpop.xlane.xlu0 %14557 }
 0x970   : > { %v23630_v45 = vsub.f32 %v23558_v26, %v14521_v38  ;;  %v14588_v59 = vmul.f32 0.0078125, %v14558_v32  ;;  %v14554_v23 = vmul.f32 %v23627_v6, %v23627_v6 }
 0x971   : > { %v14556_v28 = vpop.xlane.xlu1 %14555 }
 0x972   : > { %v14604_v27 = vadd.f32 1e-06, %v14588_v59  ;;  %v14587_v60 = vmul.f32 0.0078125, %v14556_v28  ;;  %14585 = vadd.xlane.f32.xlu0 %v14554_v23  ;;  %v14553_v33 = vmul.f32 %v23630_v45, %v23630_v45 }
 0x973   : > { %v14562_v18 = vpop.xlane.xlu0 %14561 }
 0x974   : > { %17417 = vrsqrt.f32 %v14604_v27  ;;  %v14603_v9 = vadd.f32 1e-06, %v14587_v60  ;;  %v14590_v31 = vmul.f32 0.0078125, %v14562_v18  ;;  %14583 = vadd.xlane.f32.xlu1 %v14553_v33 }
 0x975   : > { %v14560_v34 = vpop.xlane.xlu1 %14559 }
 0x976   : > { %17419 = vrsqrt.f32 %v14603_v9  ;;  %v14589_v26 = vmul.f32 0.0078125, %v14560_v34  ;;  %v14606_v21 = vadd.f32 1e-06, %v14590_v31 }
 0x977   : > { %v14566_v51 = vpop.xlane.xlu0 %14565 }
 0x978   : > { %v14605_v56 = vadd.f32 1e-06, %v14589_v26  ;;  %v14592_v10 = vmul.f32 0.0078125, %v14566_v51  ;;  %v15093_v51 = vld [vmem:[#allocation10 + $0xf8] sm:$0xff] }
 0x979   : > { %v14564_v43 = vpop.xlane.xlu1 %14563  ;;  %16300 = vmatprep.subr.mxu0 %v15093_v51 }
 0x97a   : > { %17421 = vrsqrt.f32 %v14605_v56  ;;  %v14591_v8 = vmul.f32 0.0078125, %v14564_v43  ;;  %v14608_v12 = vadd.f32 1e-06, %v14592_v10  ;;  %v15077_v43 = vld [vmem:[#allocation10 + $0x78] sm:$0xff] }
 0x97b   : > { %17423 = vrsqrt.f32 %v14606_v21  ;;  %v14570_v49 = vpop.xlane.xlu0 %14569  ;;  %16301 = vmatpush3.msra.mxu0 %v15077_v43  ;;  %v15063_v43 = vld [vmem:[#allocation10 + $0x8] sm:$0xff] }
 0x97c   : > { %v14607_v29 = vadd.f32 1e-06, %v14591_v8  ;;  %v14594_v7 = vmul.f32 0.0078125, %v14570_v49  ;;  %v15076_v8 = vld [vmem:[#allocation10 + $0x70] sm:$0xff]  ;;  %v15075_v49 = vld [vmem:[#allocation10 + $0x68] sm:$0xff] }
 0x97d   : > { %v14568_v5 = vpop.xlane.xlu1 %14567 }
 0x97e   : > { %17425 = vrsqrt.f32 %v14607_v29  ;;  %v14593_v42 = vmul.f32 0.0078125, %v14568_v5  ;;  %v14610_v46 = vadd.f32 1e-06, %v14594_v7 }
 0x97f   : > { %17427 = vrsqrt.f32 %v14608_v12 }
 0x980   : > { %v14609_v20 = vadd.f32 1e-06, %v14593_v42 }
 0x981   : > { %v17418_v17 = vpop.eup %17417  ;;  %v14572_v13 = vpop.xlane.xlu1 %14571 }
 0x982   : > { %v14636_v41 = vmul.f32 %v17418_v17, %v23548_v22  ;;  %v14595_v48 = vmul.f32 0.0078125, %v14572_v13  ;;  %17429 = vrsqrt.f32 %v14609_v20 }
 0x983   : > { %v17420_v24 = vpop.eup %17419  ;;  %17431 = vrsqrt.f32 %v14610_v46 }
 0x984   : > { %v14635_v62 = vmul.f32 %v17420_v24, %v23555_v39  ;;  %v14574_v39 = vpop.xlane.xlu0 %14573  ;;  %v14659_v22 = vmul.f32 %v23641_v36, %v14636_v41  ;;  %v14611_v55 = vadd.f32 1e-06, %v14595_v48 }
 0x985   : > { %v14596_v57 = vmul.f32 0.0078125, %v14574_v39  ;;  %v14576_v15 = vpop.xlane.xlu1 %14575 }
 0x986   : > { %v14658_v61 = vmul.f32 %v23641_v36, %v14635_v62  ;;  %v23657_v58 = vadd.f32 %v23647_v4, %v14659_v22  ;;  %17433 = vrsqrt.f32 %v14611_v55  ;;  %v14597_v32 = vmul.f32 0.0078125, %v14576_v15  ;;  %v15088_v55 = vld [vmem:[#allocation10 + $0xd0] sm:$0xff]  ;;  %v15086_v15 = vld [vmem:[#allocation10 + $0xc0] sm:$0xff] }
 0x987   : > { %v17422_v54 = vpop.eup %17421 }
 0x988   : > { %v23650_v30 = vadd.f32 %v23647_v4, %v14658_v61  ;;  %v14637_v50 = vmul.f32 %v17422_v54, %v23568_v63  ;;  %v17424_v1 = vpop.eup %17423  ;;  %v14612_v63 = vadd.f32 1e-06, %v14596_v57  ;;  %v14578_v38 = vpop.xlane.xlu0 %14577  ;;  %v14613_v60 = vadd.f32 1e-06, %v14597_v32  ;;  %v15073_v57 = vld [vmem:[#allocation10 + $0x58] sm:$0xff] }
 0x989   : > { %v14638_v14 = vmul.f32 %v17424_v1, %v23562_v35  ;;  %v14598_v35 = vmul.f32 0.0078125, %v14578_v38  ;;  %v15089_v1 = vld [vmem:[#allocation10 + $0xd8] sm:$0xff] }
 0x98a   : > { %14806 = vmatmul.mubr.f32.vlgmr.msra.gmra.mxu1 %v23650_v30  ;;  %v14660_v3 = vmul.f32 %v23641_v36, %v14637_v50  ;;  %17435 = vrsqrt.f32 %v14612_v63  ;;  %v15074_v50 = vld [vmem:[#allocation10 + $0x60] sm:$0xff]  ;;  %v15085_v38 = vld [vmem:[#allocation10 + $0xb8] sm:$0xff] }
 0x98b   : > { %14811 = vmatprep.mubr.f32.mxu1 %v24825_v37  ;;  %v17426_v40 = vpop.eup %17425  ;;  %v14661_v23 = vmul.f32 %v23641_v36, %v14638_v14  ;;  %v14614_v34 = vadd.f32 1e-06, %v14598_v35  ;;  %17437 = vrsqrt.f32 %v14613_v60  ;;  %v15087_v14 = vld [vmem:[#allocation10 + $0xc8] sm:$0xff]  ;;  %v15070_v63 = vld [vmem:[#allocation10 + $0x40] sm:$0xff]  ;;  %v15069_v32 = vld [vmem:[#allocation10 + $0x38] sm:$0xff] }
 0x98c   : > { %v23664_v59 = vadd.f32 %v23647_v4, %v14660_v3  ;;  %v14639_v28 = vmul.f32 %v17426_v40, %v23578_v11  ;;  %v17428_v27 = vpop.eup %17427  ;;  %v15072_v3 = vld [vmem:[#allocation10 + $0x50] sm:$0xff]  ;;  %v15071_v40 = vld [vmem:[#allocation10 + $0x48] sm:$0xff]  ;;  %v15082_v60 = vld [vmem:[#allocation10 + $0xa0] sm:$0xff] }
 0x98d   : > { %v23671_v33 = vadd.f32 %v23647_v4, %v14661_v23  ;;  %v14640_v9 = vmul.f32 %v17428_v27, %v23573_v2  ;;  %v15092_v2 = vld [vmem:[#allocation10 + $0xf0] sm:$0xff]  ;;  %17439 = vrsqrt.f32 %v14614_v34  ;;  %v15083_v27 = vld [vmem:[#allocation10 + $0xa8] sm:$0xff] }
 0x98e   : > { %14812 = vmatmul.mubr.f32.gmra.mxu1 %v23657_v58  ;;  %v14662_v18 = vmul.f32 %v23641_v36, %v14639_v28  ;;  %16302 = vmatprep.subr.mxu0 %v15092_v2  ;;  %v15084_v23 = vld [vmem:[#allocation10 + $0xb0] sm:$0xff]  ;;  %v15067_v35 = vld [vmem:[#allocation10 + $0x28] sm:$0xff] }
 0x98f   : > { %14817 = vmatprep.mubr.f32.mxu1 %v24825_v37  ;;  %v17430_v31 = vpop.eup %17429  ;;  %v14663_v26 = vmul.f32 %v23641_v36, %v14640_v9  ;;  %16303 = vmatpush3.msra.mxu0 %v15076_v8  ;;  %v15068_v28 = vld [vmem:[#allocation10 + $0x30] sm:$0xff]  ;;  %v15081_v9 = vld [vmem:[#allocation10 + $0x98] sm:$0xff] }
 0x990   : > { %v23678_v11 = vadd.f32 %v23647_v4, %v14662_v18  ;;  %v14641_v21 = vmul.f32 %v17430_v31, %v23588_v44  ;;  %v17432_v56 = vpop.eup %17431  ;;  %v15091_v44 = vld [vmem:[#allocation10 + $0xe8] sm:$0xff]  ;;  %v15066_v18 = vld [vmem:[#allocation10 + $0x20] sm:$0xff]  ;;  %v15065_v31 = vld [vmem:[#allocation10 + $0x18] sm:$0xff] }
 0x991   : > { %v23685_v29 = vadd.f32 %v23647_v4, %v14663_v26  ;;  %v14642_v12 = vmul.f32 %v17432_v56, %v23583_v25  ;;  %16304 = vmatprep.subr.mxu0 %v15091_v44  ;;  %v15080_v26 = vld [vmem:[#allocation10 + $0x90] sm:$0xff]  ;;  %v15079_v56 = vld [vmem:[#allocation10 + $0x88] sm:$0xff] }
 0x992   : > { %14818 = vmatmul.mubr.f32.gmra.mxu1 %v23664_v59  ;;  %v14664_v5 = vmul.f32 %v23641_v36, %v14641_v21  ;;  %16305 = vmatpush3.msra.mxu0 %v15075_v49  ;;  %v15064_v21 = vld [vmem:[#allocation10 + $0x10] sm:$0xff] }
 0x993   : > { %14823 = vmatprep.mubr.f32.mxu1 %v24825_v37  ;;  %v17434_v10 = vpop.eup %17433  ;;  %v14665_v24 = vmul.f32 %v23641_v36, %v14642_v12  ;;  %v15062_v12 = vld [vmem:[#allocation10] sm:$0xff] }
 0x994   : > { %v23692_v17 = vadd.f32 %v23647_v4, %v14664_v5  ;;  %v14643_v7 = vmul.f32 %v17434_v10, %v23598_v16  ;;  %v15078_v5 = vld [vmem:[#allocation10 + $0x80] sm:$0xff] }
 0x995   : > { %v23699_v25 = vadd.f32 %v23647_v4, %v14665_v24 }
 0x996   : > { %14824 = vmatmul.mubr.f32.gmra.mxu1 %v23671_v33  ;;  %v14666_v62 = vmul.f32 %v23641_v36, %v14643_v7 }
 0x997   : > { %14829 = vmatprep.mubr.f32.mxu1 %v24825_v37  ;;  %v17436_v42 = vpop.eup %17435 }
 0x998   : > { %v14644_v20 = vmul.f32 %v17436_v42, %v23593_v52  ;;  %v17438_v13 = vpop.eup %17437  ;;  %v23706_v41 = vadd.f32 %v23647_v4, %v14666_v62 }
 0x999   : > { %v14645_v61 = vmul.f32 %v17438_v13, %v23608_v47 }
 0x99a   : > { %14830 = vmatmul.mubr.f32.gmra.mxu1 %v23678_v11  ;;  %v14667_v16 = vmul.f32 %v23641_v36, %v14644_v20  ;;  %v17440_v54 = vpop.eup %17439 }
 0x99b   : > { %14835 = vmatprep.mubr.f32.mxu1 %v24825_v37  ;;  %v14668_v52 = vmul.f32 %v23641_v36, %v14645_v61  ;;  %v14646_v48 = vmul.f32 %v17440_v54, %v23603_v0  ;;  %v15090_v0 = vld [vmem:[#allocation10 + $0xe0] sm:$0xff] }
 0x99c   : > { %v23713_v46 = vadd.f32 %v23647_v4, %v14667_v16  ;;  %16306 = vmatprep.subr.mxu0 %v15090_v0 }
 0x99d   : > { %v23720_v39 = vadd.f32 %v23647_v4, %v14668_v52  ;;  %v14669_v47 = vmul.f32 %v23641_v36, %v14646_v48  ;;  %16307 = vmatpush3.msra.mxu0 %v15074_v50 }
 0x99e   : > { %14836 = vmatmul.mubr.f32.gmra.mxu1 %v23685_v29  ;;  %16308 = vmatprep.subr.mxu0 %v15089_v1 }
 0x99f   : > { %14841 = vmatprep.mubr.f32.mxu1 %v24825_v37  ;;  %v23726_v22 = vadd.f32 %v23647_v4, %v14669_v47  ;;  %16309 = vmatpush3.msra.mxu0 %v15073_v57 }
 0x9a0   : > { %16310 = vmatprep.subr.mxu0 %v15088_v55 }
 0x9a1   : > { %16311 = vmatpush3.msra.mxu0 %v15072_v3 }
 0x9a2   : > { %14842 = vmatmul.mubr.f32.gmra.mxu1 %v23692_v17  ;;  %16312 = vmatprep.subr.mxu0 %v15087_v14 }
 0x9a3   : > { %14847 = vmatprep.mubr.f32.mxu1 %v24825_v37  ;;  %16313 = vmatpush3.msra.mxu0 %v15071_v40  ;;  %v14729_v40 = vld [vmem:[%s24158_s7] sm:$0x3] }
 0x9a4   : > { %16314 = vmatprep.subr.mxu0 %v15086_v15 }
 0x9a5   : > { %16315 = vmatpush3.msra.mxu0 %v15070_v63 }
 0x9a6   : > { %14848 = vmatmul.mubr.f32.gmra.mxu1 %v23699_v25  ;;  %16316 = vmatprep.subr.mxu0 %v15085_v38 }
 0x9a7   : > { %14853 = vmatprep.mubr.f32.mxu1 %v24825_v37  ;;  %16317 = vmatpush3.msra.mxu0 %v15069_v32 }
 0x9a8   : > { %16318 = vmatprep.subr.mxu0 %v15084_v23 }
 0x9a9   : > { %16319 = vmatpush3.msra.mxu0 %v15068_v28 }
 0x9aa   : > { %14854 = vmatmul.mubr.f32.gmra.mxu1 %v23706_v41  ;;  %16320 = vmatprep.subr.mxu0 %v15083_v27 }
 0x9ab   : > { %14859 = vmatprep.mubr.f32.mxu1 %v24825_v37  ;;  %16321 = vmatpush3.msra.mxu0 %v15067_v35 }
 0x9ac   : > { %16322 = vmatprep.subr.mxu0 %v15082_v60 }
 0x9ad   : > { %16323 = vmatpush3.msra.mxu0 %v15066_v18 }
 0x9ae   : > { %14860 = vmatmul.mubr.f32.gmra.mxu1 %v23713_v46  ;;  %16324 = vmatprep.subr.mxu0 %v15081_v9 }
 0x9af   : > { %14865 = vmatprep.mubr.f32.mxu1 %v24825_v37  ;;  %16325 = vmatpush3.msra.mxu0 %v15065_v31 }
 0x9b0   : > { %16326 = vmatprep.subr.mxu0 %v15080_v26 }
 0x9b1   : > { %16327 = vmatpush3.msra.mxu0 %v15064_v21 }
 0x9b2   : > { %14866 = vmatmul.mubr.f32.gmra.mxu1 %v23720_v39  ;;  %16328 = vmatprep.subr.mxu0 %v15079_v56 }
 0x9b3   : > { %14871 = vmatprep.mubr.f32.mxu1 %v24825_v37  ;;  %16329 = vmatpush3.msra.mxu0 %v15063_v43 }
 0x9b4   : > { %16330 = vmatprep.subr.mxu0 %v15078_v5 }
 0x9b5   : > { %16331 = vmatpush3.msra.mxu0 %v15062_v12 }
 0x9b6   : > { %14872 = vmatmul.mubr.f32.gmra.mxu1 %v23726_v22 }
 0x9b7   : > { %14877 = vmatprep.mubr.f32.mxu1 %v24825_v37 }
 0x9f5   : > { %v14582_v34 = vpop.xlane.xlu0 %14581 }
 0x9f6   : > { %v14600_v51 = vmul.f32 0.0078125, %v14582_v34 }
 0x9f7   : > { %v14580_v2 = vpop.xlane.xlu1 %14579 }
 0x9f8   : > { %v14616_v8 = vadd.f32 1e-06, %v14600_v51  ;;  %v14599_v10 = vmul.f32 0.0078125, %v14580_v2 }
 0x9fa   : > { %17441 = vrsqrt.f32 %v14616_v8  ;;  %v14615_v44 = vadd.f32 1e-06, %v14599_v10 }
 0x9fb   : > { %v14586_v49 = vpop.xlane.xlu0 %14585 }
 0x9fc   : > { %17443 = vrsqrt.f32 %v14615_v44  ;;  %v14602_v42 = vmul.f32 0.0078125, %v14586_v49 }
 0x9fd   : > { %v14584_v24 = vpop.xlane.xlu1 %14583 }
 0x9fe   : > { %v14618_v7 = vadd.f32 1e-06, %v14602_v42  ;;  %v14601_v62 = vmul.f32 0.0078125, %v14584_v24 }
 0xa00   : > { %17445 = vrsqrt.f32 %v14618_v7  ;;  %v14617_v20 = vadd.f32 1e-06, %v14601_v62 }
 0xa02   : > { %17447 = vrsqrt.f32 %v14617_v20 }
 0xa07   : > { %v17442_v13 = vpop.eup %17441 }
 0xa08   : > { %v14648_v54 = vmul.f32 %v17442_v13, %v23617_v53 }
 0xa09   : > { %v17444_v16 = vpop.eup %17443 }
 0xa0a   : > { %v14647_v61 = vmul.f32 %v17444_v16, %v23620_v19  ;;  %v14671_v47 = vmul.f32 %v23641_v36, %v14648_v54 }
 0xa0c   : > { %v14670_v52 = vmul.f32 %v23641_v36, %v14647_v61  ;;  %v23740_v1 = vadd.f32 %v23647_v4, %v14671_v47 }
 0xa0d   : > { %v17446_v0 = vpop.eup %17445 }
 0xa0e   : > { %v23734_v48 = vadd.f32 %v23647_v4, %v14670_v52  ;;  %v14650_v53 = vmul.f32 %v17446_v0, %v23627_v6  ;;  %v24826_v6 = vld [vmem:[#allocation24_spill] sm:$0xff] }
 0xa0f   : > { %v17448_v50 = vpop.eup %17447  ;;  %v14737_v15 = vsub.s32 1, %v24826_v6 }
 0xa10   : > { %14878 = vmatmul.mubr.f32.gmra.mxu1 %v23734_v48  ;;  %v14649_v19 = vmul.f32 %v17448_v50, %v23630_v45  ;;  %v14673_v3 = vmul.f32 %v23641_v36, %v14650_v53  ;;  %v14733_v45 = vsub.s32 0, %v24826_v6 }
 0xa11   : > { %14883 = vmatprep.mubr.f32.mxu1 %v24825_v37 }
 0xa12   : > { %v14672_v57 = vmul.f32 %v23641_v36, %v14649_v19  ;;  %v23754_v14 = vadd.f32 %v23647_v4, %v14673_v3  ;;  %v23762_v63 = vrot.slane %v14729_v40, %v14733_v45  ;;  %v23764_v36 = vrot.slane %v14729_v40, %v14737_v15 }
 0xa14   : > { %14884 = vmatmul.mubr.f32.gmra.mxu1 %v23740_v1  ;;  %v23748_v55 = vadd.f32 %v23647_v4, %v14672_v57 }
 0xa15   : > { %14889 = vmatprep.mubr.f32.mxu1 %v24825_v37 }
 0xa18   : > { %14890 = vmatmul.mubr.f32.gmra.mxu1 %v23748_v55 }
 0xa19   : > { %14895 = vmatprep.mubr.f32.mxu1 %v24825_v37 }
 0xa1c   : > { %14896 = vmatmul.mubr.f32.gmra.mxu1 %v23754_v14 }
 0xa4a   : > { %v14807_v38 = vpop.f32.mrf.mxu1 }
 0xa4b   : > { %v14808_v37 = vadd.f32 %v14807_v38, %v23762_v63 }
 0xa4c   : > { %v14809_v32 = vpop.f32.mrf.mxu1 }
 0xa4d   : > { %v14934_v4 = vmul.f32 0.70710677, %v14808_v37  ;;  %v14810_v23 = vadd.f32 %v14809_v32, %v23764_v36  ;;  %v14902_v50 = vmul.f32 0.5, %v14808_v37 }
 0xa4e   : > { %v14813_v28 = vpop.f32.mrf.mxu1 }
 0xa4f   : > { %17449 = verf.f32 %v14934_v4  ;;  %v14935_v27 = vmul.f32 0.70710677, %v14810_v23  ;;  %v14814_v35 = vadd.f32 %v14813_v28, %v23762_v63  ;;  %v14903_v54 = vmul.f32 0.5, %v14810_v23 }
 0xa50   : > { %v14815_v60 = vpop.f32.mrf.mxu1 }
 0xa51   : > { %17451 = verf.f32 %v14935_v27  ;;  %v14936_v18 = vmul.f32 0.70710677, %v14814_v35  ;;  %v14816_v9 = vadd.f32 %v14815_v60, %v23764_v36  ;;  %v14904_v60 = vmul.f32 0.5, %v14814_v35 }
 0xa52   : > { %v14819_v31 = vpop.f32.mrf.mxu1 }
 0xa53   : > { %17453 = verf.f32 %v14936_v18  ;;  %v14937_v34 = vmul.f32 0.70710677, %v14816_v9  ;;  %v14820_v26 = vadd.f32 %v14819_v31, %v23762_v63  ;;  %v14905_v23 = vmul.f32 0.5, %v14816_v9 }
 0xa54   : > { %v14821_v21 = vpop.f32.mrf.mxu1 }
 0xa55   : > { %17455 = verf.f32 %v14937_v34  ;;  %v14938_v56 = vmul.f32 0.70710677, %v14820_v26  ;;  %v14822_v51 = vadd.f32 %v14821_v21, %v23764_v36 }
 0xa56   : > { %v14825_v43 = vpop.f32.mrf.mxu1 }
 0xa57   : > { %17457 = verf.f32 %v14938_v56  ;;  %v14939_v2 = vmul.f32 0.70710677, %v14822_v51  ;;  %v23773_v8 = vadd.f32 %v14825_v43, %v23762_v63  ;;  %v14907_v35 = vmul.f32 0.5, %v14822_v51 }
 0xa58   : > { %v14827_v10 = vpop.f32.mrf.mxu1 }
 0xa59   : > { %17459 = verf.f32 %v14939_v2  ;;  %v14940_v5 = vmul.f32 0.70710677, %v23773_v8  ;;  %v23777_v12 = vadd.f32 %v14827_v10, %v23764_v36 }
 0xa5a   : > { %v14831_v44 = vpop.f32.mrf.mxu1 }
 0xa5b   : > { %17461 = verf.f32 %v14940_v5  ;;  %v14941_v49 = vmul.f32 0.70710677, %v23777_v12  ;;  %v23781_v42 = vadd.f32 %v14831_v44, %v23762_v63  ;;  %v14906_v44 = vmul.f32 0.5, %v14820_v26 }
 0xa5c   : > { %v17450_v24 = vpop.eup %17449  ;;  %v14833_v7 = vpop.f32.mrf.mxu1 }
 0xa5d   : > { %17463 = verf.f32 %v14941_v49  ;;  %v14942_v62 = vmul.f32 0.70710677, %v23781_v42  ;;  %v14998_v13 = vadd.f32 1.0, %v17450_v24  ;;  %v23785_v16 = vadd.f32 %v14833_v7, %v23764_v36 }
 0xa5e   : > { %v17452_v20 = vpop.eup %17451  ;;  %v14837_v61 = vpop.f32.mrf.mxu1 }
 0xa5f   : > { %17465 = verf.f32 %v14942_v62  ;;  %v23788_v52 = vadd.f32 %v14837_v61, %v23762_v63  ;;  %v14999_v47 = vadd.f32 1.0, %v17452_v20  ;;  %v14943_v19 = vmul.f32 0.70710677, %v23785_v16 }
 0xa60   : > { %v17454_v0 = vpop.eup %17453  ;;  %v14839_v53 = vpop.f32.mrf.mxu1  ;;  %v15030_v40 = vmul.f32 %v14998_v13, %v14902_v50  ;;  %v14909_v50 = vmul.f32 0.5, %v23777_v12 }
 0xa61   : > { %v14944_v57 = vmul.f32 0.70710677, %v23788_v52  ;;  %v23793_v3 = vadd.f32 %v14839_v53, %v23764_v36  ;;  %v15031_v6 = vmul.f32 %v14999_v47, %v14903_v54  ;;  %17467 = verf.f32 %v14943_v19 }
 0xa62   : > { %v17456_v45 = vpop.eup %17455  ;;  %v14843_v15 = vpop.f32.mrf.mxu1  ;;  %v15000_v37 = vadd.f32 1.0, %v17454_v0 }
 0xa63   : > { %17469 = verf.f32 %v14944_v57  ;;  %v14945_v38 = vmul.f32 0.70710677, %v23793_v3  ;;  %v23797_v32 = vadd.f32 %v14843_v15, %v23762_v63  ;;  %15165 = vmatprep.mubr.f32.mxu0 %v15031_v6  ;;  %v15001_v27 = vadd.f32 1.0, %v17456_v45 }
 0xa64   : > { %v17458_v4 = vpop.eup %17457  ;;  %v14845_v28 = vpop.f32.mrf.mxu1  ;;  %15166 = vmatmul.mubr.f32.vlgmr.msra.gmra.mxu0 %v15030_v40  ;;  %v15032_v9 = vmul.f32 %v15000_v37, %v14904_v60  ;;  %v14908_v57 = vmul.f32 0.5, %v23773_v8 }
 0xa65   : > { %17471 = verf.f32 %v14945_v38  ;;  %v14946_v18 = vmul.f32 0.70710677, %v23797_v32  ;;  %v23801_v31 = vadd.f32 %v14845_v28, %v23764_v36  ;;  %v15033_v56 = vmul.f32 %v15001_v27, %v14905_v23 }
 0xa66   : > { %v17460_v34 = vpop.eup %17459  ;;  %v14849_v21 = vpop.f32.mrf.mxu1  ;;  %v15002_v43 = vadd.f32 1.0, %v17458_v4  ;;  %v14911_v28 = vmul.f32 0.5, %v23785_v16 }
 0xa67   : > { %17473 = verf.f32 %v14946_v18  ;;  %v14947_v2 = vmul.f32 0.70710677, %v23801_v31  ;;  %v23805_v10 = vadd.f32 %v14849_v21, %v23762_v63  ;;  %15170 = vmatprep.mubr.f32.mxu0 %v15033_v56  ;;  %v15003_v24 = vadd.f32 1.0, %v17460_v34 }
 0xa68   : > { %v17462_v5 = vpop.eup %17461  ;;  %v14851_v49 = vpop.f32.mrf.mxu1  ;;  %15171 = vmatmul.mubr.f32.gmra.mxu0 %v15032_v9  ;;  %v15034_v54 = vmul.f32 %v15002_v43, %v14906_v44  ;;  %v14910_v18 = vmul.f32 0.5, %v23781_v42 }
 0xa69   : > { %17475 = verf.f32 %v14947_v2  ;;  %v14948_v7 = vmul.f32 0.70710677, %v23805_v10  ;;  %v23809_v62 = vadd.f32 %v14851_v49, %v23764_v36  ;;  %v15035_v61 = vmul.f32 %v15003_v24, %v14907_v35 }
 0xa6a   : > { %v17464_v20 = vpop.eup %17463  ;;  %v14855_v13 = vpop.f32.mrf.mxu1  ;;  %v15004_v51 = vadd.f32 1.0, %v17462_v5  ;;  %v14913_v35 = vmul.f32 0.5, %v23793_v3 }
 0xa6b   : > { %17477 = verf.f32 %v14948_v7  ;;  %v14949_v47 = vmul.f32 0.70710677, %v23809_v62  ;;  %v23813_v26 = vadd.f32 %v14855_v13, %v23762_v63  ;;  %15175 = vmatprep.mubr.f32.mxu0 %v15035_v61  ;;  %v15005_v53 = vadd.f32 1.0, %v17464_v20 }
 0xa6c   : > { %v17466_v0 = vpop.eup %17465  ;;  %v14857_v19 = vpop.f32.mrf.mxu1  ;;  %15176 = vmatmul.mubr.f32.gmra.mxu0 %v15034_v54  ;;  %v15036_v12 = vmul.f32 %v15004_v51, %v14908_v57  ;;  %v14912_v7 = vmul.f32 0.5, %v23788_v52 }
 0xa6d   : > { %17479 = verf.f32 %v14949_v47  ;;  %v14950_v6 = vmul.f32 0.70710677, %v23813_v26  ;;  %v23819_v45 = vadd.f32 %v14857_v19, %v23764_v36  ;;  %v15037_v15 = vmul.f32 %v15005_v53, %v14909_v50 }
 0xa6e   : > { %v14861_v40 = vpop.f32.mrf.mxu1  ;;  %v17468_v38 = vpop.eup %17467  ;;  %v15006_v37 = vadd.f32 1.0, %v17466_v0  ;;  %v14915_v53 = vmul.f32 0.5, %v23801_v31 }
 0xa6f   : > { %17481 = verf.f32 %v14950_v6  ;;  %v23822_v4 = vadd.f32 %v14861_v40, %v23762_v63  ;;  %v14951_v8 = vmul.f32 0.70710677, %v23819_v45  ;;  %15180 = vmatprep.mubr.f32.mxu0 %v15037_v15  ;;  %v15007_v60 = vadd.f32 1.0, %v17468_v38 }
 0xa70   : > { %v17470_v23 = vpop.eup %17469  ;;  %v14863_v27 = vpop.f32.mrf.mxu1  ;;  %15181 = vmatmul.mubr.f32.gmra.mxu0 %v15036_v12  ;;  %v15038_v9 = vmul.f32 %v15006_v37, %v14910_v18  ;;  %v14914_v6 = vmul.f32 0.5, %v23797_v32  ;;  %v14917_v38 = vmul.f32 0.5, %v23809_v62 }
 0xa71   : > { %v14952_v34 = vmul.f32 0.70710677, %v23822_v4  ;;  %v23829_v21 = vadd.f32 %v14863_v27, %v23764_v36  ;;  %17483 = verf.f32 %v14951_v8  ;;  %v15039_v2 = vmul.f32 %v15007_v60, %v14911_v28 }
 0xa72   : > { %v17472_v56 = vpop.eup %17471  ;;  %v14867_v43 = vpop.f32.mrf.mxu1  ;;  %v15008_v5 = vadd.f32 1.0, %v17470_v23  ;;  %v14916_v60 = vmul.f32 0.5, %v23805_v10 }
 0xa73   : > { %17485 = verf.f32 %v14952_v34  ;;  %v14953_v16 = vmul.f32 0.70710677, %v23829_v21  ;;  %v23834_v42 = vadd.f32 %v14867_v43, %v23762_v63  ;;  %15185 = vmatprep.mubr.f32.mxu0 %v15039_v2  ;;  %v15009_v24 = vadd.f32 1.0, %v17472_v56 }
 0xa74   : > { %v17474_v44 = vpop.eup %17473  ;;  %v14869_v49 = vpop.f32.mrf.mxu1  ;;  %15186 = vmatmul.mubr.f32.gmra.mxu0 %v15038_v9  ;;  %v15040_v51 = vmul.f32 %v15008_v5, %v14912_v7  ;;  %v14919_v43 = vmul.f32 0.5, %v23819_v45  ;;  %v14918_v9 = vmul.f32 0.5, %v23813_v26  ;;  %v14921_v10 = vmul.f32 0.5, %v23829_v21 }
 0xa75   : > { %17487 = verf.f32 %v14953_v16  ;;  %v14870_v20 = vadd.f32 %v14869_v49, %v23764_v36  ;;  %v14954_v61 = vmul.f32 0.70710677, %v23834_v42  ;;  %v15041_v47 = vmul.f32 %v15009_v24, %v14913_v35 }
 0xa76   : > { %v17476_v13 = vpop.eup %17475  ;;  %v14873_v54 = vpop.f32.mrf.mxu1  ;;  %v15010_v0 = vadd.f32 1.0, %v17474_v44  ;;  %v14920_v7 = vmul.f32 0.5, %v23822_v4 }
 0xa77   : > { %v14955_v3 = vmul.f32 0.70710677, %v14870_v20  ;;  %v14874_v50 = vadd.f32 %v14873_v54, %v23762_v63  ;;  %17489 = verf.f32 %v14954_v61  ;;  %15190 = vmatprep.mubr.f32.mxu0 %v15041_v47  ;;  %v15011_v57 = vadd.f32 1.0, %v17476_v13 }
 0xa78   : > { %v17478_v19 = vpop.eup %17477  ;;  %v14875_v52 = vpop.f32.mrf.mxu1  ;;  %15191 = vmatmul.mubr.f32.gmra.mxu0 %v15040_v51  ;;  %v15042_v23 = vmul.f32 %v15010_v0, %v14914_v6  ;;  %v14923_v47 = vmul.f32 0.5, %v14870_v20  ;;  %v14922_v0 = vmul.f32 0.5, %v23834_v42 }
 0xa79   : > { %17491 = verf.f32 %v14955_v3  ;;  %v14956_v40 = vmul.f32 0.70710677, %v14874_v50  ;;  %v14876_v37 = vadd.f32 %v14875_v52, %v23764_v36  ;;  %v15043_v12 = vmul.f32 %v15011_v57, %v14915_v53 }
 0xa7a   : > { %v17480_v15 = vpop.eup %17479  ;;  %v15012_v28 = vadd.f32 1.0, %v17478_v19  ;;  %v14924_v4 = vmul.f32 0.5, %v14874_v50 }
 0xa7b   : > { %17493 = verf.f32 %v14956_v40  ;;  %v15013_v8 = vadd.f32 1.0, %v17480_v15  ;;  %v14957_v27 = vmul.f32 0.70710677, %v14876_v37  ;;  %15195 = vmatprep.mubr.f32.mxu0 %v15043_v12  ;;  %v14925_v52 = vmul.f32 0.5, %v14876_v37 }
 0xa7c   : > { %v17482_v31 = vpop.eup %17481  ;;  %15196 = vmatmul.mubr.f32.gmra.mxu0 %v15042_v23  ;;  %v15044_v34 = vmul.f32 %v15012_v28, %v14916_v60 }
 0xa7d   : > { %v15045_v32 = vmul.f32 %v15013_v8, %v14917_v38  ;;  %17495 = verf.f32 %v14957_v27  ;;  %v15014_v56 = vadd.f32 1.0, %v17482_v31 }
 0xa7e   : > { %v17484_v18 = vpop.eup %17483 }
 0xa7f   : > { %15200 = vmatprep.mubr.f32.mxu0 %v15045_v32  ;;  %v15015_v2 = vadd.f32 1.0, %v17484_v18  ;;  %v15046_v44 = vmul.f32 %v15014_v56, %v14918_v9 }
 0xa80   : > { %v17486_v62 = vpop.eup %17485  ;;  %15201 = vmatmul.mubr.f32.gmra.mxu0 %v15044_v34 }
 0xa81   : > { %v15047_v16 = vmul.f32 %v15015_v2, %v14919_v43  ;;  %v15016_v35 = vadd.f32 1.0, %v17486_v62 }
 0xa82   : > { %v17488_v5 = vpop.eup %17487 }
 0xa83   : > { %v15017_v49 = vadd.f32 1.0, %v17488_v5  ;;  %15205 = vmatprep.mubr.f32.mxu0 %v15047_v16  ;;  %v15048_v54 = vmul.f32 %v15016_v35, %v14920_v7 }
 0xa84   : > { %v17490_v24 = vpop.eup %17489  ;;  %15206 = vmatmul.mubr.f32.gmra.mxu0 %v15046_v44 }
 0xa85   : > { %v15049_v13 = vmul.f32 %v15017_v49, %v14921_v10  ;;  %v15018_v45 = vadd.f32 1.0, %v17490_v24 }
 0xa86   : > { %v17492_v61 = vpop.eup %17491 }
 0xa87   : > { %15210 = vmatprep.mubr.f32.mxu0 %v15049_v13  ;;  %v15019_v26 = vadd.f32 1.0, %v17492_v61  ;;  %v15050_v21 = vmul.f32 %v15018_v45, %v14922_v0 }
 0xa88   : > { %v17494_v51 = vpop.eup %17493  ;;  %15211 = vmatmul.mubr.f32.gmra.mxu0 %v15048_v54 }
 0xa89   : > { %v15051_v3 = vmul.f32 %v15019_v26, %v14923_v47  ;;  %v15020_v53 = vadd.f32 1.0, %v17494_v51 }
 0xa8a   : > { %v17496_v19 = vpop.eup %17495 }
 0xa8b   : > { %15215 = vmatprep.mubr.f32.mxu0 %v15051_v3  ;;  %v15021_v57 = vadd.f32 1.0, %v17496_v19  ;;  %v15052_v40 = vmul.f32 %v15020_v53, %v14924_v4 }
 0xa8c   : > { %15216 = vmatmul.mubr.f32.gmra.mxu0 %v15050_v21 }
 0xa8d   : > { %v15053_v6 = vmul.f32 %v15021_v57, %v14925_v52 }
 0xa8f   : > { %15220 = vmatprep.mubr.f32.mxu0 %v15053_v6 }
 0xa90   : > { %15221 = vmatmul.mubr.f32.gmra.mxu0 %v15052_v40 }
 0xad0   : > { %v14879_v20 = vpop.f32.mrf.mxu1 }
 0xad1   : > { %v14880_v15 = vadd.f32 %v14879_v20, %v23762_v63 }
 0xad2   : > { %v14881_v38 = vpop.f32.mrf.mxu1 }
 0xad3   : > { %v14958_v12 = vmul.f32 0.70710677, %v14880_v15  ;;  %v14882_v42 = vadd.f32 %v14881_v38, %v23764_v36  ;;  %v14926_v61 = vmul.f32 0.5, %v14880_v15 }
 0xad4   : > { %v14885_v23 = vpop.f32.mrf.mxu1 }
 0xad5   : > { %17497 = verf.f32 %v14958_v12  ;;  %v14959_v28 = vmul.f32 0.70710677, %v14882_v42  ;;  %v14886_v8 = vadd.f32 %v14885_v23, %v23762_v63  ;;  %v14927_v24 = vmul.f32 0.5, %v14882_v42 }
 0xad6   : > { %v14887_v37 = vpop.f32.mrf.mxu1 }
 0xad7   : > { %17499 = verf.f32 %v14959_v28  ;;  %v14960_v50 = vmul.f32 0.70710677, %v14886_v8  ;;  %v14888_v31 = vadd.f32 %v14887_v37, %v23764_v36  ;;  %v14928_v3 = vmul.f32 0.5, %v14886_v8 }
 0xad8   : > { %v14891_v27 = vpop.f32.mrf.mxu1 }
 0xad9   : > { %17501 = verf.f32 %v14960_v50  ;;  %v14961_v60 = vmul.f32 0.70710677, %v14888_v31  ;;  %v14892_v32 = vadd.f32 %v14891_v27, %v23762_v63  ;;  %v23861_v50 = vld [vmem:[%s24160_s9] ss:$0 sm:$0xff] }
 0xada   : > { %v14893_v18 = vpop.f32.mrf.mxu1 }
 0xadb   : > { %17503 = verf.f32 %v14961_v60  ;;  %v14962_v34 = vmul.f32 0.70710677, %v14892_v32  ;;  %v14894_v56 = vadd.f32 %v14893_v18, %v23764_v36  ;;  %v14930_v6 = vmul.f32 0.5, %v14892_v32 }
 0xadc   : > { %v14897_v62 = vpop.f32.mrf.mxu1 }
 0xadd   : > { %17505 = verf.f32 %v14962_v34  ;;  %v14963_v43 = vmul.f32 0.70710677, %v14894_v56  ;;  %v14898_v2 = vadd.f32 %v14897_v62, %v23762_v63  ;;  %v14929_v63 = vmul.f32 0.5, %v14888_v31 }
 0xade   : > { %v14899_v9 = vpop.f32.mrf.mxu1  ;;  %v14931_v52 = vmul.f32 0.5, %v14894_v56 }
 0xadf   : > { %17507 = verf.f32 %v14963_v43  ;;  %v14964_v5 = vmul.f32 0.70710677, %v14898_v2  ;;  %v14900_v16 = vadd.f32 %v14899_v9, %v23764_v36  ;;  %v14932_v23 = vmul.f32 0.5, %v14898_v2 }
 0xae1   : > { %17509 = verf.f32 %v14964_v5  ;;  %v14965_v44 = vmul.f32 0.70710677, %v14900_v16  ;;  %v14933_v12 = vmul.f32 0.5, %v14900_v16 }
 0xae2   : > { %v17498_v35 = vpop.eup %17497 }
 0xae3   : > { %17511 = verf.f32 %v14965_v44  ;;  %v15022_v49 = vadd.f32 1.0, %v17498_v35 }
 0xae4   : > { %v17500_v10 = vpop.eup %17499 }
 0xae5   : > { %v15023_v7 = vadd.f32 1.0, %v17500_v10  ;;  %v15054_v47 = vmul.f32 %v15022_v49, %v14926_v61 }
 0xae6   : > { %v17502_v13 = vpop.eup %17501 }
 0xae7   : > { %v15055_v54 = vmul.f32 %v15023_v7, %v14927_v24  ;;  %v15024_v26 = vadd.f32 1.0, %v17502_v13 }
 0xae8   : > { %v17504_v45 = vpop.eup %17503 }
 0xae9   : > { %15225 = vmatprep.mubr.f32.mxu0 %v15055_v54  ;;  %v15025_v51 = vadd.f32 1.0, %v17504_v45  ;;  %v15056_v21 = vmul.f32 %v15024_v26, %v14928_v3 }
 0xaea   : > { %v17506_v0 = vpop.eup %17505  ;;  %15226 = vmatmul.mubr.f32.gmra.mxu0 %v15054_v47 }
 0xaeb   : > { %v15057_v36 = vmul.f32 %v15025_v51, %v14929_v63  ;;  %v15026_v53 = vadd.f32 1.0, %v17506_v0 }
 0xaec   : > { %v17508_v19 = vpop.eup %17507 }
 0xaed   : > { %15230 = vmatprep.mubr.f32.mxu0 %v15057_v36  ;;  %v15027_v57 = vadd.f32 1.0, %v17508_v19  ;;  %v15058_v15 = vmul.f32 %v15026_v53, %v14930_v6 }
 0xaee   : > { %v17510_v4 = vpop.eup %17509  ;;  %15231 = vmatmul.mubr.f32.gmra.mxu0 %v15056_v21 }
 0xaef   : > { %v15059_v40 = vmul.f32 %v15027_v57, %v14931_v52  ;;  %v15028_v38 = vadd.f32 1.0, %v17510_v4 }
 0xaf0   : > { %v17512_v20 = vpop.eup %17511 }
 0xaf1   : > { %15235 = vmatprep.mubr.f32.mxu0 %v15059_v40  ;;  %v15029_v42 = vadd.f32 1.0, %v17512_v20  ;;  %v15060_v8 = vmul.f32 %v15028_v38, %v14932_v23 }
 0xaf2   : > { %15236 = vmatmul.mubr.f32.gmra.mxu0 %v15058_v15 }
 0xaf3   : > { %v15061_v28 = vmul.f32 %v15029_v42, %v14933_v12 }
 0xaf5   : > { %15240 = vmatprep.mubr.f32.mxu0 %v15061_v28 }
 0xaf6   : > { %15241 = vmatmul.mubr.f32.gmra.mxu0 %v15060_v8 }
 0xb24   : > { %v16332_v37 = vpop.f32.mrf.mxu0 }
 0xb26   : > { %v16333_v31 = vpop.f32.mrf.mxu0 }
 0xb27   : > { %v16334_v27 = vadd.f32 %v16333_v31, %v16332_v37 }
 0xb28   : > { %v16335_v32 = vpop.f32.mrf.mxu0 }
 0xb29   : > { %v15168_v60 = vadd.f32 %v16334_v27, %v23861_v50 }
 0xb2a   : > { %v16336_v18 = vpop.f32.mrf.mxu0 }
 0xb2b   : > { %v23865_v34 = vadd.f32 %v15168_v60, %v23650_v30  ;;  %v16337_v56 = vadd.f32 %v16336_v18, %v16335_v32 }
 0xb2c   : > { %v16338_v62 = vpop.f32.mrf.mxu0 }
 0xb2d   : > { %15262 = vadd.xlane.f32.xlu1 %v23865_v34  ;;  %v15173_v43 = vadd.f32 %v16337_v56, %v23861_v50 }
 0xb2e   : > { %v16339_v2 = vpop.f32.mrf.mxu0 }
 0xb2f   : > { %v16340_v9 = vadd.f32 %v16339_v2, %v16338_v62  ;;  %v23870_v5 = vadd.f32 %v15173_v43, %v23657_v58 }
 0xb30   : > { %v16341_v16 = vpop.f32.mrf.mxu0 }
 0xb31   : > { %v15178_v44 = vadd.f32 %v16340_v9, %v23861_v50  ;;  %15264 = vadd.xlane.f32.xlu0 %v23870_v5 }
 0xb32   : > { %v16342_v35 = vpop.f32.mrf.mxu0 }
 0xb33   : > { %v16343_v10 = vadd.f32 %v16342_v35, %v16341_v16  ;;  %v23875_v30 = vadd.f32 %v15178_v44, %v23664_v59 }
 0xb34   : > { %v16344_v49 = vpop.f32.mrf.mxu0 }
 0xb35   : > { %v15183_v24 = vadd.f32 %v16343_v10, %v23861_v50  ;;  %15266 = vadd.xlane.f32.xlu1 %v23875_v30 }
 0xb36   : > { %v16345_v7 = vpop.f32.mrf.mxu0 }
 0xb37   : > { %v16346_v13 = vadd.f32 %v16345_v7, %v16344_v49  ;;  %v23880_v58 = vadd.f32 %v15183_v24, %v23671_v33 }
 0xb38   : > { %v16347_v61 = vpop.f32.mrf.mxu0 }
 0xb39   : > { %v15188_v54 = vadd.f32 %v16346_v13, %v23861_v50  ;;  %15268 = vadd.xlane.f32.xlu0 %v23880_v58 }
 0xb3a   : > { %v16348_v45 = vpop.f32.mrf.mxu0 }
 0xb3b   : > { %v16349_v47 = vadd.f32 %v16348_v45, %v16347_v61  ;;  %v23885_v59 = vadd.f32 %v15188_v54, %v23678_v11 }
 0xb3c   : > { %v16350_v26 = vpop.f32.mrf.mxu0 }
 0xb3d   : > { %v15193_v63 = vadd.f32 %v16349_v47, %v23861_v50  ;;  %15270 = vadd.xlane.f32.xlu1 %v23885_v59 }
 0xb3e   : > { %v16351_v51 = vpop.f32.mrf.mxu0 }
 0xb3f   : > { %v16352_v0 = vadd.f32 %v16351_v51, %v16350_v26  ;;  %v23890_v33 = vadd.f32 %v15193_v63, %v23685_v29 }
 0xb40   : > { %v16353_v3 = vpop.f32.mrf.mxu0 }
 0xb41   : > { %v15198_v36 = vadd.f32 %v16352_v0, %v23861_v50  ;;  %15272 = vadd.xlane.f32.xlu0 %v23890_v33 }
 0xb42   : > { %v16354_v19 = vpop.f32.mrf.mxu0 }
 0xb43   : > { %v16355_v21 = vadd.f32 %v16354_v19, %v16353_v3  ;;  %v23895_v11 = vadd.f32 %v15198_v36, %v23692_v17 }
 0xb44   : > { %v16356_v53 = vpop.f32.mrf.mxu0 }
 0xb45   : > { %v15203_v52 = vadd.f32 %v16355_v21, %v23861_v50  ;;  %15274 = vadd.xlane.f32.xlu1 %v23895_v11 }
 0xb46   : > { %v16357_v57 = vpop.f32.mrf.mxu0 }
 0xb47   : > { %v16358_v4 = vadd.f32 %v16357_v57, %v16356_v53  ;;  %v23900_v29 = vadd.f32 %v15203_v52, %v23699_v25 }
 0xb48   : > { %v16359_v6 = vpop.f32.mrf.mxu0 }
 0xb49   : > { %v15208_v40 = vadd.f32 %v16358_v4, %v23861_v50  ;;  %15276 = vadd.xlane.f32.xlu0 %v23900_v29 }
 0xb4a   : > { %v16360_v20 = vpop.f32.mrf.mxu0 }
 0xb4b   : > { %v16361_v15 = vadd.f32 %v16360_v20, %v16359_v6  ;;  %v23905_v17 = vadd.f32 %v15208_v40, %v23706_v41 }
 0xb4c   : > { %v16362_v38 = vpop.f32.mrf.mxu0 }
 0xb4d   : > { %v15213_v12 = vadd.f32 %v16361_v15, %v23861_v50  ;;  %15278 = vadd.xlane.f32.xlu1 %v23905_v17 }
 0xb4e   : > { %v16363_v42 = vpop.f32.mrf.mxu0 }
 0xb4f   : > { %v16364_v23 = vadd.f32 %v16363_v42, %v16362_v38  ;;  %v23910_v25 = vadd.f32 %v15213_v12, %v23713_v46 }
 0xb50   : > { %v16365_v28 = vpop.f32.mrf.mxu0 }
 0xb51   : > { %v15218_v8 = vadd.f32 %v16364_v23, %v23861_v50  ;;  %15280 = vadd.xlane.f32.xlu0 %v23910_v25 }
 0xb52   : > { %v16366_v37 = vpop.f32.mrf.mxu0 }
 0xb53   : > { %v16367_v31 = vadd.f32 %v16366_v37, %v16365_v28  ;;  %v23915_v41 = vadd.f32 %v15218_v8, %v23720_v39 }
 0xb55   : > { %v15223_v27 = vadd.f32 %v16367_v31, %v23861_v50  ;;  %15282 = vadd.xlane.f32.xlu1 %v23915_v41 }
 0xb57   : > { %v23920_v60 = vadd.f32 %v15223_v27, %v23726_v22 }
 0xb59   : > { %15284 = vadd.xlane.f32.xlu0 %v23920_v60 }
 0xbaa   : > { %v16368_v46 = vpop.f32.mrf.mxu0 }
 0xbac   : > { %v16369_v32 = vpop.f32.mrf.mxu0 }
 0xbad   : > { %v16370_v18 = vadd.f32 %v16369_v32, %v16368_v46 }
 0xbae   : > { %v16371_v56 = vpop.f32.mrf.mxu0 }
 0xbaf   : > { %v15228_v62 = vadd.f32 %v16370_v18, %v23861_v50 }
 0xbb0   : > { %v16372_v43 = vpop.f32.mrf.mxu0 }
 0xbb1   : > { %v16373_v2 = vadd.f32 %v16372_v43, %v16371_v56  ;;  %v23925_v39 = vadd.f32 %v15228_v62, %v23734_v48 }
 0xbb2   : > { %v16374_v9 = vpop.f32.mrf.mxu0 }
 0xbb3   : > { %v15233_v16 = vadd.f32 %v16373_v2, %v23861_v50  ;;  %15286 = vadd.xlane.f32.xlu1 %v23925_v39 }
 0xbb4   : > { %v16375_v22 = vpop.f32.mrf.mxu0 }
 0xbb5   : > { %v23930_v44 = vadd.f32 %v15233_v16, %v23740_v1  ;;  %v16376_v35 = vadd.f32 %v16375_v22, %v16374_v9 }
 0xbb6   : > { %v16377_v10 = vpop.f32.mrf.mxu0  ;;  %v15263_v24 = vpop.xlane.xlu1 %15262 }
 0xbb7   : > { %15288 = vadd.xlane.f32.xlu0 %v23930_v44  ;;  %v15238_v49 = vadd.f32 %v16376_v35, %v23861_v50  ;;  %v15294_v13 = vmul.f32 0.0078125, %v15263_v24 }
 0xbb8   : > { %v16378_v7 = vpop.f32.mrf.mxu0 }
 0xbb9   : > { %v16379_v48 = vadd.f32 %v16378_v7, %v16377_v10  ;;  %v23935_v61 = vadd.f32 %v15238_v49, %v23748_v55  ;;  %v23938_v54 = vsub.f32 %v23865_v34, %v15294_v13 }
 0xbba   : > { %v15265_v1 = vpop.xlane.xlu0 %15264 }
 0xbbb   : > { %v15243_v45 = vadd.f32 %v16379_v48, %v23861_v50  ;;  %15290 = vadd.xlane.f32.xlu1 %v23935_v61  ;;  %v15326_v47 = vmul.f32 %v23938_v54, %v23938_v54  ;;  %v15295_v63 = vmul.f32 0.0078125, %v15265_v1 }
 0xbbd   : > { %v23945_v26 = vadd.f32 %v15243_v45, %v23754_v14  ;;  %v23949_v55 = vsub.f32 %v23870_v5, %v15295_v63 }
 0xbbe   : > { %v15267_v34 = vpop.xlane.xlu1 %15266 }
 0xbbf   : > { %15342 = vadd.xlane.f32.xlu1 %v15326_v47  ;;  %15292 = vadd.xlane.f32.xlu0 %v23945_v26  ;;  %v15296_v51 = vmul.f32 0.0078125, %v15267_v34  ;;  %v15327_v50 = vmul.f32 %v23949_v55, %v23949_v55 }
 0xbc1   : > { %v23954_v0 = vsub.f32 %v23875_v30, %v15296_v51 }
 0xbc2   : > { %v15269_v3 = vpop.xlane.xlu0 %15268 }
 0xbc3   : > { %15344 = vadd.xlane.f32.xlu0 %v15327_v50  ;;  %v15297_v36 = vmul.f32 0.0078125, %v15269_v3  ;;  %v15328_v14 = vmul.f32 %v23954_v0, %v23954_v0 }
 0xbc5   : > { %v23959_v19 = vsub.f32 %v23880_v58, %v15297_v36  ;;  %15346 = vadd.xlane.f32.xlu1 %v15328_v14 }
 0xbc6   : > { %v15271_v5 = vpop.xlane.xlu1 %15270 }
 0xbc7   : > { %v15298_v21 = vmul.f32 0.0078125, %v15271_v5  ;;  %v15329_v53 = vmul.f32 %v23959_v19, %v23959_v19 }
 0xbc9   : > { %v23964_v52 = vsub.f32 %v23885_v59, %v15298_v21  ;;  %15348 = vadd.xlane.f32.xlu0 %v15329_v53 }
 0xbca   : > { %v15273_v30 = vpop.xlane.xlu0 %15272 }
 0xbcb   : > { %v15299_v57 = vmul.f32 0.0078125, %v15273_v30  ;;  %v15330_v4 = vmul.f32 %v23964_v52, %v23964_v52  ;;  %v24026_v30 = vld [vmem:[%s24161_s10] ss:$0 sm:$0xff] }
 0xbcd   : > { %v23969_v6 = vsub.f32 %v23890_v33, %v15299_v57  ;;  %15350 = vadd.xlane.f32.xlu1 %v15330_v4 }
 0xbce   : > { %v15275_v58 = vpop.xlane.xlu1 %15274 }
 0xbcf   : > { %v15300_v40 = vmul.f32 0.0078125, %v15275_v58  ;;  %v15331_v20 = vmul.f32 %v23969_v6, %v23969_v6  ;;  %v24032_v58 = vld [vmem:[%s24162_s11] ss:$0 sm:$0xff] }
 0xbd1   : > { %v23974_v15 = vsub.f32 %v23895_v11, %v15300_v40  ;;  %15352 = vadd.xlane.f32.xlu0 %v15331_v20 }
 0xbd2   : > { %v15277_v59 = vpop.xlane.xlu0 %15276 }
 0xbd3   : > { %v15301_v38 = vmul.f32 0.0078125, %v15277_v59  ;;  %v15332_v12 = vmul.f32 %v23974_v15, %v23974_v15 }
 0xbd5   : > { %v23979_v42 = vsub.f32 %v23900_v29, %v15301_v38  ;;  %15354 = vadd.xlane.f32.xlu1 %v15332_v12 }
 0xbd6   : > { %v15279_v33 = vpop.xlane.xlu1 %15278 }
 0xbd7   : > { %v15302_v23 = vmul.f32 0.0078125, %v15279_v33  ;;  %v15333_v28 = vmul.f32 %v23979_v42, %v23979_v42 }
 0xbd9   : > { %v23984_v8 = vsub.f32 %v23905_v17, %v15302_v23  ;;  %15356 = vadd.xlane.f32.xlu0 %v15333_v28 }
 0xbda   : > { %v15281_v11 = vpop.xlane.xlu0 %15280 }
 0xbdb   : > { %v15303_v37 = vmul.f32 0.0078125, %v15281_v11  ;;  %v15334_v31 = vmul.f32 %v23984_v8, %v23984_v8 }
 0xbdd   : > { %v23989_v27 = vsub.f32 %v23910_v25, %v15303_v37  ;;  %15358 = vadd.xlane.f32.xlu1 %v15334_v31 }
 0xbde   : > { %v15283_v29 = vpop.xlane.xlu1 %15282 }
 0xbdf   : > { %v15304_v46 = vmul.f32 0.0078125, %v15283_v29  ;;  %v15335_v32 = vmul.f32 %v23989_v27, %v23989_v27 }
 0xbe1   : > { %v23994_v18 = vsub.f32 %v23915_v41, %v15304_v46  ;;  %15360 = vadd.xlane.f32.xlu0 %v15335_v32 }
 0xbe2   : > { %v15285_v17 = vpop.xlane.xlu0 %15284 }
 0xbe3   : > { %v15305_v56 = vmul.f32 0.0078125, %v15285_v17  ;;  %v15336_v62 = vmul.f32 %v23994_v18, %v23994_v18 }
 0xbe5   : > { %v23999_v43 = vsub.f32 %v23920_v60, %v15305_v56  ;;  %15362 = vadd.xlane.f32.xlu1 %v15336_v62 }
 0xbe7   : > { %v15337_v25 = vmul.f32 %v23999_v43, %v23999_v43 }
 0xbe9   : > { %15364 = vadd.xlane.f32.xlu0 %v15337_v25 }
 0xc3c   : > { %v15287_v2 = vpop.xlane.xlu1 %15286 }
 0xc3d   : > { %v15306_v9 = vmul.f32 0.0078125, %v15287_v2 }
 0xc3f   : > { %v24004_v16 = vsub.f32 %v23925_v39, %v15306_v9 }
 0xc40   : > { %v15289_v41 = vpop.xlane.xlu0 %15288 }
 0xc41   : > { %v15307_v22 = vmul.f32 0.0078125, %v15289_v41  ;;  %v15338_v35 = vmul.f32 %v24004_v16, %v24004_v16 }
 0xc43   : > { %v24009_v10 = vsub.f32 %v23930_v44, %v15307_v22  ;;  %15366 = vadd.xlane.f32.xlu1 %v15338_v35 }
 0xc44   : > { %v15291_v60 = vpop.xlane.xlu1 %15290 }
 0xc45   : > { %v15339_v49 = vmul.f32 %v24009_v10, %v24009_v10  ;;  %v15308_v24 = vmul.f32 0.0078125, %v15291_v60 }
 0xc47   : > { %15368 = vadd.xlane.f32.xlu0 %v15339_v49  ;;  %v24014_v7 = vsub.f32 %v23935_v61, %v15308_v24 }
 0xc48   : > { %v15343_v39 = vpop.xlane.xlu1 %15342  ;;  %v15293_v13 = vpop.xlane.xlu0 %15292 }
 0xc49   : > { %v15374_v48 = vmul.f32 0.0078125, %v15343_v39  ;;  %v15309_v45 = vmul.f32 0.0078125, %v15293_v13  ;;  %v15340_v1 = vmul.f32 %v24014_v7, %v24014_v7 }
 0xc4b   : > { %v15390_v47 = vadd.f32 1e-06, %v15374_v48  ;;  %v24019_v44 = vsub.f32 %v23945_v26, %v15309_v45  ;;  %15370 = vadd.xlane.f32.xlu1 %v15340_v1 }
 0xc4c   : > { %v15345_v63 = vpop.xlane.xlu0 %15344 }
 0xc4d   : > { %17513 = vrsqrt.f32 %v15390_v47  ;;  %v15341_v34 = vmul.f32 %v24019_v44, %v24019_v44  ;;  %v15375_v51 = vmul.f32 0.0078125, %v15345_v63 }
 0xc4e   : > { %v15347_v50 = vpop.xlane.xlu1 %15346 }
 0xc4f   : > { %15372 = vadd.xlane.f32.xlu0 %v15341_v34  ;;  %v15391_v61 = vadd.f32 1e-06, %v15375_v51  ;;  %v15376_v3 = vmul.f32 0.0078125, %v15347_v50 }
 0xc51   : > { %17515 = vrsqrt.f32 %v15391_v61  ;;  %v15392_v36 = vadd.f32 1e-06, %v15376_v3 }
 0xc52   : > { %v15349_v14 = vpop.xlane.xlu0 %15348 }
 0xc53   : > { %17517 = vrsqrt.f32 %v15392_v36  ;;  %v15377_v5 = vmul.f32 0.0078125, %v15349_v14 }
 0xc55   : > { %v15393_v21 = vadd.f32 1e-06, %v15377_v5 }
 0xc56   : > { %v15351_v53 = vpop.xlane.xlu1 %15350 }
 0xc57   : > { %17519 = vrsqrt.f32 %v15393_v21  ;;  %v15378_v57 = vmul.f32 0.0078125, %v15351_v53 }
 0xc59   : > { %v15394_v40 = vadd.f32 1e-06, %v15378_v57 }
 0xc5a   : > { %v17514_v26 = vpop.eup %17513  ;;  %v15353_v59 = vpop.xlane.xlu0 %15352 }
 0xc5b   : > { %v15422_v4 = vmul.f32 %v17514_v26, %v23938_v54  ;;  %17521 = vrsqrt.f32 %v15394_v40  ;;  %v15379_v38 = vmul.f32 0.0078125, %v15353_v59 }
 0xc5d   : > { %v15445_v20 = vmul.f32 %v24026_v30, %v15422_v4  ;;  %v15395_v28 = vadd.f32 1e-06, %v15379_v38 }
 0xc5e   : > { %v17516_v12 = vpop.eup %17515  ;;  %v15355_v54 = vpop.xlane.xlu1 %15354 }
 0xc5f   : > { %v15468_v33 = vadd.f32 %v24032_v58, %v15445_v20  ;;  %v15423_v23 = vmul.f32 %v17516_v12, %v23949_v55  ;;  %17523 = vrsqrt.f32 %v15395_v28  ;;  %v15380_v37 = vmul.f32 0.0078125, %v15355_v54 }
 0xc60   : > { %v17518_v31 = vpop.eup %17517 }
 0xc61   : > { %15484 = vst [vmem:[%s24039_s14] sm:$0xff] %v15468_v33  ;;  %v15446_v11 = vmul.f32 %v24026_v30, %v15423_v23  ;;  %v15424_v46 = vmul.f32 %v17518_v31, %v23954_v0  ;;  %v15396_v32 = vadd.f32 1e-06, %v15380_v37 }
 0xc62   : > { %v15357_v55 = vpop.xlane.xlu0 %15356 }
 0xc63   : > { %v15469_v29 = vadd.f32 %v24032_v58, %v15446_v11  ;;  %v15447_v17 = vmul.f32 %v24026_v30, %v15424_v46  ;;  %17525 = vrsqrt.f32 %v15396_v32  ;;  %v15381_v56 = vmul.f32 0.0078125, %v15357_v55 }
 0xc64   : > { %v17520_v62 = vpop.eup %17519 }
 0xc65   : > { %15485 = vst [vmem:[%s24039_s14 + $0x8] sm:$0xff] %v15469_v29  ;;  %v15470_v25 = vadd.f32 %v24032_v58, %v15447_v17  ;;  %v15425_v2 = vmul.f32 %v17520_v62, %v23959_v19  ;;  %v15397_v9 = vadd.f32 1e-06, %v15381_v56 }
 0xc66   : > { %v15359_v41 = vpop.xlane.xlu1 %15358 }
 0xc67   : > { %15486 = vst [vmem:[%s24039_s14 + $0x10] sm:$0xff] %v15470_v25  ;;  %v15448_v22 = vmul.f32 %v24026_v30, %v15425_v2  ;;  %17527 = vrsqrt.f32 %v15397_v9  ;;  %v15382_v0 = vmul.f32 0.0078125, %v15359_v41 }
 0xc68   : > { %v17522_v35 = vpop.eup %17521 }
 0xc69   : > { %v15471_v60 = vadd.f32 %v24032_v58, %v15448_v22  ;;  %v15426_v49 = vmul.f32 %v17522_v35, %v23964_v52  ;;  %v15398_v24 = vadd.f32 1e-06, %v15382_v0 }
 0xc6a   : > { %v15361_v39 = vpop.xlane.xlu0 %15360 }
 0xc6b   : > { %15487 = vst [vmem:[%s24039_s14 + $0x18] sm:$0xff] %v15471_v60  ;;  %v15449_v13 = vmul.f32 %v24026_v30, %v15426_v49  ;;  %17529 = vrsqrt.f32 %v15398_v24  ;;  %v15383_v19 = vmul.f32 0.0078125, %v15361_v39 }
 0xc6c   : > { %v17524_v48 = vpop.eup %17523 }
 0xc6d   : > { %v15472_v45 = vadd.f32 %v24032_v58, %v15449_v13  ;;  %v15427_v1 = vmul.f32 %v17524_v48, %v23969_v6  ;;  %v15399_v47 = vadd.f32 1e-06, %v15383_v19 }
 0xc6e   : > { %v15363_v63 = vpop.xlane.xlu1 %15362 }
 0xc6f   : > { %15488 = vst [vmem:[%s24039_s14 + $0x20] sm:$0xff] %v15472_v45  ;;  %v15450_v34 = vmul.f32 %v24026_v30, %v15427_v1  ;;  %17531 = vrsqrt.f32 %v15399_v47  ;;  %v15384_v52 = vmul.f32 0.0078125, %v15363_v63 }
 0xc70   : > { %v17526_v51 = vpop.eup %17525 }
 0xc71   : > { %v15473_v61 = vadd.f32 %v24032_v58, %v15450_v34  ;;  %v15428_v50 = vmul.f32 %v17526_v51, %v23974_v15  ;;  %v15400_v3 = vadd.f32 1e-06, %v15384_v52 }
 0xc72   : > { %v15365_v36 = vpop.xlane.xlu0 %15364 }
 0xc73   : > { %15489 = vst [vmem:[%s24039_s14 + $0x28] sm:$0xff] %v15473_v61  ;;  %v15451_v14 = vmul.f32 %v24026_v30, %v15428_v50  ;;  %17533 = vrsqrt.f32 %v15400_v3  ;;  %v15385_v6 = vmul.f32 0.0078125, %v15365_v36 }
 0xc74   : > { %v17528_v5 = vpop.eup %17527 }
 0xc75   : > { %v15474_v21 = vadd.f32 %v24032_v58, %v15451_v14  ;;  %v15429_v53 = vmul.f32 %v17528_v5, %v23979_v42  ;;  %v15401_v26 = vadd.f32 1e-06, %v15385_v6 }
 0xc77   : > { %15490 = vst [vmem:[%s24039_s14 + $0x30] sm:$0xff] %v15474_v21  ;;  %v15452_v57 = vmul.f32 %v24026_v30, %v15429_v53  ;;  %17535 = vrsqrt.f32 %v15401_v26 }
 0xc78   : > { %v17530_v15 = vpop.eup %17529 }
 0xc79   : > { %v15475_v4 = vadd.f32 %v24032_v58, %v15452_v57  ;;  %v15430_v40 = vmul.f32 %v17530_v15, %v23984_v8 }
 0xc7b   : > { %15491 = vst [vmem:[%s24039_s14 + $0x38] sm:$0xff] %v15475_v4  ;;  %v15453_v20 = vmul.f32 %v24026_v30, %v15430_v40 }
 0xc7c   : > { %v17532_v59 = vpop.eup %17531 }
 0xc7d   : > { %v15476_v38 = vadd.f32 %v24032_v58, %v15453_v20  ;;  %v15431_v42 = vmul.f32 %v17532_v59, %v23989_v27 }
 0xc7f   : > { %15492 = vst [vmem:[%s24039_s14 + $0x40] sm:$0xff] %v15476_v38  ;;  %v15454_v12 = vmul.f32 %v24026_v30, %v15431_v42 }
 0xc80   : > { %v17534_v33 = vpop.eup %17533 }
 0xc81   : > { %v15477_v23 = vadd.f32 %v24032_v58, %v15454_v12  ;;  %v15432_v28 = vmul.f32 %v17534_v33, %v23994_v18 }
 0xc83   : > { %15493 = vst [vmem:[%s24039_s14 + $0x48] sm:$0xff] %v15477_v23  ;;  %v15455_v8 = vmul.f32 %v24026_v30, %v15432_v28 }
 0xc84   : > { %v17536_v54 = vpop.eup %17535 }
 0xc85   : > { %v15478_v11 = vadd.f32 %v24032_v58, %v15455_v8  ;;  %v15433_v37 = vmul.f32 %v17536_v54, %v23999_v43 }
 0xc87   : > { %15494 = vst [vmem:[%s24039_s14 + $0x50] sm:$0xff] %v15478_v11  ;;  %v15456_v31 = vmul.f32 %v24026_v30, %v15433_v37 }
 0xc89   : > { %v15479_v27 = vadd.f32 %v24032_v58, %v15456_v31 }
 0xc8b   : > { %15495 = vst [vmem:[%s24039_s14 + $0x58] sm:$0xff] %v15479_v27 }
 0xccc   : > { %v15367_v29 = vpop.xlane.xlu1 %15366 }
 0xccd   : > { %v15386_v46 = vmul.f32 0.0078125, %v15367_v29 }
 0xccf   : > { %v15402_v32 = vadd.f32 1e-06, %v15386_v46 }
 0xcd0   : > { %v15369_v55 = vpop.xlane.xlu0 %15368 }
 0xcd1   : > { %17537 = vrsqrt.f32 %v15402_v32  ;;  %v15387_v18 = vmul.f32 0.0078125, %v15369_v55 }
 0xcd3   : > { %v15403_v17 = vadd.f32 1e-06, %v15387_v18 }
 0xcd4   : > { %v15371_v56 = vpop.xlane.xlu1 %15370 }
 0xcd5   : > { %17539 = vrsqrt.f32 %v15403_v17  ;;  %v15388_v62 = vmul.f32 0.0078125, %v15371_v56 }
 0xcd7   : > { %v15404_v25 = vadd.f32 1e-06, %v15388_v62 }
 0xcd8   : > { %v15373_v2 = vpop.xlane.xlu0 %15372 }
 0xcd9   : > { %17541 = vrsqrt.f32 %v15404_v25  ;;  %v15389_v43 = vmul.f32 0.0078125, %v15373_v2 }
 0xcdb   : > { %v15405_v9 = vadd.f32 1e-06, %v15389_v43 }
 0xcdd   : > { %17543 = vrsqrt.f32 %v15405_v9 }
 0xcde   : > { %v17538_v41 = vpop.eup %17537 }
 0xcdf   : > { %v15434_v22 = vmul.f32 %v17538_v41, %v24004_v16 }
 0xce1   : > { %v15457_v0 = vmul.f32 %v24026_v30, %v15434_v22 }
 0xce2   : > { %v17540_v35 = vpop.eup %17539 }
 0xce3   : > { %v15480_v60 = vadd.f32 %v24032_v58, %v15457_v0  ;;  %v15435_v49 = vmul.f32 %v17540_v35, %v24009_v10 }
 0xce5   : > { %15496 = vst [vmem:[%s24039_s14 + $0x60] sm:$0xff] %v15480_v60  ;;  %v15458_v24 = vmul.f32 %v24026_v30, %v15435_v49 }
 0xce6   : > { %v17542_v39 = vpop.eup %17541 }
 0xce7   : > { %v15481_v13 = vadd.f32 %v24032_v58, %v15458_v24  ;;  %v15436_v19 = vmul.f32 %v17542_v39, %v24014_v7 }
 0xce9   : > { %15497 = vst [vmem:[%s24039_s14 + $0x68] sm:$0xff] %v15481_v13  ;;  %v15459_v16 = vmul.f32 %v24026_v30, %v15436_v19 }
 0xcea   : > { %v17544_v48 = vpop.eup %17543 }
 0xceb   : > { %v15482_v45 = vadd.f32 %v24032_v58, %v15459_v16  ;;  %v15437_v1 = vmul.f32 %v17544_v48, %v24019_v44 }
 0xced   : > { %15498 = vst [vmem:[%s24039_s14 + $0x70] sm:$0xff] %v15482_v45  ;;  %v15460_v10 = vmul.f32 %v24026_v30, %v15437_v1 }
 0xcef   : > { %v15483_v7 = vadd.f32 %v24032_v58, %v15460_v10 }
 0xcf1   : > { %15499 = vst [vmem:[%s24039_s14 + $0x78] sm:$0xff] %v15483_v7 }
 0xcf2   : > { %17706 = shalt.err (!%p17703_p2)
}
 0xcf3   : > { %s17707_s27 = scalar_lea.hbm %s24104_s30, 2048  ;;  %s17711_s26 = scalar_lea.hbm %s24163_s12, 4096 }
 0xcf4   : > { %p17708_p3 = scmp.ne.s32.totalorder %s24104_s30, %s17707_s27  ;;  %p17712_p0 = scmp.lt.s32.totalorder %s24104_s30, %s24163_s12 }
 0xcf5   : > { %p17713_p11 = scmp.lt.s32.totalorder %s17711_s26, %s17707_s27 }
 0xcf6   : > { %p17709_p4 = pnand %p17708_p3, %p24827_p7 }
 0xcf7   : > { %p17714_p6 = por %p17713_p11, %p17712_p0 }
 0xcf8   : > { %p17710_p8 = pneg %p17709_p4 }
 0xcfa   : > { %p17715_p12 = pnand %p17714_p6, %p17710_p8 }
 0xcfc   : > { %17718 = shalt.err (!%p17715_p12)
}
 0xcfd   : > { %s17785_s19 = smov 128   ;;  %s17786_s16 = smov 8  }
 0xcfe   : > { %16958 = dma.vmem_to_hbm [thread:$0]  (%p24827_p7), %s24106_s13, 2048, %s24104_s30, %s15501_s2, %s17785_s19, %s17785_s19, %s17786_s16  }
 0xcff PF: > { %s24828_s17 = sld [smem:[#allocation16_spill]]  ;;  %p24831_p13 = scmp.ge.s32.totalorder %s17765_s24, 2 }
 0xd00   : > { %s24829_s25 = sld [smem:[#allocation17_spill]] }
 0xd05   : > { %s15530_s15 = sand.u32 1, %s24828_s17  }
 0xd06   : > { %p24830_p9 = scmp.ne.s32.totalorder %s24829_s25, 0  ;;  %s15531_s1 = scalar_lea.sflag [#allocation4], %s15530_s15 }
 0xd08   : > { %p16978_p5 = pnand %p24831_p13, %p24830_p9 }
 0xd0a   : > { %p16979_p10 = pneg %p16978_p5 }
 0xd0c   : > { %17748 = dma.done.wait (%p16979_p10), %s15531_s1, 2048  }
 0xd0d   : > { %17750 = vsyncadd (%p16979_p10), %s15531_s1, 4294965248  ;;  %p27_p1 = scmp.ge.s32.totalorder %s17946_s18, 4   ;;  %s24832_s21 = smov %s17757_s22 }
 0xd0e   : > { %s24833_s22 = smov %s17761_s23  ;;  %s24834_s23 = smov %s17962_s28 }
 0xd0f   : > { %s24835_s24 = smov %s17946_s18  ;;  %29 = sbr.rel (!%p27_p1) target bundleno = 12 (0xc), region = 129 }
 0xd14   :  { %15536 = vsyncpa [#allocation3], 1 }
 0xd15   :  { %15538 = vsyncpa [#allocation3 + $0x1], 1 }
 0xd16   :  { %15539 = vsyncpa [#allocation6], 1 }
 0xd17   :  { %15540 = vsyncpa [#allocation9], 1 }
 0xd18   :  { %15541 = vsyncpa [#allocation4], 1 }
 0xd19   :  { %15543 = vsyncpa [#allocation4 + $0x1], 1 }

</bundles_post_ra>
